<compile_context>
chip_gen: v7x
topology: tpu7x:2x2x1
jax: 0.10.0
libtpu: 0.0.40
codegen_flags: <defaults>
</compile_context>

<pallas_src>
import math
from functools import partial

import jax
import jax.numpy as jnp
from jax.experimental import pallas as pl
from jax.experimental.pallas import tpu as pltpu

VMEM = pl.BlockSpec(memory_space=pltpu.MemorySpace.VMEM)

LN_EPS = 1e-5          # nn.LayerNorm default
LEAKY_SLOPE = 0.01     # F.leaky_relu default negative_slope


def fc_dims(d_model, output_size):
    """Mirror of the __init__ loop that builds the shared FC head."""
    dims = [d_model]
    cur = d_model
    while cur // 3 > output_size * 2:
        cur = cur // 3
        dims.append(cur)
    dims.append(output_size)
    return dims


def snapped_d_model(cfg):
    d_model = cfg['d_model_transformer']
    n_head = cfg['transformer_n_head']
    # NOTE: faithfully mirrors the original `if d_model // n_head != 0` check.
    if d_model // n_head != 0:
        d_model = int(d_model / n_head) * n_head
    return d_model


def moving_avg_matrix(T, k):
    """Constant (T, T) operator: stride-1 moving average with edge replication.

    mm[t] = (1/k) * sum_{s=-pad..pad} x[clamp(t+s, 0, T-1)].  Exactly the
    series_decomp moving_avg (AvgPool1d after front/end replication)."""
    pad = (k - 1) // 2
    rows = []
    for t in range(T):
        row = [0.0] * T
        for s in range(-pad, pad + 1):
            row[min(max(t + s, 0), T - 1)] += 1.0 / k
        rows.append(row)
    return jnp.array(rows, dtype=jnp.float32)


# ---------------------------------------------------------------------------
# Fused forward kernel: decomp -> embedding -> 2 transformer stacks -> shared
# FC head -> fc_season_sum (both branches).  No grid, no scratch; everything
# lives in VMEM as values.
# ---------------------------------------------------------------------------
def _fused_kernel(B, T, D, H, n_layers, n_fc, *refs):
    dh = D // H
    BT = B * T
    G = 2 * B                                           # branch-fused groups

    it = iter(refs)
    x_ref = next(it)                                    # (B, T, Din)
    avg_ref = next(it)                                  # (T, T) moving-avg matrix
    embw_ref, embb_ref = next(it), next(it)             # (Din, D), (1, D)
    wqkv_ref, bqkv_ref = next(it), next(it)             # (2, L, D, 3D), (2, L, 1, 3D)
    wo_ref, bo_ref = next(it), next(it)                 # (2, L, D, D),  (2, L, 1, D)
    ln1g_ref, ln1b_ref = next(it), next(it)             # (2, L, 1, D)
    ln2g_ref, ln2b_ref = next(it), next(it)             # (2, L, 1, D)
    w1_ref, b1_ref = next(it), next(it)                 # (2, L, D, Dff), (2, L, 1, Dff)
    w2_ref, b2_ref = next(it), next(it)                 # (2, L, Dff, D), (2, L, 1, D)
    fcw_refs = [next(it) for _ in range(n_fc)]          # shared FC head
    fcb_refs = [next(it) for _ in range(n_fc)]
    wsum_ref, bsum_ref = next(it), next(it)             # (T, 1), (1, 1)
    season_ref, trend_ref = next(it), next(it)          # (B, O) each

    # ---- series_decomp as one batched contraction (no scratch, no masked st) -
    x3 = x_ref[...]                                     # (B, T, Din)
    Din = x3.shape[-1]
    avg_b = jnp.broadcast_to(avg_ref[...], (B, T, T))   # constant operator
    mm3 = jax.lax.dot_general(                          # (B, T, Din) trend
        avg_b, x3, (((2,), (1,)), ((0,), (0,))),
        preferred_element_type=jnp.float32)
    res3 = x3 - mm3                                     # seasonal residual

    # ---- branch-fused embedding: (2*B*T, Din) @ (Din, D) --------------------
    slab = jnp.concatenate([res3.reshape(BT, Din), mm3.reshape(BT, Din)], axis=0)
    h_all = jnp.dot(slab, embw_ref[...],
                    preferred_element_type=jnp.float32) + embb_ref[...]

    inv_sqrt_dh = 1.0 / math.sqrt(dh)

    def layer_norm(v, g, b):
        m = jnp.mean(v, axis=-1, keepdims=True)
        c = v - m
        var = jnp.mean(c * c, axis=-1, keepdims=True)
        return c * jax.lax.rsqrt(var + LN_EPS) * g + b

    def encoder(h, br):
        # h: (B*T, D) flattened tokens.  Post-norm TransformerEncoderLayer:
        #   h = LN1(h + SelfAttn(h)); h = LN2(h + FFN(h)); activation=leaky_relu.
        for l in range(n_layers):
            qkv = jnp.dot(h, wqkv_ref[br, l],
                          preferred_element_type=jnp.float32) + bqkv_ref[br, l]
            q3 = qkv[:, 0:D].reshape(B, T, D)
            k3 = qkv[:, D:2 * D].reshape(B, T, D)
            v3 = qkv[:, 2 * D:3 * D].reshape(B, T, D)
            kT = jnp.swapaxes(k3, 1, 2)                 # (B, D, T): 1 transpose/layer
            head_outs = []
            for hd in range(H):                          # batched over B per head
                lo = hd * dh
                q_h = q3[:, :, lo:lo + dh]              # (B, T, dh)
                kT_h = kT[:, lo:lo + dh, :]             # (B, dh, T) time-major
                v_h = v3[:, :, lo:lo + dh]              # (B, T, dh)
                s = jax.lax.dot_general(
                    q_h, kT_h, (((2,), (1,)), ((0,), (0,))),
                    preferred_element_type=jnp.float32) * inv_sqrt_dh   # (B,T,T)
                s = s - jnp.max(s, axis=-1, keepdims=True)
                e = jnp.exp(s)
                a = e * pl.reciprocal(jnp.sum(e, axis=-1, keepdims=True),
                                      approx=True)
                head_outs.append(jax.lax.dot_general(
                    a, v_h, (((2,), (1,)), ((0,), (0,))),
                    preferred_element_type=jnp.float32))                # (B,T,dh)
            attn3 = jnp.concatenate(head_outs, axis=-1)                 # (B,T,D)
            attn = jnp.dot(attn3.reshape(BT, D), wo_ref[br, l],
                           preferred_element_type=jnp.float32) + bo_ref[br, l]
            # TODO(synk): attention / residual / FFN dropouts are eval-mode
            # no-ops and omitted.
            h = layer_norm(h + attn, ln1g_ref[br, l], ln1b_ref[br, l])
            ff = jnp.dot(h, w1_ref[br, l],
                         preferred_element_type=jnp.float32) + b1_ref[br, l]
            ff = jnp.where(ff > 0.0, ff, LEAKY_SLOPE * ff)              # leaky_relu
            ff = jnp.dot(ff, w2_ref[br, l],
                         preferred_element_type=jnp.float32) + b2_ref[br, l]
            h = layer_norm(h + ff, ln2g_ref[br, l], ln2b_ref[br, l])
        return h

    # Branch-specific encoders (different weights), then re-fuse the slab.
    h_all = jnp.concatenate([encoder(h_all[0:BT, :], 0),
                             encoder(h_all[BT:2 * BT, :], 1)], axis=0)

    # ---- shared FC head on the fused (2*B*T, .) slab -------------------------
    for i in range(n_fc - 1):
        h_all = jnp.dot(h_all, fcw_refs[i][...],
                        preferred_element_type=jnp.float32) + fcb_refs[i][...]
        h_all = jnp.maximum(h_all, 0.0)                 # ReLU (Dropout = no-op)
    h_all = jnp.dot(h_all, fcw_refs[n_fc - 1][...],
                    preferred_element_type=jnp.float32) + fcb_refs[n_fc - 1][...]

    # ---- fc_season_sum (Linear(T,1)) over T for all batches & branches at once
    O = h_all.shape[-1]
    fc3 = h_all.reshape(G, T, O)                        # (2B, T, O)
    wsum3 = wsum_ref[...].reshape(1, T, 1)
    out2 = jnp.sum(fc3 * wsum3, axis=1) + bsum_ref[...]  # (2B, O)
    season_ref[...] = out2[0:B, :]
    trend_ref[...] = out2[B:2 * B, :]


# ---------------------------------------------------------------------------
# Wrapper: one pallas_call for the whole forward.
# ---------------------------------------------------------------------------
def decomp_transformer_forward(x, params, cfg):
    B, T, Din = x.shape
    D = snapped_d_model(cfg)
    H = cfg['transformer_n_head']
    n_layers = cfg['num_layers_transformer']
    O = cfg['num_labels']
    k_ma = cfg['kernel_size']
    assert k_ma % 2 == 1, "series_decomp requires an odd kernel_size"
    dims = fc_dims(D, O)
    n_fc = len(dims) - 1

    avg_mat = moving_avg_matrix(T, k_ma)                # compile-time constant

    inputs = [x, avg_mat,
              params['emb_w'], params['emb_b'],
              params['wqkv'], params['bqkv'],
              params['wo'], params['bo'],
              params['ln1g'], params['ln1b'],
              params['ln2g'], params['ln2b'],
              params['w1'], params['b1'],
              params['w2'], params['b2']]
    inputs += [params[f'fc_w_{i}'] for i in range(n_fc)]
    inputs += [params[f'fc_b_{i}'] for i in range(n_fc)]
    inputs += [params['wsum'], params['bsum']]

    kernel = partial(_fused_kernel, B, T, D, H, n_layers, n_fc)

    season, trend = pl.pallas_call(
        kernel,
        out_shape=(jax.ShapeDtypeStruct((B, O), jnp.float32),
                   jax.ShapeDtypeStruct((B, O), jnp.float32)),
        in_specs=[VMEM] * len(inputs),
        out_specs=(VMEM, VMEM),
        compiler_params=pltpu.CompilerParams(
            vmem_limit_bytes=8 * 1024 * 1024),
    )(*inputs)
    return season[:, None, :], trend[:, None, :]        # (B, 1, O) each


# ---------------------------------------------------------------------------
# Pure-JAX reference (same math, no Pallas) for the correctness check.
# ---------------------------------------------------------------------------
def reference_forward(x, p, cfg):
    B, T, _ = x.shape
    D = snapped_d_model(cfg)
    H = cfg['transformer_n_head']
    dh = D // H
    n_layers = cfg['num_layers_transformer']
    O = cfg['num_labels']
    k = cfg['kernel_size']
    pad = (k - 1) // 2
    dims = fc_dims(D, O)
    n_fc = len(dims) - 1

    front = jnp.repeat(x[:, 0:1, :], pad, axis=1)
    end = jnp.repeat(x[:, -1:, :], pad, axis=1)
    xp = jnp.concatenate([front, x, end], axis=1)
    mm = sum(xp[:, j:j + T, :] for j in range(k)) / float(k)
    res = x - mm

    def ln(v, g, b):
        m = jnp.mean(v, axis=-1, keepdims=True)
        c = v - m
        var = jnp.mean(c * c, axis=-1, keepdims=True)
        return c * jax.lax.rsqrt(var + LN_EPS) * g + b

    def encoder(h, br):
        for l in range(n_layers):
            qkv = h @ p['wqkv'][br, l] + p['bqkv'][br, l]
            q, kk, v = qkv[..., :D], qkv[..., D:2 * D], qkv[..., 2 * D:]
            qh = q.reshape(B, T, H, dh).transpose(0, 2, 1, 3)
            kh = kk.reshape(B, T, H, dh).transpose(0, 2, 1, 3)
            vh = v.reshape(B, T, H, dh).transpose(0, 2, 1, 3)
            s = jnp.einsum('bhtd,bhsd->bhts', qh, kh) / math.sqrt(dh)
            a = jax.nn.softmax(s, axis=-1)
            o = jnp.einsum('bhts,bhsd->bhtd', a, vh)
            o = o.transpose(0, 2, 1, 3).reshape(B, T, D)
            o = o @ p['wo'][br, l] + p['bo'][br, l]
            h = ln(h + o, p['ln1g'][br, l], p['ln1b'][br, l])
            ff = h @ p['w1'][br, l] + p['b1'][br, l]
            ff = jnp.where(ff > 0.0, ff, LEAKY_SLOPE * ff)
            ff = ff @ p['w2'][br, l] + p['b2'][br, l]
            h = ln(h + ff, p['ln2g'][br, l], p['ln2b'][br, l])
        return h

    def fc_head(h):
        for i in range(n_fc - 1):
            h = jnp.maximum(h @ p[f'fc_w_{i}'] + p[f'fc_b_{i}'], 0.0)
        return h @ p[f'fc_w_{n_fc - 1}'] + p[f'fc_b_{n_fc - 1}']

    s = fc_head(encoder(res @ p['emb_w'] + p['emb_b'], 0))   # (B, T, O)
    t = fc_head(encoder(mm @ p['emb_w'] + p['emb_b'], 1))
    wsum = p['wsum'][:, 0]
    bsum = p['bsum'][0, 0]
    s_out = jnp.einsum('bto,t->bo', s, wsum) + bsum
    t_out = jnp.einsum('bto,t->bo', t, wsum) + bsum
    return s_out[:, None, :], t_out[:, None, :]


# ---------------------------------------------------------------------------
# Deterministic parameter init (pre-transposed / pre-stacked for the kernel).
# ---------------------------------------------------------------------------
def init_params(cfg, key):
    Din = cfg['input_size']
    D = snapped_d_model(cfg)
    n_layers = cfg['num_layers_transformer']
    d_ff = cfg['d_ff_transformer']
    O = cfg['num_labels']
    T = cfg['sequence_length']
    dims = fc_dims(D, O)
    n_fc = len(dims) - 1

    keys = iter(jax.random.split(key, 64))

    def u(shape, scale):
        return jax.random.uniform(next(keys), shape, jnp.float32, -scale, scale)

    def stack(shape, scale):
        return u((2, n_layers) + shape, scale)

    p = {}
    p['emb_w'] = u((Din, D), 1.0 / math.sqrt(Din))          # Linear weight.T
    p['emb_b'] = u((1, D), 1.0 / math.sqrt(Din))
    p['wqkv'] = stack((D, 3 * D), 1.0 / math.sqrt(D))       # in_proj_weight.T
    p['bqkv'] = stack((1, 3 * D), 1.0 / math.sqrt(D))
    p['wo'] = stack((D, D), 1.0 / math.sqrt(D))             # out_proj.weight.T
    p['bo'] = stack((1, D), 1.0 / math.sqrt(D))
    p['ln1g'] = 1.0 + 0.1 * jax.random.normal(next(keys), (2, n_layers, 1, D), jnp.float32)
    p['ln1b'] = 0.1 * jax.random.normal(next(keys), (2, n_layers, 1, D), jnp.float32)
    p['ln2g'] = 1.0 + 0.1 * jax.random.normal(next(keys), (2, n_layers, 1, D), jnp.float32)
    p['ln2b'] = 0.1 * jax.random.normal(next(keys), (2, n_layers, 1, D), jnp.float32)
    p['w1'] = stack((D, d_ff), 1.0 / math.sqrt(D))          # linear1.weight.T
    p['b1'] = stack((1, d_ff), 1.0 / math.sqrt(D))
    p['w2'] = stack((d_ff, D), 1.0 / math.sqrt(d_ff))       # linear2.weight.T
    p['b2'] = stack((1, D), 1.0 / math.sqrt(d_ff))
    for i in range(n_fc):                                   # shared FC head
        din, dout = dims[i], dims[i + 1]
        p[f'fc_w_{i}'] = u((din, dout), 1.0 / math.sqrt(din))
        p[f'fc_b_{i}'] = u((1, dout), 1.0 / math.sqrt(din))
    # fc_season_sum (used for BOTH branches in the original forward).
    p['wsum'] = u((T, 1), 1.0 / math.sqrt(T))               # Linear(T,1).weight.T
    p['bsum'] = u((1, 1), 1.0 / math.sqrt(T))
    # TODO(synk): fc_trend_sum exists in __init__ but is never used in forward().
    return p


if __name__ == "__main__":
    cfg = dict(input_size=4, num_labels=3, sequence_length=16,
               d_model_transformer=32, transformer_n_head=4,
               num_layers_transformer=2, d_ff_transformer=64,
               kernel_size=3, dropout=0.0, head_dropout_transformer=0.0)

    key = jax.random.PRNGKey(0)
    k_params, k_x = jax.random.split(key)
    params = init_params(cfg, k_params)

    B = 2
    x = jax.random.normal(k_x, (B, cfg['sequence_length'], cfg['input_size']),
                          jnp.float32)

    fwd = jax.jit(lambda xx, pp: decomp_transformer_forward(xx, pp, cfg))
    season, trend = fwd(x, params)
    jax.block_until_ready((season, trend))

    assert season.shape == (B, 1, cfg['num_labels']), season.shape
    assert trend.shape == (B, 1, cfg['num_labels']), trend.shape

    s_ref, t_ref = reference_forward(x, params, cfg)
    err = max(float(jnp.max(jnp.abs(season - s_ref))),
              float(jnp.max(jnp.abs(trend - t_ref))))
    # Tolerance 5e-3 leaves headroom for the EUP approx-reciprocal softmax.
    assert err < 5e-3, f"max abs error {err}"
    print("KERNEL_OK")
</pallas_src>

<mosaic_0001>
module attributes {stable_mosaic.version = 11 : i64} {
  func.func @_fused_kernel(%arg0: memref<2x16x4xf32, #tpu.memory_space<vmem>>, %arg1: memref<16x16xf32, #tpu.memory_space<vmem>>, %arg2: memref<4x32xf32, #tpu.memory_space<vmem>>, %arg3: memref<1x32xf32, #tpu.memory_space<vmem>>, %arg4: memref<2x2x32x96xf32, #tpu.memory_space<vmem>>, %arg5: memref<2x2x1x96xf32, #tpu.memory_space<vmem>>, %arg6: memref<2x2x32x32xf32, #tpu.memory_space<vmem>>, %arg7: memref<2x2x1x32xf32, #tpu.memory_space<vmem>>, %arg8: memref<2x2x1x32xf32, #tpu.memory_space<vmem>>, %arg9: memref<2x2x1x32xf32, #tpu.memory_space<vmem>>, %arg10: memref<2x2x1x32xf32, #tpu.memory_space<vmem>>, %arg11: memref<2x2x1x32xf32, #tpu.memory_space<vmem>>, %arg12: memref<2x2x32x64xf32, #tpu.memory_space<vmem>>, %arg13: memref<2x2x1x64xf32, #tpu.memory_space<vmem>>, %arg14: memref<2x2x64x32xf32, #tpu.memory_space<vmem>>, %arg15: memref<2x2x1x32xf32, #tpu.memory_space<vmem>>, %arg16: memref<32x10xf32, #tpu.memory_space<vmem>>, %arg17: memref<10x3xf32, #tpu.memory_space<vmem>>, %arg18: memref<1x10xf32, #tpu.memory_space<vmem>>, %arg19: memref<1x3xf32, #tpu.memory_space<vmem>>, %arg20: memref<16x1xf32, #tpu.memory_space<vmem>>, %arg21: memref<1x1xf32, #tpu.memory_space<vmem>>, %arg22: memref<2x3xf32, #tpu.memory_space<vmem>>, %arg23: memref<2x3xf32, #tpu.memory_space<vmem>>) attributes {dimension_semantics = [], scalar_prefetch = 0 : i64, scratch_operands = 0 : i64, tpu.core_type = #tpu.core_type<tc>} {
    %c0 = arith.constant 0 : index
    %c0_0 = arith.constant 0 : index
    %c0_1 = arith.constant 0 : index
    %0 = vector.load %arg0[%c0, %c0_0, %c0_1] : memref<2x16x4xf32, #tpu.memory_space<vmem>>, vector<2x16x4xf32>
    %c0_2 = arith.constant 0 : index
    %c0_3 = arith.constant 0 : index
    %1 = vector.load %arg1[%c0_2, %c0_3] : memref<16x16xf32, #tpu.memory_space<vmem>>, vector<16x16xf32>
    %2 = vector.shape_cast %1 : vector<16x16xf32> to vector<1x16x16xf32>
    %3 = vector.broadcast %2 : vector<1x16x16xf32> to vector<2x16x16xf32>
    %cst = arith.constant dense<0.000000e+00> : vector<2x16x4xf32>
    %4 = tpu.matmul %3, %0, %cst {dimension_numbers = #tpu.dot_dimension_numbers<[2], [1], [1], [2], [0, 0, 0, 1, 1, 2], [0], [0]>} : vector<2x16x16xf32>, vector<2x16x4xf32>, vector<2x16x4xf32> -> vector<2x16x4xf32>
    %5 = arith.subf %0, %4 : vector<2x16x4xf32>
    %6 = vector.shape_cast %5 : vector<2x16x4xf32> to vector<32x4xf32>
    %7 = vector.shape_cast %4 : vector<2x16x4xf32> to vector<32x4xf32>
    %8 = tpu.concatenate %6, %7 in 0 : vector<32x4xf32>, vector<32x4xf32> -> vector<64x4xf32>
    %c0_4 = arith.constant 0 : index
    %c0_5 = arith.constant 0 : index
    %9 = vector.load %arg2[%c0_4, %c0_5] : memref<4x32xf32, #tpu.memory_space<vmem>>, vector<4x32xf32>
    %cst_6 = arith.constant dense<0.000000e+00> : vector<64x32xf32>
    %10 = tpu.matmul %8, %9, %cst_6 {dimension_numbers = #tpu.dot_dimension_numbers<[1], [0], [0], [1], [0, 0, 1, 1], [], []>} : vector<64x4xf32>, vector<4x32xf32>, vector<64x32xf32> -> vector<64x32xf32>
    %c0_7 = arith.constant 0 : index
    %c0_8 = arith.constant 0 : index
    %11 = vector.load %arg3[%c0_7, %c0_8] : memref<1x32xf32, #tpu.memory_space<vmem>>, vector<1x32xf32>
    %12 = vector.broadcast %11 : vector<1x32xf32> to vector<64x32xf32>
    %13 = arith.addf %10, %12 : vector<64x32xf32>
    %14 = vector.extract_strided_slice %13 {offsets = [0, 0], sizes = [32, 32], strides = [1, 1]} : vector<64x32xf32> to vector<32x32xf32>
    %c0_9 = arith.constant 0 : index
    %c0_10 = arith.constant 0 : index
    %c0_11 = arith.constant 0 : index
    %c0_12 = arith.constant 0 : index
    %15 = vector.load %arg4[%c0_9, %c0_10, %c0_11, %c0_12] : memref<2x2x32x96xf32, #tpu.memory_space<vmem>>, vector<1x1x32x96xf32>
    %16 = vector.shape_cast %15 : vector<1x1x32x96xf32> to vector<32x96xf32>
    %cst_13 = arith.constant dense<0.000000e+00> : vector<32x96xf32>
    %17 = tpu.matmul %14, %16, %cst_13 {dimension_numbers = #tpu.dot_dimension_numbers<[1], [0], [0], [1], [0, 0, 1, 1], [], []>} : vector<32x32xf32>, vector<32x96xf32>, vector<32x96xf32> -> vector<32x96xf32>
    %c0_14 = arith.constant 0 : index
    %c0_15 = arith.constant 0 : index
    %c0_16 = arith.constant 0 : index
    %c0_17 = arith.constant 0 : index
    %18 = vector.load %arg5[%c0_14, %c0_15, %c0_16, %c0_17] : memref<2x2x1x96xf32, #tpu.memory_space<vmem>>, vector<1x1x1x96xf32>
    %19 = vector.shape_cast %18 : vector<1x1x1x96xf32> to vector<1x96xf32>
    %20 = vector.broadcast %19 : vector<1x96xf32> to vector<32x96xf32>
    %21 = arith.addf %17, %20 : vector<32x96xf32>
    %22 = vector.extract_strided_slice %21 {offsets = [0, 0], sizes = [32, 32], strides = [1, 1]} : vector<32x96xf32> to vector<32x32xf32>
    %23 = vector.shape_cast %22 : vector<32x32xf32> to vector<2x16x32xf32>
    %24 = vector.extract_strided_slice %21 {offsets = [0, 32], sizes = [32, 32], strides = [1, 1]} : vector<32x96xf32> to vector<32x32xf32>
    %25 = vector.shape_cast %24 : vector<32x32xf32> to vector<2x16x32xf32>
    %26 = vector.extract_strided_slice %21 {offsets = [0, 64], sizes = [32, 32], strides = [1, 1]} : vector<32x96xf32> to vector<32x32xf32>
    %27 = vector.shape_cast %26 : vector<32x32xf32> to vector<2x16x32xf32>
    %28 = tpu.transpose %25, [0, 2, 1] : vector<2x16x32xf32> -> vector<2x32x16xf32>
    %29 = vector.extract_strided_slice %23 {offsets = [0, 0, 0], sizes = [2, 16, 8], strides = [1, 1, 1]} : vector<2x16x32xf32> to vector<2x16x8xf32>
    %30 = vector.extract_strided_slice %28 {offsets = [0, 0, 0], sizes = [2, 8, 16], strides = [1, 1, 1]} : vector<2x32x16xf32> to vector<2x8x16xf32>
    %31 = vector.extract_strided_slice %27 {offsets = [0, 0, 0], sizes = [2, 16, 8], strides = [1, 1, 1]} : vector<2x16x32xf32> to vector<2x16x8xf32>
    %cst_18 = arith.constant dense<0.000000e+00> : vector<2x16x16xf32>
    %32 = tpu.matmul %29, %30, %cst_18 {dimension_numbers = #tpu.dot_dimension_numbers<[2], [1], [1], [2], [0, 0, 0, 1, 1, 2], [0], [0]>} : vector<2x16x8xf32>, vector<2x8x16xf32>, vector<2x16x16xf32> -> vector<2x16x16xf32>
    %cst_19 = arith.constant 0.353553385 : f32
    %33 = vector.broadcast %cst_19 : f32 to vector<2x16x16xf32>
    %34 = arith.mulf %32, %33 : vector<2x16x16xf32>
    %cst_20 = arith.constant dense<0xFF800000> : vector<2x16xf32>
    %35 = vector.multi_reduction <maximumf>, %34, %cst_20 [2] : vector<2x16x16xf32> to vector<2x16xf32>
    %36 = vector.shape_cast %35 : vector<2x16xf32> to vector<2x16x1xf32>
    %37 = vector.broadcast %36 : vector<2x16x1xf32> to vector<2x16x16xf32>
    %38 = arith.subf %34, %37 : vector<2x16x16xf32>
    %39 = math.exp %38 : vector<2x16x16xf32>
    %cst_21 = arith.constant dense<0.000000e+00> : vector<2x16xf32>
    %40 = vector.multi_reduction <add>, %39, %cst_21 [2] : vector<2x16x16xf32> to vector<2x16xf32>
    %41 = vector.shape_cast %40 : vector<2x16xf32> to vector<2x16x1xf32>
    %42 = tpu.reciprocal %41 {approx = true} : vector<2x16x1xf32> -> vector<2x16x1xf32>
    %43 = vector.broadcast %42 : vector<2x16x1xf32> to vector<2x16x16xf32>
    %44 = arith.mulf %39, %43 : vector<2x16x16xf32>
    %cst_22 = arith.constant dense<0.000000e+00> : vector<2x16x8xf32>
    %45 = tpu.matmul %44, %31, %cst_22 {dimension_numbers = #tpu.dot_dimension_numbers<[2], [1], [1], [2], [0, 0, 0, 1, 1, 2], [0], [0]>} : vector<2x16x16xf32>, vector<2x16x8xf32>, vector<2x16x8xf32> -> vector<2x16x8xf32>
    %46 = vector.extract_strided_slice %23 {offsets = [0, 0, 8], sizes = [2, 16, 8], strides = [1, 1, 1]} : vector<2x16x32xf32> to vector<2x16x8xf32>
    %47 = vector.extract_strided_slice %28 {offsets = [0, 8, 0], sizes = [2, 8, 16], strides = [1, 1, 1]} : vector<2x32x16xf32> to vector<2x8x16xf32>
    %48 = vector.extract_strided_slice %27 {offsets = [0, 0, 8], sizes = [2, 16, 8], strides = [1, 1, 1]} : vector<2x16x32xf32> to vector<2x16x8xf32>
    %cst_23 = arith.constant dense<0.000000e+00> : vector<2x16x16xf32>
    %49 = tpu.matmul %46, %47, %cst_23 {dimension_numbers = #tpu.dot_dimension_numbers<[2], [1], [1], [2], [0, 0, 0, 1, 1, 2], [0], [0]>} : vector<2x16x8xf32>, vector<2x8x16xf32>, vector<2x16x16xf32> -> vector<2x16x16xf32>
    %cst_24 = arith.constant 0.353553385 : f32
    %50 = vector.broadcast %cst_24 : f32 to vector<2x16x16xf32>
    %51 = arith.mulf %49, %50 : vector<2x16x16xf32>
    %cst_25 = arith.constant dense<0xFF800000> : vector<2x16xf32>
    %52 = vector.multi_reduction <maximumf>, %51, %cst_25 [2] : vector<2x16x16xf32> to vector<2x16xf32>
    %53 = vector.shape_cast %52 : vector<2x16xf32> to vector<2x16x1xf32>
    %54 = vector.broadcast %53 : vector<2x16x1xf32> to vector<2x16x16xf32>
    %55 = arith.subf %51, %54 : vector<2x16x16xf32>
    %56 = math.exp %55 : vector<2x16x16xf32>
    %cst_26 = arith.constant dense<0.000000e+00> : vector<2x16xf32>
    %57 = vector.multi_reduction <add>, %56, %cst_26 [2] : vector<2x16x16xf32> to vector<2x16xf32>
    %58 = vector.shape_cast %57 : vector<2x16xf32> to vector<2x16x1xf32>
    %59 = tpu.reciprocal %58 {approx = true} : vector<2x16x1xf32> -> vector<2x16x1xf32>
    %60 = vector.broadcast %59 : vector<2x16x1xf32> to vector<2x16x16xf32>
    %61 = arith.mulf %56, %60 : vector<2x16x16xf32>
    %cst_27 = arith.constant dense<0.000000e+00> : vector<2x16x8xf32>
    %62 = tpu.matmul %61, %48, %cst_27 {dimension_numbers = #tpu.dot_dimension_numbers<[2], [1], [1], [2], [0, 0, 0, 1, 1, 2], [0], [0]>} : vector<2x16x16xf32>, vector<2x16x8xf32>, vector<2x16x8xf32> -> vector<2x16x8xf32>
    %63 = vector.extract_strided_slice %23 {offsets = [0, 0, 16], sizes = [2, 16, 8], strides = [1, 1, 1]} : vector<2x16x32xf32> to vector<2x16x8xf32>
    %64 = vector.extract_strided_slice %28 {offsets = [0, 16, 0], sizes = [2, 8, 16], strides = [1, 1, 1]} : vector<2x32x16xf32> to vector<2x8x16xf32>
    %65 = vector.extract_strided_slice %27 {offsets = [0, 0, 16], sizes = [2, 16, 8], strides = [1, 1, 1]} : vector<2x16x32xf32> to vector<2x16x8xf32>
    %cst_28 = arith.constant dense<0.000000e+00> : vector<2x16x16xf32>
    %66 = tpu.matmul %63, %64, %cst_28 {dimension_numbers = #tpu.dot_dimension_numbers<[2], [1], [1], [2], [0, 0, 0, 1, 1, 2], [0], [0]>} : vector<2x16x8xf32>, vector<2x8x16xf32>, vector<2x16x16xf32> -> vector<2x16x16xf32>
    %cst_29 = arith.constant 0.353553385 : f32
    %67 = vector.broadcast %cst_29 : f32 to vector<2x16x16xf32>
    %68 = arith.mulf %66, %67 : vector<2x16x16xf32>
    %cst_30 = arith.constant dense<0xFF800000> : vector<2x16xf32>
    %69 = vector.multi_reduction <maximumf>, %68, %cst_30 [2] : vector<2x16x16xf32> to vector<2x16xf32>
    %70 = vector.shape_cast %69 : vector<2x16xf32> to vector<2x16x1xf32>
    %71 = vector.broadcast %70 : vector<2x16x1xf32> to vector<2x16x16xf32>
    %72 = arith.subf %68, %71 : vector<2x16x16xf32>
    %73 = math.exp %72 : vector<2x16x16xf32>
    %cst_31 = arith.constant dense<0.000000e+00> : vector<2x16xf32>
    %74 = vector.multi_reduction <add>, %73, %cst_31 [2] : vector<2x16x16xf32> to vector<2x16xf32>
    %75 = vector.shape_cast %74 : vector<2x16xf32> to vector<2x16x1xf32>
    %76 = tpu.reciprocal %75 {approx = true} : vector<2x16x1xf32> -> vector<2x16x1xf32>
    %77 = vector.broadcast %76 : vector<2x16x1xf32> to vector<2x16x16xf32>
    %78 = arith.mulf %73, %77 : vector<2x16x16xf32>
    %cst_32 = arith.constant dense<0.000000e+00> : vector<2x16x8xf32>
    %79 = tpu.matmul %78, %65, %cst_32 {dimension_numbers = #tpu.dot_dimension_numbers<[2], [1], [1], [2], [0, 0, 0, 1, 1, 2], [0], [0]>} : vector<2x16x16xf32>, vector<2x16x8xf32>, vector<2x16x8xf32> -> vector<2x16x8xf32>
    %80 = vector.extract_strided_slice %23 {offsets = [0, 0, 24], sizes = [2, 16, 8], strides = [1, 1, 1]} : vector<2x16x32xf32> to vector<2x16x8xf32>
    %81 = vector.extract_strided_slice %28 {offsets = [0, 24, 0], sizes = [2, 8, 16], strides = [1, 1, 1]} : vector<2x32x16xf32> to vector<2x8x16xf32>
    %82 = vector.extract_strided_slice %27 {offsets = [0, 0, 24], sizes = [2, 16, 8], strides = [1, 1, 1]} : vector<2x16x32xf32> to vector<2x16x8xf32>
    %cst_33 = arith.constant dense<0.000000e+00> : vector<2x16x16xf32>
    %83 = tpu.matmul %80, %81, %cst_33 {dimension_numbers = #tpu.dot_dimension_numbers<[2], [1], [1], [2], [0, 0, 0, 1, 1, 2], [0], [0]>} : vector<2x16x8xf32>, vector<2x8x16xf32>, vector<2x16x16xf32> -> vector<2x16x16xf32>
    %cst_34 = arith.constant 0.353553385 : f32
    %84 = vector.broadcast %cst_34 : f32 to vector<2x16x16xf32>
    %85 = arith.mulf %83, %84 : vector<2x16x16xf32>
    %cst_35 = arith.constant dense<0xFF800000> : vector<2x16xf32>
    %86 = vector.multi_reduction <maximumf>, %85, %cst_35 [2] : vector<2x16x16xf32> to vector<2x16xf32>
    %87 = vector.shape_cast %86 : vector<2x16xf32> to vector<2x16x1xf32>
    %88 = vector.broadcast %87 : vector<2x16x1xf32> to vector<2x16x16xf32>
    %89 = arith.subf %85, %88 : vector<2x16x16xf32>
    %90 = math.exp %89 : vector<2x16x16xf32>
    %cst_36 = arith.constant dense<0.000000e+00> : vector<2x16xf32>
    %91 = vector.multi_reduction <add>, %90, %cst_36 [2] : vector<2x16x16xf32> to vector<2x16xf32>
    %92 = vector.shape_cast %91 : vector<2x16xf32> to vector<2x16x1xf32>
    %93 = tpu.reciprocal %92 {approx = true} : vector<2x16x1xf32> -> vector<2x16x1xf32>
    %94 = vector.broadcast %93 : vector<2x16x1xf32> to vector<2x16x16xf32>
    %95 = arith.mulf %90, %94 : vector<2x16x16xf32>
    %cst_37 = arith.constant dense<0.000000e+00> : vector<2x16x8xf32>
    %96 = tpu.matmul %95, %82, %cst_37 {dimension_numbers = #tpu.dot_dimension_numbers<[2], [1], [1], [2], [0, 0, 0, 1, 1, 2], [0], [0]>} : vector<2x16x16xf32>, vector<2x16x8xf32>, vector<2x16x8xf32> -> vector<2x16x8xf32>
    %97 = tpu.concatenate %45, %62, %79, %96 in 2 : vector<2x16x8xf32>, vector<2x16x8xf32>, vector<2x16x8xf32>, vector<2x16x8xf32> -> vector<2x16x32xf32>
    %98 = vector.shape_cast %97 : vector<2x16x32xf32> to vector<32x32xf32>
    %c0_38 = arith.constant 0 : index
    %c0_39 = arith.constant 0 : index
    %c0_40 = arith.constant 0 : index
    %c0_41 = arith.constant 0 : index
    %99 = vector.load %arg6[%c0_38, %c0_39, %c0_40, %c0_41] : memref<2x2x32x32xf32, #tpu.memory_space<vmem>>, vector<1x1x32x32xf32>
    %100 = vector.shape_cast %99 : vector<1x1x32x32xf32> to vector<32x32xf32>
    %cst_42 = arith.constant dense<0.000000e+00> : vector<32x32xf32>
    %101 = tpu.matmul %98, %100, %cst_42 {dimension_numbers = #tpu.dot_dimension_numbers<[1], [0], [0], [1], [0, 0, 1, 1], [], []>} : vector<32x32xf32>, vector<32x32xf32>, vector<32x32xf32> -> vector<32x32xf32>
    %c0_43 = arith.constant 0 : index
    %c0_44 = arith.constant 0 : index
    %c0_45 = arith.constant 0 : index
    %c0_46 = arith.constant 0 : index
    %102 = vector.load %arg7[%c0_43, %c0_44, %c0_45, %c0_46] : memref<2x2x1x32xf32, #tpu.memory_space<vmem>>, vector<1x1x1x32xf32>
    %103 = vector.shape_cast %102 : vector<1x1x1x32xf32> to vector<1x32xf32>
    %104 = vector.broadcast %103 : vector<1x32xf32> to vector<32x32xf32>
    %105 = arith.addf %101, %104 : vector<32x32xf32>
    %106 = arith.addf %14, %105 : vector<32x32xf32>
    %c0_47 = arith.constant 0 : index
    %c0_48 = arith.constant 0 : index
    %c0_49 = arith.constant 0 : index
    %c0_50 = arith.constant 0 : index
    %107 = vector.load %arg8[%c0_47, %c0_48, %c0_49, %c0_50] : memref<2x2x1x32xf32, #tpu.memory_space<vmem>>, vector<1x1x1x32xf32>
    %108 = vector.shape_cast %107 : vector<1x1x1x32xf32> to vector<1x32xf32>
    %c0_51 = arith.constant 0 : index
    %c0_52 = arith.constant 0 : index
    %c0_53 = arith.constant 0 : index
    %c0_54 = arith.constant 0 : index
    %109 = vector.load %arg9[%c0_51, %c0_52, %c0_53, %c0_54] : memref<2x2x1x32xf32, #tpu.memory_space<vmem>>, vector<1x1x1x32xf32>
    %110 = vector.shape_cast %109 : vector<1x1x1x32xf32> to vector<1x32xf32>
    %cst_55 = arith.constant dense<0.000000e+00> : vector<32xf32>
    %111 = vector.multi_reduction <add>, %106, %cst_55 [1] : vector<32x32xf32> to vector<32xf32>
    %112 = vector.shape_cast %111 : vector<32xf32> to vector<32x1xf32>
    %cst_56 = arith.constant 3.200000e+01 : f32
    %113 = vector.broadcast %cst_56 : f32 to vector<32x1xf32>
    %114 = arith.divf %112, %113 : vector<32x1xf32>
    %115 = vector.broadcast %114 : vector<32x1xf32> to vector<32x32xf32>
    %116 = arith.subf %106, %115 : vector<32x32xf32>
    %117 = arith.mulf %116, %116 : vector<32x32xf32>
    %cst_57 = arith.constant dense<0.000000e+00> : vector<32xf32>
    %118 = vector.multi_reduction <add>, %117, %cst_57 [1] : vector<32x32xf32> to vector<32xf32>
    %119 = vector.shape_cast %118 : vector<32xf32> to vector<32x1xf32>
    %cst_58 = arith.constant 3.200000e+01 : f32
    %120 = vector.broadcast %cst_58 : f32 to vector<32x1xf32>
    %121 = arith.divf %119, %120 : vector<32x1xf32>
    %cst_59 = arith.constant 9.99999974E-6 : f32
    %122 = vector.broadcast %cst_59 : f32 to vector<32x1xf32>
    %123 = arith.addf %121, %122 : vector<32x1xf32>
    %124 = math.rsqrt %123 : vector<32x1xf32>
    %125 = vector.broadcast %124 : vector<32x1xf32> to vector<32x32xf32>
    %126 = arith.mulf %116, %125 : vector<32x32xf32>
    %127 = vector.broadcast %108 : vector<1x32xf32> to vector<32x32xf32>
    %128 = arith.mulf %126, %127 : vector<32x32xf32>
    %129 = vector.broadcast %110 : vector<1x32xf32> to vector<32x32xf32>
    %130 = arith.addf %128, %129 : vector<32x32xf32>
    %c0_60 = arith.constant 0 : index
    %c0_61 = arith.constant 0 : index
    %c0_62 = arith.constant 0 : index
    %c0_63 = arith.constant 0 : index
    %131 = vector.load %arg12[%c0_60, %c0_61, %c0_62, %c0_63] : memref<2x2x32x64xf32, #tpu.memory_space<vmem>>, vector<1x1x32x64xf32>
    %132 = vector.shape_cast %131 : vector<1x1x32x64xf32> to vector<32x64xf32>
    %cst_64 = arith.constant dense<0.000000e+00> : vector<32x64xf32>
    %133 = tpu.matmul %130, %132, %cst_64 {dimension_numbers = #tpu.dot_dimension_numbers<[1], [0], [0], [1], [0, 0, 1, 1], [], []>} : vector<32x32xf32>, vector<32x64xf32>, vector<32x64xf32> -> vector<32x64xf32>
    %c0_65 = arith.constant 0 : index
    %c0_66 = arith.constant 0 : index
    %c0_67 = arith.constant 0 : index
    %c0_68 = arith.constant 0 : index
    %134 = vector.load %arg13[%c0_65, %c0_66, %c0_67, %c0_68] : memref<2x2x1x64xf32, #tpu.memory_space<vmem>>, vector<1x1x1x64xf32>
    %135 = vector.shape_cast %134 : vector<1x1x1x64xf32> to vector<1x64xf32>
    %136 = vector.broadcast %135 : vector<1x64xf32> to vector<32x64xf32>
    %137 = arith.addf %133, %136 : vector<32x64xf32>
    %cst_69 = arith.constant 0.000000e+00 : f32
    %138 = vector.broadcast %cst_69 : f32 to vector<32x64xf32>
    %139 = arith.cmpf ogt, %137, %138 : vector<32x64xf32>
    %cst_70 = arith.constant 0.00999999977 : f32
    %140 = vector.broadcast %cst_70 : f32 to vector<32x64xf32>
    %141 = arith.mulf %140, %137 : vector<32x64xf32>
    %142 = arith.select %139, %137, %141 : vector<32x64xi1>, vector<32x64xf32>
    %c0_71 = arith.constant 0 : index
    %c0_72 = arith.constant 0 : index
    %c0_73 = arith.constant 0 : index
    %c0_74 = arith.constant 0 : index
    %143 = vector.load %arg14[%c0_71, %c0_72, %c0_73, %c0_74] : memref<2x2x64x32xf32, #tpu.memory_space<vmem>>, vector<1x1x64x32xf32>
    %144 = vector.shape_cast %143 : vector<1x1x64x32xf32> to vector<64x32xf32>
    %cst_75 = arith.constant dense<0.000000e+00> : vector<32x32xf32>
    %145 = tpu.matmul %142, %144, %cst_75 {dimension_numbers = #tpu.dot_dimension_numbers<[1], [0], [0], [1], [0, 0, 1, 1], [], []>} : vector<32x64xf32>, vector<64x32xf32>, vector<32x32xf32> -> vector<32x32xf32>
    %c0_76 = arith.constant 0 : index
    %c0_77 = arith.constant 0 : index
    %c0_78 = arith.constant 0 : index
    %c0_79 = arith.constant 0 : index
    %146 = vector.load %arg15[%c0_76, %c0_77, %c0_78, %c0_79] : memref<2x2x1x32xf32, #tpu.memory_space<vmem>>, vector<1x1x1x32xf32>
    %147 = vector.shape_cast %146 : vector<1x1x1x32xf32> to vector<1x32xf32>
    %148 = vector.broadcast %147 : vector<1x32xf32> to vector<32x32xf32>
    %149 = arith.addf %145, %148 : vector<32x32xf32>
    %150 = arith.addf %130, %149 : vector<32x32xf32>
    %c0_80 = arith.constant 0 : index
    %c0_81 = arith.constant 0 : index
    %c0_82 = arith.constant 0 : index
    %c0_83 = arith.constant 0 : index
    %151 = vector.load %arg10[%c0_80, %c0_81, %c0_82, %c0_83] : memref<2x2x1x32xf32, #tpu.memory_space<vmem>>, vector<1x1x1x32xf32>
    %152 = vector.shape_cast %151 : vector<1x1x1x32xf32> to vector<1x32xf32>
    %c0_84 = arith.constant 0 : index
    %c0_85 = arith.constant 0 : index
    %c0_86 = arith.constant 0 : index
    %c0_87 = arith.constant 0 : index
    %153 = vector.load %arg11[%c0_84, %c0_85, %c0_86, %c0_87] : memref<2x2x1x32xf32, #tpu.memory_space<vmem>>, vector<1x1x1x32xf32>
    %154 = vector.shape_cast %153 : vector<1x1x1x32xf32> to vector<1x32xf32>
    %cst_88 = arith.constant dense<0.000000e+00> : vector<32xf32>
    %155 = vector.multi_reduction <add>, %150, %cst_88 [1] : vector<32x32xf32> to vector<32xf32>
    %156 = vector.shape_cast %155 : vector<32xf32> to vector<32x1xf32>
    %cst_89 = arith.constant 3.200000e+01 : f32
    %157 = vector.broadcast %cst_89 : f32 to vector<32x1xf32>
    %158 = arith.divf %156, %157 : vector<32x1xf32>
    %159 = vector.broadcast %158 : vector<32x1xf32> to vector<32x32xf32>
    %160 = arith.subf %150, %159 : vector<32x32xf32>
    %161 = arith.mulf %160, %160 : vector<32x32xf32>
    %cst_90 = arith.constant dense<0.000000e+00> : vector<32xf32>
    %162 = vector.multi_reduction <add>, %161, %cst_90 [1] : vector<32x32xf32> to vector<32xf32>
    %163 = vector.shape_cast %162 : vector<32xf32> to vector<32x1xf32>
    %cst_91 = arith.constant 3.200000e+01 : f32
    %164 = vector.broadcast %cst_91 : f32 to vector<32x1xf32>
    %165 = arith.divf %163, %164 : vector<32x1xf32>
    %cst_92 = arith.constant 9.99999974E-6 : f32
    %166 = vector.broadcast %cst_92 : f32 to vector<32x1xf32>
    %167 = arith.addf %165, %166 : vector<32x1xf32>
    %168 = math.rsqrt %167 : vector<32x1xf32>
    %169 = vector.broadcast %168 : vector<32x1xf32> to vector<32x32xf32>
    %170 = arith.mulf %160, %169 : vector<32x32xf32>
    %171 = vector.broadcast %152 : vector<1x32xf32> to vector<32x32xf32>
    %172 = arith.mulf %170, %171 : vector<32x32xf32>
    %173 = vector.broadcast %154 : vector<1x32xf32> to vector<32x32xf32>
    %174 = arith.addf %172, %173 : vector<32x32xf32>
    %c0_93 = arith.constant 0 : index
    %c1 = arith.constant 1 : index
    %c0_94 = arith.constant 0 : index
    %c0_95 = arith.constant 0 : index
    %175 = vector.load %arg4[%c0_93, %c1, %c0_94, %c0_95] : memref<2x2x32x96xf32, #tpu.memory_space<vmem>>, vector<1x1x32x96xf32>
    %176 = vector.shape_cast %175 : vector<1x1x32x96xf32> to vector<32x96xf32>
    %cst_96 = arith.constant dense<0.000000e+00> : vector<32x96xf32>
    %177 = tpu.matmul %174, %176, %cst_96 {dimension_numbers = #tpu.dot_dimension_numbers<[1], [0], [0], [1], [0, 0, 1, 1], [], []>} : vector<32x32xf32>, vector<32x96xf32>, vector<32x96xf32> -> vector<32x96xf32>
    %c0_97 = arith.constant 0 : index
    %c1_98 = arith.constant 1 : index
    %c0_99 = arith.constant 0 : index
    %c0_100 = arith.constant 0 : index
    %178 = vector.load %arg5[%c0_97, %c1_98, %c0_99, %c0_100] : memref<2x2x1x96xf32, #tpu.memory_space<vmem>>, vector<1x1x1x96xf32>
    %179 = vector.shape_cast %178 : vector<1x1x1x96xf32> to vector<1x96xf32>
    %180 = vector.broadcast %179 : vector<1x96xf32> to vector<32x96xf32>
    %181 = arith.addf %177, %180 : vector<32x96xf32>
    %182 = vector.extract_strided_slice %181 {offsets = [0, 0], sizes = [32, 32], strides = [1, 1]} : vector<32x96xf32> to vector<32x32xf32>
    %183 = vector.shape_cast %182 : vector<32x32xf32> to vector<2x16x32xf32>
    %184 = vector.extract_strided_slice %181 {offsets = [0, 32], sizes = [32, 32], strides = [1, 1]} : vector<32x96xf32> to vector<32x32xf32>
    %185 = vector.shape_cast %184 : vector<32x32xf32> to vector<2x16x32xf32>
    %186 = vector.extract_strided_slice %181 {offsets = [0, 64], sizes = [32, 32], strides = [1, 1]} : vector<32x96xf32> to vector<32x32xf32>
    %187 = vector.shape_cast %186 : vector<32x32xf32> to vector<2x16x32xf32>
    %188 = tpu.transpose %185, [0, 2, 1] : vector<2x16x32xf32> -> vector<2x32x16xf32>
    %189 = vector.extract_strided_slice %183 {offsets = [0, 0, 0], sizes = [2, 16, 8], strides = [1, 1, 1]} : vector<2x16x32xf32> to vector<2x16x8xf32>
    %190 = vector.extract_strided_slice %188 {offsets = [0, 0, 0], sizes = [2, 8, 16], strides = [1, 1, 1]} : vector<2x32x16xf32> to vector<2x8x16xf32>
    %191 = vector.extract_strided_slice %187 {offsets = [0, 0, 0], sizes = [2, 16, 8], strides = [1, 1, 1]} : vector<2x16x32xf32> to vector<2x16x8xf32>
    %cst_101 = arith.constant dense<0.000000e+00> : vector<2x16x16xf32>
    %192 = tpu.matmul %189, %190, %cst_101 {dimension_numbers = #tpu.dot_dimension_numbers<[2], [1], [1], [2], [0, 0, 0, 1, 1, 2], [0], [0]>} : vector<2x16x8xf32>, vector<2x8x16xf32>, vector<2x16x16xf32> -> vector<2x16x16xf32>
    %cst_102 = arith.constant 0.353553385 : f32
    %193 = vector.broadcast %cst_102 : f32 to vector<2x16x16xf32>
    %194 = arith.mulf %192, %193 : vector<2x16x16xf32>
    %cst_103 = arith.constant dense<0xFF800000> : vector<2x16xf32>
    %195 = vector.multi_reduction <maximumf>, %194, %cst_103 [2] : vector<2x16x16xf32> to vector<2x16xf32>
    %196 = vector.shape_cast %195 : vector<2x16xf32> to vector<2x16x1xf32>
    %197 = vector.broadcast %196 : vector<2x16x1xf32> to vector<2x16x16xf32>
    %198 = arith.subf %194, %197 : vector<2x16x16xf32>
    %199 = math.exp %198 : vector<2x16x16xf32>
    %cst_104 = arith.constant dense<0.000000e+00> : vector<2x16xf32>
    %200 = vector.multi_reduction <add>, %199, %cst_104 [2] : vector<2x16x16xf32> to vector<2x16xf32>
    %201 = vector.shape_cast %200 : vector<2x16xf32> to vector<2x16x1xf32>
    %202 = tpu.reciprocal %201 {approx = true} : vector<2x16x1xf32> -> vector<2x16x1xf32>
    %203 = vector.broadcast %202 : vector<2x16x1xf32> to vector<2x16x16xf32>
    %204 = arith.mulf %199, %203 : vector<2x16x16xf32>
    %cst_105 = arith.constant dense<0.000000e+00> : vector<2x16x8xf32>
    %205 = tpu.matmul %204, %191, %cst_105 {dimension_numbers = #tpu.dot_dimension_numbers<[2], [1], [1], [2], [0, 0, 0, 1, 1, 2], [0], [0]>} : vector<2x16x16xf32>, vector<2x16x8xf32>, vector<2x16x8xf32> -> vector<2x16x8xf32>
    %206 = vector.extract_strided_slice %183 {offsets = [0, 0, 8], sizes = [2, 16, 8], strides = [1, 1, 1]} : vector<2x16x32xf32> to vector<2x16x8xf32>
    %207 = vector.extract_strided_slice %188 {offsets = [0, 8, 0], sizes = [2, 8, 16], strides = [1, 1, 1]} : vector<2x32x16xf32> to vector<2x8x16xf32>
    %208 = vector.extract_strided_slice %187 {offsets = [0, 0, 8], sizes = [2, 16, 8], strides = [1, 1, 1]} : vector<2x16x32xf32> to vector<2x16x8xf32>
    %cst_106 = arith.constant dense<0.000000e+00> : vector<2x16x16xf32>
    %209 = tpu.matmul %206, %207, %cst_106 {dimension_numbers = #tpu.dot_dimension_numbers<[2], [1], [1], [2], [0, 0, 0, 1, 1, 2], [0], [0]>} : vector<2x16x8xf32>, vector<2x8x16xf32>, vector<2x16x16xf32> -> vector<2x16x16xf32>
    %cst_107 = arith.constant 0.353553385 : f32
    %210 = vector.broadcast %cst_107 : f32 to vector<2x16x16xf32>
    %211 = arith.mulf %209, %210 : vector<2x16x16xf32>
    %cst_108 = arith.constant dense<0xFF800000> : vector<2x16xf32>
    %212 = vector.multi_reduction <maximumf>, %211, %cst_108 [2] : vector<2x16x16xf32> to vector<2x16xf32>
    %213 = vector.shape_cast %212 : vector<2x16xf32> to vector<2x16x1xf32>
    %214 = vector.broadcast %213 : vector<2x16x1xf32> to vector<2x16x16xf32>
    %215 = arith.subf %211, %214 : vector<2x16x16xf32>
    %216 = math.exp %215 : vector<2x16x16xf32>
    %cst_109 = arith.constant dense<0.000000e+00> : vector<2x16xf32>
    %217 = vector.multi_reduction <add>, %216, %cst_109 [2] : vector<2x16x16xf32> to vector<2x16xf32>
    %218 = vector.shape_cast %217 : vector<2x16xf32> to vector<2x16x1xf32>
    %219 = tpu.reciprocal %218 {approx = true} : vector<2x16x1xf32> -> vector<2x16x1xf32>
    %220 = vector.broadcast %219 : vector<2x16x1xf32> to vector<2x16x16xf32>
    %221 = arith.mulf %216, %220 : vector<2x16x16xf32>
    %cst_110 = arith.constant dense<0.000000e+00> : vector<2x16x8xf32>
    %222 = tpu.matmul %221, %208, %cst_110 {dimension_numbers = #tpu.dot_dimension_numbers<[2], [1], [1], [2], [0, 0, 0, 1, 1, 2], [0], [0]>} : vector<2x16x16xf32>, vector<2x16x8xf32>, vector<2x16x8xf32> -> vector<2x16x8xf32>
    %223 = vector.extract_strided_slice %183 {offsets = [0, 0, 16], sizes = [2, 16, 8], strides = [1, 1, 1]} : vector<2x16x32xf32> to vector<2x16x8xf32>
    %224 = vector.extract_strided_slice %188 {offsets = [0, 16, 0], sizes = [2, 8, 16], strides = [1, 1, 1]} : vector<2x32x16xf32> to vector<2x8x16xf32>
    %225 = vector.extract_strided_slice %187 {offsets = [0, 0, 16], sizes = [2, 16, 8], strides = [1, 1, 1]} : vector<2x16x32xf32> to vector<2x16x8xf32>
    %cst_111 = arith.constant dense<0.000000e+00> : vector<2x16x16xf32>
    %226 = tpu.matmul %223, %224, %cst_111 {dimension_numbers = #tpu.dot_dimension_numbers<[2], [1], [1], [2], [0, 0, 0, 1, 1, 2], [0], [0]>} : vector<2x16x8xf32>, vector<2x8x16xf32>, vector<2x16x16xf32> -> vector<2x16x16xf32>
    %cst_112 = arith.constant 0.353553385 : f32
    %227 = vector.broadcast %cst_112 : f32 to vector<2x16x16xf32>
    %228 = arith.mulf %226, %227 : vector<2x16x16xf32>
    %cst_113 = arith.constant dense<0xFF800000> : vector<2x16xf32>
    %229 = vector.multi_reduction <maximumf>, %228, %cst_113 [2] : vector<2x16x16xf32> to vector<2x16xf32>
    %230 = vector.shape_cast %229 : vector<2x16xf32> to vector<2x16x1xf32>
    %231 = vector.broadcast %230 : vector<2x16x1xf32> to vector<2x16x16xf32>
    %232 = arith.subf %228, %231 : vector<2x16x16xf32>
    %233 = math.exp %232 : vector<2x16x16xf32>
    %cst_114 = arith.constant dense<0.000000e+00> : vector<2x16xf32>
    %234 = vector.multi_reduction <add>, %233, %cst_114 [2] : vector<2x16x16xf32> to vector<2x16xf32>
    %235 = vector.shape_cast %234 : vector<2x16xf32> to vector<2x16x1xf32>
    %236 = tpu.reciprocal %235 {approx = true} : vector<2x16x1xf32> -> vector<2x16x1xf32>
    %237 = vector.broadcast %236 : vector<2x16x1xf32> to vector<2x16x16xf32>
    %238 = arith.mulf %233, %237 : vector<2x16x16xf32>
    %cst_115 = arith.constant dense<0.000000e+00> : vector<2x16x8xf32>
    %239 = tpu.matmul %238, %225, %cst_115 {dimension_numbers = #tpu.dot_dimension_numbers<[2], [1], [1], [2], [0, 0, 0, 1, 1, 2], [0], [0]>} : vector<2x16x16xf32>, vector<2x16x8xf32>, vector<2x16x8xf32> -> vector<2x16x8xf32>
    %240 = vector.extract_strided_slice %183 {offsets = [0, 0, 24], sizes = [2, 16, 8], strides = [1, 1, 1]} : vector<2x16x32xf32> to vector<2x16x8xf32>
    %241 = vector.extract_strided_slice %188 {offsets = [0, 24, 0], sizes = [2, 8, 16], strides = [1, 1, 1]} : vector<2x32x16xf32> to vector<2x8x16xf32>
    %242 = vector.extract_strided_slice %187 {offsets = [0, 0, 24], sizes = [2, 16, 8], strides = [1, 1, 1]} : vector<2x16x32xf32> to vector<2x16x8xf32>
    %cst_116 = arith.constant dense<0.000000e+00> : vector<2x16x16xf32>
    %243 = tpu.matmul %240, %241, %cst_116 {dimension_numbers = #tpu.dot_dimension_numbers<[2], [1], [1], [2], [0, 0, 0, 1, 1, 2], [0], [0]>} : vector<2x16x8xf32>, vector<2x8x16xf32>, vector<2x16x16xf32> -> vector<2x16x16xf32>
    %cst_117 = arith.constant 0.353553385 : f32
    %244 = vector.broadcast %cst_117 : f32 to vector<2x16x16xf32>
    %245 = arith.mulf %243, %244 : vector<2x16x16xf32>
    %cst_118 = arith.constant dense<0xFF800000> : vector<2x16xf32>
    %246 = vector.multi_reduction <maximumf>, %245, %cst_118 [2] : vector<2x16x16xf32> to vector<2x16xf32>
    %247 = vector.shape_cast %246 : vector<2x16xf32> to vector<2x16x1xf32>
    %248 = vector.broadcast %247 : vector<2x16x1xf32> to vector<2x16x16xf32>
    %249 = arith.subf %245, %248 : vector<2x16x16xf32>
    %250 = math.exp %249 : vector<2x16x16xf32>
    %cst_119 = arith.constant dense<0.000000e+00> : vector<2x16xf32>
    %251 = vector.multi_reduction <add>, %250, %cst_119 [2] : vector<2x16x16xf32> to vector<2x16xf32>
    %252 = vector.shape_cast %251 : vector<2x16xf32> to vector<2x16x1xf32>
    %253 = tpu.reciprocal %252 {approx = true} : vector<2x16x1xf32> -> vector<2x16x1xf32>
    %254 = vector.broadcast %253 : vector<2x16x1xf32> to vector<2x16x16xf32>
    %255 = arith.mulf %250, %254 : vector<2x16x16xf32>
    %cst_120 = arith.constant dense<0.000000e+00> : vector<2x16x8xf32>
    %256 = tpu.matmul %255, %242, %cst_120 {dimension_numbers = #tpu.dot_dimension_numbers<[2], [1], [1], [2], [0, 0, 0, 1, 1, 2], [0], [0]>} : vector<2x16x16xf32>, vector<2x16x8xf32>, vector<2x16x8xf32> -> vector<2x16x8xf32>
    %257 = tpu.concatenate %205, %222, %239, %256 in 2 : vector<2x16x8xf32>, vector<2x16x8xf32>, vector<2x16x8xf32>, vector<2x16x8xf32> -> vector<2x16x32xf32>
    %258 = vector.shape_cast %257 : vector<2x16x32xf32> to vector<32x32xf32>
    %c0_121 = arith.constant 0 : index
    %c1_122 = arith.constant 1 : index
    %c0_123 = arith.constant 0 : index
    %c0_124 = arith.constant 0 : index
    %259 = vector.load %arg6[%c0_121, %c1_122, %c0_123, %c0_124] : memref<2x2x32x32xf32, #tpu.memory_space<vmem>>, vector<1x1x32x32xf32>
    %260 = vector.shape_cast %259 : vector<1x1x32x32xf32> to vector<32x32xf32>
    %cst_125 = arith.constant dense<0.000000e+00> : vector<32x32xf32>
    %261 = tpu.matmul %258, %260, %cst_125 {dimension_numbers = #tpu.dot_dimension_numbers<[1], [0], [0], [1], [0, 0, 1, 1], [], []>} : vector<32x32xf32>, vector<32x32xf32>, vector<32x32xf32> -> vector<32x32xf32>
    %c0_126 = arith.constant 0 : index
    %c1_127 = arith.constant 1 : index
    %c0_128 = arith.constant 0 : index
    %c0_129 = arith.constant 0 : index
    %262 = vector.load %arg7[%c0_126, %c1_127, %c0_128, %c0_129] : memref<2x2x1x32xf32, #tpu.memory_space<vmem>>, vector<1x1x1x32xf32>
    %263 = vector.shape_cast %262 : vector<1x1x1x32xf32> to vector<1x32xf32>
    %264 = vector.broadcast %263 : vector<1x32xf32> to vector<32x32xf32>
    %265 = arith.addf %261, %264 : vector<32x32xf32>
    %266 = arith.addf %174, %265 : vector<32x32xf32>
    %c0_130 = arith.constant 0 : index
    %c1_131 = arith.constant 1 : index
    %c0_132 = arith.constant 0 : index
    %c0_133 = arith.constant 0 : index
    %267 = vector.load %arg8[%c0_130, %c1_131, %c0_132, %c0_133] : memref<2x2x1x32xf32, #tpu.memory_space<vmem>>, vector<1x1x1x32xf32>
    %268 = vector.shape_cast %267 : vector<1x1x1x32xf32> to vector<1x32xf32>
    %c0_134 = arith.constant 0 : index
    %c1_135 = arith.constant 1 : index
    %c0_136 = arith.constant 0 : index
    %c0_137 = arith.constant 0 : index
    %269 = vector.load %arg9[%c0_134, %c1_135, %c0_136, %c0_137] : memref<2x2x1x32xf32, #tpu.memory_space<vmem>>, vector<1x1x1x32xf32>
    %270 = vector.shape_cast %269 : vector<1x1x1x32xf32> to vector<1x32xf32>
    %cst_138 = arith.constant dense<0.000000e+00> : vector<32xf32>
    %271 = vector.multi_reduction <add>, %266, %cst_138 [1] : vector<32x32xf32> to vector<32xf32>
    %272 = vector.shape_cast %271 : vector<32xf32> to vector<32x1xf32>
    %cst_139 = arith.constant 3.200000e+01 : f32
    %273 = vector.broadcast %cst_139 : f32 to vector<32x1xf32>
    %274 = arith.divf %272, %273 : vector<32x1xf32>
    %275 = vector.broadcast %274 : vector<32x1xf32> to vector<32x32xf32>
    %276 = arith.subf %266, %275 : vector<32x32xf32>
    %277 = arith.mulf %276, %276 : vector<32x32xf32>
    %cst_140 = arith.constant dense<0.000000e+00> : vector<32xf32>
    %278 = vector.multi_reduction <add>, %277, %cst_140 [1] : vector<32x32xf32> to vector<32xf32>
    %279 = vector.shape_cast %278 : vector<32xf32> to vector<32x1xf32>
    %cst_141 = arith.constant 3.200000e+01 : f32
    %280 = vector.broadcast %cst_141 : f32 to vector<32x1xf32>
    %281 = arith.divf %279, %280 : vector<32x1xf32>
    %cst_142 = arith.constant 9.99999974E-6 : f32
    %282 = vector.broadcast %cst_142 : f32 to vector<32x1xf32>
    %283 = arith.addf %281, %282 : vector<32x1xf32>
    %284 = math.rsqrt %283 : vector<32x1xf32>
    %285 = vector.broadcast %284 : vector<32x1xf32> to vector<32x32xf32>
    %286 = arith.mulf %276, %285 : vector<32x32xf32>
    %287 = vector.broadcast %268 : vector<1x32xf32> to vector<32x32xf32>
    %288 = arith.mulf %286, %287 : vector<32x32xf32>
    %289 = vector.broadcast %270 : vector<1x32xf32> to vector<32x32xf32>
    %290 = arith.addf %288, %289 : vector<32x32xf32>
    %c0_143 = arith.constant 0 : index
    %c1_144 = arith.constant 1 : index
    %c0_145 = arith.constant 0 : index
    %c0_146 = arith.constant 0 : index
    %291 = vector.load %arg12[%c0_143, %c1_144, %c0_145, %c0_146] : memref<2x2x32x64xf32, #tpu.memory_space<vmem>>, vector<1x1x32x64xf32>
    %292 = vector.shape_cast %291 : vector<1x1x32x64xf32> to vector<32x64xf32>
    %cst_147 = arith.constant dense<0.000000e+00> : vector<32x64xf32>
    %293 = tpu.matmul %290, %292, %cst_147 {dimension_numbers = #tpu.dot_dimension_numbers<[1], [0], [0], [1], [0, 0, 1, 1], [], []>} : vector<32x32xf32>, vector<32x64xf32>, vector<32x64xf32> -> vector<32x64xf32>
    %c0_148 = arith.constant 0 : index
    %c1_149 = arith.constant 1 : index
    %c0_150 = arith.constant 0 : index
    %c0_151 = arith.constant 0 : index
    %294 = vector.load %arg13[%c0_148, %c1_149, %c0_150, %c0_151] : memref<2x2x1x64xf32, #tpu.memory_space<vmem>>, vector<1x1x1x64xf32>
    %295 = vector.shape_cast %294 : vector<1x1x1x64xf32> to vector<1x64xf32>
    %296 = vector.broadcast %295 : vector<1x64xf32> to vector<32x64xf32>
    %297 = arith.addf %293, %296 : vector<32x64xf32>
    %cst_152 = arith.constant 0.000000e+00 : f32
    %298 = vector.broadcast %cst_152 : f32 to vector<32x64xf32>
    %299 = arith.cmpf ogt, %297, %298 : vector<32x64xf32>
    %cst_153 = arith.constant 0.00999999977 : f32
    %300 = vector.broadcast %cst_153 : f32 to vector<32x64xf32>
    %301 = arith.mulf %300, %297 : vector<32x64xf32>
    %302 = arith.select %299, %297, %301 : vector<32x64xi1>, vector<32x64xf32>
    %c0_154 = arith.constant 0 : index
    %c1_155 = arith.constant 1 : index
    %c0_156 = arith.constant 0 : index
    %c0_157 = arith.constant 0 : index
    %303 = vector.load %arg14[%c0_154, %c1_155, %c0_156, %c0_157] : memref<2x2x64x32xf32, #tpu.memory_space<vmem>>, vector<1x1x64x32xf32>
    %304 = vector.shape_cast %303 : vector<1x1x64x32xf32> to vector<64x32xf32>
    %cst_158 = arith.constant dense<0.000000e+00> : vector<32x32xf32>
    %305 = tpu.matmul %302, %304, %cst_158 {dimension_numbers = #tpu.dot_dimension_numbers<[1], [0], [0], [1], [0, 0, 1, 1], [], []>} : vector<32x64xf32>, vector<64x32xf32>, vector<32x32xf32> -> vector<32x32xf32>
    %c0_159 = arith.constant 0 : index
    %c1_160 = arith.constant 1 : index
    %c0_161 = arith.constant 0 : index
    %c0_162 = arith.constant 0 : index
    %306 = vector.load %arg15[%c0_159, %c1_160, %c0_161, %c0_162] : memref<2x2x1x32xf32, #tpu.memory_space<vmem>>, vector<1x1x1x32xf32>
    %307 = vector.shape_cast %306 : vector<1x1x1x32xf32> to vector<1x32xf32>
    %308 = vector.broadcast %307 : vector<1x32xf32> to vector<32x32xf32>
    %309 = arith.addf %305, %308 : vector<32x32xf32>
    %310 = arith.addf %290, %309 : vector<32x32xf32>
    %c0_163 = arith.constant 0 : index
    %c1_164 = arith.constant 1 : index
    %c0_165 = arith.constant 0 : index
    %c0_166 = arith.constant 0 : index
    %311 = vector.load %arg10[%c0_163, %c1_164, %c0_165, %c0_166] : memref<2x2x1x32xf32, #tpu.memory_space<vmem>>, vector<1x1x1x32xf32>
    %312 = vector.shape_cast %311 : vector<1x1x1x32xf32> to vector<1x32xf32>
    %c0_167 = arith.constant 0 : index
    %c1_168 = arith.constant 1 : index
    %c0_169 = arith.constant 0 : index
    %c0_170 = arith.constant 0 : index
    %313 = vector.load %arg11[%c0_167, %c1_168, %c0_169, %c0_170] : memref<2x2x1x32xf32, #tpu.memory_space<vmem>>, vector<1x1x1x32xf32>
    %314 = vector.shape_cast %313 : vector<1x1x1x32xf32> to vector<1x32xf32>
    %cst_171 = arith.constant dense<0.000000e+00> : vector<32xf32>
    %315 = vector.multi_reduction <add>, %310, %cst_171 [1] : vector<32x32xf32> to vector<32xf32>
    %316 = vector.shape_cast %315 : vector<32xf32> to vector<32x1xf32>
    %cst_172 = arith.constant 3.200000e+01 : f32
    %317 = vector.broadcast %cst_172 : f32 to vector<32x1xf32>
    %318 = arith.divf %316, %317 : vector<32x1xf32>
    %319 = vector.broadcast %318 : vector<32x1xf32> to vector<32x32xf32>
    %320 = arith.subf %310, %319 : vector<32x32xf32>
    %321 = arith.mulf %320, %320 : vector<32x32xf32>
    %cst_173 = arith.constant dense<0.000000e+00> : vector<32xf32>
    %322 = vector.multi_reduction <add>, %321, %cst_173 [1] : vector<32x32xf32> to vector<32xf32>
    %323 = vector.shape_cast %322 : vector<32xf32> to vector<32x1xf32>
    %cst_174 = arith.constant 3.200000e+01 : f32
    %324 = vector.broadcast %cst_174 : f32 to vector<32x1xf32>
    %325 = arith.divf %323, %324 : vector<32x1xf32>
    %cst_175 = arith.constant 9.99999974E-6 : f32
    %326 = vector.broadcast %cst_175 : f32 to vector<32x1xf32>
    %327 = arith.addf %325, %326 : vector<32x1xf32>
    %328 = math.rsqrt %327 : vector<32x1xf32>
    %329 = vector.broadcast %328 : vector<32x1xf32> to vector<32x32xf32>
    %330 = arith.mulf %320, %329 : vector<32x32xf32>
    %331 = vector.broadcast %312 : vector<1x32xf32> to vector<32x32xf32>
    %332 = arith.mulf %330, %331 : vector<32x32xf32>
    %333 = vector.broadcast %314 : vector<1x32xf32> to vector<32x32xf32>
    %334 = arith.addf %332, %333 : vector<32x32xf32>
    %335 = vector.extract_strided_slice %13 {offsets = [32, 0], sizes = [32, 32], strides = [1, 1]} : vector<64x32xf32> to vector<32x32xf32>
    %c1_176 = arith.constant 1 : index
    %c0_177 = arith.constant 0 : index
    %c0_178 = arith.constant 0 : index
    %c0_179 = arith.constant 0 : index
    %336 = vector.load %arg4[%c1_176, %c0_177, %c0_178, %c0_179] : memref<2x2x32x96xf32, #tpu.memory_space<vmem>>, vector<1x1x32x96xf32>
    %337 = vector.shape_cast %336 : vector<1x1x32x96xf32> to vector<32x96xf32>
    %cst_180 = arith.constant dense<0.000000e+00> : vector<32x96xf32>
    %338 = tpu.matmul %335, %337, %cst_180 {dimension_numbers = #tpu.dot_dimension_numbers<[1], [0], [0], [1], [0, 0, 1, 1], [], []>} : vector<32x32xf32>, vector<32x96xf32>, vector<32x96xf32> -> vector<32x96xf32>
    %c1_181 = arith.constant 1 : index
    %c0_182 = arith.constant 0 : index
    %c0_183 = arith.constant 0 : index
    %c0_184 = arith.constant 0 : index
    %339 = vector.load %arg5[%c1_181, %c0_182, %c0_183, %c0_184] : memref<2x2x1x96xf32, #tpu.memory_space<vmem>>, vector<1x1x1x96xf32>
    %340 = vector.shape_cast %339 : vector<1x1x1x96xf32> to vector<1x96xf32>
    %341 = vector.broadcast %340 : vector<1x96xf32> to vector<32x96xf32>
    %342 = arith.addf %338, %341 : vector<32x96xf32>
    %343 = vector.extract_strided_slice %342 {offsets = [0, 0], sizes = [32, 32], strides = [1, 1]} : vector<32x96xf32> to vector<32x32xf32>
    %344 = vector.shape_cast %343 : vector<32x32xf32> to vector<2x16x32xf32>
    %345 = vector.extract_strided_slice %342 {offsets = [0, 32], sizes = [32, 32], strides = [1, 1]} : vector<32x96xf32> to vector<32x32xf32>
    %346 = vector.shape_cast %345 : vector<32x32xf32> to vector<2x16x32xf32>
    %347 = vector.extract_strided_slice %342 {offsets = [0, 64], sizes = [32, 32], strides = [1, 1]} : vector<32x96xf32> to vector<32x32xf32>
    %348 = vector.shape_cast %347 : vector<32x32xf32> to vector<2x16x32xf32>
    %349 = tpu.transpose %346, [0, 2, 1] : vector<2x16x32xf32> -> vector<2x32x16xf32>
    %350 = vector.extract_strided_slice %344 {offsets = [0, 0, 0], sizes = [2, 16, 8], strides = [1, 1, 1]} : vector<2x16x32xf32> to vector<2x16x8xf32>
    %351 = vector.extract_strided_slice %349 {offsets = [0, 0, 0], sizes = [2, 8, 16], strides = [1, 1, 1]} : vector<2x32x16xf32> to vector<2x8x16xf32>
    %352 = vector.extract_strided_slice %348 {offsets = [0, 0, 0], sizes = [2, 16, 8], strides = [1, 1, 1]} : vector<2x16x32xf32> to vector<2x16x8xf32>
    %cst_185 = arith.constant dense<0.000000e+00> : vector<2x16x16xf32>
    %353 = tpu.matmul %350, %351, %cst_185 {dimension_numbers = #tpu.dot_dimension_numbers<[2], [1], [1], [2], [0, 0, 0, 1, 1, 2], [0], [0]>} : vector<2x16x8xf32>, vector<2x8x16xf32>, vector<2x16x16xf32> -> vector<2x16x16xf32>
    %cst_186 = arith.constant 0.353553385 : f32
    %354 = vector.broadcast %cst_186 : f32 to vector<2x16x16xf32>
    %355 = arith.mulf %353, %354 : vector<2x16x16xf32>
    %cst_187 = arith.constant dense<0xFF800000> : vector<2x16xf32>
    %356 = vector.multi_reduction <maximumf>, %355, %cst_187 [2] : vector<2x16x16xf32> to vector<2x16xf32>
    %357 = vector.shape_cast %356 : vector<2x16xf32> to vector<2x16x1xf32>
    %358 = vector.broadcast %357 : vector<2x16x1xf32> to vector<2x16x16xf32>
    %359 = arith.subf %355, %358 : vector<2x16x16xf32>
    %360 = math.exp %359 : vector<2x16x16xf32>
    %cst_188 = arith.constant dense<0.000000e+00> : vector<2x16xf32>
    %361 = vector.multi_reduction <add>, %360, %cst_188 [2] : vector<2x16x16xf32> to vector<2x16xf32>
    %362 = vector.shape_cast %361 : vector<2x16xf32> to vector<2x16x1xf32>
    %363 = tpu.reciprocal %362 {approx = true} : vector<2x16x1xf32> -> vector<2x16x1xf32>
    %364 = vector.broadcast %363 : vector<2x16x1xf32> to vector<2x16x16xf32>
    %365 = arith.mulf %360, %364 : vector<2x16x16xf32>
    %cst_189 = arith.constant dense<0.000000e+00> : vector<2x16x8xf32>
    %366 = tpu.matmul %365, %352, %cst_189 {dimension_numbers = #tpu.dot_dimension_numbers<[2], [1], [1], [2], [0, 0, 0, 1, 1, 2], [0], [0]>} : vector<2x16x16xf32>, vector<2x16x8xf32>, vector<2x16x8xf32> -> vector<2x16x8xf32>
    %367 = vector.extract_strided_slice %344 {offsets = [0, 0, 8], sizes = [2, 16, 8], strides = [1, 1, 1]} : vector<2x16x32xf32> to vector<2x16x8xf32>
    %368 = vector.extract_strided_slice %349 {offsets = [0, 8, 0], sizes = [2, 8, 16], strides = [1, 1, 1]} : vector<2x32x16xf32> to vector<2x8x16xf32>
    %369 = vector.extract_strided_slice %348 {offsets = [0, 0, 8], sizes = [2, 16, 8], strides = [1, 1, 1]} : vector<2x16x32xf32> to vector<2x16x8xf32>
    %cst_190 = arith.constant dense<0.000000e+00> : vector<2x16x16xf32>
    %370 = tpu.matmul %367, %368, %cst_190 {dimension_numbers = #tpu.dot_dimension_numbers<[2], [1], [1], [2], [0, 0, 0, 1, 1, 2], [0], [0]>} : vector<2x16x8xf32>, vector<2x8x16xf32>, vector<2x16x16xf32> -> vector<2x16x16xf32>
    %cst_191 = arith.constant 0.353553385 : f32
    %371 = vector.broadcast %cst_191 : f32 to vector<2x16x16xf32>
    %372 = arith.mulf %370, %371 : vector<2x16x16xf32>
    %cst_192 = arith.constant dense<0xFF800000> : vector<2x16xf32>
    %373 = vector.multi_reduction <maximumf>, %372, %cst_192 [2] : vector<2x16x16xf32> to vector<2x16xf32>
    %374 = vector.shape_cast %373 : vector<2x16xf32> to vector<2x16x1xf32>
    %375 = vector.broadcast %374 : vector<2x16x1xf32> to vector<2x16x16xf32>
    %376 = arith.subf %372, %375 : vector<2x16x16xf32>
    %377 = math.exp %376 : vector<2x16x16xf32>
    %cst_193 = arith.constant dense<0.000000e+00> : vector<2x16xf32>
    %378 = vector.multi_reduction <add>, %377, %cst_193 [2] : vector<2x16x16xf32> to vector<2x16xf32>
    %379 = vector.shape_cast %378 : vector<2x16xf32> to vector<2x16x1xf32>
    %380 = tpu.reciprocal %379 {approx = true} : vector<2x16x1xf32> -> vector<2x16x1xf32>
    %381 = vector.broadcast %380 : vector<2x16x1xf32> to vector<2x16x16xf32>
    %382 = arith.mulf %377, %381 : vector<2x16x16xf32>
    %cst_194 = arith.constant dense<0.000000e+00> : vector<2x16x8xf32>
    %383 = tpu.matmul %382, %369, %cst_194 {dimension_numbers = #tpu.dot_dimension_numbers<[2], [1], [1], [2], [0, 0, 0, 1, 1, 2], [0], [0]>} : vector<2x16x16xf32>, vector<2x16x8xf32>, vector<2x16x8xf32> -> vector<2x16x8xf32>
    %384 = vector.extract_strided_slice %344 {offsets = [0, 0, 16], sizes = [2, 16, 8], strides = [1, 1, 1]} : vector<2x16x32xf32> to vector<2x16x8xf32>
    %385 = vector.extract_strided_slice %349 {offsets = [0, 16, 0], sizes = [2, 8, 16], strides = [1, 1, 1]} : vector<2x32x16xf32> to vector<2x8x16xf32>
    %386 = vector.extract_strided_slice %348 {offsets = [0, 0, 16], sizes = [2, 16, 8], strides = [1, 1, 1]} : vector<2x16x32xf32> to vector<2x16x8xf32>
    %cst_195 = arith.constant dense<0.000000e+00> : vector<2x16x16xf32>
    %387 = tpu.matmul %384, %385, %cst_195 {dimension_numbers = #tpu.dot_dimension_numbers<[2], [1], [1], [2], [0, 0, 0, 1, 1, 2], [0], [0]>} : vector<2x16x8xf32>, vector<2x8x16xf32>, vector<2x16x16xf32> -> vector<2x16x16xf32>
    %cst_196 = arith.constant 0.353553385 : f32
    %388 = vector.broadcast %cst_196 : f32 to vector<2x16x16xf32>
    %389 = arith.mulf %387, %388 : vector<2x16x16xf32>
    %cst_197 = arith.constant dense<0xFF800000> : vector<2x16xf32>
    %390 = vector.multi_reduction <maximumf>, %389, %cst_197 [2] : vector<2x16x16xf32> to vector<2x16xf32>
    %391 = vector.shape_cast %390 : vector<2x16xf32> to vector<2x16x1xf32>
    %392 = vector.broadcast %391 : vector<2x16x1xf32> to vector<2x16x16xf32>
    %393 = arith.subf %389, %392 : vector<2x16x16xf32>
    %394 = math.exp %393 : vector<2x16x16xf32>
    %cst_198 = arith.constant dense<0.000000e+00> : vector<2x16xf32>
    %395 = vector.multi_reduction <add>, %394, %cst_198 [2] : vector<2x16x16xf32> to vector<2x16xf32>
    %396 = vector.shape_cast %395 : vector<2x16xf32> to vector<2x16x1xf32>
    %397 = tpu.reciprocal %396 {approx = true} : vector<2x16x1xf32> -> vector<2x16x1xf32>
    %398 = vector.broadcast %397 : vector<2x16x1xf32> to vector<2x16x16xf32>
    %399 = arith.mulf %394, %398 : vector<2x16x16xf32>
    %cst_199 = arith.constant dense<0.000000e+00> : vector<2x16x8xf32>
    %400 = tpu.matmul %399, %386, %cst_199 {dimension_numbers = #tpu.dot_dimension_numbers<[2], [1], [1], [2], [0, 0, 0, 1, 1, 2], [0], [0]>} : vector<2x16x16xf32>, vector<2x16x8xf32>, vector<2x16x8xf32> -> vector<2x16x8xf32>
    %401 = vector.extract_strided_slice %344 {offsets = [0, 0, 24], sizes = [2, 16, 8], strides = [1, 1, 1]} : vector<2x16x32xf32> to vector<2x16x8xf32>
    %402 = vector.extract_strided_slice %349 {offsets = [0, 24, 0], sizes = [2, 8, 16], strides = [1, 1, 1]} : vector<2x32x16xf32> to vector<2x8x16xf32>
    %403 = vector.extract_strided_slice %348 {offsets = [0, 0, 24], sizes = [2, 16, 8], strides = [1, 1, 1]} : vector<2x16x32xf32> to vector<2x16x8xf32>
    %cst_200 = arith.constant dense<0.000000e+00> : vector<2x16x16xf32>
    %404 = tpu.matmul %401, %402, %cst_200 {dimension_numbers = #tpu.dot_dimension_numbers<[2], [1], [1], [2], [0, 0, 0, 1, 1, 2], [0], [0]>} : vector<2x16x8xf32>, vector<2x8x16xf32>, vector<2x16x16xf32> -> vector<2x16x16xf32>
    %cst_201 = arith.constant 0.353553385 : f32
    %405 = vector.broadcast %cst_201 : f32 to vector<2x16x16xf32>
    %406 = arith.mulf %404, %405 : vector<2x16x16xf32>
    %cst_202 = arith.constant dense<0xFF800000> : vector<2x16xf32>
    %407 = vector.multi_reduction <maximumf>, %406, %cst_202 [2] : vector<2x16x16xf32> to vector<2x16xf32>
    %408 = vector.shape_cast %407 : vector<2x16xf32> to vector<2x16x1xf32>
    %409 = vector.broadcast %408 : vector<2x16x1xf32> to vector<2x16x16xf32>
    %410 = arith.subf %406, %409 : vector<2x16x16xf32>
    %411 = math.exp %410 : vector<2x16x16xf32>
    %cst_203 = arith.constant dense<0.000000e+00> : vector<2x16xf32>
    %412 = vector.multi_reduction <add>, %411, %cst_203 [2] : vector<2x16x16xf32> to vector<2x16xf32>
    %413 = vector.shape_cast %412 : vector<2x16xf32> to vector<2x16x1xf32>
    %414 = tpu.reciprocal %413 {approx = true} : vector<2x16x1xf32> -> vector<2x16x1xf32>
    %415 = vector.broadcast %414 : vector<2x16x1xf32> to vector<2x16x16xf32>
    %416 = arith.mulf %411, %415 : vector<2x16x16xf32>
    %cst_204 = arith.constant dense<0.000000e+00> : vector<2x16x8xf32>
    %417 = tpu.matmul %416, %403, %cst_204 {dimension_numbers = #tpu.dot_dimension_numbers<[2], [1], [1], [2], [0, 0, 0, 1, 1, 2], [0], [0]>} : vector<2x16x16xf32>, vector<2x16x8xf32>, vector<2x16x8xf32> -> vector<2x16x8xf32>
    %418 = tpu.concatenate %366, %383, %400, %417 in 2 : vector<2x16x8xf32>, vector<2x16x8xf32>, vector<2x16x8xf32>, vector<2x16x8xf32> -> vector<2x16x32xf32>
    %419 = vector.shape_cast %418 : vector<2x16x32xf32> to vector<32x32xf32>
    %c1_205 = arith.constant 1 : index
    %c0_206 = arith.constant 0 : index
    %c0_207 = arith.constant 0 : index
    %c0_208 = arith.constant 0 : index
    %420 = vector.load %arg6[%c1_205, %c0_206, %c0_207, %c0_208] : memref<2x2x32x32xf32, #tpu.memory_space<vmem>>, vector<1x1x32x32xf32>
    %421 = vector.shape_cast %420 : vector<1x1x32x32xf32> to vector<32x32xf32>
    %cst_209 = arith.constant dense<0.000000e+00> : vector<32x32xf32>
    %422 = tpu.matmul %419, %421, %cst_209 {dimension_numbers = #tpu.dot_dimension_numbers<[1], [0], [0], [1], [0, 0, 1, 1], [], []>} : vector<32x32xf32>, vector<32x32xf32>, vector<32x32xf32> -> vector<32x32xf32>
    %c1_210 = arith.constant 1 : index
    %c0_211 = arith.constant 0 : index
    %c0_212 = arith.constant 0 : index
    %c0_213 = arith.constant 0 : index
    %423 = vector.load %arg7[%c1_210, %c0_211, %c0_212, %c0_213] : memref<2x2x1x32xf32, #tpu.memory_space<vmem>>, vector<1x1x1x32xf32>
    %424 = vector.shape_cast %423 : vector<1x1x1x32xf32> to vector<1x32xf32>
    %425 = vector.broadcast %424 : vector<1x32xf32> to vector<32x32xf32>
    %426 = arith.addf %422, %425 : vector<32x32xf32>
    %427 = arith.addf %335, %426 : vector<32x32xf32>
    %c1_214 = arith.constant 1 : index
    %c0_215 = arith.constant 0 : index
    %c0_216 = arith.constant 0 : index
    %c0_217 = arith.constant 0 : index
    %428 = vector.load %arg8[%c1_214, %c0_215, %c0_216, %c0_217] : memref<2x2x1x32xf32, #tpu.memory_space<vmem>>, vector<1x1x1x32xf32>
    %429 = vector.shape_cast %428 : vector<1x1x1x32xf32> to vector<1x32xf32>
    %c1_218 = arith.constant 1 : index
    %c0_219 = arith.constant 0 : index
    %c0_220 = arith.constant 0 : index
    %c0_221 = arith.constant 0 : index
    %430 = vector.load %arg9[%c1_218, %c0_219, %c0_220, %c0_221] : memref<2x2x1x32xf32, #tpu.memory_space<vmem>>, vector<1x1x1x32xf32>
    %431 = vector.shape_cast %430 : vector<1x1x1x32xf32> to vector<1x32xf32>
    %cst_222 = arith.constant dense<0.000000e+00> : vector<32xf32>
    %432 = vector.multi_reduction <add>, %427, %cst_222 [1] : vector<32x32xf32> to vector<32xf32>
    %433 = vector.shape_cast %432 : vector<32xf32> to vector<32x1xf32>
    %cst_223 = arith.constant 3.200000e+01 : f32
    %434 = vector.broadcast %cst_223 : f32 to vector<32x1xf32>
    %435 = arith.divf %433, %434 : vector<32x1xf32>
    %436 = vector.broadcast %435 : vector<32x1xf32> to vector<32x32xf32>
    %437 = arith.subf %427, %436 : vector<32x32xf32>
    %438 = arith.mulf %437, %437 : vector<32x32xf32>
    %cst_224 = arith.constant dense<0.000000e+00> : vector<32xf32>
    %439 = vector.multi_reduction <add>, %438, %cst_224 [1] : vector<32x32xf32> to vector<32xf32>
    %440 = vector.shape_cast %439 : vector<32xf32> to vector<32x1xf32>
    %cst_225 = arith.constant 3.200000e+01 : f32
    %441 = vector.broadcast %cst_225 : f32 to vector<32x1xf32>
    %442 = arith.divf %440, %441 : vector<32x1xf32>
    %cst_226 = arith.constant 9.99999974E-6 : f32
    %443 = vector.broadcast %cst_226 : f32 to vector<32x1xf32>
    %444 = arith.addf %442, %443 : vector<32x1xf32>
    %445 = math.rsqrt %444 : vector<32x1xf32>
    %446 = vector.broadcast %445 : vector<32x1xf32> to vector<32x32xf32>
    %447 = arith.mulf %437, %446 : vector<32x32xf32>
    %448 = vector.broadcast %429 : vector<1x32xf32> to vector<32x32xf32>
    %449 = arith.mulf %447, %448 : vector<32x32xf32>
    %450 = vector.broadcast %431 : vector<1x32xf32> to vector<32x32xf32>
    %451 = arith.addf %449, %450 : vector<32x32xf32>
    %c1_227 = arith.constant 1 : index
    %c0_228 = arith.constant 0 : index
    %c0_229 = arith.constant 0 : index
    %c0_230 = arith.constant 0 : index
    %452 = vector.load %arg12[%c1_227, %c0_228, %c0_229, %c0_230] : memref<2x2x32x64xf32, #tpu.memory_space<vmem>>, vector<1x1x32x64xf32>
    %453 = vector.shape_cast %452 : vector<1x1x32x64xf32> to vector<32x64xf32>
    %cst_231 = arith.constant dense<0.000000e+00> : vector<32x64xf32>
    %454 = tpu.matmul %451, %453, %cst_231 {dimension_numbers = #tpu.dot_dimension_numbers<[1], [0], [0], [1], [0, 0, 1, 1], [], []>} : vector<32x32xf32>, vector<32x64xf32>, vector<32x64xf32> -> vector<32x64xf32>
    %c1_232 = arith.constant 1 : index
    %c0_233 = arith.constant 0 : index
    %c0_234 = arith.constant 0 : index
    %c0_235 = arith.constant 0 : index
    %455 = vector.load %arg13[%c1_232, %c0_233, %c0_234, %c0_235] : memref<2x2x1x64xf32, #tpu.memory_space<vmem>>, vector<1x1x1x64xf32>
    %456 = vector.shape_cast %455 : vector<1x1x1x64xf32> to vector<1x64xf32>
    %457 = vector.broadcast %456 : vector<1x64xf32> to vector<32x64xf32>
    %458 = arith.addf %454, %457 : vector<32x64xf32>
    %cst_236 = arith.constant 0.000000e+00 : f32
    %459 = vector.broadcast %cst_236 : f32 to vector<32x64xf32>
    %460 = arith.cmpf ogt, %458, %459 : vector<32x64xf32>
    %cst_237 = arith.constant 0.00999999977 : f32
    %461 = vector.broadcast %cst_237 : f32 to vector<32x64xf32>
    %462 = arith.mulf %461, %458 : vector<32x64xf32>
    %463 = arith.select %460, %458, %462 : vector<32x64xi1>, vector<32x64xf32>
    %c1_238 = arith.constant 1 : index
    %c0_239 = arith.constant 0 : index
    %c0_240 = arith.constant 0 : index
    %c0_241 = arith.constant 0 : index
    %464 = vector.load %arg14[%c1_238, %c0_239, %c0_240, %c0_241] : memref<2x2x64x32xf32, #tpu.memory_space<vmem>>, vector<1x1x64x32xf32>
    %465 = vector.shape_cast %464 : vector<1x1x64x32xf32> to vector<64x32xf32>
    %cst_242 = arith.constant dense<0.000000e+00> : vector<32x32xf32>
    %466 = tpu.matmul %463, %465, %cst_242 {dimension_numbers = #tpu.dot_dimension_numbers<[1], [0], [0], [1], [0, 0, 1, 1], [], []>} : vector<32x64xf32>, vector<64x32xf32>, vector<32x32xf32> -> vector<32x32xf32>
    %c1_243 = arith.constant 1 : index
    %c0_244 = arith.constant 0 : index
    %c0_245 = arith.constant 0 : index
    %c0_246 = arith.constant 0 : index
    %467 = vector.load %arg15[%c1_243, %c0_244, %c0_245, %c0_246] : memref<2x2x1x32xf32, #tpu.memory_space<vmem>>, vector<1x1x1x32xf32>
    %468 = vector.shape_cast %467 : vector<1x1x1x32xf32> to vector<1x32xf32>
    %469 = vector.broadcast %468 : vector<1x32xf32> to vector<32x32xf32>
    %470 = arith.addf %466, %469 : vector<32x32xf32>
    %471 = arith.addf %451, %470 : vector<32x32xf32>
    %c1_247 = arith.constant 1 : index
    %c0_248 = arith.constant 0 : index
    %c0_249 = arith.constant 0 : index
    %c0_250 = arith.constant 0 : index
    %472 = vector.load %arg10[%c1_247, %c0_248, %c0_249, %c0_250] : memref<2x2x1x32xf32, #tpu.memory_space<vmem>>, vector<1x1x1x32xf32>
    %473 = vector.shape_cast %472 : vector<1x1x1x32xf32> to vector<1x32xf32>
    %c1_251 = arith.constant 1 : index
    %c0_252 = arith.constant 0 : index
    %c0_253 = arith.constant 0 : index
    %c0_254 = arith.constant 0 : index
    %474 = vector.load %arg11[%c1_251, %c0_252, %c0_253, %c0_254] : memref<2x2x1x32xf32, #tpu.memory_space<vmem>>, vector<1x1x1x32xf32>
    %475 = vector.shape_cast %474 : vector<1x1x1x32xf32> to vector<1x32xf32>
    %cst_255 = arith.constant dense<0.000000e+00> : vector<32xf32>
    %476 = vector.multi_reduction <add>, %471, %cst_255 [1] : vector<32x32xf32> to vector<32xf32>
    %477 = vector.shape_cast %476 : vector<32xf32> to vector<32x1xf32>
    %cst_256 = arith.constant 3.200000e+01 : f32
    %478 = vector.broadcast %cst_256 : f32 to vector<32x1xf32>
    %479 = arith.divf %477, %478 : vector<32x1xf32>
    %480 = vector.broadcast %479 : vector<32x1xf32> to vector<32x32xf32>
    %481 = arith.subf %471, %480 : vector<32x32xf32>
    %482 = arith.mulf %481, %481 : vector<32x32xf32>
    %cst_257 = arith.constant dense<0.000000e+00> : vector<32xf32>
    %483 = vector.multi_reduction <add>, %482, %cst_257 [1] : vector<32x32xf32> to vector<32xf32>
    %484 = vector.shape_cast %483 : vector<32xf32> to vector<32x1xf32>
    %cst_258 = arith.constant 3.200000e+01 : f32
    %485 = vector.broadcast %cst_258 : f32 to vector<32x1xf32>
    %486 = arith.divf %484, %485 : vector<32x1xf32>
    %cst_259 = arith.constant 9.99999974E-6 : f32
    %487 = vector.broadcast %cst_259 : f32 to vector<32x1xf32>
    %488 = arith.addf %486, %487 : vector<32x1xf32>
    %489 = math.rsqrt %488 : vector<32x1xf32>
    %490 = vector.broadcast %489 : vector<32x1xf32> to vector<32x32xf32>
    %491 = arith.mulf %481, %490 : vector<32x32xf32>
    %492 = vector.broadcast %473 : vector<1x32xf32> to vector<32x32xf32>
    %493 = arith.mulf %491, %492 : vector<32x32xf32>
    %494 = vector.broadcast %475 : vector<1x32xf32> to vector<32x32xf32>
    %495 = arith.addf %493, %494 : vector<32x32xf32>
    %c1_260 = arith.constant 1 : index
    %c1_261 = arith.constant 1 : index
    %c0_262 = arith.constant 0 : index
    %c0_263 = arith.constant 0 : index
    %496 = vector.load %arg4[%c1_260, %c1_261, %c0_262, %c0_263] : memref<2x2x32x96xf32, #tpu.memory_space<vmem>>, vector<1x1x32x96xf32>
    %497 = vector.shape_cast %496 : vector<1x1x32x96xf32> to vector<32x96xf32>
    %cst_264 = arith.constant dense<0.000000e+00> : vector<32x96xf32>
    %498 = tpu.matmul %495, %497, %cst_264 {dimension_numbers = #tpu.dot_dimension_numbers<[1], [0], [0], [1], [0, 0, 1, 1], [], []>} : vector<32x32xf32>, vector<32x96xf32>, vector<32x96xf32> -> vector<32x96xf32>
    %c1_265 = arith.constant 1 : index
    %c1_266 = arith.constant 1 : index
    %c0_267 = arith.constant 0 : index
    %c0_268 = arith.constant 0 : index
    %499 = vector.load %arg5[%c1_265, %c1_266, %c0_267, %c0_268] : memref<2x2x1x96xf32, #tpu.memory_space<vmem>>, vector<1x1x1x96xf32>
    %500 = vector.shape_cast %499 : vector<1x1x1x96xf32> to vector<1x96xf32>
    %501 = vector.broadcast %500 : vector<1x96xf32> to vector<32x96xf32>
    %502 = arith.addf %498, %501 : vector<32x96xf32>
    %503 = vector.extract_strided_slice %502 {offsets = [0, 0], sizes = [32, 32], strides = [1, 1]} : vector<32x96xf32> to vector<32x32xf32>
    %504 = vector.shape_cast %503 : vector<32x32xf32> to vector<2x16x32xf32>
    %505 = vector.extract_strided_slice %502 {offsets = [0, 32], sizes = [32, 32], strides = [1, 1]} : vector<32x96xf32> to vector<32x32xf32>
    %506 = vector.shape_cast %505 : vector<32x32xf32> to vector<2x16x32xf32>
    %507 = vector.extract_strided_slice %502 {offsets = [0, 64], sizes = [32, 32], strides = [1, 1]} : vector<32x96xf32> to vector<32x32xf32>
    %508 = vector.shape_cast %507 : vector<32x32xf32> to vector<2x16x32xf32>
    %509 = tpu.transpose %506, [0, 2, 1] : vector<2x16x32xf32> -> vector<2x32x16xf32>
    %510 = vector.extract_strided_slice %504 {offsets = [0, 0, 0], sizes = [2, 16, 8], strides = [1, 1, 1]} : vector<2x16x32xf32> to vector<2x16x8xf32>
    %511 = vector.extract_strided_slice %509 {offsets = [0, 0, 0], sizes = [2, 8, 16], strides = [1, 1, 1]} : vector<2x32x16xf32> to vector<2x8x16xf32>
    %512 = vector.extract_strided_slice %508 {offsets = [0, 0, 0], sizes = [2, 16, 8], strides = [1, 1, 1]} : vector<2x16x32xf32> to vector<2x16x8xf32>
    %cst_269 = arith.constant dense<0.000000e+00> : vector<2x16x16xf32>
    %513 = tpu.matmul %510, %511, %cst_269 {dimension_numbers = #tpu.dot_dimension_numbers<[2], [1], [1], [2], [0, 0, 0, 1, 1, 2], [0], [0]>} : vector<2x16x8xf32>, vector<2x8x16xf32>, vector<2x16x16xf32> -> vector<2x16x16xf32>
    %cst_270 = arith.constant 0.353553385 : f32
    %514 = vector.broadcast %cst_270 : f32 to vector<2x16x16xf32>
    %515 = arith.mulf %513, %514 : vector<2x16x16xf32>
    %cst_271 = arith.constant dense<0xFF800000> : vector<2x16xf32>
    %516 = vector.multi_reduction <maximumf>, %515, %cst_271 [2] : vector<2x16x16xf32> to vector<2x16xf32>
    %517 = vector.shape_cast %516 : vector<2x16xf32> to vector<2x16x1xf32>
    %518 = vector.broadcast %517 : vector<2x16x1xf32> to vector<2x16x16xf32>
    %519 = arith.subf %515, %518 : vector<2x16x16xf32>
    %520 = math.exp %519 : vector<2x16x16xf32>
    %cst_272 = arith.constant dense<0.000000e+00> : vector<2x16xf32>
    %521 = vector.multi_reduction <add>, %520, %cst_272 [2] : vector<2x16x16xf32> to vector<2x16xf32>
    %522 = vector.shape_cast %521 : vector<2x16xf32> to vector<2x16x1xf32>
    %523 = tpu.reciprocal %522 {approx = true} : vector<2x16x1xf32> -> vector<2x16x1xf32>
    %524 = vector.broadcast %523 : vector<2x16x1xf32> to vector<2x16x16xf32>
    %525 = arith.mulf %520, %524 : vector<2x16x16xf32>
    %cst_273 = arith.constant dense<0.000000e+00> : vector<2x16x8xf32>
    %526 = tpu.matmul %525, %512, %cst_273 {dimension_numbers = #tpu.dot_dimension_numbers<[2], [1], [1], [2], [0, 0, 0, 1, 1, 2], [0], [0]>} : vector<2x16x16xf32>, vector<2x16x8xf32>, vector<2x16x8xf32> -> vector<2x16x8xf32>
    %527 = vector.extract_strided_slice %504 {offsets = [0, 0, 8], sizes = [2, 16, 8], strides = [1, 1, 1]} : vector<2x16x32xf32> to vector<2x16x8xf32>
    %528 = vector.extract_strided_slice %509 {offsets = [0, 8, 0], sizes = [2, 8, 16], strides = [1, 1, 1]} : vector<2x32x16xf32> to vector<2x8x16xf32>
    %529 = vector.extract_strided_slice %508 {offsets = [0, 0, 8], sizes = [2, 16, 8], strides = [1, 1, 1]} : vector<2x16x32xf32> to vector<2x16x8xf32>
    %cst_274 = arith.constant dense<0.000000e+00> : vector<2x16x16xf32>
    %530 = tpu.matmul %527, %528, %cst_274 {dimension_numbers = #tpu.dot_dimension_numbers<[2], [1], [1], [2], [0, 0, 0, 1, 1, 2], [0], [0]>} : vector<2x16x8xf32>, vector<2x8x16xf32>, vector<2x16x16xf32> -> vector<2x16x16xf32>
    %cst_275 = arith.constant 0.353553385 : f32
    %531 = vector.broadcast %cst_275 : f32 to vector<2x16x16xf32>
    %532 = arith.mulf %530, %531 : vector<2x16x16xf32>
    %cst_276 = arith.constant dense<0xFF800000> : vector<2x16xf32>
    %533 = vector.multi_reduction <maximumf>, %532, %cst_276 [2] : vector<2x16x16xf32> to vector<2x16xf32>
    %534 = vector.shape_cast %533 : vector<2x16xf32> to vector<2x16x1xf32>
    %535 = vector.broadcast %534 : vector<2x16x1xf32> to vector<2x16x16xf32>
    %536 = arith.subf %532, %535 : vector<2x16x16xf32>
    %537 = math.exp %536 : vector<2x16x16xf32>
    %cst_277 = arith.constant dense<0.000000e+00> : vector<2x16xf32>
    %538 = vector.multi_reduction <add>, %537, %cst_277 [2] : vector<2x16x16xf32> to vector<2x16xf32>
    %539 = vector.shape_cast %538 : vector<2x16xf32> to vector<2x16x1xf32>
    %540 = tpu.reciprocal %539 {approx = true} : vector<2x16x1xf32> -> vector<2x16x1xf32>
    %541 = vector.broadcast %540 : vector<2x16x1xf32> to vector<2x16x16xf32>
    %542 = arith.mulf %537, %541 : vector<2x16x16xf32>
    %cst_278 = arith.constant dense<0.000000e+00> : vector<2x16x8xf32>
    %543 = tpu.matmul %542, %529, %cst_278 {dimension_numbers = #tpu.dot_dimension_numbers<[2], [1], [1], [2], [0, 0, 0, 1, 1, 2], [0], [0]>} : vector<2x16x16xf32>, vector<2x16x8xf32>, vector<2x16x8xf32> -> vector<2x16x8xf32>
    %544 = vector.extract_strided_slice %504 {offsets = [0, 0, 16], sizes = [2, 16, 8], strides = [1, 1, 1]} : vector<2x16x32xf32> to vector<2x16x8xf32>
    %545 = vector.extract_strided_slice %509 {offsets = [0, 16, 0], sizes = [2, 8, 16], strides = [1, 1, 1]} : vector<2x32x16xf32> to vector<2x8x16xf32>
    %546 = vector.extract_strided_slice %508 {offsets = [0, 0, 16], sizes = [2, 16, 8], strides = [1, 1, 1]} : vector<2x16x32xf32> to vector<2x16x8xf32>
    %cst_279 = arith.constant dense<0.000000e+00> : vector<2x16x16xf32>
    %547 = tpu.matmul %544, %545, %cst_279 {dimension_numbers = #tpu.dot_dimension_numbers<[2], [1], [1], [2], [0, 0, 0, 1, 1, 2], [0], [0]>} : vector<2x16x8xf32>, vector<2x8x16xf32>, vector<2x16x16xf32> -> vector<2x16x16xf32>
    %cst_280 = arith.constant 0.353553385 : f32
    %548 = vector.broadcast %cst_280 : f32 to vector<2x16x16xf32>
    %549 = arith.mulf %547, %548 : vector<2x16x16xf32>
    %cst_281 = arith.constant dense<0xFF800000> : vector<2x16xf32>
    %550 = vector.multi_reduction <maximumf>, %549, %cst_281 [2] : vector<2x16x16xf32> to vector<2x16xf32>
    %551 = vector.shape_cast %550 : vector<2x16xf32> to vector<2x16x1xf32>
    %552 = vector.broadcast %551 : vector<2x16x1xf32> to vector<2x16x16xf32>
    %553 = arith.subf %549, %552 : vector<2x16x16xf32>
    %554 = math.exp %553 : vector<2x16x16xf32>
    %cst_282 = arith.constant dense<0.000000e+00> : vector<2x16xf32>
    %555 = vector.multi_reduction <add>, %554, %cst_282 [2] : vector<2x16x16xf32> to vector<2x16xf32>
    %556 = vector.shape_cast %555 : vector<2x16xf32> to vector<2x16x1xf32>
    %557 = tpu.reciprocal %556 {approx = true} : vector<2x16x1xf32> -> vector<2x16x1xf32>
    %558 = vector.broadcast %557 : vector<2x16x1xf32> to vector<2x16x16xf32>
    %559 = arith.mulf %554, %558 : vector<2x16x16xf32>
    %cst_283 = arith.constant dense<0.000000e+00> : vector<2x16x8xf32>
    %560 = tpu.matmul %559, %546, %cst_283 {dimension_numbers = #tpu.dot_dimension_numbers<[2], [1], [1], [2], [0, 0, 0, 1, 1, 2], [0], [0]>} : vector<2x16x16xf32>, vector<2x16x8xf32>, vector<2x16x8xf32> -> vector<2x16x8xf32>
    %561 = vector.extract_strided_slice %504 {offsets = [0, 0, 24], sizes = [2, 16, 8], strides = [1, 1, 1]} : vector<2x16x32xf32> to vector<2x16x8xf32>
    %562 = vector.extract_strided_slice %509 {offsets = [0, 24, 0], sizes = [2, 8, 16], strides = [1, 1, 1]} : vector<2x32x16xf32> to vector<2x8x16xf32>
    %563 = vector.extract_strided_slice %508 {offsets = [0, 0, 24], sizes = [2, 16, 8], strides = [1, 1, 1]} : vector<2x16x32xf32> to vector<2x16x8xf32>
    %cst_284 = arith.constant dense<0.000000e+00> : vector<2x16x16xf32>
    %564 = tpu.matmul %561, %562, %cst_284 {dimension_numbers = #tpu.dot_dimension_numbers<[2], [1], [1], [2], [0, 0, 0, 1, 1, 2], [0], [0]>} : vector<2x16x8xf32>, vector<2x8x16xf32>, vector<2x16x16xf32> -> vector<2x16x16xf32>
    %cst_285 = arith.constant 0.353553385 : f32
    %565 = vector.broadcast %cst_285 : f32 to vector<2x16x16xf32>
    %566 = arith.mulf %564, %565 : vector<2x16x16xf32>
    %cst_286 = arith.constant dense<0xFF800000> : vector<2x16xf32>
    %567 = vector.multi_reduction <maximumf>, %566, %cst_286 [2] : vector<2x16x16xf32> to vector<2x16xf32>
    %568 = vector.shape_cast %567 : vector<2x16xf32> to vector<2x16x1xf32>
    %569 = vector.broadcast %568 : vector<2x16x1xf32> to vector<2x16x16xf32>
    %570 = arith.subf %566, %569 : vector<2x16x16xf32>
    %571 = math.exp %570 : vector<2x16x16xf32>
    %cst_287 = arith.constant dense<0.000000e+00> : vector<2x16xf32>
    %572 = vector.multi_reduction <add>, %571, %cst_287 [2] : vector<2x16x16xf32> to vector<2x16xf32>
    %573 = vector.shape_cast %572 : vector<2x16xf32> to vector<2x16x1xf32>
    %574 = tpu.reciprocal %573 {approx = true} : vector<2x16x1xf32> -> vector<2x16x1xf32>
    %575 = vector.broadcast %574 : vector<2x16x1xf32> to vector<2x16x16xf32>
    %576 = arith.mulf %571, %575 : vector<2x16x16xf32>
    %cst_288 = arith.constant dense<0.000000e+00> : vector<2x16x8xf32>
    %577 = tpu.matmul %576, %563, %cst_288 {dimension_numbers = #tpu.dot_dimension_numbers<[2], [1], [1], [2], [0, 0, 0, 1, 1, 2], [0], [0]>} : vector<2x16x16xf32>, vector<2x16x8xf32>, vector<2x16x8xf32> -> vector<2x16x8xf32>
    %578 = tpu.concatenate %526, %543, %560, %577 in 2 : vector<2x16x8xf32>, vector<2x16x8xf32>, vector<2x16x8xf32>, vector<2x16x8xf32> -> vector<2x16x32xf32>
    %579 = vector.shape_cast %578 : vector<2x16x32xf32> to vector<32x32xf32>
    %c1_289 = arith.constant 1 : index
    %c1_290 = arith.constant 1 : index
    %c0_291 = arith.constant 0 : index
    %c0_292 = arith.constant 0 : index
    %580 = vector.load %arg6[%c1_289, %c1_290, %c0_291, %c0_292] : memref<2x2x32x32xf32, #tpu.memory_space<vmem>>, vector<1x1x32x32xf32>
    %581 = vector.shape_cast %580 : vector<1x1x32x32xf32> to vector<32x32xf32>
    %cst_293 = arith.constant dense<0.000000e+00> : vector<32x32xf32>
    %582 = tpu.matmul %579, %581, %cst_293 {dimension_numbers = #tpu.dot_dimension_numbers<[1], [0], [0], [1], [0, 0, 1, 1], [], []>} : vector<32x32xf32>, vector<32x32xf32>, vector<32x32xf32> -> vector<32x32xf32>
    %c1_294 = arith.constant 1 : index
    %c1_295 = arith.constant 1 : index
    %c0_296 = arith.constant 0 : index
    %c0_297 = arith.constant 0 : index
    %583 = vector.load %arg7[%c1_294, %c1_295, %c0_296, %c0_297] : memref<2x2x1x32xf32, #tpu.memory_space<vmem>>, vector<1x1x1x32xf32>
    %584 = vector.shape_cast %583 : vector<1x1x1x32xf32> to vector<1x32xf32>
    %585 = vector.broadcast %584 : vector<1x32xf32> to vector<32x32xf32>
    %586 = arith.addf %582, %585 : vector<32x32xf32>
    %587 = arith.addf %495, %586 : vector<32x32xf32>
    %c1_298 = arith.constant 1 : index
    %c1_299 = arith.constant 1 : index
    %c0_300 = arith.constant 0 : index
    %c0_301 = arith.constant 0 : index
    %588 = vector.load %arg8[%c1_298, %c1_299, %c0_300, %c0_301] : memref<2x2x1x32xf32, #tpu.memory_space<vmem>>, vector<1x1x1x32xf32>
    %589 = vector.shape_cast %588 : vector<1x1x1x32xf32> to vector<1x32xf32>
    %c1_302 = arith.constant 1 : index
    %c1_303 = arith.constant 1 : index
    %c0_304 = arith.constant 0 : index
    %c0_305 = arith.constant 0 : index
    %590 = vector.load %arg9[%c1_302, %c1_303, %c0_304, %c0_305] : memref<2x2x1x32xf32, #tpu.memory_space<vmem>>, vector<1x1x1x32xf32>
    %591 = vector.shape_cast %590 : vector<1x1x1x32xf32> to vector<1x32xf32>
    %cst_306 = arith.constant dense<0.000000e+00> : vector<32xf32>
    %592 = vector.multi_reduction <add>, %587, %cst_306 [1] : vector<32x32xf32> to vector<32xf32>
    %593 = vector.shape_cast %592 : vector<32xf32> to vector<32x1xf32>
    %cst_307 = arith.constant 3.200000e+01 : f32
    %594 = vector.broadcast %cst_307 : f32 to vector<32x1xf32>
    %595 = arith.divf %593, %594 : vector<32x1xf32>
    %596 = vector.broadcast %595 : vector<32x1xf32> to vector<32x32xf32>
    %597 = arith.subf %587, %596 : vector<32x32xf32>
    %598 = arith.mulf %597, %597 : vector<32x32xf32>
    %cst_308 = arith.constant dense<0.000000e+00> : vector<32xf32>
    %599 = vector.multi_reduction <add>, %598, %cst_308 [1] : vector<32x32xf32> to vector<32xf32>
    %600 = vector.shape_cast %599 : vector<32xf32> to vector<32x1xf32>
    %cst_309 = arith.constant 3.200000e+01 : f32
    %601 = vector.broadcast %cst_309 : f32 to vector<32x1xf32>
    %602 = arith.divf %600, %601 : vector<32x1xf32>
    %cst_310 = arith.constant 9.99999974E-6 : f32
    %603 = vector.broadcast %cst_310 : f32 to vector<32x1xf32>
    %604 = arith.addf %602, %603 : vector<32x1xf32>
    %605 = math.rsqrt %604 : vector<32x1xf32>
    %606 = vector.broadcast %605 : vector<32x1xf32> to vector<32x32xf32>
    %607 = arith.mulf %597, %606 : vector<32x32xf32>
    %608 = vector.broadcast %589 : vector<1x32xf32> to vector<32x32xf32>
    %609 = arith.mulf %607, %608 : vector<32x32xf32>
    %610 = vector.broadcast %591 : vector<1x32xf32> to vector<32x32xf32>
    %611 = arith.addf %609, %610 : vector<32x32xf32>
    %c1_311 = arith.constant 1 : index
    %c1_312 = arith.constant 1 : index
    %c0_313 = arith.constant 0 : index
    %c0_314 = arith.constant 0 : index
    %612 = vector.load %arg12[%c1_311, %c1_312, %c0_313, %c0_314] : memref<2x2x32x64xf32, #tpu.memory_space<vmem>>, vector<1x1x32x64xf32>
    %613 = vector.shape_cast %612 : vector<1x1x32x64xf32> to vector<32x64xf32>
    %cst_315 = arith.constant dense<0.000000e+00> : vector<32x64xf32>
    %614 = tpu.matmul %611, %613, %cst_315 {dimension_numbers = #tpu.dot_dimension_numbers<[1], [0], [0], [1], [0, 0, 1, 1], [], []>} : vector<32x32xf32>, vector<32x64xf32>, vector<32x64xf32> -> vector<32x64xf32>
    %c1_316 = arith.constant 1 : index
    %c1_317 = arith.constant 1 : index
    %c0_318 = arith.constant 0 : index
    %c0_319 = arith.constant 0 : index
    %615 = vector.load %arg13[%c1_316, %c1_317, %c0_318, %c0_319] : memref<2x2x1x64xf32, #tpu.memory_space<vmem>>, vector<1x1x1x64xf32>
    %616 = vector.shape_cast %615 : vector<1x1x1x64xf32> to vector<1x64xf32>
    %617 = vector.broadcast %616 : vector<1x64xf32> to vector<32x64xf32>
    %618 = arith.addf %614, %617 : vector<32x64xf32>
    %cst_320 = arith.constant 0.000000e+00 : f32
    %619 = vector.broadcast %cst_320 : f32 to vector<32x64xf32>
    %620 = arith.cmpf ogt, %618, %619 : vector<32x64xf32>
    %cst_321 = arith.constant 0.00999999977 : f32
    %621 = vector.broadcast %cst_321 : f32 to vector<32x64xf32>
    %622 = arith.mulf %621, %618 : vector<32x64xf32>
    %623 = arith.select %620, %618, %622 : vector<32x64xi1>, vector<32x64xf32>
    %c1_322 = arith.constant 1 : index
    %c1_323 = arith.constant 1 : index
    %c0_324 = arith.constant 0 : index
    %c0_325 = arith.constant 0 : index
    %624 = vector.load %arg14[%c1_322, %c1_323, %c0_324, %c0_325] : memref<2x2x64x32xf32, #tpu.memory_space<vmem>>, vector<1x1x64x32xf32>
    %625 = vector.shape_cast %624 : vector<1x1x64x32xf32> to vector<64x32xf32>
    %cst_326 = arith.constant dense<0.000000e+00> : vector<32x32xf32>
    %626 = tpu.matmul %623, %625, %cst_326 {dimension_numbers = #tpu.dot_dimension_numbers<[1], [0], [0], [1], [0, 0, 1, 1], [], []>} : vector<32x64xf32>, vector<64x32xf32>, vector<32x32xf32> -> vector<32x32xf32>
    %c1_327 = arith.constant 1 : index
    %c1_328 = arith.constant 1 : index
    %c0_329 = arith.constant 0 : index
    %c0_330 = arith.constant 0 : index
    %627 = vector.load %arg15[%c1_327, %c1_328, %c0_329, %c0_330] : memref<2x2x1x32xf32, #tpu.memory_space<vmem>>, vector<1x1x1x32xf32>
    %628 = vector.shape_cast %627 : vector<1x1x1x32xf32> to vector<1x32xf32>
    %629 = vector.broadcast %628 : vector<1x32xf32> to vector<32x32xf32>
    %630 = arith.addf %626, %629 : vector<32x32xf32>
    %631 = arith.addf %611, %630 : vector<32x32xf32>
    %c1_331 = arith.constant 1 : index
    %c1_332 = arith.constant 1 : index
    %c0_333 = arith.constant 0 : index
    %c0_334 = arith.constant 0 : index
    %632 = vector.load %arg10[%c1_331, %c1_332, %c0_333, %c0_334] : memref<2x2x1x32xf32, #tpu.memory_space<vmem>>, vector<1x1x1x32xf32>
    %633 = vector.shape_cast %632 : vector<1x1x1x32xf32> to vector<1x32xf32>
    %c1_335 = arith.constant 1 : index
    %c1_336 = arith.constant 1 : index
    %c0_337 = arith.constant 0 : index
    %c0_338 = arith.constant 0 : index
    %634 = vector.load %arg11[%c1_335, %c1_336, %c0_337, %c0_338] : memref<2x2x1x32xf32, #tpu.memory_space<vmem>>, vector<1x1x1x32xf32>
    %635 = vector.shape_cast %634 : vector<1x1x1x32xf32> to vector<1x32xf32>
    %cst_339 = arith.constant dense<0.000000e+00> : vector<32xf32>
    %636 = vector.multi_reduction <add>, %631, %cst_339 [1] : vector<32x32xf32> to vector<32xf32>
    %637 = vector.shape_cast %636 : vector<32xf32> to vector<32x1xf32>
    %cst_340 = arith.constant 3.200000e+01 : f32
    %638 = vector.broadcast %cst_340 : f32 to vector<32x1xf32>
    %639 = arith.divf %637, %638 : vector<32x1xf32>
    %640 = vector.broadcast %639 : vector<32x1xf32> to vector<32x32xf32>
    %641 = arith.subf %631, %640 : vector<32x32xf32>
    %642 = arith.mulf %641, %641 : vector<32x32xf32>
    %cst_341 = arith.constant dense<0.000000e+00> : vector<32xf32>
    %643 = vector.multi_reduction <add>, %642, %cst_341 [1] : vector<32x32xf32> to vector<32xf32>
    %644 = vector.shape_cast %643 : vector<32xf32> to vector<32x1xf32>
    %cst_342 = arith.constant 3.200000e+01 : f32
    %645 = vector.broadcast %cst_342 : f32 to vector<32x1xf32>
    %646 = arith.divf %644, %645 : vector<32x1xf32>
    %cst_343 = arith.constant 9.99999974E-6 : f32
    %647 = vector.broadcast %cst_343 : f32 to vector<32x1xf32>
    %648 = arith.addf %646, %647 : vector<32x1xf32>
    %649 = math.rsqrt %648 : vector<32x1xf32>
    %650 = vector.broadcast %649 : vector<32x1xf32> to vector<32x32xf32>
    %651 = arith.mulf %641, %650 : vector<32x32xf32>
    %652 = vector.broadcast %633 : vector<1x32xf32> to vector<32x32xf32>
    %653 = arith.mulf %651, %652 : vector<32x32xf32>
    %654 = vector.broadcast %635 : vector<1x32xf32> to vector<32x32xf32>
    %655 = arith.addf %653, %654 : vector<32x32xf32>
    %656 = tpu.concatenate %334, %655 in 0 : vector<32x32xf32>, vector<32x32xf32> -> vector<64x32xf32>
    %c0_344 = arith.constant 0 : index
    %c0_345 = arith.constant 0 : index
    %657 = vector.load %arg16[%c0_344, %c0_345] : memref<32x10xf32, #tpu.memory_space<vmem>>, vector<32x10xf32>
    %cst_346 = arith.constant dense<0.000000e+00> : vector<64x10xf32>
    %658 = tpu.matmul %656, %657, %cst_346 {dimension_numbers = #tpu.dot_dimension_numbers<[1], [0], [0], [1], [0, 0, 1, 1], [], []>} : vector<64x32xf32>, vector<32x10xf32>, vector<64x10xf32> -> vector<64x10xf32>
    %c0_347 = arith.constant 0 : index
    %c0_348 = arith.constant 0 : index
    %659 = vector.load %arg18[%c0_347, %c0_348] : memref<1x10xf32, #tpu.memory_space<vmem>>, vector<1x10xf32>
    %660 = vector.broadcast %659 : vector<1x10xf32> to vector<64x10xf32>
    %661 = arith.addf %658, %660 : vector<64x10xf32>
    %cst_349 = arith.constant 0.000000e+00 : f32
    %662 = vector.broadcast %cst_349 : f32 to vector<64x10xf32>
    %663 = arith.maximumf %661, %662 : vector<64x10xf32>
    %c0_350 = arith.constant 0 : index
    %c0_351 = arith.constant 0 : index
    %664 = vector.load %arg17[%c0_350, %c0_351] : memref<10x3xf32, #tpu.memory_space<vmem>>, vector<10x3xf32>
    %cst_352 = arith.constant dense<0.000000e+00> : vector<64x3xf32>
    %665 = tpu.matmul %663, %664, %cst_352 {dimension_numbers = #tpu.dot_dimension_numbers<[1], [0], [0], [1], [0, 0, 1, 1], [], []>} : vector<64x10xf32>, vector<10x3xf32>, vector<64x3xf32> -> vector<64x3xf32>
    %c0_353 = arith.constant 0 : index
    %c0_354 = arith.constant 0 : index
    %666 = vector.load %arg19[%c0_353, %c0_354] : memref<1x3xf32, #tpu.memory_space<vmem>>, vector<1x3xf32>
    %667 = vector.broadcast %666 : vector<1x3xf32> to vector<64x3xf32>
    %668 = arith.addf %665, %667 : vector<64x3xf32>
    %669 = vector.shape_cast %668 : vector<64x3xf32> to vector<4x16x3xf32>
    %c0_355 = arith.constant 0 : index
    %c0_356 = arith.constant 0 : index
    %670 = vector.load %arg20[%c0_355, %c0_356] : memref<16x1xf32, #tpu.memory_space<vmem>>, vector<16x1xf32>
    %671 = vector.shape_cast %670 : vector<16x1xf32> to vector<1x16x1xf32>
    %672 = vector.broadcast %671 : vector<1x16x1xf32> to vector<4x16x3xf32>
    %673 = arith.mulf %669, %672 : vector<4x16x3xf32>
    %cst_357 = arith.constant dense<0.000000e+00> : vector<4x3xf32>
    %674 = vector.multi_reduction <add>, %673, %cst_357 [1] : vector<4x16x3xf32> to vector<4x3xf32>
    %c0_358 = arith.constant 0 : index
    %c0_359 = arith.constant 0 : index
    %675 = vector.load %arg21[%c0_358, %c0_359] : memref<1x1xf32, #tpu.memory_space<vmem>>, vector<1x1xf32>
    %676 = vector.broadcast %675 : vector<1x1xf32> to vector<4x3xf32>
    %677 = arith.addf %674, %676 : vector<4x3xf32>
    %678 = vector.extract_strided_slice %677 {offsets = [0, 0], sizes = [2, 3], strides = [1, 1]} : vector<4x3xf32> to vector<2x3xf32>
    %c0_360 = arith.constant 0 : index
    %c0_361 = arith.constant 0 : index
    %679 = vector.load %arg22[%c0_360, %c0_361] : memref<2x3xf32, #tpu.memory_space<vmem>>, vector<2x3xf32>
    tpu.vector_store %arg22[%c0_360, %c0_361], %678 {strides = array<i32>} : memref<2x3xf32, #tpu.memory_space<vmem>>, vector<2x3xf32>,
    %680 = vector.extract_strided_slice %677 {offsets = [2, 0], sizes = [2, 3], strides = [1, 1]} : vector<4x3xf32> to vector<2x3xf32>
    %c0_362 = arith.constant 0 : index
    %c0_363 = arith.constant 0 : index
    %681 = vector.load %arg23[%c0_362, %c0_363] : memref<2x3xf32, #tpu.memory_space<vmem>>, vector<2x3xf32>
    tpu.vector_store %arg23[%c0_362, %c0_363], %680 {strides = array<i32>} : memref<2x3xf32, #tpu.memory_space<vmem>>, vector<2x3xf32>,
    return
  }
}

</mosaic_0001>

<bundles_post_ra>
// kernel: _lambda_.1
= control target key start
LH: loop header
LB: loop body
LE: loop exit
PB: predicated region body
PF: predicated region fallthrough
CT: control target
= control target key end

     0   :  { %s14585_s0 = inlined_call_operand.vmem [shape: f32[2,16,4], index: 0, kind: input, shape index: {}]   ;;  %s14586_s1 = inlined_call_operand.vmem [shape: f32[16,16], index: 1, kind: input, shape index: {}]   ;;  %s14587_s2 = inlined_call_operand.vmem [shape: f32[4,32], index: 2, kind: input, shape index: {}]   ;;  %s14588_s3 = inlined_call_operand.vmem [shape: f32[1,32], index: 3, kind: input, shape index: {}]   ;;  %s14589_s4 = inlined_call_operand.vmem [shape: f32[2,2,32,96], index: 4, kind: input, shape index: {}]   ;;  %s14590_s5 = inlined_call_operand.vmem [shape: f32[2,2,1,96], index: 5, kind: input, shape index: {}]   ;;  %s14591_s6 = inlined_call_operand.vmem [shape: f32[2,2,32,32], index: 6, kind: input, shape index: {}]   ;;  %s14592_s7 = inlined_call_operand.vmem [shape: f32[2,2,1,32], index: 7, kind: input, shape index: {}]   ;;  %s14593_s8 = inlined_call_operand.vmem [shape: f32[2,2,1,32], index: 8, kind: input, shape index: {}]   ;;  %s14594_s9 = inlined_call_operand.vmem [shape: f32[2,2,1,32], index: 9, kind: input, shape index: {}]   ;;  %s14595_s10 = inlined_call_operand.vmem [shape: f32[2,2,1,32], index: 10, kind: input, shape index: {}]   ;;  %s14596_s11 = inlined_call_operand.vmem [shape: f32[2,2,1,32], index: 11, kind: input, shape index: {}]   ;;  %s14597_s12 = inlined_call_operand.vmem [shape: f32[2,2,32,64], index: 12, kind: input, shape index: {}]   ;;  %s14598_s13 = inlined_call_operand.vmem [shape: f32[2,2,1,64], index: 13, kind: input, shape index: {}]   ;;  %s14599_s14 = inlined_call_operand.vmem [shape: f32[2,2,64,32], index: 14, kind: input, shape index: {}]   ;;  %s14600_s15 = inlined_call_operand.vmem [shape: f32[2,2,1,32], index: 15, kind: input, shape index: {}]   ;;  %s14601_s16 = inlined_call_operand.vmem [shape: f32[32,10], index: 16, kind: input, shape index: {}]   ;;  %s14602_s17 = inlined_call_operand.vmem [shape: f32[10,3], index: 17, kind: input, shape index: {}]   ;;  %s14603_s18 = inlined_call_operand.vmem [shape: f32[1,10], index: 18, kind: input, shape index: {}]   ;;  %s14604_s19 = inlined_call_operand.vmem [shape: f32[1,3], index: 19, kind: input, shape index: {}]   ;;  %s14605_s20 = inlined_call_operand.vmem [shape: f32[16,1], index: 20, kind: input, shape index: {}]   ;;  %s14606_s21 = inlined_call_operand.<no memory space> [shape: f32[1,1], index: 21, kind: input, shape index: {}]   ;;  %s14607_s22 = inlined_call_operand.hbm [shape: f32[2,3], index: 22, kind: output, shape index: {0}]   ;;  %s14608_s23 = inlined_call_operand.hbm [shape: f32[2,3], index: 23, kind: output, shape index: {1}]  }
   0x1   :  { %14656 = sst [smem:[#allocation9_spill]] %s14585_s0  ;;  %v29_v0 = vstv %s14606_s21 }
   0x2   :  { %14657 = sst [smem:[#allocation10_spill]] %s14586_s1  ;;  %30 = vst [vmem:[#allocation2] sm:$0x1] %v29_v0 }
   0x3   :  { %14658 = sst [smem:[#allocation11_spill]] %s14587_s2 }
   0x4   :  { %14659 = sst [smem:[#allocation12_spill]] %s14588_s3 }
   0x5   :  { %14660 = sst [smem:[#allocation13_spill]] %s14589_s4 }
   0x6   :  { %14661 = sst [smem:[#allocation14_spill]] %s14590_s5 }
   0x7   :  { %14662 = sst [smem:[#allocation15_spill]] %s14591_s6 }
   0x8   :  { %14663 = sst [smem:[#allocation16_spill]] %s14592_s7 }
   0x9   :  { %14664 = sst [smem:[#allocation17_spill]] %s14595_s10 }
   0xa   :  { %14665 = sst [smem:[#allocation18_spill]] %s14596_s11 }
   0xb   :  { %14666 = sst [smem:[#allocation19_spill]] %s14600_s15 }
   0xc   :  { %14667 = sst [smem:[#allocation20_spill]] %s14601_s16 }
   0xd   :  { %14668 = sst [smem:[#allocation21_spill]] %s14602_s17 }
   0xe   :  { %14669 = sst [smem:[#allocation22_spill]] %s14603_s18 }
   0xf   :  { %14670 = sst [smem:[#allocation23_spill]] %s14604_s19 }
  0x10   :  { %14671 = sst [smem:[#allocation24_spill]] %s14605_s20 }
  0x11   :  { %14672 = sst [smem:[#allocation25_spill]] %s14607_s22 }
  0x12   :  { %14673 = sst [smem:[#allocation26_spill]] %s14608_s23 }
  0x13   :  { %31 = vsyncpa [#allocation4], 0  ;;  %s14674_s5 = sld [smem:[#allocation9_spill]]  ;;  %s14675_s27 = sld [smem:[#allocation10_spill]]  ;;  %vm83_vm0 = vcmask 130048  }
  0x19   :  { %v77_v1 = vld [vmem:[%s14674_s5] sm:$0xff]  ;;  %v78_v2 = vld [vmem:[%s14674_s5 + $0x8] sm:$0xff]  ;;  %v79_v5 = vld [vmem:[%s14674_s5 + $0x10] sm:$0xff] }
  0x1a   :  { %v81_v3 = vld [vmem:[%s14675_s27] sm:$0xff]  ;;  %v11546_v4 = vpack.c.bf16 %v78_v2, %v77_v1  ;;  %v80_v6 = vld [vmem:[%s14674_s5 + $0x18] sm:$0xff] }
  0x1b   :  { %10782 = vmatprep.mubr.msk.f32.mxu0 %vm83_vm0, %v81_v3  ;;  %v11550_v7 = vpack.c.bf16 %v80_v6, %v79_v5 }
  0x1c   :  { %32 = vsyncpa [#allocation6], 0  ;;  %11547 = vmatprep.subr.bf16.mxu0 %v11546_v4  ;;  %v82_v8 = vld [vmem:[%s14675_s27 + $0x8] sm:$0xff]  ;;  %s14676_s24 = sld [smem:[#allocation11_spill]]  ;;  %vm277_vm1 = vcmask 1043456   ;;  %s14677_s1 = sld [smem:[#allocation13_spill]] }
  0x1d   :  { %11549 = vmatpush3.bf16.msra.mxu0 %v11546_v4  ;;  %vm252_vm2 = vcmask 31744   ;;  %s14678_s3 = sld [smem:[#allocation12_spill]]  ;;  %vm397_vm3 = vcmask 261120   ;;  %s14679_s30 = sld [smem:[#allocation14_spill]]  ;;  %vm501_vm4 = vcmask 64512   ;;  %vm2164_vm6 = vcmask 195584  }
  0x1e   :  { %11551 = vmatprep.subr.bf16.mxu0 %v11550_v7  ;;  %vm12990_vm5 = vmpackc.low %vm501_vm4, %vm501_vm4  ;;  %s14639_s25 = smov 64   ;;  %s14637_s5 = smov 88   ;;  %vm2491_vm9 = vcmask 523264  }
  0x1f   :  { %s14629_s26 = smov 120   ;;  %s14627_s2 = smov 56  }
  0x20   :  { %10783 = vmatmul.mubr.msk.f32.vlgmr.msra.gmra.mrb[0].mxu0 %vm83_vm0, %v82_v8  ;;  %s14625_s6 = smov 80   ;;  %s14623_s27 = smov 112  }
  0x21   :  { %11553 = vmatpush3.bf16.msra.mxu0 %v11550_v7  ;;  %10789 = vmatprep.mubr.msk.f32.mxu0 %vm83_vm0, %v81_v3  ;;  %s14621_s7 = smov 48   ;;  %s14619_s21 = smov 72  }
  0x22   :  { %v244_v9 = vld [vmem:[%s14676_s24] sm:$0xf]  ;;  %v387_v11 = vld [vmem:[%s14677_s1 + $0x8] sm:$0xff]  ;;  %v388_v21 = vld [vmem:[%s14677_s1 + $0x10] sm:$0xff]  ;;  %s14641_s24 = smov 96   ;;  %s14617_s28 = smov 104  }
  0x23   :  { %10792 = vmatprep.subr.msk.mxu0 %vm277_vm1, %v244_v9  ;;  %v386_v10 = vld [vmem:[%s14677_s1] sm:$0xff]  ;;  %v389_v22 = vld [vmem:[%s14677_s1 + $0x18] sm:$0xff]  ;;  %s14615_s29 = smov 40   ;;  %s14633_s0 = smov 16  }
  0x24   :  { %10790 = vmatmul.mubr.msk.f32.vlgmr.msra.gmra.mrb[2].mxu0 %vm83_vm0, %v82_v8  ;;  %v11554_v12 = vpack.c.bf16 %v387_v11, %v386_v10  ;;  %v11558_v23 = vpack.c.bf16 %v389_v22, %v388_v21  ;;  %v9937_v24 = vld [vmem:[%s14678_s3] ss:$0 sm:$0xff]  ;;  %s14635_s3 = smov 8   ;;  %s14691_s4 = smov 104  }
  0x25   :  { %10793 = vmatpush3.msk.msra.mxu0 %vm277_vm1, %v244_v9  ;;  %v9947_v41 = vld [vmem:[%s14679_s30] ss:$0 sm:$0xff]  ;;  %s14695_s23 = smov 24   ;;  %s14699_s18 = sld [smem:[#allocation17_spill]] }
  0x26   :  { %11555 = vmatprep.subr.bf16.mxu1 %v11554_v12  ;;  %s14707_s17 = sld [smem:[#allocation23_spill]] }
  0x27   :  { %11557 = vmatpush3.bf16.msra.mxu1 %v11554_v12 }
  0x28   :  { %11559 = vmatprep.subr.bf16.mxu1 %v11558_v23 }
  0x2b   :  { %11561 = vmatpush3.bf16.msra.mxu1 %v11558_v23 }
  0xf3   :  { %v10784_v13 = vpop.f32.mrb[0].mxu0 }
  0xf4   :  { %v156_v14 = vpop.f32.mrb[1].mxu0  ;;  %v241_v16 = vsub.f32 %v78_v2, %v10784_v13 }
  0xf5   :  { %v240_v15 = vsub.f32 %v77_v1, %v156_v14 }
  0xf7   :  { %v10791_v17 = vpop.f32.mrb[2].mxu0  ;;  %10794 = vmatprep.mubr.msk.f32.mxu0 %vm252_vm2, %v240_v15 }
  0xf8   :  { %v243_v18 = vsub.f32 %v80_v6, %v10791_v17  ;;  %v231_v19 = vpop.f32.mrb[3].mxu0  ;;  %10795 = vmatmul.mubr.msk.f32.vlgmr.msra.gmra.mrb[4].mxu0 %vm252_vm2, %v241_v16 }
  0xf9   :  { %v242_v20 = vsub.f32 %v79_v5, %v231_v19 }
  0xfb   :  { %10797 = vmatprep.mubr.msk.f32.mxu0 %vm252_vm2, %v242_v20 }
  0xfc   :  { %10798 = vmatmul.mubr.msk.f32.gmra.mrb[6].mxu0 %vm252_vm2, %v243_v18 }
  0xfd   :  { %10800 = vmatprep.mubr.msk.f32.mxu0 %vm252_vm2, %v156_v14 }
 0x100   :  { %10801 = vmatmul.mubr.msk.f32.gmra.mrb[8].mxu0 %vm252_vm2, %v10784_v13 }
 0x101   :  { %10803 = vmatprep.mubr.msk.f32.mxu0 %vm252_vm2, %v231_v19 }
 0x104   :  { %10804 = vmatmul.mubr.msk.f32.gmra.mrb[10].mxu0 %vm252_vm2, %v10791_v17 }
 0x1cb   :  { %v10796_v25 = vpop.f32.mrb[4].mxu0 }
 0x1cc   :  { %v347_v26 = vpop.f32.mrb[5].mxu0  ;;  %v12939_v28 = vadd.f32 %v10796_v25, %v9937_v24 }
 0x1cd   :  { %v12937_v27 = vadd.f32 %v9937_v24, %v347_v26 }
 0x1cf   :  { %v10799_v29 = vpop.f32.mrb[6].mxu0  ;;  %10814 = vmatprep.mubr.msk.f32.mxu1 %vm397_vm3, %v12937_v27 }
 0x1d0   :  { %v12943_v30 = vadd.f32 %v10799_v29, %v9937_v24  ;;  %v357_v31 = vpop.f32.mrb[7].mxu0  ;;  %10815 = vmatmul.mubr.msk.f32.vlgmr.msra.gmra.mrb[0].mxu1 %vm397_vm3, %v12939_v28 }
 0x1d1   :  { %v12947_v32 = vadd.f32 %v9937_v24, %v357_v31 }
 0x1d3   :  { %v10802_v33 = vpop.f32.mrb[8].mxu0  ;;  %10817 = vmatprep.mubr.msk.f32.mxu1 %vm397_vm3, %v12947_v32 }
 0x1d4   :  { %v12951_v34 = vadd.f32 %v10802_v33, %v9937_v24  ;;  %v367_v35 = vpop.f32.mrb[9].mxu0  ;;  %10818 = vmatmul.mubr.msk.f32.gmra.mrb[2].mxu1 %vm397_vm3, %v12943_v30 }
 0x1d5   :  { %v12955_v36 = vadd.f32 %v9937_v24, %v367_v35 }
 0x1d7   :  { %v10805_v37 = vpop.f32.mrb[10].mxu0 }
 0x1d8   :  { %v12957_v38 = vadd.f32 %v10805_v37, %v9937_v24  ;;  %v377_v39 = vpop.f32.mrb[11].mxu0 }
 0x1d9   :  { %v12959_v40 = vadd.f32 %v9937_v24, %v377_v39 }
 0x2a3   :  { %v10816_v42 = vpop.f32.mrb[0].mxu1 }
 0x2a4   :  { %v12964_v43 = vadd.f32 %v10816_v42, %v9947_v41  ;;  %v476_v44 = vpop.f32.mrb[1].mxu1 }
 0x2a5   :  { %v12966_v45 = vadd.f32 %v9947_v41, %v476_v44 }
 0x2a7   :  { %v10819_v46 = vpop.f32.mrb[2].mxu1  ;;  %10824 = vmatprep.mubr.msk.f32.mxu1 %vm501_vm4, %v12966_v45  ;;  %v12972_v47 = vpack.i.bf16 %v12964_v43, %v12966_v45 }
 0x2a8   :  { %v12974_v48 = vadd.f32 %v10819_v46, %v9947_v41  ;;  %v486_v49 = vpop.f32.mrb[3].mxu1 }
 0x2a9   :  { %v12976_v50 = vadd.f32 %v9947_v41, %v486_v49  ;;  %12067 = vrot.lane.b32.xlu0 %v12972_v47, %s14641_s24 }
 0x2ab   :  { %v12982_v51 = vpack.i.bf16 %v12974_v48, %v12976_v50  ;;  %10831 = vmatprep.mubr.msk.f32.mxu0 %vm501_vm4, %v12976_v50 }
 0x2ad   :  { %12072 = vrot.lane.b32.xlu0 %v12982_v51, %s14641_s24 }
 0x31b   :  { %v12068_v52 = vpop.permute.xlu0 %12067 }
 0x31c   :  { %v12070_v53 = vunpack.i.h.bf16 %v12068_v52  ;;  %v12069_v54 = vunpack.i.l.bf16 %v12068_v52 }
 0x31e   :  { %v11562_v56 = vpack.c.bf16 %v12070_v53, %v12069_v54 }
 0x31f   :  { %v12073_v57 = vpop.permute.xlu0 %12072 }
 0x320   :  { %v12075_v58 = vunpack.i.h.bf16 %v12073_v57  ;;  %v12074_v59 = vunpack.i.l.bf16 %v12073_v57  ;;  %11564 = vmatprep.subr.msk.bf16.mxu1 %vm12990_vm5, %v11562_v56 }
 0x321   :  { %11567 = vmatpush3.bf16.xpose.msk.msra.mxu1 %vm12990_vm5, %v11562_v56 }
 0x322   :  { %v11568_v60 = vpack.c.bf16 %v12075_v58, %v12074_v59 }
 0x324   :  { %11570 = vmatprep.subr.msk.bf16.mxu0 %vm12990_vm5, %v11568_v60 }
 0x325   :  { %11573 = vmatpush3.bf16.xpose.msk.msra.mxu0 %vm12990_vm5, %v11568_v60 }
 0x328   :  { %10825 = vmatmul.mubr.msk.f32.vlgmr.msra.gmra.mrb[4].mxu1 %vm501_vm4, %v12964_v43 }
 0x32c   :  { %10832 = vmatmul.mubr.msk.f32.vlgmr.msra.gmra.mrb[12].mxu0 %vm501_vm4, %v12974_v48 }
 0x3fb   :  { %v10826_v61 = vpop.f32.mrb[4].mxu1 }
 0x3fc   :  { %v576_v62 = vpop.f32.mrb[5].mxu1  ;;  %v675_v0 = vmul.f32 0.35355338, %v10826_v61 }
 0x3fd   :  { %v674_v63 = vmul.f32 0.35355338, %v576_v62 }
 0x3fe   :  { %v681_v6 = vsel %vm83_vm0, %v675_v0, -inf }
 0x3ff   :  { %v10833_v1 = vpop.f32.mrb[12].mxu0  ;;  %v678_v2 = vsel %vm83_vm0, %v674_v63, -inf }
 0x400   :  { %679 = vmax.xlane.f32.xlu1 %v678_v2  ;;  %v665_v3 = vpop.f32.mrb[13].mxu0  ;;  %v677_v5 = vmul.f32 0.35355338, %v10833_v1 }
 0x401   :  { %v676_v4 = vmul.f32 0.35355338, %v665_v3 }
 0x402   :  { %v687_v8 = vsel %vm83_vm0, %v677_v5, -inf }
 0x403   :  { %v684_v7 = vsel %vm83_vm0, %v676_v4, -inf }
 0x404   :  { %682 = vmax.xlane.f32.xlu1 %v681_v6  ;;  %685 = vmax.xlane.f32.xlu0 %v684_v7 }
 0x408   :  { %688 = vmax.xlane.f32.xlu1 %v687_v8 }
 0x419   :  { %12077 = vrot.lane.b32.xlu1 %v12972_v47, %s14639_s25 }
 0x41a   :  { %12082 = vrot.lane.b32.xlu0 %v12982_v51, %s14639_s25 }
 0x41d   :  { %12087 = vrot.lane.b32.xlu1 %v12972_v47, %s14637_s5 }
 0x41e   :  { %987 = vrot.lane.b32.xlu0 %v12976_v50, %s14629_s26 }
 0x421   :  { %896 = vrot.lane.b32.xlu1 %v12966_v45, %s14629_s26 }
 0x425   :  { %12092 = vrot.lane.b32.xlu1 %v12982_v51, %s14637_s5  ;;  %s14684_s5 = smov 88  }
 0x429   :  { %898 = vrot.lane.b32.xlu1 %v12964_v43, %s14629_s26 }
 0x48d   :  { %v680_v9 = vpop.xlane.xlu1 %679 }
 0x48e   :  { %v690_v10 = vsub.f32 %v674_v63, %v680_v9 }
 0x490   :  { %v694_v14 = vmul.f32 1.442695, %v690_v10 }
 0x491   :  { %v683_v11 = vpop.xlane.xlu1 %682  ;;  %v686_v12 = vpop.xlane.xlu0 %685 }
 0x492   :  { %v691_v13 = vsub.f32 %v675_v0, %v683_v11  ;;  %v692_v21 = vsub.f32 %v676_v4, %v686_v12 }
 0x494   :  { %v696_v15 = vmul.f32 1.442695, %v691_v13  ;;  %v698_v29 = vmul.f32 1.442695, %v692_v21 }
 0x495   :  { %v689_v16 = vpop.xlane.xlu1 %688  ;;  %v12083_v17 = vpop.permute.xlu0 %12082 }
 0x496   :  { %12388 = vpow2.f32 %v696_v15  ;;  %v693_v18 = vsub.f32 %v677_v5, %v689_v16  ;;  %v12085_v19 = vunpack.i.h.bf16 %v12083_v17  ;;  %v12084_v20 = vunpack.i.l.bf16 %v12083_v17 }
 0x497   :  { %12390 = vpow2.f32 %v694_v14 }
 0x498   :  { %v700_v22 = vmul.f32 1.442695, %v693_v18  ;;  %v11578_v23 = vpack.c.bf16 %v12085_v19, %v12084_v20 }
 0x499   :  { %v12078_v24 = vpop.permute.xlu1 %12077  ;;  %v988_v10 = vpop.permute.xlu0 %987 }
 0x49a   :  { %v12080_v25 = vunpack.i.h.bf16 %v12078_v24  ;;  %v12079_v26 = vunpack.i.l.bf16 %v12078_v24  ;;  %11579 = vmatprep.subr.bf16.mxu0 %v11578_v23  ;;  %12392 = vpow2.f32 %v700_v22 }
 0x49b   :  { %11581 = vmatpush3.bf16.msra.mxu0 %v11578_v23  ;;  %12394 = vpow2.f32 %v698_v29 }
 0x49c   :  { %v11574_v31 = vpack.c.bf16 %v12080_v25, %v12079_v26 }
 0x49d   :  { %v12088_v33 = vpop.permute.xlu1 %12087 }
 0x49e   :  { %v12090_v35 = vunpack.i.h.bf16 %v12088_v33  ;;  %v12089_v37 = vunpack.i.l.bf16 %v12088_v33  ;;  %11575 = vmatprep.subr.bf16.mxu1 %v11574_v31 }
 0x49f   :  { %11577 = vmatpush3.bf16.msra.mxu1 %v11574_v31 }
 0x4a0   :  { %v12389_v39 = vpop.eup %12388  ;;  %v11582_v41 = vpack.c.bf16 %v12090_v35, %v12089_v37 }
 0x4a1   :  { %v897_v42 = vpop.permute.xlu1 %896  ;;  %v705_v44 = vsel %vm83_vm0, %v12389_v39, 0.0  ;;  %v12391_v46 = vpop.eup %12390 }
 0x4a2   :  { %706 = vadd.xlane.f32.xlu1 %v705_v44  ;;  %11584 = vmatprep.subr.msk.bf16.mxu1 %vm12990_vm5, %v11582_v41  ;;  %v702_v52 = vsel %vm83_vm0, %v12391_v46, 0.0 }
 0x4a4   :  { %v12393_v53 = vpop.eup %12392 }
 0x4a5   :  { %v12093_v49 = vpop.permute.xlu1 %12092  ;;  %v711_v58 = vsel %vm83_vm0, %v12393_v53, 0.0  ;;  %v12395_v59 = vpop.eup %12394 }
 0x4a6   :  { %v12095_v54 = vunpack.i.h.bf16 %v12093_v49  ;;  %v12094_v56 = vunpack.i.l.bf16 %v12093_v49  ;;  %703 = vadd.xlane.f32.xlu1 %v702_v52  ;;  %v708_v60 = vsel %vm83_vm0, %v12395_v59, 0.0 }
 0x4a8   :  { %v11588_v57 = vpack.c.bf16 %v12095_v54, %v12094_v56 }
 0x4a9   :  { %v899_v61 = vpop.permute.xlu1 %898 }
 0x4aa   :  { %712 = vadd.xlane.f32.xlu1 %v711_v58  ;;  %11590 = vmatprep.subr.msk.bf16.mxu0 %vm12990_vm5, %v11588_v57 }
 0x4ae   :  { %709 = vadd.xlane.f32.xlu1 %v708_v60 }
 0x4bf   :  { %989 = vrot.lane.b32.xlu1 %v12974_v48, %s14629_s26  ;;  %s14692_s26 = smov 40  }
 0x52f   :  { %v707_v62 = vpop.xlane.xlu1 %706 }
 0x530   :  { %12396 = vrcp.f32 %v707_v62 }
 0x533   :  { %v704_v63 = vpop.xlane.xlu1 %703 }
 0x534   :  { %12398 = vrcp.f32 %v704_v63 }
 0x537   :  { %v713_v0 = vpop.xlane.xlu1 %712 }
 0x538   :  { %12400 = vrcp.f32 %v713_v0 }
 0x53a   :  { %v12397_v2 = vpop.eup %12396 }
 0x53b   :  { %v710_v1 = vpop.xlane.xlu1 %709  ;;  %v719_v5 = vmul.f32 %v12397_v2, %v12389_v39 }
 0x53c   :  { %12402 = vrcp.f32 %v710_v1 }
 0x53e   :  { %v12399_v3 = vpop.eup %12398 }
 0x53f   :  { %v718_v4 = vmul.f32 %v12399_v3, %v12391_v46  ;;  %v990_v11 = vpop.permute.xlu1 %989 }
 0x541   :  { %10838 = vmatprep.mubr.msk.f32.mxu1 %vm83_vm0, %v718_v4 }
 0x542   :  { %10839 = vmatmul.mubr.msk.f32.vlgmr.msra.gmra.mrb[6].mxu1 %vm83_vm0, %v719_v5  ;;  %v12401_v6 = vpop.eup %12400 }
 0x543   :  { %11587 = vmatpush3.bf16.xpose.msk.msra.mxu1 %vm12990_vm5, %v11582_v41  ;;  %10852 = vmatprep.mubr.msk.f32.mxu1 %vm501_vm4, %v897_v42  ;;  %v721_v9 = vmul.f32 %v12401_v6, %v12393_v53 }
 0x546   :  { %v12403_v7 = vpop.eup %12402 }
 0x547   :  { %v720_v8 = vmul.f32 %v12403_v7, %v12395_v59 }
 0x549   :  { %10845 = vmatprep.mubr.msk.f32.mxu0 %vm83_vm0, %v720_v8 }
 0x54a   :  { %10853 = vmatmul.mubr.msk.f32.vlgmr.msra.gmra.mrb[8].mxu1 %vm501_vm4, %v899_v61  ;;  %10846 = vmatmul.mubr.msk.f32.vlgmr.msra.gmra.mrb[14].mxu0 %vm83_vm0, %v721_v9 }
 0x54b   :  { %11593 = vmatpush3.bf16.xpose.msk.msra.mxu0 %vm12990_vm5, %v11588_v57  ;;  %10859 = vmatprep.mubr.msk.f32.mxu0 %vm501_vm4, %v988_v10 }
 0x552   :  { %10860 = vmatmul.mubr.msk.f32.vlgmr.msra.gmra.mrb[16].mxu0 %vm501_vm4, %v990_v11 }
 0x615   :  { %v13046_v12 = vpop.f32.mrb[6].mxu1 }
 0x616   :  { %v13048_v13 = vpop.f32.mrb[7].mxu1 }
 0x61d   :  { %v10854_v14 = vpop.f32.mrb[8].mxu1  ;;  %v13050_v15 = vpop.f32.mrb[14].mxu0 }
 0x61e   :  { %v1079_v16 = vmul.f32 0.35355338, %v10854_v14  ;;  %v978_v17 = vpop.f32.mrb[9].mxu1  ;;  %v13052_v18 = vpop.f32.mrb[15].mxu0 }
 0x61f   :  { %v1078_v19 = vmul.f32 0.35355338, %v978_v17 }
 0x620   :  { %v1085_v20 = vsel %vm83_vm0, %v1079_v16, -inf }
 0x621   :  { %1086 = vmax.xlane.f32.xlu1 %v1085_v20  ;;  %v1082_v21 = vsel %vm83_vm0, %v1078_v19, -inf }
 0x622   :  { %1083 = vmax.xlane.f32.xlu0 %v1082_v21 }
 0x625   :  { %v10861_v22 = vpop.f32.mrb[16].mxu0 }
 0x626   :  { %v1069_v23 = vpop.f32.mrb[17].mxu0  ;;  %v1081_v25 = vmul.f32 0.35355338, %v10861_v22 }
 0x627   :  { %v1080_v24 = vmul.f32 0.35355338, %v1069_v23 }
 0x628   :  { %v1091_v29 = vsel %vm83_vm0, %v1081_v25, -inf }
 0x629   :  { %v1088_v26 = vsel %vm83_vm0, %v1080_v24, -inf }
 0x62a   :  { %1089 = vmax.xlane.f32.xlu0 %v1088_v26 }
 0x62e   :  { %1092 = vmax.xlane.f32.xlu0 %v1091_v29 }
 0x632   :  { %12097 = vrot.lane.b32.xlu1 %v12972_v47, %s14627_s2 }
 0x636   :  { %12107 = vrot.lane.b32.xlu1 %v12972_v47, %s14625_s6 }
 0x63a   :  { %1300 = vrot.lane.b32.xlu1 %v12966_v45, %s14623_s27 }
 0x644   :  { %12102 = vrot.lane.b32.xlu0 %v12982_v51, %s14627_s2  ;;  %s14693_s2 = smov 8  }
 0x6ae   :  { %v1087_v31 = vpop.xlane.xlu1 %1086 }
 0x6af   :  { %v1095_v33 = vsub.f32 %v1079_v16, %v1087_v31  ;;  %v1084_v35 = vpop.xlane.xlu0 %1083 }
 0x6b0   :  { %v1094_v37 = vsub.f32 %v1078_v19, %v1084_v35 }
 0x6b1   :  { %v1100_v39 = vmul.f32 1.442695, %v1095_v33 }
 0x6b2   :  { %v1098_v41 = vmul.f32 1.442695, %v1094_v37  ;;  %v12098_v42 = vpop.permute.xlu1 %12097 }
 0x6b3   :  { %12404 = vpow2.f32 %v1100_v39  ;;  %v12100_v44 = vunpack.i.h.bf16 %v12098_v42  ;;  %v12099_v46 = vunpack.i.l.bf16 %v12098_v42 }
 0x6b4   :  { %12406 = vpow2.f32 %v1098_v41 }
 0x6b5   :  { %v11594_v49 = vpack.c.bf16 %v12100_v44, %v12099_v46 }
 0x6b6   :  { %v12108_v52 = vpop.permute.xlu1 %12107 }
 0x6b7   :  { %v12110_v53 = vunpack.i.h.bf16 %v12108_v52  ;;  %v12109_v54 = vunpack.i.l.bf16 %v12108_v52  ;;  %11595 = vmatprep.subr.bf16.mxu1 %v11594_v49  ;;  %v1090_v56 = vpop.xlane.xlu0 %1089 }
 0x6b8   :  { %11597 = vmatpush3.bf16.msra.mxu1 %v11594_v49  ;;  %v1096_v7 = vsub.f32 %v1080_v24, %v1090_v56 }
 0x6b9   :  { %v11602_v57 = vpack.c.bf16 %v12110_v53, %v12109_v54 }
 0x6ba   :  { %v1102_v8 = vmul.f32 1.442695, %v1096_v7  ;;  %v1301_v11 = vpop.permute.xlu1 %1300 }
 0x6bb   :  { %11604 = vmatprep.subr.msk.bf16.mxu1 %vm12990_vm5, %v11602_v57  ;;  %v1093_v58 = vpop.xlane.xlu0 %1092 }
 0x6bc   :  { %v1097_v59 = vsub.f32 %v1081_v25, %v1093_v58 }
 0x6bd   :  { %v12405_v60 = vpop.eup %12404 }
 0x6be   :  { %v12407_v61 = vpop.eup %12406  ;;  %v1104_v62 = vmul.f32 1.442695, %v1097_v59  ;;  %v1109_v63 = vsel %vm83_vm0, %v12405_v60, 0.0 }
 0x6bf   :  { %1110 = vadd.xlane.f32.xlu0 %v1109_v63  ;;  %v12103_v0 = vpop.permute.xlu0 %12102  ;;  %v1106_v1 = vsel %vm83_vm0, %v12407_v61, 0.0 }
 0x6c0   :  { %12408 = vpow2.f32 %v1104_v62  ;;  %v12105_v2 = vunpack.i.h.bf16 %v12103_v0  ;;  %v12104_v3 = vunpack.i.l.bf16 %v12103_v0  ;;  %1107 = vadd.xlane.f32.xlu1 %v1106_v1 }
 0x6c1   :  { %12410 = vpow2.f32 %v1102_v8 }
 0x6c2   :  { %v11598_v4 = vpack.c.bf16 %v12105_v2, %v12104_v3 }
 0x6c4   :  { %11599 = vmatprep.subr.bf16.mxu0 %v11598_v4 }
 0x6c5   :  { %11601 = vmatpush3.bf16.msra.mxu0 %v11598_v4 }
 0x6ca   :  { %v12409_v5 = vpop.eup %12408 }
 0x6cb   :  { %v1115_v6 = vsel %vm83_vm0, %v12409_v5, 0.0  ;;  %v12411_v9 = vpop.eup %12410 }
 0x6cc   :  { %1116 = vadd.xlane.f32.xlu0 %v1115_v6  ;;  %v1112_v10 = vsel %vm83_vm0, %v12411_v9, 0.0 }
 0x6d1   :  { %1302 = vrot.lane.b32.xlu1 %v12964_v43, %s14623_s27 }
 0x6e2   :  { %12112 = vrot.lane.b32.xlu0 %v12982_v51, %s14625_s6  ;;  %s14683_s6 = sld [smem:[#allocation16_spill]] }
 0x6e6   :  { %1391 = vrot.lane.b32.xlu0 %v12976_v50, %s14623_s27 }
 0x6f5   :  { %1113 = vadd.xlane.f32.xlu1 %v1112_v10 }
 0x706   :  { %1393 = vrot.lane.b32.xlu1 %v12974_v48, %s14623_s27  ;;  %s14688_s27 = smov 112  }
 0x74c   :  { %v1111_v14 = vpop.xlane.xlu0 %1110 }
 0x74d   :  { %12412 = vrcp.f32 %v1111_v14  ;;  %v1108_v16 = vpop.xlane.xlu1 %1107 }
 0x74e   :  { %12414 = vrcp.f32 %v1108_v16 }
 0x751   :  { %v1303_v29 = vpop.permute.xlu1 %1302 }
 0x757   :  { %v12413_v17 = vpop.eup %12412 }
 0x758   :  { %v12415_v19 = vpop.eup %12414  ;;  %v1123_v22 = vmul.f32 %v12413_v17, %v12405_v60 }
 0x759   :  { %v1117_v20 = vpop.xlane.xlu0 %1116  ;;  %v1122_v21 = vmul.f32 %v12415_v19, %v12407_v61 }
 0x75a   :  { %12416 = vrcp.f32 %v1117_v20 }
 0x75b   :  { %10866 = vmatprep.mubr.msk.f32.mxu1 %vm83_vm0, %v1122_v21 }
 0x75c   :  { %10867 = vmatmul.mubr.msk.f32.vlgmr.msra.gmra.mrb[10].mxu1 %vm83_vm0, %v1123_v22 }
 0x75d   :  { %11607 = vmatpush3.bf16.xpose.msk.msra.mxu1 %vm12990_vm5, %v11602_v57  ;;  %10880 = vmatprep.mubr.msk.f32.mxu1 %vm501_vm4, %v1301_v11  ;;  %v12113_v23 = vpop.permute.xlu0 %12112 }
 0x75e   :  { %v12115_v24 = vunpack.i.h.bf16 %v12113_v23  ;;  %v12114_v25 = vunpack.i.l.bf16 %v12113_v23 }
 0x760   :  { %v11608_v26 = vpack.c.bf16 %v12115_v24, %v12114_v25 }
 0x761   :  { %v1392_v41 = vpop.permute.xlu0 %1391 }
 0x762   :  { %11610 = vmatprep.subr.msk.bf16.mxu0 %vm12990_vm5, %v11608_v26 }
 0x764   :  { %10881 = vmatmul.mubr.msk.f32.vlgmr.msra.gmra.mrb[12].mxu1 %vm501_vm4, %v1303_v29  ;;  %v12417_v33 = vpop.eup %12416 }
 0x765   :  { %v1125_v39 = vmul.f32 %v12417_v33, %v12409_v5 }
 0x782   :  { %v1114_v31 = vpop.xlane.xlu1 %1113 }
 0x783   :  { %12418 = vrcp.f32 %v1114_v31 }
 0x786   :  { %v1394_v42 = vpop.permute.xlu1 %1393 }
 0x78d   :  { %v12419_v35 = vpop.eup %12418 }
 0x78e   :  { %v1124_v37 = vmul.f32 %v12419_v35, %v12411_v9 }
 0x790   :  { %10873 = vmatprep.mubr.msk.f32.mxu0 %vm83_vm0, %v1124_v37 }
 0x791   :  { %10874 = vmatmul.mubr.msk.f32.vlgmr.msra.gmra.mrb[18].mxu0 %vm83_vm0, %v1125_v39 }
 0x792   :  { %11613 = vmatpush3.bf16.xpose.msk.msra.mxu0 %vm12990_vm5, %v11608_v26  ;;  %10887 = vmatprep.mubr.msk.f32.mxu0 %vm501_vm4, %v1392_v41 }
 0x799   :  { %10888 = vmatmul.mubr.msk.f32.vlgmr.msra.gmra.mrb[20].mxu0 %vm501_vm4, %v1394_v42 }
 0x82f   :  { %v13094_v44 = vpop.f32.mrb[10].mxu1 }
 0x830   :  { %v13096_v46 = vpop.f32.mrb[11].mxu1 }
 0x837   :  { %v10882_v49 = vpop.f32.mrb[12].mxu1 }
 0x838   :  { %v1483_v52 = vmul.f32 0.35355338, %v10882_v49  ;;  %v1382_v53 = vpop.f32.mrb[13].mxu1 }
 0x839   :  { %v1482_v54 = vmul.f32 0.35355338, %v1382_v53 }
 0x83a   :  { %v1489_v56 = vsel %vm83_vm0, %v1483_v52, -inf }
 0x83b   :  { %1490 = vmax.xlane.f32.xlu1 %v1489_v56  ;;  %v1486_v57 = vsel %vm83_vm0, %v1482_v54, -inf }
 0x83c   :  { %1487 = vmax.xlane.f32.xlu0 %v1486_v57 }
 0x84c   :  { %12117 = vrot.lane.b32.xlu1 %v12972_v47, %s14621_s7 }
 0x850   :  { %12127 = vrot.lane.b32.xlu1 %v12972_v47, %s14619_s21 }
 0x854   :  { %1704 = vrot.lane.b32.xlu1 %v12966_v45, %s14617_s28 }
 0x864   :  { %v13106_v58 = vpop.f32.mrb[18].mxu0 }
 0x865   :  { %v13108_v59 = vpop.f32.mrb[19].mxu0 }
 0x86c   :  { %v10889_v60 = vpop.f32.mrb[20].mxu0 }
 0x86d   :  { %v1473_v61 = vpop.f32.mrb[21].mxu0  ;;  %v1485_v63 = vmul.f32 0.35355338, %v10889_v60 }
 0x86e   :  { %v1484_v62 = vmul.f32 0.35355338, %v1473_v61 }
 0x86f   :  { %v1495_v1 = vsel %vm83_vm0, %v1485_v63, -inf }
 0x870   :  { %v1492_v0 = vsel %vm83_vm0, %v1484_v62, -inf }
 0x871   :  { %1493 = vmax.xlane.f32.xlu0 %v1492_v0 }
 0x875   :  { %1496 = vmax.xlane.f32.xlu0 %v1495_v1 }
 0x88b   :  { %12122 = vrot.lane.b32.xlu0 %v12982_v51, %s14621_s7  ;;  %s14689_s7 = smov 48  }
 0x8c8   :  { %v1491_v2 = vpop.xlane.xlu1 %1490 }
 0x8c9   :  { %v1499_v3 = vsub.f32 %v1483_v52, %v1491_v2  ;;  %v1488_v45 = vpop.xlane.xlu0 %1487 }
 0x8ca   :  { %v1498_v4 = vsub.f32 %v1482_v54, %v1488_v45 }
 0x8cb   :  { %v1504_v5 = vmul.f32 1.442695, %v1499_v3 }
 0x8cc   :  { %v1502_v6 = vmul.f32 1.442695, %v1498_v4  ;;  %v12118_v7 = vpop.permute.xlu1 %12117 }
 0x8cd   :  { %12420 = vpow2.f32 %v1504_v5  ;;  %v12120_v8 = vunpack.i.h.bf16 %v12118_v7  ;;  %v12119_v9 = vunpack.i.l.bf16 %v12118_v7 }
 0x8ce   :  { %12422 = vpow2.f32 %v1502_v6 }
 0x8cf   :  { %v11614_v10 = vpack.c.bf16 %v12120_v8, %v12119_v9 }
 0x8d0   :  { %v12128_v11 = vpop.permute.xlu1 %12127 }
 0x8d1   :  { %v12130_v14 = vunpack.i.h.bf16 %v12128_v11  ;;  %v12129_v16 = vunpack.i.l.bf16 %v12128_v11  ;;  %11615 = vmatprep.subr.bf16.mxu1 %v11614_v10 }
 0x8d2   :  { %11617 = vmatpush3.bf16.msra.mxu1 %v11614_v10 }
 0x8d3   :  { %v11622_v17 = vpack.c.bf16 %v12130_v14, %v12129_v16 }
 0x8d4   :  { %v1705_v52 = vpop.permute.xlu1 %1704 }
 0x8d5   :  { %11624 = vmatprep.subr.msk.bf16.mxu1 %vm12990_vm5, %v11622_v17 }
 0x8d7   :  { %v12421_v19 = vpop.eup %12420 }
 0x8d8   :  { %v12423_v20 = vpop.eup %12422  ;;  %v1513_v21 = vsel %vm83_vm0, %v12421_v19, 0.0 }
 0x8d9   :  { %1514 = vadd.xlane.f32.xlu0 %v1513_v21  ;;  %v1510_v22 = vsel %vm83_vm0, %v12423_v20, 0.0 }
 0x8da   :  { %1511 = vadd.xlane.f32.xlu1 %v1510_v22 }
 0x8eb   :  { %1706 = vrot.lane.b32.xlu1 %v12964_v43, %s14617_s28 }
 0x8fe   :  { %v1494_v23 = vpop.xlane.xlu0 %1493 }
 0x8ff   :  { %v1500_v24 = vsub.f32 %v1484_v62, %v1494_v23 }
 0x901   :  { %v1506_v25 = vmul.f32 1.442695, %v1500_v24 }
 0x902   :  { %v1497_v26 = vpop.xlane.xlu0 %1496 }
 0x903   :  { %12424 = vpow2.f32 %v1506_v25  ;;  %v1501_v29 = vsub.f32 %v1485_v63, %v1497_v26 }
 0x905   :  { %v1508_v31 = vmul.f32 1.442695, %v1501_v29 }
 0x906   :  { %v12123_v33 = vpop.permute.xlu0 %12122 }
 0x907   :  { %12426 = vpow2.f32 %v1508_v31  ;;  %v12125_v35 = vunpack.i.h.bf16 %v12123_v33  ;;  %v12124_v37 = vunpack.i.l.bf16 %v12123_v33 }
 0x909   :  { %v11618_v39 = vpack.c.bf16 %v12125_v35, %v12124_v37 }
 0x90b   :  { %11619 = vmatprep.subr.bf16.mxu0 %v11618_v39 }
 0x90c   :  { %11621 = vmatpush3.bf16.msra.mxu0 %v11618_v39 }
 0x90d   :  { %v12425_v41 = vpop.eup %12424 }
 0x90e   :  { %v1516_v42 = vsel %vm83_vm0, %v12425_v41, 0.0 }
 0x90f   :  { %1517 = vadd.xlane.f32.xlu1 %v1516_v42 }
 0x911   :  { %v12427_v49 = vpop.eup %12426 }
 0x912   :  { %v1519_v43 = vsel %vm83_vm0, %v12427_v49, 0.0 }
 0x913   :  { %1520 = vadd.xlane.f32.xlu0 %v1519_v43 }
 0x920   :  { %1797 = vrot.lane.b32.xlu1 %v12974_v48, %s14617_s28 }
 0x929   :  { %12132 = vrot.lane.b32.xlu0 %v12982_v51, %s14619_s21  ;;  %s14690_s21 = smov 72  }
 0x92d   :  { %1795 = vrot.lane.b32.xlu0 %v12976_v50, %s14617_s28  ;;  %s14682_s28 = sld [smem:[#allocation15_spill]] }
 0x966   :  { %v1515_v53 = vpop.xlane.xlu0 %1514 }
 0x967   :  { %12428 = vrcp.f32 %v1515_v53  ;;  %v1512_v54 = vpop.xlane.xlu1 %1511 }
 0x968   :  { %12430 = vrcp.f32 %v1512_v54 }
 0x96b   :  { %v1707_v48 = vpop.permute.xlu1 %1706 }
 0x971   :  { %v12429_v56 = vpop.eup %12428 }
 0x972   :  { %v12431_v57 = vpop.eup %12430  ;;  %v1527_v61 = vmul.f32 %v12429_v56, %v12421_v19 }
 0x973   :  { %v1526_v60 = vmul.f32 %v12431_v57, %v12423_v20 }
 0x975   :  { %10894 = vmatprep.mubr.msk.f32.mxu1 %vm83_vm0, %v1526_v60 }
 0x976   :  { %10895 = vmatmul.mubr.msk.f32.vlgmr.msra.gmra.mrb[14].mxu1 %vm83_vm0, %v1527_v61 }
 0x977   :  { %11627 = vmatpush3.bf16.xpose.msk.msra.mxu1 %vm12990_vm5, %v11622_v17  ;;  %10908 = vmatprep.mubr.msk.f32.mxu1 %vm501_vm4, %v1705_v52 }
 0x97e   :  { %10909 = vmatmul.mubr.msk.f32.vlgmr.msra.gmra.mrb[16].mxu1 %vm501_vm4, %v1707_v48 }
 0x99c   :  { %v1518_v50 = vpop.xlane.xlu1 %1517 }
 0x99d   :  { %12432 = vrcp.f32 %v1518_v50 }
 0x9a0   :  { %v1521_v62 = vpop.xlane.xlu0 %1520  ;;  %v1798_v7 = vpop.permute.xlu1 %1797 }
 0x9a1   :  { %12434 = vrcp.f32 %v1521_v62 }
 0x9a4   :  { %v12133_v63 = vpop.permute.xlu0 %12132 }
 0x9a5   :  { %v12135_v0 = vunpack.i.h.bf16 %v12133_v63  ;;  %v12134_v1 = vunpack.i.l.bf16 %v12133_v63 }
 0x9a7   :  { %v12433_v2 = vpop.eup %12432  ;;  %v11628_v3 = vpack.c.bf16 %v12135_v0, %v12134_v1 }
 0x9a8   :  { %v1528_v45 = vmul.f32 %v12433_v2, %v12425_v41  ;;  %v1796_v6 = vpop.permute.xlu0 %1795 }
 0x9a9   :  { %11630 = vmatprep.subr.msk.bf16.mxu0 %vm12990_vm5, %v11628_v3 }
 0x9aa   :  { %10901 = vmatprep.mubr.msk.f32.mxu0 %vm83_vm0, %v1528_v45 }
 0x9ab   :  { %v12435_v4 = vpop.eup %12434 }
 0x9ac   :  { %v1529_v5 = vmul.f32 %v12435_v4, %v12427_v49 }
 0x9ae   :  { %10902 = vmatmul.mubr.msk.f32.vlgmr.msra.gmra.mrb[22].mxu0 %vm83_vm0, %v1529_v5 }
 0x9af   :  { %11633 = vmatpush3.bf16.xpose.msk.msra.mxu0 %vm12990_vm5, %v11628_v3  ;;  %10915 = vmatprep.mubr.msk.f32.mxu0 %vm501_vm4, %v1796_v6 }
 0x9b6   :  { %10916 = vmatmul.mubr.msk.f32.vlgmr.msra.gmra.mrb[24].mxu0 %vm501_vm4, %v1798_v7 }
 0xa49   :  { %v10896_v8 = vpop.f32.mrb[14].mxu1 }
 0xa4a   :  { %v1608_v9 = vpop.f32.mrb[15].mxu1 }
 0xa51   :  { %v10910_v10 = vpop.f32.mrb[16].mxu1 }
 0xa52   :  { %v1887_v11 = vmul.f32 0.35355338, %v10910_v10  ;;  %v1786_v14 = vpop.f32.mrb[17].mxu1 }
 0xa53   :  { %v1886_v16 = vmul.f32 0.35355338, %v1786_v14 }
 0xa54   :  { %v1893_v17 = vsel %vm83_vm0, %v1887_v11, -inf }
 0xa55   :  { %1894 = vmax.xlane.f32.xlu1 %v1893_v17  ;;  %v1890_v19 = vsel %vm83_vm0, %v1886_v16, -inf }
 0xa56   :  { %1891 = vmax.xlane.f32.xlu0 %v1890_v19  ;;  %v2169_v19 = vld [vmem:[%s14682_s28] sm:$0xff] }
 0xa81   :  { %v13144_v20 = vpop.f32.mrb[22].mxu0 }
 0xa82   :  { %v13146_v21 = vpop.f32.mrb[23].mxu0 }
 0xa89   :  { %v10917_v22 = vpop.f32.mrb[24].mxu0 }
 0xa8a   :  { %v1877_v23 = vpop.f32.mrb[25].mxu0  ;;  %v1889_v25 = vmul.f32 0.35355338, %v10917_v22  ;;  %v2170_v22 = vld [vmem:[%s14682_s28 + $0x8] sm:$0xff] }
 0xa8b   :  { %v1888_v24 = vmul.f32 0.35355338, %v1877_v23  ;;  %v2171_v23 = vld [vmem:[%s14682_s28 + $0x10] sm:$0xff] }
 0xa8c   :  { %v1899_v29 = vsel %vm83_vm0, %v1889_v25, -inf }
 0xa8d   :  { %v1896_v26 = vsel %vm83_vm0, %v1888_v24, -inf }
 0xa8e   :  { %1897 = vmax.xlane.f32.xlu0 %v1896_v26 }
 0xa92   :  { %1900 = vmax.xlane.f32.xlu0 %v1899_v29 }
 0xae2   :  { %v1895_v31 = vpop.xlane.xlu1 %1894 }
 0xae3   :  { %v1903_v33 = vsub.f32 %v1887_v11, %v1895_v31  ;;  %v1892_v35 = vpop.xlane.xlu0 %1891 }
 0xae4   :  { %v1902_v37 = vsub.f32 %v1886_v16, %v1892_v35 }
 0xae5   :  { %v1908_v39 = vmul.f32 1.442695, %v1903_v33 }
 0xae6   :  { %v1906_v41 = vmul.f32 1.442695, %v1902_v37 }
 0xae7   :  { %12436 = vpow2.f32 %v1908_v39 }
 0xae8   :  { %12438 = vpow2.f32 %v1906_v41 }
 0xaf1   :  { %v12437_v42 = vpop.eup %12436 }
 0xaf2   :  { %v12439_v49 = vpop.eup %12438  ;;  %v1917_v43 = vsel %vm83_vm0, %v12437_v42, 0.0 }
 0xaf3   :  { %1918 = vadd.xlane.f32.xlu0 %v1917_v43  ;;  %v1914_v52 = vsel %vm83_vm0, %v12439_v49, 0.0 }
 0xaf4   :  { %1915 = vadd.xlane.f32.xlu1 %v1914_v52 }
 0xb1b   :  { %v1898_v53 = vpop.xlane.xlu0 %1897 }
 0xb1c   :  { %v1904_v54 = vsub.f32 %v1888_v24, %v1898_v53  ;;  %v11642_v24 = vpack.c.bf16 %v2170_v22, %v2169_v19 }
 0xb1e   :  { %v1910_v56 = vmul.f32 1.442695, %v1904_v54 }
 0xb1f   :  { %v1901_v57 = vpop.xlane.xlu0 %1900 }
 0xb20   :  { %12440 = vpow2.f32 %v1910_v56  ;;  %v1905_v60 = vsub.f32 %v1889_v25, %v1901_v57  ;;  %v2172_v25 = vld [vmem:[%s14682_s28 + $0x18] sm:$0xff] }
 0xb21   :  { %v11646_v26 = vpack.c.bf16 %v2172_v25, %v2171_v23 }
 0xb22   :  { %v1912_v61 = vmul.f32 1.442695, %v1905_v60 }
 0xb24   :  { %12442 = vpow2.f32 %v1912_v61 }
 0xb2a   :  { %v12441_v48 = vpop.eup %12440 }
 0xb2b   :  { %v1920_v50 = vsel %vm83_vm0, %v12441_v48, 0.0 }
 0xb2c   :  { %1921 = vadd.xlane.f32.xlu1 %v1920_v50 }
 0xb2e   :  { %v12443_v62 = vpop.eup %12442 }
 0xb2f   :  { %v1923_v63 = vsel %vm83_vm0, %v12443_v62, 0.0 }
 0xb30   :  { %1924 = vadd.xlane.f32.xlu0 %v1923_v63 }
 0xb3d   :  { %12137 = vrot.lane.b32.xlu1 %v12972_v47, %s14615_s29 }
 0xb41   :  { %2112 = vrot.lane.b32.xlu1 %v13096_v46, %s14635_s3 }
 0xb45   :  { %2114 = vrot.lane.b32.xlu1 %v13094_v44, %s14635_s3 }
 0xb46   :  { %12142 = vrot.lane.b32.xlu0 %v12982_v51, %s14615_s29  ;;  %s14631_s29 = smov 24  }
 0xb49   :  { %2130 = vrot.lane.b32.xlu1 %v10896_v8, %s14633_s0 }
 0xb4a   :  { %2128 = vrot.lane.b32.xlu0 %v1608_v9, %s14633_s0 }
 0xb80   :  { %v1919_v47 = vpop.xlane.xlu0 %1918 }
 0xb81   :  { %v1916_v0 = vpop.xlane.xlu1 %1915 }
 0xb82   :  { %12444 = vrcp.f32 %v1916_v0 }
 0xb83   :  { %12446 = vrcp.f32 %v1919_v47 }
 0xb8c   :  { %v12445_v1 = vpop.eup %12444 }
 0xb8d   :  { %v1930_v2 = vmul.f32 %v12445_v1, %v12439_v49  ;;  %v12447_v5 = vpop.eup %12446 }
 0xb8e   :  { %v1931_v10 = vmul.f32 %v12447_v5, %v12437_v42 }
 0xb8f   :  { %10922 = vmatprep.mubr.msk.f32.mxu1 %vm83_vm0, %v1930_v2 }
 0xbb9   :  { %v1922_v46 = vpop.xlane.xlu1 %1921 }
 0xbba   :  { %12448 = vrcp.f32 %v1922_v46 }
 0xbbd   :  { %v12138_v3 = vpop.permute.xlu1 %12137  ;;  %v1925_v44 = vpop.xlane.xlu0 %1924 }
 0xbbe   :  { %v12140_v45 = vunpack.i.h.bf16 %v12138_v3  ;;  %v12139_v4 = vunpack.i.l.bf16 %v12138_v3  ;;  %12450 = vrcp.f32 %v1925_v44 }
 0xbc0   :  { %v11634_v51 = vpack.c.bf16 %v12140_v45, %v12139_v4 }
 0xbc1   :  { %v12143_v6 = vpop.permute.xlu0 %12142  ;;  %v2113_v37 = vpop.permute.xlu1 %2112 }
 0xbc2   :  { %v12145_v7 = vunpack.i.h.bf16 %v12143_v6  ;;  %v12144_v8 = vunpack.i.l.bf16 %v12143_v6  ;;  %11635 = vmatprep.subr.bf16.mxu1 %v11634_v51 }
 0xbc3   :  { %11637 = vmatpush3.bf16.msra.mxu1 %v11634_v51 }
 0xbc4   :  { %v12449_v9 = vpop.eup %12448  ;;  %v11638_v11 = vpack.c.bf16 %v12145_v7, %v12144_v8  ;;  %11643 = vmatprep.subr.bf16.mxu1 %v11642_v24 }
 0xbc5   :  { %v1932_v14 = vmul.f32 %v12449_v9, %v12441_v48  ;;  %v2115_v39 = vpop.permute.xlu1 %2114  ;;  %v2129_v42 = vpop.permute.xlu0 %2128 }
 0xbc6   :  { %10923 = vmatmul.mubr.msk.f32.vlgmr.msra.gmra.mrb[18].mxu1 %vm83_vm0, %v1931_v10  ;;  %11639 = vmatprep.subr.bf16.mxu0 %v11638_v11  ;;  %v2157_v49 = vsel %vm501_vm4, %v13046_v12, %v2115_v39 }
 0xbc7   :  { %11641 = vmatpush3.bf16.msra.mxu0 %v11638_v11  ;;  %10929 = vmatprep.mubr.msk.f32.mxu0 %vm83_vm0, %v1932_v14 }
 0xbc8   :  { %v12451_v16 = vpop.eup %12450  ;;  %11645 = vmatpush3.bf16.msra.mxu1 %v11642_v24 }
 0xbc9   :  { %v1933_v17 = vmul.f32 %v12451_v16, %v12443_v62  ;;  %11647 = vmatprep.subr.bf16.mxu1 %v11646_v26  ;;  %v2131_v41 = vpop.permute.xlu1 %2130 }
 0xbcb   :  { %10930 = vmatmul.mubr.msk.f32.vlgmr.msra.gmra.mrb[26].mxu0 %vm83_vm0, %v1933_v17 }
 0xbcc   :  { %11649 = vmatpush3.bf16.msra.mxu1 %v11646_v26 }
 0xc99   :  { %v10924_v29 = vpop.f32.mrb[18].mxu1 }
 0xc9a   :  { %2146 = vrot.lane.b32.xlu1 %v10924_v29, %s14631_s29  ;;  %v2012_v31 = vpop.f32.mrb[19].mxu1 }
 0xc9b   :  { %2144 = vrot.lane.b32.xlu0 %v2012_v31, %s14631_s29 }
 0xc9e   :  { %2118 = vrot.lane.b32.xlu1 %v13106_v58, %s14635_s3  ;;  %v10931_v33 = vpop.f32.mrb[26].mxu0  ;;  %v2156_v58 = vsel %vm501_vm4, %v13048_v13, %v2113_v37 }
 0xc9f   :  { %2116 = vrot.lane.b32.xlu0 %v13108_v59, %s14635_s3  ;;  %v2099_v35 = vpop.f32.mrb[27].mxu0  ;;  %s14685_s3 = smov 120  }
 0xca2   :  { %2134 = vrot.lane.b32.xlu1 %v13144_v20, %s14633_s0  ;;  %v2160_v20 = vsel %vm83_vm0, %v2156_v58, %v2129_v42  ;;  %v2357_v42 = vld [vmem:[%s14597_s12 + $0x8] sm:$0xff] }
 0xca3   :  { %2132 = vrot.lane.b32.xlu0 %v13146_v21, %s14633_s0  ;;  %v2161_v21 = vsel %vm83_vm0, %v2157_v49, %v2131_v41  ;;  %v2356_v41 = vld [vmem:[%s14597_s12] sm:$0xff]  ;;  %v2359_v49 = vld [vmem:[%s14597_s12 + $0x18] sm:$0xff]  ;;  %s14686_s0 = smov 56  }
 0xca4   :  { %v11650_v58 = vpack.c.bf16 %v2357_v42, %v2356_v41 }
 0xca6   :  { %2150 = vrot.lane.b32.xlu1 %v10931_v33, %s14631_s29  ;;  %11651 = vmatprep.subr.bf16.mxu0 %v11650_v58 }
 0xca7   :  { %2148 = vrot.lane.b32.xlu0 %v2099_v35, %s14631_s29  ;;  %11653 = vmatpush3.bf16.msra.mxu0 %v11650_v58  ;;  %s14687_s29 = smov 80  }
 0xd0c   :  { %v2147_v59 = vpop.permute.xlu1 %2146 }
 0xd0d   :  { %v2145_v43 = vpop.permute.xlu0 %2144  ;;  %v2166_v53 = vsel %vm2164_vm6, %v2161_v21, %v2147_v59  ;;  %v2358_v59 = vld [vmem:[%s14597_s12 + $0x10] sm:$0xff]  ;;  %v2477_v21 = vld [vmem:[%s14599_s14 + $0x8] sm:$0xff] }
 0xd0e   :  { %v2165_v52 = vsel %vm2164_vm6, %v2160_v20, %v2145_v43  ;;  %v11654_v20 = vpack.c.bf16 %v2359_v49, %v2358_v59  ;;  %v2476_v43 = vld [vmem:[%s14599_s14] sm:$0xff] }
 0xd0f   :  { %10940 = vmatprep.mubr.msk.f32.mxu1 %vm397_vm3, %v2165_v52  ;;  %v2478_v52 = vld [vmem:[%s14599_s14 + $0x10] sm:$0xff] }
 0xd10   :  { %v2119_v54 = vpop.permute.xlu1 %2118  ;;  %10941 = vmatmul.mubr.msk.f32.vlgmr.msra.gmra.mrb[20].mxu1 %vm397_vm3, %v2166_v53  ;;  %11655 = vmatprep.subr.bf16.mxu0 %v11654_v20  ;;  %v11658_v53 = vpack.c.bf16 %v2477_v21, %v2476_v43  ;;  %v10012_v43 = vld [vmem:[%s14600_s15] ss:$0 sm:$0xff]  ;;  %s14697_s15 = smov 64  }
 0xd11   :  { %v2117_v56 = vpop.permute.xlu0 %2116  ;;  %v2159_v61 = vsel %vm501_vm4, %v13050_v15, %v2119_v54  ;;  %11657 = vmatpush3.bf16.msra.mxu0 %v11654_v20  ;;  %v2479_v54 = vld [vmem:[%s14599_s14 + $0x18] sm:$0xff] }
 0xd12   :  { %v2158_v12 = vsel %vm501_vm4, %v13052_v18, %v2117_v56  ;;  %v10000_v18 = vld [vmem:[%s14683_s6] ss:$0 sm:$0xff]  ;;  %v11662_v56 = vpack.c.bf16 %v2479_v54, %v2478_v52  ;;  %11659 = vmatprep.subr.bf16.mxu1 %v11658_v53 }
 0xd13   :  { %11661 = vmatpush3.bf16.msra.mxu1 %v11658_v53 }
 0xd14   :  { %v2135_v13 = vpop.permute.xlu1 %2134  ;;  %11663 = vmatprep.subr.bf16.mxu1 %v11662_v56 }
 0xd15   :  { %v2133_v57 = vpop.permute.xlu0 %2132  ;;  %v2163_v62 = vsel %vm83_vm0, %v2159_v61, %v2135_v13 }
 0xd16   :  { %v2162_v48 = vsel %vm83_vm0, %v2158_v12, %v2133_v57 }
 0xd17   :  { %11665 = vmatpush3.bf16.msra.mxu1 %v11662_v56 }
 0xd18   :  { %v2151_v60 = vpop.permute.xlu1 %2150 }
 0xd19   :  { %v2149_v50 = vpop.permute.xlu0 %2148  ;;  %v2168_v0 = vsel %vm2164_vm6, %v2163_v62, %v2151_v60 }
 0xd1a   :  { %v2167_v63 = vsel %vm2164_vm6, %v2162_v48, %v2149_v50 }
 0xd1b   :  { %10943 = vmatprep.mubr.msk.f32.mxu1 %vm397_vm3, %v2167_v63 }
 0xd1c   :  { %10944 = vmatmul.mubr.msk.f32.gmra.mrb[22].mxu1 %vm397_vm3, %v2168_v0  ;;  %v10005_v0 = vld [vmem:[%s14593_s8] ss:$0 sm:$0xff] }
 0xde3   :  { %v10942_v1 = vpop.f32.mrb[20].mxu1 }
 0xde4   :  { %v2264_v2 = vadd.f32 %v10942_v1, %v10000_v18  ;;  %v2258_v15 = vpop.f32.mrb[21].mxu1 }
 0xde5   :  { %v2259_v47 = vadd.f32 %v10000_v18, %v2258_v15 }
 0xde6   :  { %v2278_v46 = vadd.f32 %v2264_v2, %v12939_v28 }
 0xde7   :  { %v2277_v3 = vadd.f32 %v2259_v47, %v12937_v27 }
 0xde8   :  { %v2286_v44 = vsel %vm397_vm3, %v2278_v46, 0.0 }
 0xde9   :  { %2287 = vadd.xlane.f32.xlu1 %v2286_v44  ;;  %v2283_v45 = vsel %vm397_vm3, %v2277_v3, 0.0 }
 0xdea   :  { %2284 = vadd.xlane.f32.xlu0 %v2283_v45 }
 0xdef   :  { %v10945_v4 = vpop.f32.mrb[22].mxu1 }
 0xdf0   :  { %v2268_v51 = vpop.f32.mrb[23].mxu1  ;;  %v2274_v5 = vadd.f32 %v10945_v4, %v10000_v18 }
 0xdf1   :  { %v2269_v6 = vadd.f32 %v10000_v18, %v2268_v51 }
 0xdf2   :  { %v2280_v9 = vadd.f32 %v2274_v5, %v12943_v30 }
 0xdf3   :  { %v2279_v7 = vadd.f32 %v2269_v6, %v12947_v32 }
 0xdf4   :  { %v2292_v28 = vsel %vm397_vm3, %v2280_v9, 0.0 }
 0xdf5   :  { %v2289_v8 = vsel %vm397_vm3, %v2279_v7, 0.0 }
 0xdf6   :  { %2290 = vadd.xlane.f32.xlu0 %v2289_v8 }
 0xdfa   :  { %2293 = vadd.xlane.f32.xlu0 %v2292_v28 }
 0xe76   :  { %v2288_v27 = vpop.xlane.xlu1 %2287 }
 0xe77   :  { %v2297_v10 = vmul.f32 0.03125, %v2288_v27  ;;  %v2285_v11 = vpop.xlane.xlu0 %2284 }
 0xe78   :  { %v2296_v14 = vmul.f32 0.03125, %v2285_v11 }
 0xe79   :  { %v2301_v16 = vsub.f32 %v2278_v46, %v2297_v10 }
 0xe7a   :  { %v2300_v17 = vsub.f32 %v2277_v3, %v2296_v14  ;;  %v10006_v3 = vld [vmem:[%s14594_s9] ss:$0 sm:$0xff] }
 0xe7b   :  { %v2305_v19 = vmul.f32 %v2301_v16, %v2301_v16  ;;  %v2480_v14 = vld [vmem:[%s14599_s14 + $0x20] sm:$0xff] }
 0xe7c   :  { %v2304_v22 = vmul.f32 %v2300_v17, %v2300_v17 }
 0xe7d   :  { %v2311_v23 = vsel %vm397_vm3, %v2305_v19, 0.0  ;;  %v2482_v19 = vld [vmem:[%s14599_s14 + $0x30] sm:$0xff] }
 0xe7e   :  { %2312 = vadd.xlane.f32.xlu0 %v2311_v23  ;;  %v2308_v32 = vsel %vm397_vm3, %v2304_v22, 0.0  ;;  %v2483_v22 = vld [vmem:[%s14599_s14 + $0x38] sm:$0xff] }
 0xe7f   :  { %2309 = vadd.xlane.f32.xlu1 %v2308_v32  ;;  %v11670_v23 = vpack.c.bf16 %v2483_v22, %v2482_v19  ;;  %v10007_v32 = vld [vmem:[%s14598_s13] ss:$0 sm:$0xff]  ;;  %v10021_v22 = vld [vmem:[%s14677_s1 + $0x30] sm:$0xff] }
 0xe83   :  { %v2291_v24 = vpop.xlane.xlu0 %2290 }
 0xe84   :  { %v2298_v30 = vmul.f32 0.03125, %v2291_v24 }
 0xe86   :  { %v2302_v25 = vsub.f32 %v2279_v7, %v2298_v30 }
 0xe87   :  { %v2294_v26 = vpop.xlane.xlu0 %2293 }
 0xe88   :  { %v2299_v29 = vmul.f32 0.03125, %v2294_v26  ;;  %v2306_v31 = vmul.f32 %v2302_v25, %v2302_v25 }
 0xe8a   :  { %v2303_v33 = vsub.f32 %v2280_v9, %v2299_v29  ;;  %v2314_v35 = vsel %vm397_vm3, %v2306_v31, 0.0 }
 0xe8b   :  { %2315 = vadd.xlane.f32.xlu1 %v2314_v35 }
 0xe8c   :  { %v2307_v37 = vmul.f32 %v2303_v33, %v2303_v33 }
 0xe8e   :  { %v2317_v39 = vsel %vm397_vm3, %v2307_v37, 0.0 }
 0xe8f   :  { %2318 = vadd.xlane.f32.xlu0 %v2317_v39 }
 0xf0b   :  { %v2313_v13 = vpop.xlane.xlu0 %2312 }
 0xf0c   :  { %v2321_v57 = vmul.f32 0.03125, %v2313_v13  ;;  %v2310_v12 = vpop.xlane.xlu1 %2309 }
 0xf0d   :  { %v2320_v60 = vmul.f32 0.03125, %v2310_v12 }
 0xf0e   :  { %v2325_v61 = vadd.f32 1e-05, %v2321_v57 }
 0xf0f   :  { %v2324_v48 = vadd.f32 1e-05, %v2320_v60 }
 0xf10   :  { %12452 = vrsqrt.f32 %v2325_v61 }
 0xf11   :  { %12454 = vrsqrt.f32 %v2324_v48 }
 0xf18   :  { %v2316_v50 = vpop.xlane.xlu1 %2315 }
 0xf19   :  { %v2322_v62 = vmul.f32 0.03125, %v2316_v50 }
 0xf1a   :  { %v12453_v63 = vpop.eup %12452 }
 0xf1b   :  { %v12455_v18 = vpop.eup %12454  ;;  %v2333_v1 = vmul.f32 %v12453_v63, %v2301_v16  ;;  %v2326_v2 = vadd.f32 1e-05, %v2322_v62  ;;  %v2481_v16 = vld [vmem:[%s14599_s14 + $0x28] sm:$0xff] }
 0xf1c   :  { %v2319_v15 = vpop.xlane.xlu0 %2318  ;;  %v2332_v47 = vmul.f32 %v12455_v18, %v2300_v17  ;;  %v11666_v17 = vpack.c.bf16 %v2481_v16, %v2480_v14  ;;  %v10019_v16 = vld [vmem:[%s14677_s1 + $0x20] sm:$0xff] }
 0xf1d   :  { %12456 = vrsqrt.f32 %v2326_v2  ;;  %v2323_v46 = vmul.f32 0.03125, %v2319_v15  ;;  %v2343_v44 = vmul.f32 %v10005_v0, %v2333_v1 }
 0xf1e   :  { %v2342_v45 = vmul.f32 %v10005_v0, %v2332_v47  ;;  %11667 = vmatprep.subr.bf16.mxu1 %v11666_v17 }
 0xf1f   :  { %v2327_v4 = vadd.f32 1e-05, %v2323_v46  ;;  %v2353_v5 = vadd.f32 %v10006_v3, %v2343_v44  ;;  %11669 = vmatpush3.bf16.msra.mxu1 %v11666_v17  ;;  %v10020_v17 = vld [vmem:[%s14677_s1 + $0x28] sm:$0xff] }
 0xf20   :  { %v2352_v51 = vadd.f32 %v10006_v3, %v2342_v45  ;;  %11671 = vmatprep.subr.bf16.mxu1 %v11670_v23  ;;  %v11674_v19 = vpack.c.bf16 %v10020_v17, %v10019_v16 }
 0xf21   :  { %12458 = vrsqrt.f32 %v2327_v4 }
 0xf22   :  { %10954 = vmatprep.mubr.msk.f32.mxu0 %vm397_vm3, %v2352_v51  ;;  %11675 = vmatprep.subr.bf16.mxu0 %v11674_v19 }
 0xf23   :  { %10955 = vmatmul.mubr.msk.f32.vlgmr.msra.gmra.mrb[28].mxu0 %vm397_vm3, %v2353_v5  ;;  %11673 = vmatpush3.bf16.msra.mxu1 %v11670_v23  ;;  %v10022_v23 = vld [vmem:[%s14677_s1 + $0x38] sm:$0xff] }
 0xf24   :  { %11677 = vmatpush3.bf16.msra.mxu0 %v11674_v19 }
 0xf27   :  { %v12457_v6 = vpop.eup %12456 }
 0xf28   :  { %v2334_v7 = vmul.f32 %v12457_v6, %v2302_v25 }
 0xf2a   :  { %v2344_v8 = vmul.f32 %v10005_v0, %v2334_v7 }
 0xf2b   :  { %v12459_v9 = vpop.eup %12458 }
 0xf2c   :  { %v2354_v28 = vadd.f32 %v10006_v3, %v2344_v8  ;;  %v2335_v27 = vmul.f32 %v12459_v9, %v2303_v33 }
 0xf2e   :  { %10957 = vmatprep.mubr.msk.f32.mxu0 %vm397_vm3, %v2354_v28  ;;  %v2345_v10 = vmul.f32 %v10005_v0, %v2335_v27 }
 0xf30   :  { %v2355_v11 = vadd.f32 %v10006_v3, %v2345_v10 }
 0xf32   :  { %10958 = vmatmul.mubr.msk.f32.gmra.mrb[30].mxu0 %vm397_vm3, %v2355_v11 }
 0xff6   :  { %v10956_v24 = vpop.f32.mrb[28].mxu0 }
 0xff7   :  { %v2451_v30 = vadd.f32 %v10956_v24, %v10007_v32  ;;  %v2445_v25 = vpop.f32.mrb[29].mxu0 }
 0xff8   :  { %v2446_v26 = vadd.f32 %v10007_v32, %v2445_v25 }
 0xff9   :  { %v2469_v29 = vmul.f32 0.01, %v2451_v30  ;;  %vm2465_vm7 = vcmp.gt.f32.partialorder %v2451_v30, 0.0 }
 0xffa   :  { %vm2464_vm8 = vcmp.gt.f32.partialorder %v2446_v26, 0.0  ;;  %v2468_v31 = vmul.f32 0.01, %v2446_v26 }
 0xffb   :  { %v2473_v35 = vsel %vm2465_vm7, %v2451_v30, %v2469_v29 }
 0xffc   :  { %v2472_v33 = vsel %vm2464_vm8, %v2446_v26, %v2468_v31 }
 0xffd   :  { %10976 = vmatprep.mubr.msk.f32.mxu1 %vm2491_vm9, %v2472_v33 }
 0xffe   :  { %10977 = vmatmul.mubr.msk.f32.vlgmr.msra.gmra.mrb[24].mxu1 %vm2491_vm9, %v2473_v35 }
0x1005   :  { %v10959_v37 = vpop.f32.mrb[30].mxu0 }
0x1006   :  { %v2461_v39 = vadd.f32 %v10959_v37, %v10007_v32  ;;  %v2455_v41 = vpop.f32.mrb[31].mxu0  ;;  %v10017_v37 = vld [vmem:[%s14595_s10] ss:$0 sm:$0xff]  ;;  %s14696_s10 = smov 96  }
0x1007   :  { %v2456_v42 = vadd.f32 %v10007_v32, %v2455_v41  ;;  %v11678_v32 = vpack.c.bf16 %v10022_v23, %v10021_v22 }
0x1008   :  { %v2471_v58 = vmul.f32 0.01, %v2461_v39  ;;  %vm2467_vm10 = vcmp.gt.f32.partialorder %v2461_v39, 0.0 }
0x1009   :  { %vm2466_vm11 = vcmp.gt.f32.partialorder %v2456_v42, 0.0  ;;  %v2470_v59 = vmul.f32 0.01, %v2456_v42  ;;  %11679 = vmatprep.subr.bf16.mxu0 %v11678_v32 }
0x100a   :  { %v2475_v20 = vsel %vm2467_vm10, %v2461_v39, %v2471_v58  ;;  %11681 = vmatpush3.bf16.msra.mxu0 %v11678_v32  ;;  %vm12770_vm10 = vmmov 1  }
0x100b   :  { %v2474_v49 = vsel %vm2466_vm11, %v2456_v42, %v2470_v59 }
0x100c   :  { %10979 = vmatprep.mubr.msk.f32.mxu1 %vm2491_vm9, %v2474_v49 }
0x100d   :  { %10980 = vmatmul.mubr.msk.f32.gmra.mrb[26].mxu1 %vm2491_vm9, %v2475_v20 }
0x10d1   :  { %v10978_v21 = vpop.f32.mrb[24].mxu1 }
0x10d2   :  { %v2576_v52 = vadd.f32 %v10978_v21, %v10012_v43  ;;  %v2570_v53 = vpop.f32.mrb[25].mxu1 }
0x10d3   :  { %v2571_v54 = vadd.f32 %v10012_v43, %v2570_v53 }
0x10d4   :  { %v2590_v56 = vadd.f32 %v2576_v52, %v2353_v5 }
0x10d5   :  { %v2589_v13 = vadd.f32 %v2571_v54, %v2352_v51 }
0x10d6   :  { %v2598_v57 = vsel %vm397_vm3, %v2590_v56, 0.0 }
0x10d7   :  { %2599 = vadd.xlane.f32.xlu0 %v2598_v57  ;;  %v2595_v12 = vsel %vm397_vm3, %v2589_v13, 0.0 }
0x10d8   :  { %2596 = vadd.xlane.f32.xlu1 %v2595_v12 }
0x10e0   :  { %v10981_v60 = vpop.f32.mrb[26].mxu1 }
0x10e1   :  { %v2586_v61 = vadd.f32 %v10981_v60, %v10012_v43  ;;  %v2580_v48 = vpop.f32.mrb[27].mxu1 }
0x10e2   :  { %v2581_v50 = vadd.f32 %v10012_v43, %v2580_v48  ;;  %v10018_v43 = vld [vmem:[%s14596_s11] ss:$0 sm:$0xff]  ;;  %s14698_s11 = sld [smem:[#allocation19_spill]] }
0x10e3   :  { %v2592_v62 = vadd.f32 %v2586_v61, %v2355_v11 }
0x10e4   :  { %v2591_v63 = vadd.f32 %v2581_v50, %v2354_v28 }
0x10e5   :  { %v2604_v0 = vsel %vm397_vm3, %v2592_v62, 0.0 }
0x10e6   :  { %2605 = vadd.xlane.f32.xlu0 %v2604_v0  ;;  %v2601_v18 = vsel %vm397_vm3, %v2591_v63, 0.0 }
0x10e7   :  { %2602 = vadd.xlane.f32.xlu1 %v2601_v18 }
0x1164   :  { %v2600_v1 = vpop.xlane.xlu0 %2599 }
0x1165   :  { %v2608_v2 = vmul.f32 0.03125, %v2600_v1  ;;  %v2597_v15 = vpop.xlane.xlu1 %2596 }
0x1166   :  { %v2607_v47 = vmul.f32 0.03125, %v2597_v15 }
0x1167   :  { %v2612_v46 = vsub.f32 %v2590_v56, %v2608_v2 }
0x1168   :  { %v2611_v3 = vsub.f32 %v2589_v13, %v2607_v47 }
0x1169   :  { %v2616_v44 = vmul.f32 %v2612_v46, %v2612_v46 }
0x116a   :  { %v2615_v45 = vmul.f32 %v2611_v3, %v2611_v3 }
0x116b   :  { %v2622_v4 = vsel %vm397_vm3, %v2616_v44, 0.0 }
0x116c   :  { %2623 = vadd.xlane.f32.xlu0 %v2622_v4  ;;  %v2619_v51 = vsel %vm397_vm3, %v2615_v45, 0.0 }
0x116d   :  { %2620 = vadd.xlane.f32.xlu1 %v2619_v51 }
0x1173   :  { %v2606_v5 = vpop.xlane.xlu0 %2605 }
0x1174   :  { %v2610_v6 = vmul.f32 0.03125, %v2606_v5  ;;  %v2603_v7 = vpop.xlane.xlu1 %2602 }
0x1175   :  { %v2609_v8 = vmul.f32 0.03125, %v2603_v7 }
0x1176   :  { %v2614_v9 = vsub.f32 %v2592_v62, %v2610_v6 }
0x1177   :  { %v2613_v28 = vsub.f32 %v2591_v63, %v2609_v8  ;;  %v10024_v63 = vld [vmem:[%s14679_s30 + $0x1] ss:$0 sm:$0xff] }
0x1178   :  { %v2618_v27 = vmul.f32 %v2614_v9, %v2614_v9 }
0x1179   :  { %v2617_v10 = vmul.f32 %v2613_v28, %v2613_v28 }
0x117a   :  { %v2628_v11 = vsel %vm397_vm3, %v2618_v27, 0.0 }
0x117b   :  { %2629 = vadd.xlane.f32.xlu0 %v2628_v11  ;;  %v2625_v14 = vsel %vm397_vm3, %v2617_v10, 0.0 }
0x117c   :  { %2626 = vadd.xlane.f32.xlu1 %v2625_v14 }
0x11f9   :  { %v2624_v24 = vpop.xlane.xlu0 %2623 }
0x11fa   :  { %v2632_v30 = vmul.f32 0.03125, %v2624_v24  ;;  %v2621_v25 = vpop.xlane.xlu1 %2620 }
0x11fb   :  { %v2631_v26 = vmul.f32 0.03125, %v2621_v25 }
0x11fc   :  { %v2636_v29 = vadd.f32 1e-05, %v2632_v30 }
0x11fd   :  { %v2635_v31 = vadd.f32 1e-05, %v2631_v26 }
0x11fe   :  { %12460 = vrsqrt.f32 %v2636_v29 }
0x11ff   :  { %12462 = vrsqrt.f32 %v2635_v31 }
0x1208   :  { %v12461_v33 = vpop.eup %12460  ;;  %v2630_v35 = vpop.xlane.xlu0 %2629 }
0x1209   :  { %v12463_v39 = vpop.eup %12462  ;;  %v2644_v41 = vmul.f32 %v12461_v33, %v2612_v46  ;;  %v2634_v42 = vmul.f32 0.03125, %v2630_v35  ;;  %v2627_v58 = vpop.xlane.xlu1 %2626 }
0x120a   :  { %v2633_v59 = vmul.f32 0.03125, %v2627_v58  ;;  %v2643_v49 = vmul.f32 %v12463_v39, %v2611_v3 }
0x120b   :  { %v2638_v20 = vadd.f32 1e-05, %v2634_v42  ;;  %v2654_v21 = vmul.f32 %v10017_v37, %v2644_v41 }
0x120c   :  { %v2637_v52 = vadd.f32 1e-05, %v2633_v59  ;;  %v2653_v53 = vmul.f32 %v10017_v37, %v2643_v49 }
0x120d   :  { %12464 = vrsqrt.f32 %v2638_v20  ;;  %v13311_v56 = vadd.f32 %v10018_v43, %v2654_v21 }
0x120e   :  { %12466 = vrsqrt.f32 %v2637_v52  ;;  %v13309_v54 = vadd.f32 %v10018_v43, %v2653_v53 }
0x1210   :  { %10990 = vmatprep.mubr.msk.f32.mxu0 %vm397_vm3, %v13309_v54 }
0x1211   :  { %10991 = vmatmul.mubr.msk.f32.vlgmr.msra.gmra.mrb[32].mxu0 %vm397_vm3, %v13311_v56 }
0x1217   :  { %v12465_v13 = vpop.eup %12464 }
0x1218   :  { %v12467_v57 = vpop.eup %12466  ;;  %v2646_v12 = vmul.f32 %v12465_v13, %v2614_v9 }
0x1219   :  { %v2645_v60 = vmul.f32 %v12467_v57, %v2613_v28 }
0x121a   :  { %v2656_v61 = vmul.f32 %v10017_v37, %v2646_v12 }
0x121b   :  { %v2655_v48 = vmul.f32 %v10017_v37, %v2645_v60 }
0x121c   :  { %v13319_v62 = vadd.f32 %v10018_v43, %v2656_v61 }
0x121d   :  { %v13317_v50 = vadd.f32 %v10018_v43, %v2655_v48 }
0x121f   :  { %10993 = vmatprep.mubr.msk.f32.mxu0 %vm397_vm3, %v13317_v50 }
0x1220   :  { %10994 = vmatmul.mubr.msk.f32.gmra.mrb[34].mxu0 %vm397_vm3, %v13319_v62 }
0x12e4   :  { %v10992_v0 = vpop.f32.mrb[32].mxu0 }
0x12e5   :  { %v13328_v18 = vadd.f32 %v10992_v0, %v10024_v63  ;;  %v2758_v1 = vpop.f32.mrb[33].mxu0 }
0x12e6   :  { %v13330_v2 = vadd.f32 %v10024_v63, %v2758_v1 }
0x12e8   :  { %11000 = vmatprep.mubr.msk.f32.mxu0 %vm501_vm4, %v13330_v2  ;;  %v13336_v15 = vpack.i.bf16 %v13328_v18, %v13330_v2 }
0x12ea   :  { %12147 = vrot.lane.b32.xlu1 %v13336_v15, %s14641_s24 }
0x12f3   :  { %v10995_v47 = vpop.f32.mrb[34].mxu0 }
0x12f4   :  { %v13340_v46 = vadd.f32 %v10995_v47, %v10024_v63  ;;  %v2768_v3 = vpop.f32.mrb[35].mxu0 }
0x12f5   :  { %v13342_v44 = vadd.f32 %v10024_v63, %v2768_v3 }
0x12f7   :  { %11007 = vmatprep.mubr.msk.f32.mxu1 %vm501_vm4, %v13342_v44  ;;  %v13348_v45 = vpack.i.bf16 %v13340_v46, %v13342_v44 }
0x12f9   :  { %12152 = vrot.lane.b32.xlu0 %v13348_v45, %s14641_s24 }
0x135c   :  { %v12148_v4 = vpop.permute.xlu1 %12147 }
0x135d   :  { %v12150_v51 = vunpack.i.h.bf16 %v12148_v4  ;;  %v12149_v5 = vunpack.i.l.bf16 %v12148_v4 }
0x135f   :  { %v11682_v6 = vpack.c.bf16 %v12150_v51, %v12149_v5 }
0x1361   :  { %11684 = vmatprep.subr.msk.bf16.mxu0 %vm12990_vm5, %v11682_v6 }
0x1362   :  { %11687 = vmatpush3.bf16.xpose.msk.msra.mxu0 %vm12990_vm5, %v11682_v6 }
0x1369   :  { %11001 = vmatmul.mubr.msk.f32.vlgmr.msra.gmra.mrb[36].mxu0 %vm501_vm4, %v13328_v18 }
0x136b   :  { %v12153_v7 = vpop.permute.xlu0 %12152 }
0x136c   :  { %v12155_v8 = vunpack.i.h.bf16 %v12153_v7  ;;  %v12154_v9 = vunpack.i.l.bf16 %v12153_v7 }
0x136e   :  { %v11688_v28 = vpack.c.bf16 %v12155_v8, %v12154_v9 }
0x1370   :  { %11690 = vmatprep.subr.msk.bf16.mxu1 %vm12990_vm5, %v11688_v28 }
0x1371   :  { %11693 = vmatpush3.bf16.xpose.msk.msra.mxu1 %vm12990_vm5, %v11688_v28 }
0x1378   :  { %11008 = vmatmul.mubr.msk.f32.vlgmr.msra.gmra.mrb[28].mxu1 %vm501_vm4, %v13340_v46 }
0x143c   :  { %v11002_v27 = vpop.f32.mrb[36].mxu0 }
0x143d   :  { %v2956_v10 = vmul.f32 0.35355338, %v11002_v27  ;;  %v2857_v11 = vpop.f32.mrb[37].mxu0 }
0x143e   :  { %v2955_v14 = vmul.f32 0.35355338, %v2857_v11 }
0x143f   :  { %v2962_v16 = vsel %vm83_vm0, %v2956_v10, -inf }
0x1440   :  { %2963 = vmax.xlane.f32.xlu0 %v2962_v16  ;;  %v2959_v17 = vsel %vm83_vm0, %v2955_v14, -inf }
0x1441   :  { %2960 = vmax.xlane.f32.xlu1 %v2959_v17 }
0x144b   :  { %v11009_v19 = vpop.f32.mrb[28].mxu1 }
0x144c   :  { %v2958_v22 = vmul.f32 0.35355338, %v11009_v19  ;;  %v2946_v23 = vpop.f32.mrb[29].mxu1 }
0x144d   :  { %v2957_v24 = vmul.f32 0.35355338, %v2946_v23 }
0x144e   :  { %v2968_v32 = vsel %vm83_vm0, %v2958_v22, -inf }
0x144f   :  { %2969 = vmax.xlane.f32.xlu0 %v2968_v32  ;;  %v2965_v30 = vsel %vm83_vm0, %v2957_v24, -inf }
0x1452   :  { %12157 = vrot.lane.b32.xlu1 %v13336_v15, %s14639_s25 }
0x1476   :  { %2966 = vmax.xlane.f32.xlu1 %v2965_v30 }
0x1487   :  { %12167 = vrot.lane.b32.xlu1 %v13336_v15, %s14684_s5 }
0x148b   :  { %12172 = vrot.lane.b32.xlu1 %v13348_v45, %s14684_s5 }
0x14cd   :  { %v2964_v25 = vpop.xlane.xlu0 %2963 }
0x14ce   :  { %v2972_v26 = vsub.f32 %v2956_v10, %v2964_v25  ;;  %v2961_v29 = vpop.xlane.xlu1 %2960 }
0x14cf   :  { %v2971_v31 = vsub.f32 %v2955_v14, %v2961_v29 }
0x14d0   :  { %v2977_v33 = vmul.f32 1.442695, %v2972_v26 }
0x14d1   :  { %v2975_v35 = vmul.f32 1.442695, %v2971_v31 }
0x14d2   :  { %12468 = vpow2.f32 %v2977_v33  ;;  %v12158_v37 = vpop.permute.xlu1 %12157 }
0x14d3   :  { %12470 = vpow2.f32 %v2975_v35  ;;  %v12160_v39 = vunpack.i.h.bf16 %v12158_v37  ;;  %v12159_v41 = vunpack.i.l.bf16 %v12158_v37 }
0x14d5   :  { %v11694_v42 = vpack.c.bf16 %v12160_v39, %v12159_v41 }
0x14d7   :  { %11695 = vmatprep.subr.bf16.mxu0 %v11694_v42 }
0x14d8   :  { %11697 = vmatpush3.bf16.msra.mxu0 %v11694_v42 }
0x14dc   :  { %v12469_v58 = vpop.eup %12468  ;;  %v2970_v43 = vpop.xlane.xlu0 %2969 }
0x14dd   :  { %v12471_v59 = vpop.eup %12470  ;;  %v2986_v49 = vsel %vm83_vm0, %v12469_v58, 0.0  ;;  %v2974_v21 = vsub.f32 %v2958_v22, %v2970_v43 }
0x14de   :  { %2987 = vadd.xlane.f32.xlu0 %v2986_v49  ;;  %v2983_v20 = vsel %vm83_vm0, %v12471_v59, 0.0 }
0x14df   :  { %2984 = vadd.xlane.f32.xlu1 %v2983_v20  ;;  %v2981_v52 = vmul.f32 1.442695, %v2974_v21 }
0x14e1   :  { %12472 = vpow2.f32 %v2981_v52 }
0x14eb   :  { %v12473_v63 = vpop.eup %12472 }
0x14ec   :  { %v2992_v1 = vsel %vm83_vm0, %v12473_v63, 0.0 }
0x14f0   :  { %3179 = vrot.lane.b32.xlu1 %v13328_v18, %s14685_s3 }
0x14f4   :  { %12162 = vrot.lane.b32.xlu0 %v13348_v45, %s14639_s25  ;;  %s14694_s25 = smov 16  }
0x1503   :  { %v2967_v53 = vpop.xlane.xlu1 %2966 }
0x1504   :  { %v2973_v13 = vsub.f32 %v2957_v24, %v2967_v53 }
0x1506   :  { %v2979_v57 = vmul.f32 1.442695, %v2973_v13 }
0x1507   :  { %v12168_v12 = vpop.permute.xlu1 %12167 }
0x1508   :  { %12474 = vpow2.f32 %v2979_v57  ;;  %v12170_v60 = vunpack.i.h.bf16 %v12168_v12  ;;  %v12169_v61 = vunpack.i.l.bf16 %v12168_v12 }
0x150a   :  { %v11702_v48 = vpack.c.bf16 %v12170_v60, %v12169_v61 }
0x150b   :  { %v12173_v3 = vpop.permute.xlu1 %12172 }
0x150c   :  { %11704 = vmatprep.subr.msk.bf16.mxu1 %vm12990_vm5, %v11702_v48  ;;  %v12175_v27 = vunpack.i.h.bf16 %v12173_v3  ;;  %v12174_v10 = vunpack.i.l.bf16 %v12173_v3 }
0x150d   :  { %11707 = vmatpush3.bf16.xpose.msk.msra.mxu1 %vm12990_vm5, %v11702_v48 }
0x150e   :  { %v11708_v16 = vpack.c.bf16 %v12175_v27, %v12174_v10 }
0x1512   :  { %v12475_v0 = vpop.eup %12474 }
0x1513   :  { %2993 = vadd.xlane.f32.xlu0 %v2992_v1  ;;  %v2989_v47 = vsel %vm83_vm0, %v12475_v0, 0.0 }
0x1514   :  { %2990 = vadd.xlane.f32.xlu1 %v2989_v47 }
0x1525   :  { %3270 = vrot.lane.b32.xlu1 %v13340_v46, %s14685_s3 }
0x1529   :  { %3177 = vrot.lane.b32.xlu0 %v13330_v2, %s14685_s3 }
0x152d   :  { %3268 = vrot.lane.b32.xlu0 %v13342_v44, %s14685_s3 }
0x156b   :  { %v2988_v4 = vpop.xlane.xlu0 %2987 }
0x156c   :  { %12476 = vrcp.f32 %v2988_v4  ;;  %v2985_v51 = vpop.xlane.xlu1 %2984 }
0x156d   :  { %12478 = vrcp.f32 %v2985_v51 }
0x156f   :  { %v12163_v5 = vpop.permute.xlu0 %12162 }
0x1570   :  { %v12165_v6 = vunpack.i.h.bf16 %v12163_v5  ;;  %v12164_v7 = vunpack.i.l.bf16 %v12163_v5  ;;  %v3180_v17 = vpop.permute.xlu1 %3179 }
0x1572   :  { %v11698_v8 = vpack.c.bf16 %v12165_v6, %v12164_v7 }
0x1574   :  { %11699 = vmatprep.subr.bf16.mxu0 %v11698_v8 }
0x1576   :  { %v12477_v9 = vpop.eup %12476 }
0x1577   :  { %v12479_v28 = vpop.eup %12478  ;;  %v3000_v14 = vmul.f32 %v12477_v9, %v12469_v58 }
0x1578   :  { %v2999_v11 = vmul.f32 %v12479_v28, %v12471_v59 }
0x157a   :  { %11014 = vmatprep.mubr.msk.f32.mxu0 %vm83_vm0, %v2999_v11 }
0x157b   :  { %11015 = vmatmul.mubr.msk.f32.vlgmr.msra.gmra.mrb[38].mxu0 %vm83_vm0, %v3000_v14 }
0x157c   :  { %11701 = vmatpush3.bf16.msra.mxu0 %v11698_v8 }
0x157d   :  { %11710 = vmatprep.subr.msk.bf16.mxu0 %vm12990_vm5, %v11708_v16 }
0x15a0   :  { %v2994_v19 = vpop.xlane.xlu0 %2993 }
0x15a1   :  { %12480 = vrcp.f32 %v2994_v19  ;;  %v2991_v22 = vpop.xlane.xlu1 %2990 }
0x15a2   :  { %12482 = vrcp.f32 %v2991_v22 }
0x15a4   :  { %v3178_v23 = vpop.permute.xlu0 %3177 }
0x15a5   :  { %11028 = vmatprep.mubr.msk.f32.mxu1 %vm501_vm4, %v3178_v23  ;;  %v3271_v29 = vpop.permute.xlu1 %3270 }
0x15a6   :  { %11029 = vmatmul.mubr.msk.f32.vlgmr.msra.gmra.mrb[30].mxu1 %vm501_vm4, %v3180_v17 }
0x15a8   :  { %v3269_v26 = vpop.permute.xlu0 %3268 }
0x15ab   :  { %v12481_v32 = vpop.eup %12480 }
0x15ac   :  { %v12483_v24 = vpop.eup %12482  ;;  %v3002_v25 = vmul.f32 %v12481_v32, %v12473_v63 }
0x15ad   :  { %v3001_v30 = vmul.f32 %v12483_v24, %v12475_v0 }
0x15af   :  { %11021 = vmatprep.mubr.msk.f32.mxu0 %vm83_vm0, %v3001_v30 }
0x15b0   :  { %11022 = vmatmul.mubr.msk.f32.vlgmr.msra.gmra.mrb[40].mxu0 %vm83_vm0, %v3002_v25 }
0x15b1   :  { %11713 = vmatpush3.bf16.xpose.msk.msra.mxu0 %vm12990_vm5, %v11708_v16  ;;  %11035 = vmatprep.mubr.msk.f32.mxu0 %vm501_vm4, %v3269_v26 }
0x15b8   :  { %11036 = vmatmul.mubr.msk.f32.vlgmr.msra.gmra.mrb[42].mxu0 %vm501_vm4, %v3271_v29 }
0x164e   :  { %v13404_v31 = vpop.f32.mrb[38].mxu0 }
0x164f   :  { %v13406_v33 = vpop.f32.mrb[39].mxu0 }
0x1679   :  { %v11030_v35 = vpop.f32.mrb[30].mxu1 }
0x167a   :  { %v3360_v37 = vmul.f32 0.35355338, %v11030_v35  ;;  %v3259_v39 = vpop.f32.mrb[31].mxu1 }
0x167b   :  { %v3359_v41 = vmul.f32 0.35355338, %v3259_v39 }
0x167c   :  { %v3366_v42 = vsel %vm83_vm0, %v3360_v37, -inf }
0x167d   :  { %3367 = vmax.xlane.f32.xlu1 %v3366_v42  ;;  %v3363_v58 = vsel %vm83_vm0, %v3359_v41, -inf }
0x167e   :  { %3364 = vmax.xlane.f32.xlu0 %v3363_v58 }
0x1683   :  { %v13410_v59 = vpop.f32.mrb[40].mxu0 }
0x1684   :  { %v13412_v49 = vpop.f32.mrb[41].mxu0 }
0x168b   :  { %v11037_v20 = vpop.f32.mrb[42].mxu0 }
0x168c   :  { %v3350_v43 = vpop.f32.mrb[43].mxu0  ;;  %v3362_v52 = vmul.f32 0.35355338, %v11037_v20 }
0x168d   :  { %v3361_v21 = vmul.f32 0.35355338, %v3350_v43 }
0x168e   :  { %v3372_v13 = vsel %vm83_vm0, %v3362_v52, -inf }
0x168f   :  { %v3369_v53 = vsel %vm83_vm0, %v3361_v21, -inf }
0x1690   :  { %3370 = vmax.xlane.f32.xlu0 %v3369_v53 }
0x1694   :  { %3373 = vmax.xlane.f32.xlu0 %v3372_v13 }
0x170a   :  { %v3368_v57 = vpop.xlane.xlu1 %3367 }
0x170b   :  { %v3376_v12 = vsub.f32 %v3360_v37, %v3368_v57  ;;  %v3365_v60 = vpop.xlane.xlu0 %3364 }
0x170c   :  { %v3375_v61 = vsub.f32 %v3359_v41, %v3365_v60 }
0x170d   :  { %v3381_v48 = vmul.f32 1.442695, %v3376_v12 }
0x170e   :  { %v3379_v63 = vmul.f32 1.442695, %v3375_v61 }
0x170f   :  { %12484 = vpow2.f32 %v3381_v48 }
0x1710   :  { %12486 = vpow2.f32 %v3379_v63 }
0x1719   :  { %v12485_v0 = vpop.eup %12484 }
0x171a   :  { %v12487_v1 = vpop.eup %12486  ;;  %v3390_v47 = vsel %vm83_vm0, %v12485_v0, 0.0 }
0x171b   :  { %3391 = vadd.xlane.f32.xlu0 %v3390_v47  ;;  %v3387_v3 = vsel %vm83_vm0, %v12487_v1, 0.0 }
0x171c   :  { %3388 = vadd.xlane.f32.xlu1 %v3387_v3 }
0x171d   :  { %v3371_v4 = vpop.xlane.xlu0 %3370 }
0x171e   :  { %v3377_v7 = vsub.f32 %v3361_v21, %v3371_v4 }
0x1720   :  { %v3383_v8 = vmul.f32 1.442695, %v3377_v7 }
0x1721   :  { %v3374_v51 = vpop.xlane.xlu0 %3373 }
0x1722   :  { %v3378_v5 = vsub.f32 %v3362_v52, %v3374_v51 }
0x1724   :  { %v3385_v6 = vmul.f32 1.442695, %v3378_v5 }
0x1726   :  { %12488 = vpow2.f32 %v3385_v6 }
0x1727   :  { %12490 = vpow2.f32 %v3383_v8 }
0x172d   :  { %12177 = vrot.lane.b32.xlu1 %v13336_v15, %s14686_s0 }
0x1730   :  { %v12489_v9 = vpop.eup %12488 }
0x1731   :  { %12182 = vrot.lane.b32.xlu0 %v13348_v45, %s14686_s0  ;;  %12187 = vrot.lane.b32.xlu1 %v13336_v15, %s14687_s29  ;;  %v3396_v28 = vsel %vm83_vm0, %v12489_v9, 0.0  ;;  %v12491_v27 = vpop.eup %12490 }
0x1732   :  { %v3393_v10 = vsel %vm83_vm0, %v12491_v27, 0.0 }
0x1735   :  { %12192 = vrot.lane.b32.xlu1 %v13348_v45, %s14687_s29 }
0x1739   :  { %3583 = vrot.lane.b32.xlu1 %v13328_v18, %s14688_s27 }
0x1750   :  { %3397 = vadd.xlane.f32.xlu0 %v3396_v28 }
0x175d   :  { %3394 = vadd.xlane.f32.xlu1 %v3393_v10 }
0x1766   :  { %3581 = vrot.lane.b32.xlu0 %v13330_v2, %s14688_s27 }
0x176a   :  { %3672 = vrot.lane.b32.xlu0 %v13342_v44, %s14688_s27 }
0x176e   :  { %3674 = vrot.lane.b32.xlu1 %v13340_v46, %s14688_s27 }
0x17a8   :  { %v3392_v11 = vpop.xlane.xlu0 %3391 }
0x17a9   :  { %12492 = vrcp.f32 %v3392_v11  ;;  %v3389_v14 = vpop.xlane.xlu1 %3388 }
0x17aa   :  { %12494 = vrcp.f32 %v3389_v14 }
0x17ac   :  { %v12183_v16 = vpop.permute.xlu0 %12182 }
0x17ad   :  { %v12185_v17 = vunpack.i.h.bf16 %v12183_v16  ;;  %v12184_v19 = vunpack.i.l.bf16 %v12183_v16  ;;  %v12178_v22 = vpop.permute.xlu1 %12177 }
0x17ae   :  { %v12180_v23 = vunpack.i.h.bf16 %v12178_v22  ;;  %v12179_v32 = vunpack.i.l.bf16 %v12178_v22 }
0x17af   :  { %v11718_v24 = vpack.c.bf16 %v12185_v17, %v12184_v19 }
0x17b0   :  { %v11714_v30 = vpack.c.bf16 %v12180_v23, %v12179_v32 }
0x17b1   :  { %v12188_v25 = vpop.permute.xlu1 %12187  ;;  %11719 = vmatprep.subr.bf16.mxu0 %v11718_v24 }
0x17b2   :  { %v12190_v26 = vunpack.i.h.bf16 %v12188_v25  ;;  %v12189_v29 = vunpack.i.l.bf16 %v12188_v25  ;;  %11715 = vmatprep.subr.bf16.mxu1 %v11714_v30  ;;  %11721 = vmatpush3.bf16.msra.mxu0 %v11718_v24 }
0x17b3   :  { %v12493_v35 = vpop.eup %12492  ;;  %11717 = vmatpush3.bf16.msra.mxu1 %v11714_v30 }
0x17b4   :  { %v12495_v37 = vpop.eup %12494  ;;  %v11722_v39 = vpack.c.bf16 %v12190_v26, %v12189_v29  ;;  %v3404_v43 = vmul.f32 %v12493_v35, %v12485_v0 }
0x17b5   :  { %v12193_v41 = vpop.permute.xlu1 %12192  ;;  %v3403_v42 = vmul.f32 %v12495_v37, %v12487_v1 }
0x17b6   :  { %v12195_v58 = vunpack.i.h.bf16 %v12193_v41  ;;  %v12194_v20 = vunpack.i.l.bf16 %v12193_v41  ;;  %11724 = vmatprep.subr.msk.bf16.mxu1 %vm12990_vm5, %v11722_v39 }
0x17b7   :  { %11042 = vmatprep.mubr.msk.f32.mxu1 %vm83_vm0, %v3403_v42 }
0x17b8   :  { %v11728_v21 = vpack.c.bf16 %v12195_v58, %v12194_v20  ;;  %11043 = vmatmul.mubr.msk.f32.vlgmr.msra.gmra.mrb[32].mxu1 %vm83_vm0, %v3404_v43 }
0x17b9   :  { %v3584_v13 = vpop.permute.xlu1 %3583 }
0x17ba   :  { %11730 = vmatprep.subr.msk.bf16.mxu0 %vm12990_vm5, %v11728_v21 }
0x17bc   :  { %11727 = vmatpush3.bf16.xpose.msk.msra.mxu1 %vm12990_vm5, %v11722_v39 }
0x17dd   :  { %v3398_v52 = vpop.xlane.xlu0 %3397 }
0x17de   :  { %12496 = vrcp.f32 %v3398_v52 }
0x17e1   :  { %v3582_v53 = vpop.permute.xlu0 %3581 }
0x17e2   :  { %11056 = vmatprep.mubr.msk.f32.mxu1 %vm501_vm4, %v3582_v53 }
0x17e3   :  { %11057 = vmatmul.mubr.msk.f32.vlgmr.msra.gmra.mrb[34].mxu1 %vm501_vm4, %v3584_v13 }
0x17e5   :  { %v3673_v63 = vpop.permute.xlu0 %3672 }
0x17e8   :  { %v12497_v12 = vpop.eup %12496 }
0x17e9   :  { %v3406_v48 = vmul.f32 %v12497_v12, %v12489_v9 }
0x17ea   :  { %v3395_v57 = vpop.xlane.xlu1 %3394 }
0x17eb   :  { %12498 = vrcp.f32 %v3395_v57 }
0x17ee   :  { %v3675_v0 = vpop.permute.xlu1 %3674 }
0x17f5   :  { %v12499_v60 = vpop.eup %12498 }
0x17f6   :  { %v3405_v61 = vmul.f32 %v12499_v60, %v12491_v27 }
0x17f8   :  { %11049 = vmatprep.mubr.msk.f32.mxu0 %vm83_vm0, %v3405_v61 }
0x17f9   :  { %11050 = vmatmul.mubr.msk.f32.vlgmr.msra.gmra.mrb[44].mxu0 %vm83_vm0, %v3406_v48 }
0x17fa   :  { %11733 = vmatpush3.bf16.xpose.msk.msra.mxu0 %vm12990_vm5, %v11728_v21  ;;  %11063 = vmatprep.mubr.msk.f32.mxu0 %vm501_vm4, %v3673_v63 }
0x1801   :  { %11064 = vmatmul.mubr.msk.f32.vlgmr.msra.gmra.mrb[46].mxu0 %vm501_vm4, %v3675_v0 }
0x188b   :  { %v13452_v1 = vpop.f32.mrb[32].mxu1 }
0x188c   :  { %v13454_v47 = vpop.f32.mrb[33].mxu1 }
0x18b6   :  { %v11058_v3 = vpop.f32.mrb[34].mxu1 }
0x18b7   :  { %v3764_v4 = vmul.f32 0.35355338, %v11058_v3  ;;  %v3663_v51 = vpop.f32.mrb[35].mxu1 }
0x18b8   :  { %v3763_v5 = vmul.f32 0.35355338, %v3663_v51 }
0x18b9   :  { %v3770_v6 = vsel %vm83_vm0, %v3764_v4, -inf }
0x18ba   :  { %3771 = vmax.xlane.f32.xlu1 %v3770_v6  ;;  %v3767_v7 = vsel %vm83_vm0, %v3763_v5, -inf }
0x18bb   :  { %3768 = vmax.xlane.f32.xlu0 %v3767_v7 }
0x18cc   :  { %v13458_v8 = vpop.f32.mrb[44].mxu0 }
0x18cd   :  { %v13460_v9 = vpop.f32.mrb[45].mxu0 }
0x18d4   :  { %v11065_v28 = vpop.f32.mrb[46].mxu0 }
0x18d5   :  { %v3754_v27 = vpop.f32.mrb[47].mxu0  ;;  %v3766_v11 = vmul.f32 0.35355338, %v11065_v28 }
0x18d6   :  { %v3765_v10 = vmul.f32 0.35355338, %v3754_v27 }
0x18d7   :  { %v3776_v16 = vsel %vm83_vm0, %v3766_v11, -inf }
0x18d8   :  { %v3773_v14 = vsel %vm83_vm0, %v3765_v10, -inf }
0x18d9   :  { %3774 = vmax.xlane.f32.xlu0 %v3773_v14 }
0x18dd   :  { %3777 = vmax.xlane.f32.xlu0 %v3776_v16 }
0x1947   :  { %v3772_v17 = vpop.xlane.xlu1 %3771 }
0x1948   :  { %v3780_v19 = vsub.f32 %v3764_v4, %v3772_v17  ;;  %v3769_v22 = vpop.xlane.xlu0 %3768 }
0x1949   :  { %v3779_v23 = vsub.f32 %v3763_v5, %v3769_v22 }
0x194a   :  { %v3785_v32 = vmul.f32 1.442695, %v3780_v19 }
0x194b   :  { %v3783_v24 = vmul.f32 1.442695, %v3779_v23 }
0x194c   :  { %12500 = vpow2.f32 %v3785_v32 }
0x194d   :  { %12502 = vpow2.f32 %v3783_v24 }
0x1956   :  { %v12501_v30 = vpop.eup %12500 }
0x1957   :  { %v12503_v25 = vpop.eup %12502  ;;  %v3794_v26 = vsel %vm83_vm0, %v12501_v30, 0.0 }
0x1958   :  { %3795 = vadd.xlane.f32.xlu0 %v3794_v26  ;;  %v3791_v29 = vsel %vm83_vm0, %v12503_v25, 0.0 }
0x1959   :  { %3792 = vadd.xlane.f32.xlu1 %v3791_v29 }
0x1966   :  { %v3775_v35 = vpop.xlane.xlu0 %3774 }
0x1967   :  { %v3781_v42 = vsub.f32 %v3765_v10, %v3775_v35 }
0x1969   :  { %v3787_v58 = vmul.f32 1.442695, %v3781_v42 }
0x196a   :  { %12197 = vrot.lane.b32.xlu1 %v13336_v15, %s14689_s7  ;;  %v3778_v37 = vpop.xlane.xlu0 %3777 }
0x196b   :  { %v3782_v39 = vsub.f32 %v3766_v11, %v3778_v37 }
0x196d   :  { %v3789_v41 = vmul.f32 1.442695, %v3782_v39 }
0x196e   :  { %12207 = vrot.lane.b32.xlu1 %v13336_v15, %s14690_s21  ;;  %12202 = vrot.lane.b32.xlu0 %v13348_v45, %s14689_s7 }
0x196f   :  { %12504 = vpow2.f32 %v3789_v41 }
0x1970   :  { %12506 = vpow2.f32 %v3787_v58 }
0x1972   :  { %12212 = vrot.lane.b32.xlu1 %v13348_v45, %s14690_s21 }
0x1976   :  { %3987 = vrot.lane.b32.xlu1 %v13328_v18, %s14691_s4 }
0x1979   :  { %v12505_v20 = vpop.eup %12504 }
0x197a   :  { %v3800_v43 = vsel %vm83_vm0, %v12505_v20, 0.0  ;;  %v12507_v21 = vpop.eup %12506 }
0x197b   :  { %v3797_v52 = vsel %vm83_vm0, %v12507_v21, 0.0 }
0x198d   :  { %3801 = vadd.xlane.f32.xlu0 %v3800_v43 }
0x199a   :  { %3798 = vadd.xlane.f32.xlu1 %v3797_v52 }
0x19a3   :  { %3985 = vrot.lane.b32.xlu0 %v13330_v2, %s14691_s4 }
0x19a7   :  { %4076 = vrot.lane.b32.xlu0 %v13342_v44, %s14691_s4 }
0x19ab   :  { %4078 = vrot.lane.b32.xlu1 %v13340_v46, %s14691_s4 }
0x19e5   :  { %v3796_v18 = vpop.xlane.xlu0 %3795 }
0x19e6   :  { %12508 = vrcp.f32 %v3796_v18  ;;  %v3793_v53 = vpop.xlane.xlu1 %3792 }
0x19e7   :  { %12510 = vrcp.f32 %v3793_v53 }
0x19e9   :  { %v12203_v13 = vpop.permute.xlu0 %12202 }
0x19ea   :  { %v12205_v57 = vunpack.i.h.bf16 %v12203_v13  ;;  %v12204_v12 = vunpack.i.l.bf16 %v12203_v13  ;;  %v12198_v60 = vpop.permute.xlu1 %12197 }
0x19eb   :  { %v12200_v61 = vunpack.i.h.bf16 %v12198_v60  ;;  %v12199_v48 = vunpack.i.l.bf16 %v12198_v60 }
0x19ec   :  { %v11738_v63 = vpack.c.bf16 %v12205_v57, %v12204_v12 }
0x19ed   :  { %v11734_v0 = vpack.c.bf16 %v12200_v61, %v12199_v48 }
0x19ee   :  { %v12208_v3 = vpop.permute.xlu1 %12207  ;;  %11739 = vmatprep.subr.bf16.mxu0 %v11738_v63 }
0x19ef   :  { %v12210_v2 = vunpack.i.h.bf16 %v12208_v3  ;;  %v12209_v4 = vunpack.i.l.bf16 %v12208_v3  ;;  %11735 = vmatprep.subr.bf16.mxu1 %v11734_v0  ;;  %11741 = vmatpush3.bf16.msra.mxu0 %v11738_v63 }
0x19f0   :  { %v12509_v44 = vpop.eup %12508  ;;  %11737 = vmatpush3.bf16.msra.mxu1 %v11734_v0 }
0x19f1   :  { %v12511_v46 = vpop.eup %12510  ;;  %v11742_v51 = vpack.c.bf16 %v12210_v2, %v12209_v4  ;;  %v3808_v27 = vmul.f32 %v12509_v44, %v12501_v30 }
0x19f2   :  { %v12213_v5 = vpop.permute.xlu1 %12212  ;;  %v3807_v6 = vmul.f32 %v12511_v46, %v12503_v25 }
0x19f3   :  { %v12215_v7 = vunpack.i.h.bf16 %v12213_v5  ;;  %v12214_v28 = vunpack.i.l.bf16 %v12213_v5  ;;  %11744 = vmatprep.subr.msk.bf16.mxu1 %vm12990_vm5, %v11742_v51 }
0x19f4   :  { %11070 = vmatprep.mubr.msk.f32.mxu1 %vm83_vm0, %v3807_v6 }
0x19f5   :  { %v11748_v10 = vpack.c.bf16 %v12215_v7, %v12214_v28  ;;  %11071 = vmatmul.mubr.msk.f32.vlgmr.msra.gmra.mrb[36].mxu1 %vm83_vm0, %v3808_v27 }
0x19f6   :  { %v3988_v16 = vpop.permute.xlu1 %3987 }
0x19f7   :  { %11750 = vmatprep.subr.msk.bf16.mxu0 %vm12990_vm5, %v11748_v10 }
0x19f9   :  { %11747 = vmatpush3.bf16.xpose.msk.msra.mxu1 %vm12990_vm5, %v11742_v51 }
0x1a1a   :  { %v3802_v11 = vpop.xlane.xlu0 %3801 }
0x1a1b   :  { %12512 = vrcp.f32 %v3802_v11 }
0x1a1e   :  { %v3986_v14 = vpop.permute.xlu0 %3985 }
0x1a1f   :  { %11084 = vmatprep.mubr.msk.f32.mxu1 %vm501_vm4, %v3986_v14 }
0x1a20   :  { %11085 = vmatmul.mubr.msk.f32.vlgmr.msra.gmra.mrb[38].mxu1 %vm501_vm4, %v3988_v16 }
0x1a22   :  { %v4077_v24 = vpop.permute.xlu0 %4076 }
0x1a25   :  { %v12513_v19 = vpop.eup %12512 }
0x1a26   :  { %v3810_v32 = vmul.f32 %v12513_v19, %v12505_v20 }
0x1a27   :  { %v3799_v17 = vpop.xlane.xlu1 %3798 }
0x1a28   :  { %12514 = vrcp.f32 %v3799_v17 }
0x1a2b   :  { %v4079_v30 = vpop.permute.xlu1 %4078 }
0x1a32   :  { %v12515_v22 = vpop.eup %12514 }
0x1a33   :  { %v3809_v23 = vmul.f32 %v12515_v22, %v12507_v21 }
0x1a35   :  { %11077 = vmatprep.mubr.msk.f32.mxu0 %vm83_vm0, %v3809_v23 }
0x1a36   :  { %11078 = vmatmul.mubr.msk.f32.vlgmr.msra.gmra.mrb[48].mxu0 %vm83_vm0, %v3810_v32 }
0x1a37   :  { %11753 = vmatpush3.bf16.xpose.msk.msra.mxu0 %vm12990_vm5, %v11748_v10  ;;  %11091 = vmatprep.mubr.msk.f32.mxu0 %vm501_vm4, %v4077_v24 }
0x1a3e   :  { %11092 = vmatmul.mubr.msk.f32.vlgmr.msra.gmra.mrb[50].mxu0 %vm501_vm4, %v4079_v30 }
0x1ac8   :  { %v11072_v25 = vpop.f32.mrb[36].mxu1 }
0x1ac9   :  { %v3889_v26 = vpop.f32.mrb[37].mxu1 }
0x1af3   :  { %v11086_v29 = vpop.f32.mrb[38].mxu1 }
0x1af4   :  { %v4168_v35 = vmul.f32 0.35355338, %v11086_v29  ;;  %v4067_v37 = vpop.f32.mrb[39].mxu1 }
0x1af5   :  { %v4167_v39 = vmul.f32 0.35355338, %v4067_v37 }
0x1af6   :  { %v4174_v41 = vsel %vm83_vm0, %v4168_v35, -inf }
0x1af7   :  { %4175 = vmax.xlane.f32.xlu1 %v4174_v41  ;;  %v4171_v42 = vsel %vm83_vm0, %v4167_v39, -inf }
0x1af8   :  { %4172 = vmax.xlane.f32.xlu0 %v4171_v42  ;;  %v10077_v42 = vld [vmem:[%s14682_s28 + $0x20] sm:$0xff] }
0x1b09   :  { %v13502_v58 = vpop.f32.mrb[48].mxu0 }
0x1b0a   :  { %v13504_v20 = vpop.f32.mrb[49].mxu0 }
0x1b11   :  { %v11093_v43 = vpop.f32.mrb[50].mxu0 }
0x1b12   :  { %v4158_v21 = vpop.f32.mrb[51].mxu0  ;;  %v4170_v18 = vmul.f32 0.35355338, %v11093_v43  ;;  %v10078_v43 = vld [vmem:[%s14682_s28 + $0x28] sm:$0xff] }
0x1b13   :  { %v4169_v52 = vmul.f32 0.35355338, %v4158_v21  ;;  %v10079_v21 = vld [vmem:[%s14682_s28 + $0x30] sm:$0xff] }
0x1b14   :  { %v4180_v13 = vsel %vm83_vm0, %v4170_v18, -inf }
0x1b15   :  { %v4177_v53 = vsel %vm83_vm0, %v4169_v52, -inf }
0x1b16   :  { %4178 = vmax.xlane.f32.xlu0 %v4177_v53 }
0x1b1a   :  { %4181 = vmax.xlane.f32.xlu0 %v4180_v13 }
0x1b84   :  { %v4176_v57 = vpop.xlane.xlu1 %4175 }
0x1b85   :  { %v4184_v12 = vsub.f32 %v4168_v35, %v4176_v57  ;;  %v4173_v60 = vpop.xlane.xlu0 %4172 }
0x1b86   :  { %v4183_v61 = vsub.f32 %v4167_v39, %v4173_v60 }
0x1b87   :  { %v4189_v48 = vmul.f32 1.442695, %v4184_v12 }
0x1b88   :  { %v4187_v63 = vmul.f32 1.442695, %v4183_v61 }
0x1b89   :  { %12516 = vpow2.f32 %v4189_v48 }
0x1b8a   :  { %12518 = vpow2.f32 %v4187_v63 }
0x1b93   :  { %v12517_v0 = vpop.eup %12516 }
0x1b94   :  { %v12519_v3 = vpop.eup %12518  ;;  %v4198_v2 = vsel %vm83_vm0, %v12517_v0, 0.0 }
0x1b95   :  { %4199 = vadd.xlane.f32.xlu0 %v4198_v2  ;;  %v4195_v4 = vsel %vm83_vm0, %v12519_v3, 0.0 }
0x1b96   :  { %4196 = vadd.xlane.f32.xlu1 %v4195_v4 }
0x1ba3   :  { %v4179_v44 = vpop.xlane.xlu0 %4178 }
0x1ba4   :  { %v4185_v46 = vsub.f32 %v4169_v52, %v4179_v44  ;;  %v11762_v52 = vpack.c.bf16 %v10078_v43, %v10077_v42 }
0x1ba6   :  { %v4191_v51 = vmul.f32 1.442695, %v4185_v46 }
0x1ba7   :  { %v4182_v5 = vpop.xlane.xlu0 %4181 }
0x1ba8   :  { %12520 = vpow2.f32 %v4191_v51  ;;  %v4186_v6 = vsub.f32 %v4170_v18, %v4182_v5  ;;  %v10080_v18 = vld [vmem:[%s14682_s28 + $0x38] sm:$0xff] }
0x1ba9   :  { %v11766_v53 = vpack.c.bf16 %v10080_v18, %v10079_v21 }
0x1baa   :  { %v4193_v7 = vmul.f32 1.442695, %v4186_v6 }
0x1bac   :  { %12522 = vpow2.f32 %v4193_v7 }
0x1bb2   :  { %v12521_v28 = vpop.eup %12520 }
0x1bb3   :  { %v4201_v27 = vsel %vm83_vm0, %v12521_v28, 0.0 }
0x1bb4   :  { %4202 = vadd.xlane.f32.xlu1 %v4201_v27 }
0x1bb6   :  { %v12523_v10 = vpop.eup %12522 }
0x1bb7   :  { %v4204_v11 = vsel %vm83_vm0, %v12523_v10, 0.0 }
0x1bb8   :  { %4205 = vadd.xlane.f32.xlu0 %v4204_v11 }
0x1bc5   :  { %12217 = vrot.lane.b32.xlu1 %v13336_v15, %s14692_s26 }
0x1bc9   :  { %4393 = vrot.lane.b32.xlu1 %v13454_v47, %s14693_s2 }
0x1bcd   :  { %4395 = vrot.lane.b32.xlu1 %v13452_v1, %s14693_s2 }
0x1bce   :  { %12222 = vrot.lane.b32.xlu0 %v13348_v45, %s14692_s26 }
0x1bd1   :  { %4411 = vrot.lane.b32.xlu1 %v11072_v25, %s14694_s25 }
0x1bd2   :  { %4409 = vrot.lane.b32.xlu0 %v3889_v26, %s14694_s25 }
0x1c22   :  { %v4200_v15 = vpop.xlane.xlu0 %4199 }
0x1c23   :  { %v4197_v14 = vpop.xlane.xlu1 %4196 }
0x1c24   :  { %12524 = vrcp.f32 %v4197_v14 }
0x1c25   :  { %12526 = vrcp.f32 %v4200_v15 }
0x1c2e   :  { %v12525_v16 = vpop.eup %12524 }
0x1c2f   :  { %v4211_v17 = vmul.f32 %v12525_v16, %v12519_v3  ;;  %v12527_v32 = vpop.eup %12526 }
0x1c30   :  { %v4212_v29 = vmul.f32 %v12527_v32, %v12517_v0 }
0x1c31   :  { %11098 = vmatprep.mubr.msk.f32.mxu1 %vm83_vm0, %v4211_v17 }
0x1c41   :  { %v4203_v19 = vpop.xlane.xlu1 %4202 }
0x1c42   :  { %12528 = vrcp.f32 %v4203_v19 }
0x1c45   :  { %v12218_v47 = vpop.permute.xlu1 %12217  ;;  %v4206_v22 = vpop.xlane.xlu0 %4205 }
0x1c46   :  { %v12220_v1 = vunpack.i.h.bf16 %v12218_v47  ;;  %v12219_v23 = vunpack.i.l.bf16 %v12218_v47  ;;  %12530 = vrcp.f32 %v4206_v22 }
0x1c48   :  { %v11754_v45 = vpack.c.bf16 %v12220_v1, %v12219_v23 }
0x1c49   :  { %v12223_v24 = vpop.permute.xlu0 %12222  ;;  %v4394_v61 = vpop.permute.xlu1 %4393 }
0x1c4a   :  { %v12225_v30 = vunpack.i.h.bf16 %v12223_v24  ;;  %v12224_v25 = vunpack.i.l.bf16 %v12223_v24  ;;  %11755 = vmatprep.subr.bf16.mxu1 %v11754_v45 }
0x1c4b   :  { %11757 = vmatpush3.bf16.msra.mxu1 %v11754_v45 }
0x1c4c   :  { %v12529_v26 = vpop.eup %12528  ;;  %v11758_v35 = vpack.c.bf16 %v12225_v30, %v12224_v25  ;;  %11763 = vmatprep.subr.bf16.mxu1 %v11762_v52 }
0x1c4d   :  { %v4213_v37 = vmul.f32 %v12529_v26, %v12521_v28  ;;  %v4396_v48 = vpop.permute.xlu1 %4395  ;;  %v4410_v0 = vpop.permute.xlu0 %4409 }
0x1c4e   :  { %11099 = vmatmul.mubr.msk.f32.vlgmr.msra.gmra.mrb[40].mxu1 %vm83_vm0, %v4212_v29  ;;  %11759 = vmatprep.subr.bf16.mxu0 %v11758_v35 }
0x1c4f   :  { %11761 = vmatpush3.bf16.msra.mxu0 %v11758_v35  ;;  %11105 = vmatprep.mubr.msk.f32.mxu0 %vm83_vm0, %v4213_v37 }
0x1c50   :  { %v12531_v39 = vpop.eup %12530  ;;  %11765 = vmatpush3.bf16.msra.mxu1 %v11762_v52 }
0x1c51   :  { %v4214_v41 = vmul.f32 %v12531_v39, %v12523_v10  ;;  %11767 = vmatprep.subr.bf16.mxu1 %v11766_v53  ;;  %v4412_v63 = vpop.permute.xlu1 %4411 }
0x1c53   :  { %11106 = vmatmul.mubr.msk.f32.vlgmr.msra.gmra.mrb[52].mxu0 %vm83_vm0, %v4214_v41 }
0x1c54   :  { %11769 = vmatpush3.bf16.msra.mxu1 %v11766_v53 }
0x1d21   :  { %v11100_v13 = vpop.f32.mrb[40].mxu1 }
0x1d22   :  { %4427 = vrot.lane.b32.xlu1 %v11100_v13, %s14695_s23  ;;  %v4293_v57 = vpop.f32.mrb[41].mxu1 }
0x1d23   :  { %4425 = vrot.lane.b32.xlu0 %v4293_v57, %s14695_s23 }
0x1d26   :  { %4399 = vrot.lane.b32.xlu1 %v13458_v8, %s14693_s2  ;;  %v11107_v12 = vpop.f32.mrb[52].mxu0  ;;  %v4437_v8 = vsel %vm501_vm4, %v13406_v33, %v4394_v61 }
0x1d27   :  { %4397 = vrot.lane.b32.xlu0 %v13460_v9, %s14693_s2  ;;  %v4380_v60 = vpop.f32.mrb[53].mxu0  ;;  %v4438_v9 = vsel %vm501_vm4, %v13404_v31, %v4396_v48 }
0x1d2a   :  { %4415 = vrot.lane.b32.xlu1 %v13502_v58, %s14694_s25  ;;  %v4441_v58 = vsel %vm83_vm0, %v4437_v8, %v4410_v0  ;;  %v10092_v0 = vld [vmem:[%s14597_s12 + $0x28] sm:$0xff] }
0x1d2b   :  { %4413 = vrot.lane.b32.xlu0 %v13504_v20, %s14694_s25  ;;  %v4442_v20 = vsel %vm83_vm0, %v4438_v9, %v4412_v63  ;;  %v10091_v63 = vld [vmem:[%s14597_s12 + $0x20] sm:$0xff]  ;;  %v10094_v9 = vld [vmem:[%s14597_s12 + $0x38] sm:$0xff] }
0x1d2c   :  { %v11770_v8 = vpack.c.bf16 %v10092_v0, %v10091_v63 }
0x1d2e   :  { %4431 = vrot.lane.b32.xlu1 %v11107_v12, %s14695_s23  ;;  %11771 = vmatprep.subr.bf16.mxu0 %v11770_v8 }
0x1d2f   :  { %4429 = vrot.lane.b32.xlu0 %v4380_v60, %s14695_s23  ;;  %11773 = vmatpush3.bf16.msra.mxu0 %v11770_v8 }
0x1d94   :  { %v4428_v3 = vpop.permute.xlu1 %4427 }
0x1d95   :  { %v4426_v2 = vpop.permute.xlu0 %4425  ;;  %v4446_v44 = vsel %vm2164_vm6, %v4442_v20, %v4428_v3  ;;  %v10093_v3 = vld [vmem:[%s14597_s12 + $0x30] sm:$0xff]  ;;  %v10120_v20 = vld [vmem:[%s14677_s1 + $0x48] sm:$0xff] }
0x1d96   :  { %v4445_v4 = vsel %vm2164_vm6, %v4441_v58, %v4426_v2  ;;  %v11774_v58 = vpack.c.bf16 %v10094_v9, %v10093_v3  ;;  %v10119_v2 = vld [vmem:[%s14677_s1 + $0x40] sm:$0xff] }
0x1d97   :  { %11116 = vmatprep.mubr.msk.f32.mxu1 %vm397_vm3, %v4445_v4  ;;  %v11794_v4 = vpack.c.bf16 %v10120_v20, %v10119_v2 }
0x1d98   :  { %v4400_v46 = vpop.permute.xlu1 %4399  ;;  %11117 = vmatmul.mubr.msk.f32.vlgmr.msra.gmra.mrb[42].mxu1 %vm397_vm3, %v4446_v44  ;;  %11775 = vmatprep.subr.bf16.mxu0 %v11774_v58  ;;  %v10101_v44 = vld [vmem:[%s14599_s14 + $0x40] sm:$0xff] }
0x1d99   :  { %v4398_v51 = vpop.permute.xlu0 %4397  ;;  %v4440_v7 = vsel %vm501_vm4, %v13410_v59, %v4400_v46  ;;  %11777 = vmatpush3.bf16.msra.mxu0 %v11774_v58  ;;  %v10102_v46 = vld [vmem:[%s14599_s14 + $0x48] sm:$0xff] }
0x1d9a   :  { %v4439_v31 = vsel %vm501_vm4, %v13412_v49, %v4398_v51  ;;  %v10082_v49 = vld [vmem:[%s14683_s6 + $0x1] ss:$0 sm:$0xff]  ;;  %11795 = vmatprep.subr.bf16.mxu0 %v11794_v4  ;;  %v10103_v51 = vld [vmem:[%s14599_s14 + $0x50] sm:$0xff] }
0x1d9c   :  { %v4416_v33 = vpop.permute.xlu1 %4415 }
0x1d9d   :  { %v4414_v5 = vpop.permute.xlu0 %4413  ;;  %v4444_v10 = vsel %vm83_vm0, %v4440_v7, %v4416_v33  ;;  %v11778_v33 = vpack.c.bf16 %v10102_v46, %v10101_v44 }
0x1d9e   :  { %v4443_v28 = vsel %vm83_vm0, %v4439_v31, %v4414_v5  ;;  %v10104_v5 = vld [vmem:[%s14599_s14 + $0x58] sm:$0xff] }
0x1d9f   :  { %v11782_v31 = vpack.c.bf16 %v10104_v5, %v10103_v51  ;;  %11779 = vmatprep.subr.bf16.mxu1 %v11778_v33 }
0x1da0   :  { %v4432_v6 = vpop.permute.xlu1 %4431  ;;  %11781 = vmatpush3.bf16.msra.mxu1 %v11778_v33 }
0x1da1   :  { %v4430_v27 = vpop.permute.xlu0 %4429  ;;  %v4448_v14 = vsel %vm2164_vm6, %v4444_v10, %v4432_v6  ;;  %11783 = vmatprep.subr.bf16.mxu1 %v11782_v31 }
0x1da2   :  { %v4447_v11 = vsel %vm2164_vm6, %v4443_v28, %v4430_v27 }
0x1da3   :  { %11119 = vmatprep.mubr.msk.f32.mxu1 %vm397_vm3, %v4447_v11 }
0x1da4   :  { %11120 = vmatmul.mubr.msk.f32.gmra.mrb[44].mxu1 %vm397_vm3, %v4448_v14 }
0x1da5   :  { %11785 = vmatpush3.bf16.msra.mxu1 %v11782_v31 }
0x1e6b   :  { %v11118_v16 = vpop.f32.mrb[42].mxu1 }
0x1e6c   :  { %v4546_v17 = vadd.f32 %v11118_v16, %v10082_v49  ;;  %v4540_v59 = vpop.f32.mrb[43].mxu1 }
0x1e6d   :  { %v4541_v15 = vadd.f32 %v10082_v49, %v4540_v59 }
0x1e6e   :  { %v4560_v19 = vadd.f32 %v4546_v17, %v13311_v56  ;;  %v10089_v17 = vld [vmem:[%s14593_s8 + $0x1] ss:$0 sm:$0xff] }
0x1e6f   :  { %v4559_v47 = vadd.f32 %v4541_v15, %v13309_v54 }
0x1e70   :  { %v4570_v22 = vsel %vm397_vm3, %v4560_v19, 0.0 }
0x1e71   :  { %4571 = vadd.xlane.f32.xlu1 %v4570_v22  ;;  %v4567_v1 = vsel %vm397_vm3, %v4559_v47, 0.0 }
0x1e72   :  { %4568 = vadd.xlane.f32.xlu0 %v4567_v1 }
0x1e77   :  { %v11121_v23 = vpop.f32.mrb[44].mxu1 }
0x1e78   :  { %v4550_v45 = vpop.f32.mrb[45].mxu1  ;;  %v4556_v32 = vadd.f32 %v11121_v23, %v10082_v49  ;;  %v10090_v23 = vld [vmem:[%s14594_s9 + $0x1] ss:$0 sm:$0xff] }
0x1e79   :  { %v4551_v24 = vadd.f32 %v10082_v49, %v4550_v45 }
0x1e7a   :  { %v4562_v25 = vadd.f32 %v4556_v32, %v13319_v62 }
0x1e7b   :  { %v4561_v30 = vadd.f32 %v4551_v24, %v13317_v50  ;;  %v10121_v24 = vld [vmem:[%s14677_s1 + $0x50] sm:$0xff] }
0x1e7c   :  { %v4576_v56 = vsel %vm397_vm3, %v4562_v25, 0.0 }
0x1e7d   :  { %v4573_v26 = vsel %vm397_vm3, %v4561_v30, 0.0 }
0x1e7e   :  { %4574 = vadd.xlane.f32.xlu0 %v4573_v26 }
0x1e82   :  { %4577 = vadd.xlane.f32.xlu0 %v4576_v56 }
0x1efe   :  { %v4572_v54 = vpop.xlane.xlu1 %4571 }
0x1eff   :  { %v4580_v29 = vmul.f32 0.03125, %v4572_v54  ;;  %v4569_v35 = vpop.xlane.xlu0 %4568 }
0x1f00   :  { %v4579_v37 = vmul.f32 0.03125, %v4569_v35 }
0x1f01   :  { %v4584_v39 = vsub.f32 %v4560_v19, %v4580_v29 }
0x1f02   :  { %v4583_v41 = vsub.f32 %v4559_v47, %v4579_v37 }
0x1f03   :  { %v4588_v42 = vmul.f32 %v4584_v39, %v4584_v39 }
0x1f04   :  { %v4587_v43 = vmul.f32 %v4583_v41, %v4583_v41 }
0x1f05   :  { %v4594_v21 = vsel %vm397_vm3, %v4588_v42, 0.0 }
0x1f06   :  { %4595 = vadd.xlane.f32.xlu0 %v4594_v21  ;;  %v4591_v50 = vsel %vm397_vm3, %v4587_v43, 0.0 }
0x1f07   :  { %4592 = vadd.xlane.f32.xlu1 %v4591_v50  ;;  %v10105_v50 = vld [vmem:[%s14599_s14 + $0x60] sm:$0xff] }
0x1f0b   :  { %v4575_v62 = vpop.xlane.xlu0 %4574 }
0x1f0c   :  { %v4581_v52 = vmul.f32 0.03125, %v4575_v62  ;;  %v10106_v62 = vld [vmem:[%s14599_s14 + $0x68] sm:$0xff] }
0x1f0e   :  { %v13583_v18 = vsub.f32 %v4561_v30, %v4581_v52  ;;  %v10122_v30 = vld [vmem:[%s14677_s1 + $0x58] sm:$0xff]  ;;  %v11786_v52 = vpack.c.bf16 %v10106_v62, %v10105_v50 }
0x1f0f   :  { %v4578_v53 = vpop.xlane.xlu0 %4577  ;;  %v11798_v54 = vpack.c.bf16 %v10122_v30, %v10121_v24 }
0x1f10   :  { %v4582_v13 = vmul.f32 0.03125, %v4578_v53  ;;  %v4589_v57 = vmul.f32 %v13583_v18, %v13583_v18  ;;  %11787 = vmatprep.subr.bf16.mxu1 %v11786_v52  ;;  %v10108_v53 = vld [vmem:[%s14599_s14 + $0x78] sm:$0xff] }
0x1f11   :  { %11789 = vmatpush3.bf16.msra.mxu1 %v11786_v52 }
0x1f12   :  { %v13587_v12 = vsub.f32 %v4562_v25, %v4582_v13  ;;  %v4597_v60 = vsel %vm397_vm3, %v4589_v57, 0.0  ;;  %v10096_v57 = vld [vmem:[%s14598_s13 + $0x1] ss:$0 sm:$0xff] }
0x1f13   :  { %4598 = vadd.xlane.f32.xlu1 %v4597_v60 }
0x1f14   :  { %v4590_v61 = vmul.f32 %v13587_v12, %v13587_v12 }
0x1f16   :  { %v4600_v48 = vsel %vm397_vm3, %v4590_v61, 0.0 }
0x1f17   :  { %4601 = vadd.xlane.f32.xlu0 %v4600_v48 }
0x1f93   :  { %v4596_v6 = vpop.xlane.xlu0 %4595 }
0x1f94   :  { %v4604_v7 = vmul.f32 0.03125, %v4596_v6  ;;  %v4593_v28 = vpop.xlane.xlu1 %4592 }
0x1f95   :  { %v4603_v27 = vmul.f32 0.03125, %v4593_v28 }
0x1f96   :  { %v4608_v10 = vadd.f32 1e-05, %v4604_v7 }
0x1f97   :  { %v4607_v11 = vadd.f32 1e-05, %v4603_v27 }
0x1f98   :  { %12532 = vrsqrt.f32 %v4608_v10 }
0x1f99   :  { %12534 = vrsqrt.f32 %v4607_v11 }
0x1fa0   :  { %v4599_v14 = vpop.xlane.xlu1 %4598 }
0x1fa1   :  { %v4605_v49 = vmul.f32 0.03125, %v4599_v14 }
0x1fa2   :  { %v12533_v16 = vpop.eup %12532 }
0x1fa3   :  { %v12535_v59 = vpop.eup %12534  ;;  %v4616_v15 = vmul.f32 %v12533_v16, %v4584_v39  ;;  %v4609_v19 = vadd.f32 1e-05, %v4605_v49 }
0x1fa4   :  { %v4602_v47 = vpop.xlane.xlu0 %4601  ;;  %v4615_v22 = vmul.f32 %v12535_v59, %v4583_v41 }
0x1fa5   :  { %12536 = vrsqrt.f32 %v4609_v19  ;;  %v4606_v1 = vmul.f32 0.03125, %v4602_v47  ;;  %v4626_v45 = vmul.f32 %v10089_v17, %v4616_v15 }
0x1fa6   :  { %v4625_v32 = vmul.f32 %v10089_v17, %v4615_v22 }
0x1fa7   :  { %v4610_v25 = vadd.f32 1e-05, %v4606_v1  ;;  %v13637_v56 = vadd.f32 %v10090_v23, %v4626_v45 }
0x1fa8   :  { %v13635_v26 = vadd.f32 %v10090_v23, %v4625_v32 }
0x1fa9   :  { %12538 = vrsqrt.f32 %v4610_v25 }
0x1faa   :  { %11130 = vmatprep.mubr.msk.f32.mxu0 %vm397_vm3, %v13635_v26 }
0x1fab   :  { %11131 = vmatmul.mubr.msk.f32.vlgmr.msra.gmra.mrb[54].mxu0 %vm397_vm3, %v13637_v56 }
0x1fac   :  { %11797 = vmatpush3.bf16.msra.mxu0 %v11794_v4  ;;  %v10124_v4 = vld [vmem:[%s14679_s30 + $0x2] ss:$0 sm:$0xff] }
0x1fad   :  { %11799 = vmatprep.subr.bf16.mxu0 %v11798_v54 }
0x1faf   :  { %v12537_v29 = vpop.eup %12536 }
0x1fb0   :  { %v4617_v35 = vmul.f32 %v12537_v29, %v13583_v18  ;;  %11801 = vmatpush3.bf16.msra.mxu0 %v11798_v54  ;;  %v10107_v18 = vld [vmem:[%s14599_s14 + $0x70] sm:$0xff] }
0x1fb1   :  { %v11790_v13 = vpack.c.bf16 %v10108_v53, %v10107_v18 }
0x1fb2   :  { %v4627_v37 = vmul.f32 %v10089_v17, %v4617_v35 }
0x1fb3   :  { %v12539_v39 = vpop.eup %12538  ;;  %11791 = vmatprep.subr.bf16.mxu1 %v11790_v13 }
0x1fb4   :  { %v13644_v41 = vadd.f32 %v10090_v23, %v4627_v37  ;;  %v4618_v42 = vmul.f32 %v12539_v39, %v13587_v12  ;;  %11793 = vmatpush3.bf16.msra.mxu1 %v11790_v13 }
0x1fb6   :  { %11133 = vmatprep.mubr.msk.f32.mxu0 %vm397_vm3, %v13644_v41  ;;  %v4628_v43 = vmul.f32 %v10089_v17, %v4618_v42 }
0x1fb8   :  { %v13649_v21 = vadd.f32 %v10090_v23, %v4628_v43 }
0x1fba   :  { %11134 = vmatmul.mubr.msk.f32.gmra.mrb[56].mxu0 %vm397_vm3, %v13649_v21 }
0x1fbb   :  { %11166 = vmatprep.mubr.msk.f32.mxu0 %vm397_vm3, %v12955_v36 }
0x1fbe   :  { %11167 = vmatmul.mubr.msk.f32.vlgmr.msra.gmra.mrb[58].mxu0 %vm397_vm3, %v12951_v34 }
0x1fbf   :  { %11169 = vmatprep.mubr.msk.f32.mxu0 %vm397_vm3, %v12959_v40 }
0x1fc2   :  { %11170 = vmatmul.mubr.msk.f32.gmra.mrb[60].mxu0 %vm397_vm3, %v12957_v38 }
0x207e   :  { %v11132_v12 = vpop.f32.mrb[54].mxu0 }
0x207f   :  { %v4736_v60 = vadd.f32 %v11132_v12, %v10096_v57  ;;  %v4730_v61 = vpop.f32.mrb[55].mxu0 }
0x2080   :  { %v4731_v48 = vadd.f32 %v10096_v57, %v4730_v61 }
0x2081   :  { %v4754_v63 = vmul.f32 0.01, %v4736_v60  ;;  %vm4750_vm12 = vcmp.gt.f32.partialorder %v4736_v60, 0.0 }
0x2082   :  { %vm4749_vm13 = vcmp.gt.f32.partialorder %v4731_v48, 0.0  ;;  %v4753_v0 = vmul.f32 0.01, %v4731_v48 }
0x2083   :  { %v4758_v3 = vsel %vm4750_vm12, %v4736_v60, %v4754_v63  ;;  %vm9688_vm12 = vcmask 80896  }
0x2084   :  { %v4757_v8 = vsel %vm4749_vm13, %v4731_v48, %v4753_v0  ;;  %vm9895_vm13 = vcmask 1041409  }
0x2085   :  { %11152 = vmatprep.mubr.msk.f32.mxu1 %vm2491_vm9, %v4757_v8 }
0x2086   :  { %11153 = vmatmul.mubr.msk.f32.vlgmr.msra.gmra.mrb[46].mxu1 %vm2491_vm9, %v4758_v3 }
0x208d   :  { %v11135_v9 = vpop.f32.mrb[56].mxu0 }
0x208e   :  { %v4746_v58 = vadd.f32 %v11135_v9, %v10096_v57  ;;  %v4740_v2 = vpop.f32.mrb[57].mxu0 }
0x208f   :  { %v4741_v20 = vadd.f32 %v10096_v57, %v4740_v2 }
0x2090   :  { %v4756_v44 = vmul.f32 0.01, %v4746_v58  ;;  %vm4752_vm14 = vcmp.gt.f32.partialorder %v4746_v58, 0.0 }
0x2091   :  { %vm4751_vm15 = vcmp.gt.f32.partialorder %v4741_v20, 0.0  ;;  %v4755_v46 = vmul.f32 0.01, %v4741_v20  ;;  %v11168_v51 = vpop.f32.mrb[58].mxu0 }
0x2092   :  { %v13681_v33 = vadd.f32 %v11168_v51, %v10124_v4  ;;  %v5046_v5 = vpop.f32.mrb[59].mxu0  ;;  %v4760_v7 = vsel %vm4752_vm14, %v4746_v58, %v4756_v44  ;;  %vm9898_vm14 = vcmask 17408  }
0x2093   :  { %v13683_v31 = vadd.f32 %v10124_v4, %v5046_v5  ;;  %v4759_v6 = vsel %vm4751_vm15, %v4741_v20, %v4755_v46 }
0x2094   :  { %11155 = vmatprep.mubr.msk.f32.mxu1 %vm2491_vm9, %v4759_v6 }
0x2095   :  { %11156 = vmatmul.mubr.msk.f32.gmra.mrb[48].mxu1 %vm2491_vm9, %v4760_v7  ;;  %v11171_v28 = vpop.f32.mrb[60].mxu0  ;;  %11176 = vmatprep.mubr.msk.f32.mxu0 %vm501_vm4, %v13683_v31  ;;  %v13691_v27 = vpack.i.bf16 %v13681_v33, %v13683_v31 }
0x2096   :  { %v13693_v10 = vadd.f32 %v11171_v28, %v10124_v4  ;;  %v5056_v11 = vpop.f32.mrb[61].mxu0 }
0x2097   :  { %v13695_v14 = vadd.f32 %v10124_v4, %v5056_v11  ;;  %12227 = vrot.lane.b32.xlu1 %v13691_v27, %s14696_s10 }
0x2099   :  { %11183 = vmatprep.mubr.msk.f32.mxu1 %vm501_vm4, %v13695_v14  ;;  %v13703_v49 = vpack.i.bf16 %v13693_v10, %v13695_v14 }
0x209b   :  { %12232 = vrot.lane.b32.xlu0 %v13703_v49, %s14696_s10 }
0x2109   :  { %v12228_v16 = vpop.permute.xlu1 %12227 }
0x210a   :  { %v12230_v17 = vunpack.i.h.bf16 %v12228_v16  ;;  %v12229_v59 = vunpack.i.l.bf16 %v12228_v16 }
0x210c   :  { %v11802_v15 = vpack.c.bf16 %v12230_v17, %v12229_v59 }
0x210d   :  { %v12233_v19 = vpop.permute.xlu0 %12232 }
0x210e   :  { %v12235_v47 = vunpack.i.h.bf16 %v12233_v19  ;;  %v12234_v22 = vunpack.i.l.bf16 %v12233_v19  ;;  %11804 = vmatprep.subr.msk.bf16.mxu0 %vm12990_vm5, %v11802_v15 }
0x210f   :  { %11807 = vmatpush3.bf16.xpose.msk.msra.mxu0 %vm12990_vm5, %v11802_v15 }
0x2110   :  { %v11808_v1 = vpack.c.bf16 %v12235_v47, %v12234_v22 }
0x2112   :  { %11810 = vmatprep.subr.msk.bf16.mxu1 %vm12990_vm5, %v11808_v1 }
0x2113   :  { %11813 = vmatpush3.bf16.xpose.msk.msra.mxu1 %vm12990_vm5, %v11808_v1 }
0x2116   :  { %11177 = vmatmul.mubr.msk.f32.vlgmr.msra.gmra.mrb[62].mxu0 %vm501_vm4, %v13681_v33 }
0x211a   :  { %11184 = vmatmul.mubr.msk.f32.vlgmr.msra.gmra.mrb[50].mxu1 %vm501_vm4, %v13693_v10 }
0x2159   :  { %v13719_v23 = vpop.f32.mrb[46].mxu1 }
0x215a   :  { %v13721_v45 = vpop.f32.mrb[47].mxu1 }
0x2168   :  { %v13723_v32 = vpop.f32.mrb[48].mxu1 }
0x2169   :  { %v13725_v24 = vpop.f32.mrb[49].mxu1 }
0x21e9   :  { %v11178_v30 = vpop.f32.mrb[62].mxu0 }
0x21ea   :  { %v5244_v25 = vmul.f32 0.35355338, %v11178_v30  ;;  %v5145_v54 = vpop.f32.mrb[63].mxu0 }
0x21eb   :  { %v5243_v29 = vmul.f32 0.35355338, %v5145_v54 }
0x21ec   :  { %v5250_v35 = vsel %vm83_vm0, %v5244_v25, -inf }
0x21ed   :  { %5251 = vmax.xlane.f32.xlu0 %v5250_v35  ;;  %v11185_v37 = vpop.f32.mrb[50].mxu1  ;;  %v5247_v39 = vsel %vm83_vm0, %v5243_v29, -inf }
0x21ee   :  { %v5246_v42 = vmul.f32 0.35355338, %v11185_v37  ;;  %5248 = vmax.xlane.f32.xlu1 %v5247_v39  ;;  %v5234_v43 = vpop.f32.mrb[51].mxu1 }
0x21ef   :  { %v5245_v62 = vmul.f32 0.35355338, %v5234_v43 }
0x21f0   :  { %v5256_v50 = vsel %vm83_vm0, %v5246_v42, -inf }
0x21f1   :  { %5257 = vmax.xlane.f32.xlu0 %v5256_v50  ;;  %v5253_v52 = vsel %vm83_vm0, %v5245_v62, -inf }
0x21ff   :  { %12237 = vrot.lane.b32.xlu1 %v13691_v27, %s14697_s15 }
0x2203   :  { %12247 = vrot.lane.b32.xlu1 %v13691_v27, %s14684_s5 }
0x2207   :  { %12242 = vrot.lane.b32.xlu0 %v13703_v49, %s14697_s15 }
0x2227   :  { %5254 = vmax.xlane.f32.xlu1 %v5253_v52 }
0x2238   :  { %5465 = vrot.lane.b32.xlu1 %v13683_v31, %s14685_s3 }
0x227a   :  { %v5252_v18 = vpop.xlane.xlu0 %5251 }
0x227b   :  { %v5260_v53 = vsub.f32 %v5244_v25, %v5252_v18  ;;  %v5249_v13 = vpop.xlane.xlu1 %5248 }
0x227c   :  { %v5259_v57 = vsub.f32 %v5243_v29, %v5249_v13 }
0x227d   :  { %v5265_v12 = vmul.f32 1.442695, %v5260_v53 }
0x227e   :  { %v5263_v60 = vmul.f32 1.442695, %v5259_v57  ;;  %v5258_v61 = vpop.xlane.xlu0 %5257 }
0x227f   :  { %12540 = vpow2.f32 %v5265_v12  ;;  %v5262_v48 = vsub.f32 %v5246_v42, %v5258_v61  ;;  %v12238_v63 = vpop.permute.xlu1 %12237 }
0x2280   :  { %12542 = vpow2.f32 %v5263_v60  ;;  %v12240_v0 = vunpack.i.h.bf16 %v12238_v63  ;;  %v12239_v8 = vunpack.i.l.bf16 %v12238_v63 }
0x2281   :  { %v5269_v3 = vmul.f32 1.442695, %v5262_v48 }
0x2282   :  { %v12243_v9 = vpop.permute.xlu0 %12242  ;;  %v11814_v58 = vpack.c.bf16 %v12240_v0, %v12239_v8 }
0x2283   :  { %12544 = vpow2.f32 %v5269_v3  ;;  %v12245_v2 = vunpack.i.h.bf16 %v12243_v9  ;;  %v12244_v20 = vunpack.i.l.bf16 %v12243_v9  ;;  %v12248_v4 = vpop.permute.xlu1 %12247 }
0x2284   :  { %v12250_v44 = vunpack.i.h.bf16 %v12248_v4  ;;  %v12249_v46 = vunpack.i.l.bf16 %v12248_v4  ;;  %11815 = vmatprep.subr.bf16.mxu0 %v11814_v58 }
0x2285   :  { %11817 = vmatpush3.bf16.msra.mxu0 %v11814_v58  ;;  %v11818_v51 = vpack.c.bf16 %v12245_v2, %v12244_v20 }
0x2286   :  { %v11822_v5 = vpack.c.bf16 %v12250_v44, %v12249_v46 }
0x2287   :  { %11819 = vmatprep.subr.bf16.mxu0 %v11818_v51 }
0x2288   :  { %11824 = vmatprep.subr.msk.bf16.mxu1 %vm12990_vm5, %v11822_v5 }
0x2289   :  { %v12541_v6 = vpop.eup %12540  ;;  %11827 = vmatpush3.bf16.xpose.msk.msra.mxu1 %vm12990_vm5, %v11822_v5 }
0x228a   :  { %v12543_v7 = vpop.eup %12542  ;;  %v5274_v28 = vsel %vm83_vm0, %v12541_v6, 0.0 }
0x228b   :  { %5275 = vadd.xlane.f32.xlu0 %v5274_v28  ;;  %v5271_v11 = vsel %vm83_vm0, %v12543_v7, 0.0 }
0x228c   :  { %5272 = vadd.xlane.f32.xlu1 %v5271_v11 }
0x228d   :  { %v12545_v16 = vpop.eup %12544 }
0x228e   :  { %v5280_v17 = vsel %vm83_vm0, %v12545_v16, 0.0 }
0x228f   :  { %5281 = vadd.xlane.f32.xlu0 %v5280_v17 }
0x229d   :  { %5467 = vrot.lane.b32.xlu1 %v13681_v33, %s14685_s3 }
0x22a5   :  { %12252 = vrot.lane.b32.xlu0 %v13703_v49, %s14684_s5 }
0x22a9   :  { %5556 = vrot.lane.b32.xlu0 %v13695_v14, %s14685_s3 }
0x22b4   :  { %v5255_v59 = vpop.xlane.xlu1 %5254 }
0x22b5   :  { %v5261_v15 = vsub.f32 %v5245_v62, %v5255_v59 }
0x22b7   :  { %v5267_v19 = vmul.f32 1.442695, %v5261_v15 }
0x22b8   :  { %v5466_v47 = vpop.permute.xlu1 %5465 }
0x22b9   :  { %12546 = vpow2.f32 %v5267_v19  ;;  %11204 = vmatprep.mubr.msk.f32.mxu1 %vm501_vm4, %v5466_v47 }
0x22c3   :  { %v12547_v22 = vpop.eup %12546 }
0x22c4   :  { %v5277_v1 = vsel %vm83_vm0, %v12547_v22, 0.0 }
0x22c5   :  { %5278 = vadd.xlane.f32.xlu1 %v5277_v1 }
0x22d6   :  { %5558 = vrot.lane.b32.xlu1 %v13693_v10, %s14685_s3 }
0x2318   :  { %v5276_v30 = vpop.xlane.xlu0 %5275 }
0x2319   :  { %12548 = vrcp.f32 %v5276_v30  ;;  %v5273_v25 = vpop.xlane.xlu1 %5272 }
0x231a   :  { %12550 = vrcp.f32 %v5273_v25 }
0x231c   :  { %v5282_v54 = vpop.xlane.xlu0 %5281 }
0x231d   :  { %v5468_v29 = vpop.permute.xlu1 %5467  ;;  %12552 = vrcp.f32 %v5282_v54 }
0x231e   :  { %11205 = vmatmul.mubr.msk.f32.vlgmr.msra.gmra.mrb[52].mxu1 %vm501_vm4, %v5468_v29 }
0x2320   :  { %v12253_v35 = vpop.permute.xlu0 %12252 }
0x2321   :  { %v12255_v42 = vunpack.i.h.bf16 %v12253_v35  ;;  %v12254_v43 = vunpack.i.l.bf16 %v12253_v35 }
0x2323   :  { %v12549_v37 = vpop.eup %12548  ;;  %v11828_v52 = vpack.c.bf16 %v12255_v42, %v12254_v43 }
0x2324   :  { %v12551_v39 = vpop.eup %12550  ;;  %v5288_v62 = vmul.f32 %v12549_v37, %v12541_v6  ;;  %v5557_v60 = vpop.permute.xlu0 %5556 }
0x2325   :  { %v5287_v50 = vmul.f32 %v12551_v39, %v12543_v7 }
0x2327   :  { %11190 = vmatprep.mubr.msk.f32.mxu0 %vm83_vm0, %v5287_v50  ;;  %v12553_v53 = vpop.eup %12552 }
0x2328   :  { %11191 = vmatmul.mubr.msk.f32.vlgmr.msra.gmra.mrb[64].mxu0 %vm83_vm0, %v5288_v62  ;;  %v5290_v12 = vmul.f32 %v12553_v53, %v12545_v16 }
0x2329   :  { %11821 = vmatpush3.bf16.msra.mxu0 %v11818_v51 }
0x232a   :  { %11830 = vmatprep.subr.msk.bf16.mxu0 %vm12990_vm5, %v11828_v52 }
0x2352   :  { %v5279_v18 = vpop.xlane.xlu1 %5278 }
0x2353   :  { %12554 = vrcp.f32 %v5279_v18 }
0x2356   :  { %v5559_v61 = vpop.permute.xlu1 %5558 }
0x235d   :  { %v12555_v13 = vpop.eup %12554 }
0x235e   :  { %v5289_v57 = vmul.f32 %v12555_v13, %v12547_v22 }
0x2360   :  { %11197 = vmatprep.mubr.msk.f32.mxu0 %vm83_vm0, %v5289_v57 }
0x2361   :  { %11198 = vmatmul.mubr.msk.f32.vlgmr.msra.gmra.mrb[66].mxu0 %vm83_vm0, %v5290_v12 }
0x2362   :  { %11833 = vmatpush3.bf16.xpose.msk.msra.mxu0 %vm12990_vm5, %v11828_v52  ;;  %11211 = vmatprep.mubr.msk.f32.mxu0 %vm501_vm4, %v5557_v60 }
0x2369   :  { %11212 = vmatmul.mubr.msk.f32.vlgmr.msra.gmra.mrb[68].mxu0 %vm501_vm4, %v5559_v61 }
0x23f1   :  { %v11206_v48 = vpop.f32.mrb[52].mxu1 }
0x23f2   :  { %v5648_v63 = vmul.f32 0.35355338, %v11206_v48  ;;  %v5547_v0 = vpop.f32.mrb[53].mxu1 }
0x23f3   :  { %v5647_v8 = vmul.f32 0.35355338, %v5547_v0 }
0x23f4   :  { %v5654_v3 = vsel %vm83_vm0, %v5648_v63, -inf }
0x23f5   :  { %5655 = vmax.xlane.f32.xlu1 %v5654_v3  ;;  %v5651_v9 = vsel %vm83_vm0, %v5647_v8, -inf }
0x23f6   :  { %5652 = vmax.xlane.f32.xlu0 %v5651_v9 }
0x23fb   :  { %v13769_v58 = vpop.f32.mrb[64].mxu0 }
0x23fc   :  { %v13771_v2 = vpop.f32.mrb[65].mxu0 }
0x2434   :  { %v13773_v20 = vpop.f32.mrb[66].mxu0 }
0x2435   :  { %v13775_v4 = vpop.f32.mrb[67].mxu0 }
0x243c   :  { %v11213_v44 = vpop.f32.mrb[68].mxu0 }
0x243d   :  { %v5638_v46 = vpop.f32.mrb[69].mxu0  ;;  %v5650_v5 = vmul.f32 0.35355338, %v11213_v44 }
0x243e   :  { %v5649_v51 = vmul.f32 0.35355338, %v5638_v46 }
0x243f   :  { %v5660_v7 = vsel %vm83_vm0, %v5650_v5, -inf }
0x2440   :  { %v5657_v6 = vsel %vm83_vm0, %v5649_v51, -inf }
0x2441   :  { %5658 = vmax.xlane.f32.xlu0 %v5657_v6 }
0x2445   :  { %5661 = vmax.xlane.f32.xlu0 %v5660_v7 }
0x2482   :  { %v5656_v28 = vpop.xlane.xlu1 %5655 }
0x2483   :  { %v5664_v11 = vsub.f32 %v5648_v63, %v5656_v28  ;;  %v5653_v16 = vpop.xlane.xlu0 %5652 }
0x2484   :  { %v5663_v17 = vsub.f32 %v5647_v8, %v5653_v16 }
0x2485   :  { %v5669_v59 = vmul.f32 1.442695, %v5664_v11 }
0x2486   :  { %v5667_v15 = vmul.f32 1.442695, %v5663_v17 }
0x2487   :  { %12556 = vpow2.f32 %v5669_v59 }
0x2488   :  { %12558 = vpow2.f32 %v5667_v15 }
0x2491   :  { %v12557_v19 = vpop.eup %12556 }
0x2492   :  { %v12559_v47 = vpop.eup %12558  ;;  %v5678_v22 = vsel %vm83_vm0, %v12557_v19, 0.0 }
0x2493   :  { %5679 = vadd.xlane.f32.xlu0 %v5678_v22  ;;  %v5675_v1 = vsel %vm83_vm0, %v12559_v47, 0.0 }
0x2494   :  { %5676 = vadd.xlane.f32.xlu1 %v5675_v1 }
0x24a5   :  { %12257 = vrot.lane.b32.xlu1 %v13691_v27, %s14686_s0 }
0x24a9   :  { %12267 = vrot.lane.b32.xlu1 %v13691_v27, %s14687_s29  ;;  %12262 = vrot.lane.b32.xlu0 %v13703_v49, %s14686_s0 }
0x24ad   :  { %5869 = vrot.lane.b32.xlu1 %v13683_v31, %s14688_s27 }
0x24b1   :  { %5871 = vrot.lane.b32.xlu1 %v13681_v33, %s14688_s27 }
0x24ce   :  { %v5659_v30 = vpop.xlane.xlu0 %5658 }
0x24cf   :  { %v5665_v25 = vsub.f32 %v5649_v51, %v5659_v30 }
0x24d1   :  { %v5671_v54 = vmul.f32 1.442695, %v5665_v25 }
0x24d2   :  { %v5662_v29 = vpop.xlane.xlu0 %5661 }
0x24d3   :  { %12560 = vpow2.f32 %v5671_v54  ;;  %v5666_v35 = vsub.f32 %v5650_v5, %v5662_v29 }
0x24d5   :  { %v5673_v37 = vmul.f32 1.442695, %v5666_v35 }
0x24d7   :  { %12562 = vpow2.f32 %v5673_v37 }
0x24dd   :  { %v12561_v39 = vpop.eup %12560 }
0x24de   :  { %v5681_v42 = vsel %vm83_vm0, %v12561_v39, 0.0 }
0x24df   :  { %5682 = vadd.xlane.f32.xlu1 %v5681_v42 }
0x24e1   :  { %v12563_v43 = vpop.eup %12562 }
0x24e2   :  { %v5684_v50 = vsel %vm83_vm0, %v12563_v43, 0.0 }
0x24e3   :  { %5685 = vadd.xlane.f32.xlu0 %v5684_v50 }
0x24f0   :  { %5962 = vrot.lane.b32.xlu1 %v13693_v10, %s14688_s27 }
0x24f9   :  { %12272 = vrot.lane.b32.xlu0 %v13703_v49, %s14687_s29 }
0x24fd   :  { %5960 = vrot.lane.b32.xlu0 %v13695_v14, %s14688_s27 }
0x2520   :  { %v5680_v62 = vpop.xlane.xlu0 %5679 }
0x2521   :  { %12564 = vrcp.f32 %v5680_v62  ;;  %v5677_v52 = vpop.xlane.xlu1 %5676 }
0x2522   :  { %12566 = vrcp.f32 %v5677_v52 }
0x2524   :  { %v12263_v18 = vpop.permute.xlu0 %12262 }
0x2525   :  { %v12265_v53 = vunpack.i.h.bf16 %v12263_v18  ;;  %v12264_v13 = vunpack.i.l.bf16 %v12263_v18  ;;  %v12258_v57 = vpop.permute.xlu1 %12257 }
0x2526   :  { %v12260_v12 = vunpack.i.h.bf16 %v12258_v57  ;;  %v12259_v60 = vunpack.i.l.bf16 %v12258_v57 }
0x2527   :  { %v11838_v61 = vpack.c.bf16 %v12265_v53, %v12264_v13 }
0x2528   :  { %v11834_v48 = vpack.c.bf16 %v12260_v12, %v12259_v60 }
0x2529   :  { %11839 = vmatprep.subr.bf16.mxu0 %v11838_v61  ;;  %v12268_v63 = vpop.permute.xlu1 %12267 }
0x252a   :  { %v12270_v0 = vunpack.i.h.bf16 %v12268_v63  ;;  %v12269_v8 = vunpack.i.l.bf16 %v12268_v63  ;;  %11835 = vmatprep.subr.bf16.mxu1 %v11834_v48  ;;  %11841 = vmatpush3.bf16.msra.mxu0 %v11838_v61 }
0x252b   :  { %v12565_v3 = vpop.eup %12564  ;;  %11837 = vmatpush3.bf16.msra.mxu1 %v11834_v48 }
0x252c   :  { %v12567_v9 = vpop.eup %12566  ;;  %v11842_v44 = vpack.c.bf16 %v12270_v0, %v12269_v8  ;;  %v5692_v51 = vmul.f32 %v12565_v3, %v12557_v19 }
0x252d   :  { %v5691_v46 = vmul.f32 %v12567_v9, %v12559_v47  ;;  %v5870_v5 = vpop.permute.xlu1 %5869 }
0x252e   :  { %11844 = vmatprep.subr.msk.bf16.mxu1 %vm12990_vm5, %v11842_v44 }
0x252f   :  { %11218 = vmatprep.mubr.msk.f32.mxu1 %vm83_vm0, %v5691_v46 }
0x2530   :  { %11219 = vmatmul.mubr.msk.f32.vlgmr.msra.gmra.mrb[54].mxu1 %vm83_vm0, %v5692_v51 }
0x2531   :  { %11232 = vmatprep.mubr.msk.f32.mxu1 %vm501_vm4, %v5870_v5  ;;  %v5872_v6 = vpop.permute.xlu1 %5871 }
0x2534   :  { %11847 = vmatpush3.bf16.xpose.msk.msra.mxu1 %vm12990_vm5, %v11842_v44 }
0x253b   :  { %11233 = vmatmul.mubr.msk.f32.vlgmr.msra.gmra.mrb[56].mxu1 %vm501_vm4, %v5872_v6 }
0x256c   :  { %v5683_v7 = vpop.xlane.xlu1 %5682 }
0x256d   :  { %12568 = vrcp.f32 %v5683_v7 }
0x2570   :  { %v5686_v28 = vpop.xlane.xlu0 %5685  ;;  %v5963_v30 = vpop.permute.xlu1 %5962 }
0x2571   :  { %12570 = vrcp.f32 %v5686_v28 }
0x2574   :  { %v12273_v11 = vpop.permute.xlu0 %12272 }
0x2575   :  { %v12275_v16 = vunpack.i.h.bf16 %v12273_v11  ;;  %v12274_v17 = vunpack.i.l.bf16 %v12273_v11 }
0x2577   :  { %v12569_v59 = vpop.eup %12568  ;;  %v11848_v15 = vpack.c.bf16 %v12275_v16, %v12274_v17 }
0x2578   :  { %v5693_v19 = vmul.f32 %v12569_v59, %v12561_v39  ;;  %v5961_v1 = vpop.permute.xlu0 %5960 }
0x2579   :  { %11850 = vmatprep.subr.msk.bf16.mxu0 %vm12990_vm5, %v11848_v15 }
0x257a   :  { %11225 = vmatprep.mubr.msk.f32.mxu0 %vm83_vm0, %v5693_v19 }
0x257b   :  { %v12571_v47 = vpop.eup %12570 }
0x257c   :  { %v5694_v22 = vmul.f32 %v12571_v47, %v12563_v43 }
0x257e   :  { %11226 = vmatmul.mubr.msk.f32.vlgmr.msra.gmra.mrb[70].mxu0 %vm83_vm0, %v5694_v22 }
0x257f   :  { %11853 = vmatpush3.bf16.xpose.msk.msra.mxu0 %vm12990_vm5, %v11848_v15  ;;  %11239 = vmatprep.mubr.msk.f32.mxu0 %vm501_vm4, %v5961_v1 }
0x2586   :  { %11240 = vmatmul.mubr.msk.f32.vlgmr.msra.gmra.mrb[72].mxu0 %vm501_vm4, %v5963_v30 }
0x2603   :  { %v13815_v25 = vpop.f32.mrb[54].mxu1 }
0x2604   :  { %v13817_v54 = vpop.f32.mrb[55].mxu1 }
0x260e   :  { %v11234_v29 = vpop.f32.mrb[56].mxu1 }
0x260f   :  { %v6052_v35 = vmul.f32 0.35355338, %v11234_v29  ;;  %v5951_v37 = vpop.f32.mrb[57].mxu1 }
0x2610   :  { %v6051_v39 = vmul.f32 0.35355338, %v5951_v37 }
0x2611   :  { %v6058_v42 = vsel %vm83_vm0, %v6052_v35, -inf }
0x2612   :  { %6059 = vmax.xlane.f32.xlu1 %v6058_v42  ;;  %v6055_v43 = vsel %vm83_vm0, %v6051_v39, -inf }
0x2613   :  { %6056 = vmax.xlane.f32.xlu0 %v6055_v43 }
0x2651   :  { %v13821_v50 = vpop.f32.mrb[70].mxu0 }
0x2652   :  { %v13823_v62 = vpop.f32.mrb[71].mxu0 }
0x2659   :  { %v11241_v52 = vpop.f32.mrb[72].mxu0 }
0x265a   :  { %v6042_v18 = vpop.f32.mrb[73].mxu0  ;;  %v6054_v13 = vmul.f32 0.35355338, %v11241_v52 }
0x265b   :  { %v6053_v53 = vmul.f32 0.35355338, %v6042_v18 }
0x265c   :  { %v6064_v12 = vsel %vm83_vm0, %v6054_v13, -inf }
0x265d   :  { %v6061_v57 = vsel %vm83_vm0, %v6053_v53, -inf }
0x265e   :  { %6062 = vmax.xlane.f32.xlu0 %v6061_v57 }
0x2662   :  { %6065 = vmax.xlane.f32.xlu0 %v6064_v12 }
0x269f   :  { %v6060_v60 = vpop.xlane.xlu1 %6059 }
0x26a0   :  { %v6068_v61 = vsub.f32 %v6052_v35, %v6060_v60  ;;  %v6057_v48 = vpop.xlane.xlu0 %6056 }
0x26a1   :  { %v6067_v63 = vsub.f32 %v6051_v39, %v6057_v48 }
0x26a2   :  { %v6073_v0 = vmul.f32 1.442695, %v6068_v61 }
0x26a3   :  { %v6071_v8 = vmul.f32 1.442695, %v6067_v63 }
0x26a4   :  { %12572 = vpow2.f32 %v6073_v0 }
0x26a5   :  { %12574 = vpow2.f32 %v6071_v8 }
0x26ae   :  { %v12573_v3 = vpop.eup %12572 }
0x26af   :  { %v12575_v9 = vpop.eup %12574  ;;  %v6082_v44 = vsel %vm83_vm0, %v12573_v3, 0.0 }
0x26b0   :  { %6083 = vadd.xlane.f32.xlu0 %v6082_v44  ;;  %v6079_v46 = vsel %vm83_vm0, %v12575_v9, 0.0 }
0x26b1   :  { %6080 = vadd.xlane.f32.xlu1 %v6079_v46 }
0x26c2   :  { %12277 = vrot.lane.b32.xlu1 %v13691_v27, %s14689_s7 }
0x26c6   :  { %12282 = vrot.lane.b32.xlu0 %v13703_v49, %s14689_s7  ;;  %12287 = vrot.lane.b32.xlu1 %v13691_v27, %s14690_s21 }
0x26ca   :  { %6273 = vrot.lane.b32.xlu1 %v13683_v31, %s14691_s4 }
0x26ce   :  { %6275 = vrot.lane.b32.xlu1 %v13681_v33, %s14691_s4 }
0x26eb   :  { %v6063_v51 = vpop.xlane.xlu0 %6062 }
0x26ec   :  { %v6069_v5 = vsub.f32 %v6053_v53, %v6063_v51 }
0x26ee   :  { %v6075_v6 = vmul.f32 1.442695, %v6069_v5 }
0x26ef   :  { %v6066_v7 = vpop.xlane.xlu0 %6065 }
0x26f0   :  { %12576 = vpow2.f32 %v6075_v6  ;;  %v6070_v28 = vsub.f32 %v6054_v13, %v6066_v7 }
0x26f2   :  { %v6077_v11 = vmul.f32 1.442695, %v6070_v28 }
0x26f4   :  { %12578 = vpow2.f32 %v6077_v11 }
0x26fa   :  { %v12577_v16 = vpop.eup %12576 }
0x26fb   :  { %v6085_v17 = vsel %vm83_vm0, %v12577_v16, 0.0 }
0x26fc   :  { %6086 = vadd.xlane.f32.xlu1 %v6085_v17 }
0x26fe   :  { %v12579_v59 = vpop.eup %12578 }
0x26ff   :  { %v6088_v15 = vsel %vm83_vm0, %v12579_v59, 0.0 }
0x2700   :  { %6089 = vadd.xlane.f32.xlu0 %v6088_v15 }
0x270d   :  { %6366 = vrot.lane.b32.xlu1 %v13693_v10, %s14691_s4 }
0x2716   :  { %12292 = vrot.lane.b32.xlu0 %v13703_v49, %s14690_s21 }
0x271a   :  { %6364 = vrot.lane.b32.xlu0 %v13695_v14, %s14691_s4 }
0x273d   :  { %v6084_v33 = vpop.xlane.xlu0 %6083 }
0x273e   :  { %12580 = vrcp.f32 %v6084_v33  ;;  %v6081_v31 = vpop.xlane.xlu1 %6080 }
0x273f   :  { %12582 = vrcp.f32 %v6081_v31 }
0x2741   :  { %v12283_v19 = vpop.permute.xlu0 %12282 }
0x2742   :  { %v12285_v47 = vunpack.i.h.bf16 %v12283_v19  ;;  %v12284_v22 = vunpack.i.l.bf16 %v12283_v19  ;;  %v12278_v1 = vpop.permute.xlu1 %12277 }
0x2743   :  { %v12280_v30 = vunpack.i.h.bf16 %v12278_v1  ;;  %v12279_v29 = vunpack.i.l.bf16 %v12278_v1 }
0x2744   :  { %v11858_v35 = vpack.c.bf16 %v12285_v47, %v12284_v22 }
0x2745   :  { %v11854_v37 = vpack.c.bf16 %v12280_v30, %v12279_v29 }
0x2746   :  { %v12288_v39 = vpop.permute.xlu1 %12287  ;;  %11859 = vmatprep.subr.bf16.mxu0 %v11858_v35 }
0x2747   :  { %v12290_v10 = vunpack.i.h.bf16 %v12288_v39  ;;  %v12289_v42 = vunpack.i.l.bf16 %v12288_v39  ;;  %11855 = vmatprep.subr.bf16.mxu1 %v11854_v37  ;;  %11861 = vmatpush3.bf16.msra.mxu0 %v11858_v35 }
0x2748   :  { %v12581_v43 = vpop.eup %12580  ;;  %11857 = vmatpush3.bf16.msra.mxu1 %v11854_v37 }
0x2749   :  { %v12583_v14 = vpop.eup %12582  ;;  %v11862_v52 = vpack.c.bf16 %v12290_v10, %v12289_v42  ;;  %v6096_v53 = vmul.f32 %v12581_v43, %v12573_v3 }
0x274a   :  { %v6095_v18 = vmul.f32 %v12583_v14, %v12575_v9  ;;  %v6274_v13 = vpop.permute.xlu1 %6273 }
0x274b   :  { %11864 = vmatprep.subr.msk.bf16.mxu1 %vm12990_vm5, %v11862_v52 }
0x274c   :  { %11246 = vmatprep.mubr.msk.f32.mxu1 %vm83_vm0, %v6095_v18 }
0x274d   :  { %11247 = vmatmul.mubr.msk.f32.vlgmr.msra.gmra.mrb[58].mxu1 %vm83_vm0, %v6096_v53 }
0x274e   :  { %11260 = vmatprep.mubr.msk.f32.mxu1 %vm501_vm4, %v6274_v13  ;;  %v6276_v57 = vpop.permute.xlu1 %6275 }
0x2751   :  { %11867 = vmatpush3.bf16.xpose.msk.msra.mxu1 %vm12990_vm5, %v11862_v52 }
0x2758   :  { %11261 = vmatmul.mubr.msk.f32.vlgmr.msra.gmra.mrb[60].mxu1 %vm501_vm4, %v6276_v57 }
0x2789   :  { %v6087_v12 = vpop.xlane.xlu1 %6086 }
0x278a   :  { %12584 = vrcp.f32 %v6087_v12 }
0x278d   :  { %v6090_v60 = vpop.xlane.xlu0 %6089  ;;  %v6367_v51 = vpop.permute.xlu1 %6366 }
0x278e   :  { %12586 = vrcp.f32 %v6090_v60 }
0x2791   :  { %v12293_v61 = vpop.permute.xlu0 %12292 }
0x2792   :  { %v12295_v48 = vunpack.i.h.bf16 %v12293_v61  ;;  %v12294_v63 = vunpack.i.l.bf16 %v12293_v61 }
0x2794   :  { %v12585_v0 = vpop.eup %12584  ;;  %v11868_v8 = vpack.c.bf16 %v12295_v48, %v12294_v63 }
0x2795   :  { %v6097_v3 = vmul.f32 %v12585_v0, %v12577_v16  ;;  %v6365_v46 = vpop.permute.xlu0 %6364 }
0x2796   :  { %11870 = vmatprep.subr.msk.bf16.mxu0 %vm12990_vm5, %v11868_v8 }
0x2797   :  { %11253 = vmatprep.mubr.msk.f32.mxu0 %vm83_vm0, %v6097_v3 }
0x2798   :  { %v12587_v9 = vpop.eup %12586 }
0x2799   :  { %v6098_v44 = vmul.f32 %v12587_v9, %v12579_v59 }
0x279b   :  { %11254 = vmatmul.mubr.msk.f32.vlgmr.msra.gmra.mrb[74].mxu0 %vm83_vm0, %v6098_v44 }
0x279c   :  { %11873 = vmatpush3.bf16.xpose.msk.msra.mxu0 %vm12990_vm5, %v11868_v8  ;;  %11267 = vmatprep.mubr.msk.f32.mxu0 %vm501_vm4, %v6365_v46 }
0x27a3   :  { %11268 = vmatmul.mubr.msk.f32.vlgmr.msra.gmra.mrb[76].mxu0 %vm501_vm4, %v6367_v51 }
0x2820   :  { %v11248_v5 = vpop.f32.mrb[58].mxu1 }
0x2821   :  { %v6177_v6 = vpop.f32.mrb[59].mxu1 }
0x282b   :  { %v11262_v7 = vpop.f32.mrb[60].mxu1 }
0x282c   :  { %v6456_v28 = vmul.f32 0.35355338, %v11262_v7  ;;  %v6355_v11 = vpop.f32.mrb[61].mxu1 }
0x282d   :  { %v6455_v16 = vmul.f32 0.35355338, %v6355_v11 }
0x282e   :  { %v6462_v17 = vsel %vm83_vm0, %v6456_v28, -inf }
0x282f   :  { %6463 = vmax.xlane.f32.xlu1 %v6462_v17  ;;  %v6459_v59 = vsel %vm83_vm0, %v6455_v16, -inf }
0x2830   :  { %6460 = vmax.xlane.f32.xlu0 %v6459_v59 }
0x286e   :  { %v13865_v15 = vpop.f32.mrb[74].mxu0 }
0x286f   :  { %v13867_v33 = vpop.f32.mrb[75].mxu0 }
0x2876   :  { %v11269_v31 = vpop.f32.mrb[76].mxu0 }
0x2877   :  { %v6446_v19 = vpop.f32.mrb[77].mxu0  ;;  %v6458_v22 = vmul.f32 0.35355338, %v11269_v31 }
0x2878   :  { %v6457_v47 = vmul.f32 0.35355338, %v6446_v19 }
0x2879   :  { %v6468_v30 = vsel %vm83_vm0, %v6458_v22, -inf }
0x287a   :  { %v6465_v1 = vsel %vm83_vm0, %v6457_v47, -inf }
0x287b   :  { %6466 = vmax.xlane.f32.xlu0 %v6465_v1  ;;  %v10178_v1 = vld [vmem:[%s14682_s28 + $0x48] sm:$0xff] }
0x287f   :  { %6469 = vmax.xlane.f32.xlu0 %v6468_v30  ;;  %v10179_v30 = vld [vmem:[%s14682_s28 + $0x50] sm:$0xff] }
0x28bc   :  { %v6464_v29 = vpop.xlane.xlu1 %6463 }
0x28bd   :  { %v6472_v35 = vsub.f32 %v6456_v28, %v6464_v29  ;;  %v6461_v37 = vpop.xlane.xlu0 %6460 }
0x28be   :  { %v6471_v39 = vsub.f32 %v6455_v16, %v6461_v37 }
0x28bf   :  { %v6477_v10 = vmul.f32 1.442695, %v6472_v35  ;;  %v10180_v35 = vld [vmem:[%s14682_s28 + $0x58] sm:$0xff] }
0x28c0   :  { %v6475_v42 = vmul.f32 1.442695, %v6471_v39  ;;  %v11886_v37 = vpack.c.bf16 %v10180_v35, %v10179_v30 }
0x28c1   :  { %12588 = vpow2.f32 %v6477_v10 }
0x28c2   :  { %12590 = vpow2.f32 %v6475_v42 }
0x28cb   :  { %v12589_v43 = vpop.eup %12588 }
0x28cc   :  { %v12591_v14 = vpop.eup %12590  ;;  %v6486_v52 = vsel %vm83_vm0, %v12589_v43, 0.0 }
0x28cd   :  { %6487 = vadd.xlane.f32.xlu0 %v6486_v52  ;;  %v6483_v18 = vsel %vm83_vm0, %v12591_v14, 0.0 }
0x28ce   :  { %6484 = vadd.xlane.f32.xlu1 %v6483_v18 }
0x2908   :  { %v6467_v53 = vpop.xlane.xlu0 %6466 }
0x2909   :  { %v6473_v13 = vsub.f32 %v6457_v47, %v6467_v53 }
0x290b   :  { %v6479_v57 = vmul.f32 1.442695, %v6473_v13 }
0x290c   :  { %v6470_v12 = vpop.xlane.xlu0 %6469 }
0x290d   :  { %12592 = vpow2.f32 %v6479_v57  ;;  %v6474_v60 = vsub.f32 %v6458_v22, %v6470_v12  ;;  %v10177_v22 = vld [vmem:[%s14682_s28 + $0x40] sm:$0xff] }
0x290e   :  { %v11882_v29 = vpack.c.bf16 %v10178_v1, %v10177_v22 }
0x290f   :  { %v6481_v61 = vmul.f32 1.442695, %v6474_v60 }
0x2911   :  { %12594 = vpow2.f32 %v6481_v61 }
0x2917   :  { %v12593_v48 = vpop.eup %12592 }
0x2918   :  { %v6489_v63 = vsel %vm83_vm0, %v12593_v48, 0.0 }
0x2919   :  { %6490 = vadd.xlane.f32.xlu1 %v6489_v63 }
0x291b   :  { %v12595_v0 = vpop.eup %12594 }
0x291c   :  { %v6492_v8 = vsel %vm83_vm0, %v12595_v0, 0.0 }
0x291d   :  { %6493 = vadd.xlane.f32.xlu0 %v6492_v8 }
0x292a   :  { %12297 = vrot.lane.b32.xlu1 %v13691_v27, %s14692_s26 }
0x292e   :  { %6681 = vrot.lane.b32.xlu1 %v13817_v54, %s14693_s2 }
0x2932   :  { %6683 = vrot.lane.b32.xlu1 %v13815_v25, %s14693_s2 }
0x2933   :  { %12302 = vrot.lane.b32.xlu0 %v13703_v49, %s14692_s26 }
0x2936   :  { %6699 = vrot.lane.b32.xlu1 %v11248_v5, %s14694_s25 }
0x2937   :  { %6697 = vrot.lane.b32.xlu0 %v6177_v6, %s14694_s25 }
0x295a   :  { %v6488_v27 = vpop.xlane.xlu0 %6487 }
0x295b   :  { %v6485_v3 = vpop.xlane.xlu1 %6484 }
0x295c   :  { %12596 = vrcp.f32 %v6485_v3 }
0x295d   :  { %12598 = vrcp.f32 %v6488_v27 }
0x2966   :  { %v12597_v9 = vpop.eup %12596 }
0x2967   :  { %v6499_v44 = vmul.f32 %v12597_v9, %v12591_v14  ;;  %v12599_v28 = vpop.eup %12598 }
0x2968   :  { %v6500_v17 = vmul.f32 %v12599_v28, %v12589_v43 }
0x2969   :  { %11274 = vmatprep.mubr.msk.f32.mxu1 %vm83_vm0, %v6499_v44 }
0x29a6   :  { %v6491_v46 = vpop.xlane.xlu1 %6490 }
0x29a7   :  { %12600 = vrcp.f32 %v6491_v46 }
0x29aa   :  { %v12298_v54 = vpop.permute.xlu1 %12297  ;;  %v6494_v51 = vpop.xlane.xlu0 %6493 }
0x29ab   :  { %v12300_v25 = vunpack.i.h.bf16 %v12298_v54  ;;  %v12299_v7 = vunpack.i.l.bf16 %v12298_v54  ;;  %12602 = vrcp.f32 %v6494_v51 }
0x29ad   :  { %v11874_v49 = vpack.c.bf16 %v12300_v25, %v12299_v7 }
0x29ae   :  { %v12303_v5 = vpop.permute.xlu0 %12302  ;;  %v6682_v14 = vpop.permute.xlu1 %6681 }
0x29af   :  { %v12305_v11 = vunpack.i.h.bf16 %v12303_v5  ;;  %v12304_v6 = vunpack.i.l.bf16 %v12303_v5  ;;  %11875 = vmatprep.subr.bf16.mxu1 %v11874_v49 }
0x29b0   :  { %11877 = vmatpush3.bf16.msra.mxu1 %v11874_v49 }
0x29b1   :  { %v12601_v16 = vpop.eup %12600  ;;  %v11878_v59 = vpack.c.bf16 %v12305_v11, %v12304_v6  ;;  %11883 = vmatprep.subr.bf16.mxu1 %v11882_v29 }
0x29b2   :  { %v6501_v31 = vmul.f32 %v12601_v16, %v12593_v48  ;;  %v6684_v52 = vpop.permute.xlu1 %6683  ;;  %v6698_v53 = vpop.permute.xlu0 %6697 }
0x29b3   :  { %11275 = vmatmul.mubr.msk.f32.vlgmr.msra.gmra.mrb[62].mxu1 %vm83_vm0, %v6500_v17  ;;  %11879 = vmatprep.subr.bf16.mxu0 %v11878_v59 }
0x29b4   :  { %11881 = vmatpush3.bf16.msra.mxu0 %v11878_v59  ;;  %11281 = vmatprep.mubr.msk.f32.mxu0 %vm83_vm0, %v6501_v31 }
0x29b5   :  { %v12603_v19 = vpop.eup %12602  ;;  %11885 = vmatpush3.bf16.msra.mxu1 %v11882_v29 }
0x29b6   :  { %v6502_v47 = vmul.f32 %v12603_v19, %v12595_v0  ;;  %11887 = vmatprep.subr.bf16.mxu1 %v11886_v37  ;;  %v6700_v18 = vpop.permute.xlu1 %6699 }
0x29b8   :  { %11282 = vmatmul.mubr.msk.f32.vlgmr.msra.gmra.mrb[78].mxu0 %vm83_vm0, %v6502_v47 }
0x29b9   :  { %11889 = vmatpush3.bf16.msra.mxu1 %v11886_v37 }
0x2a86   :  { %v11276_v39 = vpop.f32.mrb[62].mxu1 }
0x2a87   :  { %6715 = vrot.lane.b32.xlu1 %v11276_v39, %s14695_s23  ;;  %v6581_v10 = vpop.f32.mrb[63].mxu1 }
0x2a88   :  { %6713 = vrot.lane.b32.xlu0 %v6581_v10, %s14695_s23 }
0x2a8b   :  { %6687 = vrot.lane.b32.xlu1 %v13821_v50, %s14693_s2  ;;  %v11283_v42 = vpop.f32.mrb[78].mxu0  ;;  %v6725_v50 = vsel %vm501_vm4, %v13771_v2, %v6682_v14 }
0x2a8c   :  { %6685 = vrot.lane.b32.xlu0 %v13823_v62, %s14693_s2  ;;  %v6668_v43 = vpop.f32.mrb[79].mxu0  ;;  %v6726_v62 = vsel %vm501_vm4, %v13769_v58, %v6684_v52 }
0x2a8f   :  { %6703 = vrot.lane.b32.xlu1 %v13865_v15, %s14694_s25  ;;  %v6729_v15 = vsel %vm83_vm0, %v6725_v50, %v6698_v53 }
0x2a90   :  { %6701 = vrot.lane.b32.xlu0 %v13867_v33, %s14694_s25  ;;  %v6730_v33 = vsel %vm83_vm0, %v6726_v62, %v6700_v18  ;;  %v10191_v62 = vld [vmem:[%s14597_s12 + $0x40] sm:$0xff] }
0x2a93   :  { %6719 = vrot.lane.b32.xlu1 %v11283_v42, %s14695_s23 }
0x2a94   :  { %6717 = vrot.lane.b32.xlu0 %v6668_v43, %s14695_s23 }
0x2af9   :  { %v6716_v13 = vpop.permute.xlu1 %6715 }
0x2afa   :  { %v6714_v57 = vpop.permute.xlu0 %6713  ;;  %v6734_v60 = vsel %vm2164_vm6, %v6730_v33, %v6716_v13  ;;  %v10193_v33 = vld [vmem:[%s14597_s12 + $0x50] sm:$0xff] }
0x2afb   :  { %v6733_v12 = vsel %vm2164_vm6, %v6729_v15, %v6714_v57  ;;  %v10192_v15 = vld [vmem:[%s14597_s12 + $0x48] sm:$0xff] }
0x2afc   :  { %11292 = vmatprep.mubr.msk.f32.mxu1 %vm397_vm3, %v6733_v12  ;;  %v11890_v57 = vpack.c.bf16 %v10192_v15, %v10191_v62  ;;  %v10194_v12 = vld [vmem:[%s14597_s12 + $0x58] sm:$0xff] }
0x2afd   :  { %v6688_v61 = vpop.permute.xlu1 %6687  ;;  %11293 = vmatmul.mubr.msk.f32.vlgmr.msra.gmra.mrb[64].mxu1 %vm397_vm3, %v6734_v60  ;;  %v11894_v60 = vpack.c.bf16 %v10194_v12, %v10193_v33 }
0x2afe   :  { %v6686_v48 = vpop.permute.xlu0 %6685  ;;  %v6728_v8 = vsel %vm501_vm4, %v13773_v20, %v6688_v61  ;;  %11891 = vmatprep.subr.bf16.mxu0 %v11890_v57  ;;  %v10201_v61 = vld [vmem:[%s14599_s14 + $0x80] sm:$0xff] }
0x2aff   :  { %v6727_v58 = vsel %vm501_vm4, %v13775_v4, %v6686_v48  ;;  %v10182_v4 = vld [vmem:[%s14683_s6 + $0x2] ss:$0 sm:$0xff]  ;;  %11893 = vmatpush3.bf16.msra.mxu0 %v11890_v57  ;;  %v10202_v48 = vld [vmem:[%s14599_s14 + $0x88] sm:$0xff]  ;;  %s14700_s6 = sld [smem:[#allocation18_spill]] }
0x2b00   :  { %11895 = vmatprep.subr.bf16.mxu0 %v11894_v60 }
0x2b01   :  { %v6704_v2 = vpop.permute.xlu1 %6703 }
0x2b02   :  { %v6702_v63 = vpop.permute.xlu0 %6701  ;;  %v6732_v44 = vsel %vm83_vm0, %v6728_v8, %v6704_v2  ;;  %v10203_v2 = vld [vmem:[%s14599_s14 + $0x90] sm:$0xff] }
0x2b03   :  { %v6731_v3 = vsel %vm83_vm0, %v6727_v58, %v6702_v63  ;;  %11897 = vmatpush3.bf16.msra.mxu0 %v11894_v60  ;;  %v11898_v63 = vpack.c.bf16 %v10202_v48, %v10201_v61  ;;  %v10204_v58 = vld [vmem:[%s14599_s14 + $0x98] sm:$0xff] }
0x2b05   :  { %v6720_v0 = vpop.permute.xlu1 %6719  ;;  %11899 = vmatprep.subr.bf16.mxu1 %v11898_v63 }
0x2b06   :  { %v6718_v9 = vpop.permute.xlu0 %6717  ;;  %v6736_v46 = vsel %vm2164_vm6, %v6732_v44, %v6720_v0  ;;  %v11902_v0 = vpack.c.bf16 %v10204_v58, %v10203_v2  ;;  %11901 = vmatpush3.bf16.msra.mxu1 %v11898_v63  ;;  %v10210_v58 = vld [vmem:[%s14698_s11 + $0x2] ss:$0 sm:$0xff] }
0x2b07   :  { %v6735_v27 = vsel %vm2164_vm6, %v6731_v3, %v6718_v9 }
0x2b08   :  { %11295 = vmatprep.mubr.msk.f32.mxu1 %vm397_vm3, %v6735_v27  ;;  %11903 = vmatprep.subr.bf16.mxu1 %v11902_v0 }
0x2b09   :  { %11296 = vmatmul.mubr.msk.f32.gmra.mrb[66].mxu1 %vm397_vm3, %v6736_v46 }
0x2b0a   :  { %11905 = vmatpush3.bf16.msra.mxu1 %v11902_v0 }
0x2bd0   :  { %v11294_v54 = vpop.f32.mrb[64].mxu1 }
0x2bd1   :  { %v6834_v51 = vadd.f32 %v11294_v54, %v10182_v4  ;;  %v6828_v20 = vpop.f32.mrb[65].mxu1 }
0x2bd2   :  { %v6829_v25 = vadd.f32 %v10182_v4, %v6828_v20  ;;  %v10189_v20 = vld [vmem:[%s14593_s8 + $0x2] ss:$0 sm:$0xff] }
0x2bd3   :  { %v6848_v7 = vadd.f32 %v6834_v51, %v12951_v34 }
0x2bd4   :  { %v6847_v49 = vadd.f32 %v6829_v25, %v12955_v36 }
0x2bd5   :  { %v6858_v28 = vsel %vm397_vm3, %v6848_v7, 0.0 }
0x2bd6   :  { %6859 = vadd.xlane.f32.xlu1 %v6858_v28  ;;  %v6855_v5 = vsel %vm397_vm3, %v6847_v49, 0.0 }
0x2bd7   :  { %6856 = vadd.xlane.f32.xlu0 %v6855_v5 }
0x2bdc   :  { %v11297_v11 = vpop.f32.mrb[66].mxu1 }
0x2bdd   :  { %v6838_v6 = vpop.f32.mrb[67].mxu1  ;;  %v6844_v16 = vadd.f32 %v11297_v11, %v10182_v4 }
0x2bde   :  { %v6839_v17 = vadd.f32 %v10182_v4, %v6838_v6  ;;  %v10190_v6 = vld [vmem:[%s14594_s9 + $0x2] ss:$0 sm:$0xff] }
0x2bdf   :  { %v6850_v31 = vadd.f32 %v6844_v16, %v12957_v38 }
0x2be0   :  { %v6849_v59 = vadd.f32 %v6839_v17, %v12959_v40 }
0x2be1   :  { %v6864_v34 = vsel %vm397_vm3, %v6850_v31, 0.0 }
0x2be2   :  { %v6861_v19 = vsel %vm397_vm3, %v6849_v59, 0.0 }
0x2be3   :  { %6862 = vadd.xlane.f32.xlu0 %v6861_v19 }
0x2be7   :  { %6865 = vadd.xlane.f32.xlu0 %v6864_v34 }
0x2c63   :  { %v6860_v36 = vpop.xlane.xlu1 %6859 }
0x2c64   :  { %v6868_v47 = vmul.f32 0.03125, %v6860_v36  ;;  %v6857_v22 = vpop.xlane.xlu0 %6856 }
0x2c65   :  { %v6867_v1 = vmul.f32 0.03125, %v6857_v22 }
0x2c66   :  { %v6872_v30 = vsub.f32 %v6848_v7, %v6868_v47 }
0x2c67   :  { %v6871_v29 = vsub.f32 %v6847_v49, %v6867_v1 }
0x2c68   :  { %v6876_v35 = vmul.f32 %v6872_v30, %v6872_v30 }
0x2c69   :  { %v6875_v37 = vmul.f32 %v6871_v29, %v6871_v29 }
0x2c6a   :  { %v6882_v39 = vsel %vm397_vm3, %v6876_v35, 0.0 }
0x2c6b   :  { %6883 = vadd.xlane.f32.xlu0 %v6882_v39  ;;  %v6879_v40 = vsel %vm397_vm3, %v6875_v37, 0.0  ;;  %v10205_v37 = vld [vmem:[%s14599_s14 + $0xa0] sm:$0xff]  ;;  %v10206_v39 = vld [vmem:[%s14599_s14 + $0xa8] sm:$0xff] }
0x2c6c   :  { %6880 = vadd.xlane.f32.xlu1 %v6879_v40  ;;  %v11906_v40 = vpack.c.bf16 %v10206_v39, %v10205_v37 }
0x2c6e   :  { %11907 = vmatprep.subr.bf16.mxu1 %v11906_v40 }
0x2c6f   :  { %11909 = vmatpush3.bf16.msra.mxu1 %v11906_v40 }
0x2c70   :  { %v6863_v38 = vpop.xlane.xlu0 %6862 }
0x2c71   :  { %v6869_v10 = vmul.f32 0.03125, %v6863_v38  ;;  %v10207_v38 = vld [vmem:[%s14599_s14 + $0xb0] sm:$0xff] }
0x2c73   :  { %v6873_v42 = vsub.f32 %v6849_v59, %v6869_v10  ;;  %v10208_v10 = vld [vmem:[%s14599_s14 + $0xb8] sm:$0xff] }
0x2c74   :  { %v6866_v43 = vpop.xlane.xlu0 %6865 }
0x2c75   :  { %v6870_v14 = vmul.f32 0.03125, %v6866_v43  ;;  %v6877_v52 = vmul.f32 %v6873_v42, %v6873_v42  ;;  %v10196_v43 = vld [vmem:[%s14598_s13 + $0x2] ss:$0 sm:$0xff] }
0x2c77   :  { %v6874_v18 = vsub.f32 %v6850_v31, %v6870_v14  ;;  %v6885_v53 = vsel %vm397_vm3, %v6877_v52, 0.0 }
0x2c78   :  { %6886 = vadd.xlane.f32.xlu1 %v6885_v53 }
0x2c79   :  { %v6878_v50 = vmul.f32 %v6874_v18, %v6874_v18 }
0x2c7b   :  { %v6888_v13 = vsel %vm397_vm3, %v6878_v50, 0.0 }
0x2c7c   :  { %6889 = vadd.xlane.f32.xlu0 %v6888_v13 }
0x2cf8   :  { %v6884_v8 = vpop.xlane.xlu0 %6883 }
0x2cf9   :  { %v6892_v3 = vmul.f32 0.03125, %v6884_v8  ;;  %v6881_v9 = vpop.xlane.xlu1 %6880 }
0x2cfa   :  { %v6891_v44 = vmul.f32 0.03125, %v6881_v9 }
0x2cfb   :  { %v6896_v27 = vadd.f32 1e-05, %v6892_v3 }
0x2cfc   :  { %v6895_v46 = vadd.f32 1e-05, %v6891_v44 }
0x2cfd   :  { %12604 = vrsqrt.f32 %v6896_v27 }
0x2cfe   :  { %12606 = vrsqrt.f32 %v6895_v46 }
0x2d05   :  { %v6887_v4 = vpop.xlane.xlu1 %6886 }
0x2d06   :  { %v6893_v54 = vmul.f32 0.03125, %v6887_v4 }
0x2d07   :  { %v12605_v51 = vpop.eup %12604 }
0x2d08   :  { %v12607_v25 = vpop.eup %12606  ;;  %v6904_v7 = vmul.f32 %v12605_v51, %v6872_v30  ;;  %v6897_v49 = vadd.f32 1e-05, %v6893_v54 }
0x2d09   :  { %v6890_v28 = vpop.xlane.xlu0 %6889  ;;  %v6903_v5 = vmul.f32 %v12607_v25, %v6871_v29 }
0x2d0a   :  { %12608 = vrsqrt.f32 %v6897_v49  ;;  %v6894_v11 = vmul.f32 0.03125, %v6890_v28  ;;  %v6914_v16 = vmul.f32 %v10189_v20, %v6904_v7 }
0x2d0b   :  { %v6913_v17 = vmul.f32 %v10189_v20, %v6903_v5 }
0x2d0c   :  { %v6898_v59 = vadd.f32 1e-05, %v6894_v11  ;;  %v6924_v19 = vadd.f32 %v10190_v6, %v6914_v16 }
0x2d0d   :  { %v6923_v31 = vadd.f32 %v10190_v6, %v6913_v17 }
0x2d0e   :  { %12610 = vrsqrt.f32 %v6898_v59 }
0x2d0f   :  { %11306 = vmatprep.mubr.msk.f32.mxu0 %vm397_vm3, %v6923_v31 }
0x2d10   :  { %11307 = vmatmul.mubr.msk.f32.vlgmr.msra.gmra.mrb[80].mxu0 %vm397_vm3, %v6924_v19 }
0x2d14   :  { %v12609_v34 = vpop.eup %12608 }
0x2d15   :  { %v6905_v36 = vmul.f32 %v12609_v34, %v6873_v42  ;;  %v11910_v42 = vpack.c.bf16 %v10208_v10, %v10207_v38 }
0x2d17   :  { %v6915_v47 = vmul.f32 %v10189_v20, %v6905_v36  ;;  %11911 = vmatprep.subr.bf16.mxu1 %v11910_v42 }
0x2d18   :  { %v12611_v22 = vpop.eup %12610  ;;  %11913 = vmatpush3.bf16.msra.mxu1 %v11910_v42  ;;  %v10219_v42 = vld [vmem:[%s14677_s1 + $0x60] sm:$0xff] }
0x2d19   :  { %v6925_v1 = vadd.f32 %v10190_v6, %v6915_v47  ;;  %v6906_v30 = vmul.f32 %v12611_v22, %v6874_v18 }
0x2d1b   :  { %11309 = vmatprep.mubr.msk.f32.mxu0 %vm397_vm3, %v6925_v1  ;;  %v6916_v29 = vmul.f32 %v10189_v20, %v6906_v30 }
0x2d1d   :  { %v6926_v35 = vadd.f32 %v10190_v6, %v6916_v29 }
0x2d1f   :  { %11310 = vmatmul.mubr.msk.f32.gmra.mrb[82].mxu0 %vm397_vm3, %v6926_v35 }
0x2de3   :  { %v11308_v14 = vpop.f32.mrb[80].mxu0 }
0x2de4   :  { %v7024_v52 = vadd.f32 %v11308_v14, %v10196_v43  ;;  %v7018_v18 = vpop.f32.mrb[81].mxu0 }
0x2de5   :  { %v7019_v53 = vadd.f32 %v10196_v43, %v7018_v18  ;;  %v10222_v18 = vld [vmem:[%s14677_s1 + $0x78] sm:$0xff] }
0x2de6   :  { %v7042_v50 = vmul.f32 0.01, %v7024_v52  ;;  %vm7038_vm1 = vcmp.gt.f32.partialorder %v7024_v52, 0.0 }
0x2de7   :  { %vm7037_vm2 = vcmp.gt.f32.partialorder %v7019_v53, 0.0  ;;  %v7041_v13 = vmul.f32 0.01, %v7019_v53 }
0x2de8   :  { %v7046_v15 = vsel %vm7038_vm1, %v7024_v52, %v7042_v50  ;;  %v10221_v52 = vld [vmem:[%s14677_s1 + $0x70] sm:$0xff] }
0x2de9   :  { %v7045_v62 = vsel %vm7037_vm2, %v7019_v53, %v7041_v13  ;;  %v11918_v53 = vpack.c.bf16 %v10222_v18, %v10221_v52 }
0x2dea   :  { %11328 = vmatprep.mubr.msk.f32.mxu1 %vm2491_vm9, %v7045_v62 }
0x2deb   :  { %11329 = vmatmul.mubr.msk.f32.vlgmr.msra.gmra.mrb[68].mxu1 %vm2491_vm9, %v7046_v15 }
0x2df2   :  { %v11311_v57 = vpop.f32.mrb[82].mxu0 }
0x2df3   :  { %v7034_v33 = vadd.f32 %v11311_v57, %v10196_v43  ;;  %v7028_v12 = vpop.f32.mrb[83].mxu0 }
0x2df4   :  { %v7029_v60 = vadd.f32 %v10196_v43, %v7028_v12  ;;  %v10220_v43 = vld [vmem:[%s14677_s1 + $0x68] sm:$0xff]  ;;  %s14703_s1 = sld [smem:[#allocation20_spill]] }
0x2df5   :  { %v7044_v61 = vmul.f32 0.01, %v7034_v33  ;;  %vm7040_vm7 = vcmp.gt.f32.partialorder %v7034_v33, 0.0  ;;  %v11914_v14 = vpack.c.bf16 %v10220_v43, %v10219_v42 }
0x2df6   :  { %vm7039_vm8 = vcmp.gt.f32.partialorder %v7029_v60, 0.0  ;;  %v7043_v48 = vmul.f32 0.01, %v7029_v60 }
0x2df7   :  { %v7048_v63 = vsel %vm7040_vm7, %v7034_v33, %v7044_v61  ;;  %11915 = vmatprep.subr.bf16.mxu0 %v11914_v14  ;;  %v10217_v61 = vld [vmem:[%s14699_s18 + $0x2] ss:$0 sm:$0xff] }
0x2df8   :  { %v7047_v2 = vsel %vm7039_vm8, %v7029_v60, %v7043_v48  ;;  %11917 = vmatpush3.bf16.msra.mxu0 %v11914_v14 }
0x2df9   :  { %11331 = vmatprep.mubr.msk.f32.mxu1 %vm2491_vm9, %v7047_v2  ;;  %11919 = vmatprep.subr.bf16.mxu0 %v11918_v53 }
0x2dfa   :  { %11332 = vmatmul.mubr.msk.f32.gmra.mrb[70].mxu1 %vm2491_vm9, %v7048_v63 }
0x2dfc   :  { %11921 = vmatpush3.bf16.msra.mxu0 %v11918_v53 }
0x2ebe   :  { %v11330_v0 = vpop.f32.mrb[68].mxu1 }
0x2ebf   :  { %v7150_v8 = vadd.f32 %v11330_v0, %v10210_v58  ;;  %v7144_v3 = vpop.f32.mrb[69].mxu1 }
0x2ec0   :  { %v7145_v9 = vadd.f32 %v10210_v58, %v7144_v3 }
0x2ec1   :  { %v7164_v44 = vadd.f32 %v7150_v8, %v6924_v19 }
0x2ec2   :  { %v7163_v27 = vadd.f32 %v7145_v9, %v6923_v31  ;;  %v10218_v9 = vld [vmem:[%s14700_s6 + $0x2] ss:$0 sm:$0xff] }
0x2ec3   :  { %v7174_v46 = vsel %vm397_vm3, %v7164_v44, 0.0 }
0x2ec4   :  { %7175 = vadd.xlane.f32.xlu0 %v7174_v46  ;;  %v7171_v4 = vsel %vm397_vm3, %v7163_v27, 0.0 }
0x2ec5   :  { %7172 = vadd.xlane.f32.xlu1 %v7171_v4 }
0x2ecd   :  { %v11333_v54 = vpop.f32.mrb[70].mxu1 }
0x2ece   :  { %v7160_v51 = vadd.f32 %v11333_v54, %v10210_v58  ;;  %v7154_v20 = vpop.f32.mrb[71].mxu1 }
0x2ecf   :  { %v7155_v25 = vadd.f32 %v10210_v58, %v7154_v20 }
0x2ed0   :  { %v7166_v7 = vadd.f32 %v7160_v51, %v6926_v35 }
0x2ed1   :  { %v7165_v49 = vadd.f32 %v7155_v25, %v6925_v1 }
0x2ed2   :  { %v7180_v28 = vsel %vm397_vm3, %v7166_v7, 0.0 }
0x2ed3   :  { %7181 = vadd.xlane.f32.xlu0 %v7180_v28  ;;  %v7177_v5 = vsel %vm397_vm3, %v7165_v49, 0.0 }
0x2ed4   :  { %7178 = vadd.xlane.f32.xlu1 %v7177_v5 }
0x2f51   :  { %v7176_v11 = vpop.xlane.xlu0 %7175 }
0x2f52   :  { %v7184_v6 = vmul.f32 0.03125, %v7176_v11  ;;  %v7173_v16 = vpop.xlane.xlu1 %7172 }
0x2f53   :  { %v7183_v17 = vmul.f32 0.03125, %v7173_v16 }
0x2f54   :  { %v7188_v59 = vsub.f32 %v7164_v44, %v7184_v6  ;;  %v10224_v6 = vld [vmem:[%s14679_s30 + $0x3] ss:$0 sm:$0xff] }
0x2f55   :  { %v7187_v31 = vsub.f32 %v7163_v27, %v7183_v17 }
0x2f56   :  { %v7192_v19 = vmul.f32 %v7188_v59, %v7188_v59 }
0x2f57   :  { %v7191_v34 = vmul.f32 %v7187_v31, %v7187_v31 }
0x2f58   :  { %v7198_v36 = vsel %vm397_vm3, %v7192_v19, 0.0 }
0x2f59   :  { %7199 = vadd.xlane.f32.xlu0 %v7198_v36  ;;  %v7195_v47 = vsel %vm397_vm3, %v7191_v34, 0.0 }
0x2f5a   :  { %7196 = vadd.xlane.f32.xlu1 %v7195_v47 }
0x2f60   :  { %v7182_v22 = vpop.xlane.xlu0 %7181 }
0x2f61   :  { %v7186_v1 = vmul.f32 0.03125, %v7182_v22  ;;  %v7179_v30 = vpop.xlane.xlu1 %7178 }
0x2f62   :  { %v7185_v29 = vmul.f32 0.03125, %v7179_v30 }
0x2f63   :  { %v7190_v35 = vsub.f32 %v7166_v7, %v7186_v1 }
0x2f64   :  { %v7189_v37 = vsub.f32 %v7165_v49, %v7185_v29 }
0x2f65   :  { %v7194_v39 = vmul.f32 %v7190_v35, %v7190_v35 }
0x2f66   :  { %v7193_v40 = vmul.f32 %v7189_v37, %v7189_v37 }
0x2f67   :  { %v7204_v38 = vsel %vm397_vm3, %v7194_v39, 0.0 }
0x2f68   :  { %7205 = vadd.xlane.f32.xlu0 %v7204_v38  ;;  %v7201_v10 = vsel %vm397_vm3, %v7193_v40, 0.0 }
0x2f69   :  { %7202 = vadd.xlane.f32.xlu1 %v7201_v10 }
0x2fe6   :  { %v7200_v50 = vpop.xlane.xlu0 %7199 }
0x2fe7   :  { %v7208_v13 = vmul.f32 0.03125, %v7200_v50  ;;  %v7197_v62 = vpop.xlane.xlu1 %7196 }
0x2fe8   :  { %v7207_v15 = vmul.f32 0.03125, %v7197_v62 }
0x2fe9   :  { %v7212_v57 = vadd.f32 1e-05, %v7208_v13 }
0x2fea   :  { %v7211_v33 = vadd.f32 1e-05, %v7207_v15 }
0x2feb   :  { %12612 = vrsqrt.f32 %v7212_v57 }
0x2fec   :  { %12614 = vrsqrt.f32 %v7211_v33 }
0x2ff5   :  { %v12613_v12 = vpop.eup %12612  ;;  %v7206_v60 = vpop.xlane.xlu0 %7205 }
0x2ff6   :  { %v12615_v48 = vpop.eup %12614  ;;  %v7220_v2 = vmul.f32 %v12613_v12, %v7188_v59  ;;  %v7210_v63 = vmul.f32 0.03125, %v7206_v60  ;;  %v7203_v58 = vpop.xlane.xlu1 %7202 }
0x2ff7   :  { %v7209_v0 = vmul.f32 0.03125, %v7203_v58  ;;  %v7219_v8 = vmul.f32 %v12615_v48, %v7187_v31 }
0x2ff8   :  { %v7214_v3 = vadd.f32 1e-05, %v7210_v63  ;;  %v7230_v44 = vmul.f32 %v10217_v61, %v7220_v2 }
0x2ff9   :  { %v7213_v27 = vadd.f32 1e-05, %v7209_v0  ;;  %v7229_v46 = vmul.f32 %v10217_v61, %v7219_v8 }
0x2ffa   :  { %12616 = vrsqrt.f32 %v7214_v3  ;;  %v14032_v54 = vadd.f32 %v10218_v9, %v7230_v44 }
0x2ffb   :  { %12618 = vrsqrt.f32 %v7213_v27  ;;  %v14030_v4 = vadd.f32 %v10218_v9, %v7229_v46 }
0x2ffd   :  { %11342 = vmatprep.mubr.msk.f32.mxu0 %vm397_vm3, %v14030_v4 }
0x2ffe   :  { %11343 = vmatmul.mubr.msk.f32.vlgmr.msra.gmra.mrb[84].mxu0 %vm397_vm3, %v14032_v54 }
0x3004   :  { %v12617_v51 = vpop.eup %12616 }
0x3005   :  { %v12619_v20 = vpop.eup %12618  ;;  %v7222_v25 = vmul.f32 %v12617_v51, %v7190_v35 }
0x3006   :  { %v7221_v7 = vmul.f32 %v12619_v20, %v7189_v37 }
0x3007   :  { %v7232_v49 = vmul.f32 %v10217_v61, %v7222_v25 }
0x3008   :  { %v7231_v28 = vmul.f32 %v10217_v61, %v7221_v7 }
0x3009   :  { %v14040_v11 = vadd.f32 %v10218_v9, %v7232_v49 }
0x300a   :  { %v14038_v5 = vadd.f32 %v10218_v9, %v7231_v28 }
0x300c   :  { %11345 = vmatprep.mubr.msk.f32.mxu0 %vm397_vm3, %v14038_v5 }
0x300d   :  { %11346 = vmatmul.mubr.msk.f32.gmra.mrb[86].mxu0 %vm397_vm3, %v14040_v11 }
0x30d1   :  { %v11344_v16 = vpop.f32.mrb[84].mxu0 }
0x30d2   :  { %v14049_v17 = vadd.f32 %v11344_v16, %v10224_v6  ;;  %v7334_v59 = vpop.f32.mrb[85].mxu0 }
0x30d3   :  { %v14051_v31 = vadd.f32 %v10224_v6, %v7334_v59 }
0x30d5   :  { %11352 = vmatprep.mubr.msk.f32.mxu0 %vm501_vm4, %v14051_v31  ;;  %v14057_v19 = vpack.i.bf16 %v14049_v17, %v14051_v31 }
0x30d7   :  { %12307 = vrot.lane.b32.xlu1 %v14057_v19, %s14696_s10 }
0x30e0   :  { %v11347_v34 = vpop.f32.mrb[86].mxu0 }
0x30e1   :  { %v14061_v36 = vadd.f32 %v11347_v34, %v10224_v6  ;;  %v7344_v47 = vpop.f32.mrb[87].mxu0 }
0x30e2   :  { %v14063_v22 = vadd.f32 %v10224_v6, %v7344_v47 }
0x30e4   :  { %11359 = vmatprep.mubr.msk.f32.mxu1 %vm501_vm4, %v14063_v22  ;;  %v14069_v1 = vpack.i.bf16 %v14061_v36, %v14063_v22 }
0x30e6   :  { %12312 = vrot.lane.b32.xlu0 %v14069_v1, %s14696_s10 }
0x3149   :  { %v12308_v30 = vpop.permute.xlu1 %12307 }
0x314a   :  { %v12310_v29 = vunpack.i.h.bf16 %v12308_v30  ;;  %v12309_v35 = vunpack.i.l.bf16 %v12308_v30 }
0x314c   :  { %v11922_v37 = vpack.c.bf16 %v12310_v29, %v12309_v35 }
0x314e   :  { %11924 = vmatprep.subr.msk.bf16.mxu0 %vm12990_vm5, %v11922_v37 }
0x314f   :  { %11927 = vmatpush3.bf16.xpose.msk.msra.mxu0 %vm12990_vm5, %v11922_v37 }
0x3156   :  { %11353 = vmatmul.mubr.msk.f32.vlgmr.msra.gmra.mrb[88].mxu0 %vm501_vm4, %v14049_v17 }
0x3158   :  { %v12313_v39 = vpop.permute.xlu0 %12312 }
0x3159   :  { %v12315_v40 = vunpack.i.h.bf16 %v12313_v39  ;;  %v12314_v38 = vunpack.i.l.bf16 %v12313_v39 }
0x315b   :  { %v11928_v10 = vpack.c.bf16 %v12315_v40, %v12314_v38 }
0x315d   :  { %11930 = vmatprep.subr.msk.bf16.mxu1 %vm12990_vm5, %v11928_v10 }
0x315e   :  { %11933 = vmatpush3.bf16.xpose.msk.msra.mxu1 %vm12990_vm5, %v11928_v10 }
0x3165   :  { %11360 = vmatmul.mubr.msk.f32.vlgmr.msra.gmra.mrb[72].mxu1 %vm501_vm4, %v14061_v36 }
0x3229   :  { %v11354_v42 = vpop.f32.mrb[88].mxu0 }
0x322a   :  { %v7532_v43 = vmul.f32 0.35355338, %v11354_v42  ;;  %v7433_v14 = vpop.f32.mrb[89].mxu0 }
0x322b   :  { %v7531_v52 = vmul.f32 0.35355338, %v7433_v14 }
0x322c   :  { %v7538_v18 = vsel %vm83_vm0, %v7532_v43, -inf }
0x322d   :  { %7539 = vmax.xlane.f32.xlu0 %v7538_v18  ;;  %v7535_v53 = vsel %vm83_vm0, %v7531_v52, -inf }
0x322e   :  { %7536 = vmax.xlane.f32.xlu1 %v7535_v53 }
0x3238   :  { %v11361_v50 = vpop.f32.mrb[72].mxu1 }
0x3239   :  { %v7534_v13 = vmul.f32 0.35355338, %v11361_v50  ;;  %v7522_v62 = vpop.f32.mrb[73].mxu1 }
0x323a   :  { %v7533_v15 = vmul.f32 0.35355338, %v7522_v62 }
0x323b   :  { %v7544_v57 = vsel %vm83_vm0, %v7534_v13, -inf }
0x323c   :  { %7545 = vmax.xlane.f32.xlu0 %v7544_v57  ;;  %v7541_v33 = vsel %vm83_vm0, %v7533_v15, -inf }
0x323d   :  { %7542 = vmax.xlane.f32.xlu1 %v7541_v33 }
0x32ba   :  { %v7540_v12 = vpop.xlane.xlu0 %7539 }
0x32bb   :  { %v7548_v60 = vsub.f32 %v7532_v43, %v7540_v12  ;;  %v7537_v61 = vpop.xlane.xlu1 %7536 }
0x32bc   :  { %v7547_v48 = vsub.f32 %v7531_v52, %v7537_v61 }
0x32bd   :  { %v7553_v2 = vmul.f32 1.442695, %v7548_v60 }
0x32be   :  { %v7551_v63 = vmul.f32 1.442695, %v7547_v48 }
0x32bf   :  { %12620 = vpow2.f32 %v7553_v2 }
0x32c0   :  { %12622 = vpow2.f32 %v7551_v63 }
0x32c9   :  { %v12621_v58 = vpop.eup %12620  ;;  %v7546_v9 = vpop.xlane.xlu0 %7545 }
0x32ca   :  { %v12623_v0 = vpop.eup %12622  ;;  %v7562_v8 = vsel %vm83_vm0, %v12621_v58, 0.0  ;;  %v7550_v44 = vsub.f32 %v7534_v13, %v7546_v9  ;;  %v7543_v46 = vpop.xlane.xlu1 %7542 }
0x32cb   :  { %7563 = vadd.xlane.f32.xlu0 %v7562_v8  ;;  %v7559_v3 = vsel %vm83_vm0, %v12623_v0, 0.0  ;;  %v7549_v51 = vsub.f32 %v7533_v15, %v7543_v46 }
0x32cc   :  { %7560 = vadd.xlane.f32.xlu1 %v7559_v3  ;;  %v7557_v27 = vmul.f32 1.442695, %v7550_v44 }
0x32cd   :  { %v7555_v20 = vmul.f32 1.442695, %v7549_v51 }
0x32ce   :  { %12624 = vpow2.f32 %v7557_v27 }
0x32cf   :  { %12626 = vpow2.f32 %v7555_v20 }
0x32d8   :  { %v12625_v25 = vpop.eup %12624 }
0x32d9   :  { %v7568_v7 = vsel %vm83_vm0, %v12625_v25, 0.0  ;;  %v12627_v49 = vpop.eup %12626 }
0x32da   :  { %v7565_v28 = vsel %vm83_vm0, %v12627_v49, 0.0 }
0x32dd   :  { %12317 = vrot.lane.b32.xlu1 %v14057_v19, %s14697_s15 }
0x32e1   :  { %12322 = vrot.lane.b32.xlu0 %v14069_v1, %s14697_s15  ;;  %12327 = vrot.lane.b32.xlu1 %v14057_v19, %s14684_s5 }
0x32e5   :  { %12332 = vrot.lane.b32.xlu1 %v14069_v1, %s14684_s5 }
0x32e9   :  { %7755 = vrot.lane.b32.xlu1 %v14049_v17, %s14685_s3 }
0x3300   :  { %7569 = vadd.xlane.f32.xlu0 %v7568_v7 }
0x330d   :  { %7566 = vadd.xlane.f32.xlu1 %v7565_v28 }
0x3316   :  { %7753 = vrot.lane.b32.xlu0 %v14051_v31, %s14685_s3 }
0x331a   :  { %7844 = vrot.lane.b32.xlu0 %v14063_v22, %s14685_s3 }
0x331e   :  { %7846 = vrot.lane.b32.xlu1 %v14061_v36, %s14685_s3 }
0x3358   :  { %v7564_v6 = vpop.xlane.xlu0 %7563 }
0x3359   :  { %12628 = vrcp.f32 %v7564_v6  ;;  %v7561_v16 = vpop.xlane.xlu1 %7560 }
0x335a   :  { %12630 = vrcp.f32 %v7561_v16 }
0x335c   :  { %v12323_v59 = vpop.permute.xlu0 %12322 }
0x335d   :  { %v12318_v34 = vpop.permute.xlu1 %12317  ;;  %v12325_v47 = vunpack.i.h.bf16 %v12323_v59  ;;  %v12324_v30 = vunpack.i.l.bf16 %v12323_v59 }
0x335e   :  { %v12320_v29 = vunpack.i.h.bf16 %v12318_v34  ;;  %v12319_v35 = vunpack.i.l.bf16 %v12318_v34 }
0x335f   :  { %v11938_v40 = vpack.c.bf16 %v12325_v47, %v12324_v30 }
0x3360   :  { %v11934_v37 = vpack.c.bf16 %v12320_v29, %v12319_v35 }
0x3361   :  { %v12328_v39 = vpop.permute.xlu1 %12327 }
0x3362   :  { %v12330_v38 = vunpack.i.h.bf16 %v12328_v39  ;;  %v12329_v10 = vunpack.i.l.bf16 %v12328_v39  ;;  %11935 = vmatprep.subr.bf16.mxu0 %v11934_v37 }
0x3363   :  { %v12629_v42 = vpop.eup %12628  ;;  %11937 = vmatpush3.bf16.msra.mxu0 %v11934_v37 }
0x3364   :  { %v12631_v43 = vpop.eup %12630  ;;  %v11942_v14 = vpack.c.bf16 %v12330_v38, %v12329_v10  ;;  %11939 = vmatprep.subr.bf16.mxu0 %v11938_v40  ;;  %v7576_v53 = vmul.f32 %v12629_v42, %v12621_v58 }
0x3365   :  { %v12333_v52 = vpop.permute.xlu1 %12332  ;;  %v7575_v18 = vmul.f32 %v12631_v43, %v12623_v0 }
0x3366   :  { %v12335_v50 = vunpack.i.h.bf16 %v12333_v52  ;;  %v12334_v13 = vunpack.i.l.bf16 %v12333_v52  ;;  %11944 = vmatprep.subr.msk.bf16.mxu1 %vm12990_vm5, %v11942_v14 }
0x3367   :  { %11366 = vmatprep.mubr.msk.f32.mxu0 %vm83_vm0, %v7575_v18  ;;  %11947 = vmatpush3.bf16.xpose.msk.msra.mxu1 %vm12990_vm5, %v11942_v14 }
0x3368   :  { %v11948_v62 = vpack.c.bf16 %v12335_v50, %v12334_v13  ;;  %11367 = vmatmul.mubr.msk.f32.vlgmr.msra.gmra.mrb[90].mxu0 %vm83_vm0, %v7576_v53 }
0x3369   :  { %11941 = vmatpush3.bf16.msra.mxu0 %v11938_v40  ;;  %v7756_v33 = vpop.permute.xlu1 %7755 }
0x336a   :  { %11950 = vmatprep.subr.msk.bf16.mxu0 %vm12990_vm5, %v11948_v62 }
0x338d   :  { %v7570_v15 = vpop.xlane.xlu0 %7569 }
0x338e   :  { %12632 = vrcp.f32 %v7570_v15 }
0x3391   :  { %v7754_v57 = vpop.permute.xlu0 %7753 }
0x3392   :  { %11380 = vmatprep.mubr.msk.f32.mxu1 %vm501_vm4, %v7754_v57 }
0x3393   :  { %11381 = vmatmul.mubr.msk.f32.vlgmr.msra.gmra.mrb[74].mxu1 %vm501_vm4, %v7756_v33 }
0x3395   :  { %v7845_v63 = vpop.permute.xlu0 %7844 }
0x3398   :  { %v12633_v60 = vpop.eup %12632 }
0x3399   :  { %v7578_v2 = vmul.f32 %v12633_v60, %v12625_v25 }
0x339a   :  { %v7567_v12 = vpop.xlane.xlu1 %7566 }
0x339b   :  { %12634 = vrcp.f32 %v7567_v12 }
0x339e   :  { %v7847_v58 = vpop.permute.xlu1 %7846 }
0x33a5   :  { %v12635_v61 = vpop.eup %12634 }
0x33a6   :  { %v7577_v48 = vmul.f32 %v12635_v61, %v12627_v49 }
0x33a8   :  { %11373 = vmatprep.mubr.msk.f32.mxu0 %vm83_vm0, %v7577_v48 }
0x33a9   :  { %11374 = vmatmul.mubr.msk.f32.vlgmr.msra.gmra.mrb[92].mxu0 %vm83_vm0, %v7578_v2 }
0x33aa   :  { %11953 = vmatpush3.bf16.xpose.msk.msra.mxu0 %vm12990_vm5, %v11948_v62  ;;  %11387 = vmatprep.mubr.msk.f32.mxu0 %vm501_vm4, %v7845_v63 }
0x33b1   :  { %11388 = vmatmul.mubr.msk.f32.vlgmr.msra.gmra.mrb[94].mxu0 %vm501_vm4, %v7847_v58 }
0x343b   :  { %v14125_v0 = vpop.f32.mrb[90].mxu0 }
0x343c   :  { %v14127_v8 = vpop.f32.mrb[91].mxu0 }
0x3466   :  { %v11382_v3 = vpop.f32.mrb[74].mxu1 }
0x3467   :  { %v7936_v9 = vmul.f32 0.35355338, %v11382_v3  ;;  %v7835_v44 = vpop.f32.mrb[75].mxu1 }
0x3468   :  { %v7935_v27 = vmul.f32 0.35355338, %v7835_v44 }
0x3469   :  { %v7942_v46 = vsel %vm83_vm0, %v7936_v9, -inf }
0x346a   :  { %7943 = vmax.xlane.f32.xlu1 %v7942_v46  ;;  %v7939_v51 = vsel %vm83_vm0, %v7935_v27, -inf }
0x346b   :  { %7940 = vmax.xlane.f32.xlu0 %v7939_v51 }
0x347c   :  { %v14131_v20 = vpop.f32.mrb[92].mxu0 }
0x347d   :  { %v14133_v25 = vpop.f32.mrb[93].mxu0 }
0x3484   :  { %v11389_v7 = vpop.f32.mrb[94].mxu0 }
0x3485   :  { %v7926_v49 = vpop.f32.mrb[95].mxu0  ;;  %v7938_v6 = vmul.f32 0.35355338, %v11389_v7 }
0x3486   :  { %v7937_v28 = vmul.f32 0.35355338, %v7926_v49 }
0x3487   :  { %v7948_v59 = vsel %vm83_vm0, %v7938_v6, -inf }
0x3488   :  { %v7945_v16 = vsel %vm83_vm0, %v7937_v28, -inf }
0x3489   :  { %7946 = vmax.xlane.f32.xlu0 %v7945_v16 }
0x348d   :  { %7949 = vmax.xlane.f32.xlu0 %v7948_v59 }
0x34f7   :  { %v7944_v34 = vpop.xlane.xlu1 %7943 }
0x34f8   :  { %v7952_v47 = vsub.f32 %v7936_v9, %v7944_v34  ;;  %v7941_v30 = vpop.xlane.xlu0 %7940 }
0x34f9   :  { %v7951_v29 = vsub.f32 %v7935_v27, %v7941_v30 }
0x34fa   :  { %v7957_v35 = vmul.f32 1.442695, %v7952_v47 }
0x34fb   :  { %v7955_v37 = vmul.f32 1.442695, %v7951_v29 }
0x34fc   :  { %12636 = vpow2.f32 %v7957_v35 }
0x34fd   :  { %12638 = vpow2.f32 %v7955_v37 }
0x3506   :  { %v12637_v39 = vpop.eup %12636 }
0x3507   :  { %v12639_v40 = vpop.eup %12638  ;;  %v7966_v38 = vsel %vm83_vm0, %v12637_v39, 0.0 }
0x3508   :  { %7967 = vadd.xlane.f32.xlu0 %v7966_v38  ;;  %v7963_v10 = vsel %vm83_vm0, %v12639_v40, 0.0 }
0x3509   :  { %7964 = vadd.xlane.f32.xlu1 %v7963_v10 }
0x3516   :  { %v7947_v42 = vpop.xlane.xlu0 %7946 }
0x3517   :  { %v7953_v18 = vsub.f32 %v7937_v28, %v7947_v42 }
0x3519   :  { %v7959_v53 = vmul.f32 1.442695, %v7953_v18 }
0x351a   :  { %12337 = vrot.lane.b32.xlu1 %v14057_v19, %s14686_s0  ;;  %v7950_v43 = vpop.xlane.xlu0 %7949 }
0x351b   :  { %v7954_v14 = vsub.f32 %v7938_v6, %v7950_v43 }
0x351d   :  { %v7961_v52 = vmul.f32 1.442695, %v7954_v14 }
0x351e   :  { %12347 = vrot.lane.b32.xlu1 %v14057_v19, %s14687_s29  ;;  %12342 = vrot.lane.b32.xlu0 %v14069_v1, %s14686_s0 }
0x351f   :  { %12640 = vpow2.f32 %v7961_v52 }
0x3520   :  { %12642 = vpow2.f32 %v7959_v53 }
0x3522   :  { %12352 = vrot.lane.b32.xlu1 %v14069_v1, %s14687_s29 }
0x3526   :  { %8159 = vrot.lane.b32.xlu1 %v14049_v17, %s14688_s27 }
0x3529   :  { %v12641_v50 = vpop.eup %12640 }
0x352a   :  { %v7972_v13 = vsel %vm83_vm0, %v12641_v50, 0.0  ;;  %v12643_v62 = vpop.eup %12642 }
0x352b   :  { %v7969_v15 = vsel %vm83_vm0, %v12643_v62, 0.0 }
0x353d   :  { %7973 = vadd.xlane.f32.xlu0 %v7972_v13 }
0x354a   :  { %7970 = vadd.xlane.f32.xlu1 %v7969_v15 }
0x3553   :  { %8157 = vrot.lane.b32.xlu0 %v14051_v31, %s14688_s27 }
0x3557   :  { %8248 = vrot.lane.b32.xlu0 %v14063_v22, %s14688_s27 }
0x355b   :  { %8250 = vrot.lane.b32.xlu1 %v14061_v36, %s14688_s27 }
0x3595   :  { %v7968_v57 = vpop.xlane.xlu0 %7967 }
0x3596   :  { %12644 = vrcp.f32 %v7968_v57  ;;  %v7965_v33 = vpop.xlane.xlu1 %7964 }
0x3597   :  { %12646 = vrcp.f32 %v7965_v33 }
0x3599   :  { %v12343_v12 = vpop.permute.xlu0 %12342 }
0x359a   :  { %v12345_v60 = vunpack.i.h.bf16 %v12343_v12  ;;  %v12344_v61 = vunpack.i.l.bf16 %v12343_v12  ;;  %v12338_v48 = vpop.permute.xlu1 %12337 }
0x359b   :  { %v12340_v2 = vunpack.i.h.bf16 %v12338_v48  ;;  %v12339_v63 = vunpack.i.l.bf16 %v12338_v48 }
0x359c   :  { %v11958_v58 = vpack.c.bf16 %v12345_v60, %v12344_v61 }
0x359d   :  { %v11954_v3 = vpack.c.bf16 %v12340_v2, %v12339_v63 }
0x359e   :  { %v12348_v9 = vpop.permute.xlu1 %12347  ;;  %11959 = vmatprep.subr.bf16.mxu0 %v11958_v58 }
0x359f   :  { %v12350_v44 = vunpack.i.h.bf16 %v12348_v9  ;;  %v12349_v27 = vunpack.i.l.bf16 %v12348_v9  ;;  %11955 = vmatprep.subr.bf16.mxu1 %v11954_v3  ;;  %11961 = vmatpush3.bf16.msra.mxu0 %v11958_v58 }
0x35a0   :  { %v12645_v46 = vpop.eup %12644  ;;  %11957 = vmatpush3.bf16.msra.mxu1 %v11954_v3 }
0x35a1   :  { %v12647_v51 = vpop.eup %12646  ;;  %v11962_v7 = vpack.c.bf16 %v12350_v44, %v12349_v27  ;;  %v7980_v6 = vmul.f32 %v12645_v46, %v12637_v39 }
0x35a2   :  { %v12353_v49 = vpop.permute.xlu1 %12352  ;;  %v7979_v28 = vmul.f32 %v12647_v51, %v12639_v40 }
0x35a3   :  { %v12355_v16 = vunpack.i.h.bf16 %v12353_v49  ;;  %v12354_v59 = vunpack.i.l.bf16 %v12353_v49  ;;  %11964 = vmatprep.subr.msk.bf16.mxu1 %vm12990_vm5, %v11962_v7 }
0x35a4   :  { %11394 = vmatprep.mubr.msk.f32.mxu1 %vm83_vm0, %v7979_v28 }
0x35a5   :  { %v11968_v34 = vpack.c.bf16 %v12355_v16, %v12354_v59  ;;  %11395 = vmatmul.mubr.msk.f32.vlgmr.msra.gmra.mrb[76].mxu1 %vm83_vm0, %v7980_v6 }
0x35a6   :  { %v8160_v29 = vpop.permute.xlu1 %8159 }
0x35a7   :  { %11970 = vmatprep.subr.msk.bf16.mxu0 %vm12990_vm5, %v11968_v34 }
0x35a9   :  { %11967 = vmatpush3.bf16.xpose.msk.msra.mxu1 %vm12990_vm5, %v11962_v7 }
0x35ca   :  { %v7974_v47 = vpop.xlane.xlu0 %7973 }
0x35cb   :  { %12648 = vrcp.f32 %v7974_v47 }
0x35ce   :  { %v8158_v30 = vpop.permute.xlu0 %8157 }
0x35cf   :  { %11408 = vmatprep.mubr.msk.f32.mxu1 %vm501_vm4, %v8158_v30 }
0x35d0   :  { %11409 = vmatmul.mubr.msk.f32.vlgmr.msra.gmra.mrb[78].mxu1 %vm501_vm4, %v8160_v29 }
0x35d2   :  { %v8249_v10 = vpop.permute.xlu0 %8248 }
0x35d5   :  { %v12649_v37 = vpop.eup %12648 }
0x35d6   :  { %v7982_v38 = vmul.f32 %v12649_v37, %v12641_v50 }
0x35d7   :  { %v7971_v35 = vpop.xlane.xlu1 %7970 }
0x35d8   :  { %12650 = vrcp.f32 %v7971_v35 }
0x35db   :  { %v8251_v42 = vpop.permute.xlu1 %8250 }
0x35e2   :  { %v12651_v39 = vpop.eup %12650 }
0x35e3   :  { %v7981_v40 = vmul.f32 %v12651_v39, %v12643_v62 }
0x35e5   :  { %11401 = vmatprep.mubr.msk.f32.mxu0 %vm83_vm0, %v7981_v40 }
0x35e6   :  { %11402 = vmatmul.mubr.msk.f32.vlgmr.msra.gmra.mrb[96].mxu0 %vm83_vm0, %v7982_v38 }
0x35e7   :  { %11973 = vmatpush3.bf16.xpose.msk.msra.mxu0 %vm12990_vm5, %v11968_v34  ;;  %11415 = vmatprep.mubr.msk.f32.mxu0 %vm501_vm4, %v8249_v10 }
0x35ee   :  { %11416 = vmatmul.mubr.msk.f32.vlgmr.msra.gmra.mrb[98].mxu0 %vm501_vm4, %v8251_v42 }
0x3678   :  { %v14173_v43 = vpop.f32.mrb[76].mxu1 }
0x3679   :  { %v14175_v14 = vpop.f32.mrb[77].mxu1 }
0x36a3   :  { %v11410_v52 = vpop.f32.mrb[78].mxu1 }
0x36a4   :  { %v8340_v18 = vmul.f32 0.35355338, %v11410_v52  ;;  %v8239_v53 = vpop.f32.mrb[79].mxu1 }
0x36a5   :  { %v8339_v50 = vmul.f32 0.35355338, %v8239_v53 }
0x36a6   :  { %v8346_v13 = vsel %vm83_vm0, %v8340_v18, -inf }
0x36a7   :  { %8347 = vmax.xlane.f32.xlu1 %v8346_v13  ;;  %v8343_v62 = vsel %vm83_vm0, %v8339_v50, -inf }
0x36a8   :  { %8344 = vmax.xlane.f32.xlu0 %v8343_v62 }
0x36b9   :  { %v14179_v15 = vpop.f32.mrb[96].mxu0 }
0x36ba   :  { %v14181_v57 = vpop.f32.mrb[97].mxu0 }
0x36c1   :  { %v11417_v33 = vpop.f32.mrb[98].mxu0 }
0x36c2   :  { %v8330_v12 = vpop.f32.mrb[99].mxu0  ;;  %v8342_v61 = vmul.f32 0.35355338, %v11417_v33 }
0x36c3   :  { %v8341_v60 = vmul.f32 0.35355338, %v8330_v12 }
0x36c4   :  { %v8352_v2 = vsel %vm83_vm0, %v8342_v61, -inf }
0x36c5   :  { %v8349_v48 = vsel %vm83_vm0, %v8341_v60, -inf }
0x36c6   :  { %8350 = vmax.xlane.f32.xlu0 %v8349_v48 }
0x36ca   :  { %8353 = vmax.xlane.f32.xlu0 %v8352_v2 }
0x3734   :  { %v8348_v63 = vpop.xlane.xlu1 %8347 }
0x3735   :  { %v8356_v58 = vsub.f32 %v8340_v18, %v8348_v63  ;;  %v8345_v3 = vpop.xlane.xlu0 %8344 }
0x3736   :  { %v8355_v9 = vsub.f32 %v8339_v50, %v8345_v3 }
0x3737   :  { %v8361_v44 = vmul.f32 1.442695, %v8356_v58 }
0x3738   :  { %v8359_v27 = vmul.f32 1.442695, %v8355_v9 }
0x3739   :  { %12652 = vpow2.f32 %v8361_v44 }
0x373a   :  { %12654 = vpow2.f32 %v8359_v27 }
0x3743   :  { %v12653_v46 = vpop.eup %12652 }
0x3744   :  { %v12655_v51 = vpop.eup %12654  ;;  %v8370_v7 = vsel %vm83_vm0, %v12653_v46, 0.0 }
0x3745   :  { %8371 = vadd.xlane.f32.xlu0 %v8370_v7  ;;  %v8367_v49 = vsel %vm83_vm0, %v12655_v51, 0.0 }
0x3746   :  { %8368 = vadd.xlane.f32.xlu1 %v8367_v49 }
0x3753   :  { %v8351_v28 = vpop.xlane.xlu0 %8350 }
0x3754   :  { %v8357_v34 = vsub.f32 %v8341_v60, %v8351_v28 }
0x3756   :  { %v8363_v47 = vmul.f32 1.442695, %v8357_v34 }
0x3757   :  { %12357 = vrot.lane.b32.xlu1 %v14057_v19, %s14689_s7  ;;  %v8354_v6 = vpop.xlane.xlu0 %8353 }
0x3758   :  { %v8358_v16 = vsub.f32 %v8342_v61, %v8354_v6 }
0x375a   :  { %v8365_v59 = vmul.f32 1.442695, %v8358_v16 }
0x375b   :  { %12367 = vrot.lane.b32.xlu1 %v14057_v19, %s14690_s21  ;;  %12362 = vrot.lane.b32.xlu0 %v14069_v1, %s14689_s7 }
0x375c   :  { %12656 = vpow2.f32 %v8365_v59 }
0x375d   :  { %12658 = vpow2.f32 %v8363_v47 }
0x375f   :  { %12372 = vrot.lane.b32.xlu1 %v14069_v1, %s14690_s21 }
0x3763   :  { %8563 = vrot.lane.b32.xlu1 %v14049_v17, %s14691_s4 }
0x3766   :  { %v12657_v30 = vpop.eup %12656 }
0x3767   :  { %v8376_v29 = vsel %vm83_vm0, %v12657_v30, 0.0  ;;  %v12659_v35 = vpop.eup %12658 }
0x3768   :  { %v8373_v37 = vsel %vm83_vm0, %v12659_v35, 0.0 }
0x377a   :  { %8377 = vadd.xlane.f32.xlu0 %v8376_v29 }
0x3787   :  { %8374 = vadd.xlane.f32.xlu1 %v8373_v37 }
0x3790   :  { %8561 = vrot.lane.b32.xlu0 %v14051_v31, %s14691_s4 }
0x3794   :  { %8652 = vrot.lane.b32.xlu0 %v14063_v22, %s14691_s4 }
0x3798   :  { %8654 = vrot.lane.b32.xlu1 %v14061_v36, %s14691_s4  ;;  %s14701_s4 = smov 24  }
0x37d2   :  { %v8372_v17 = vpop.xlane.xlu0 %8371 }
0x37d3   :  { %12660 = vrcp.f32 %v8372_v17  ;;  %v8369_v39 = vpop.xlane.xlu1 %8368 }
0x37d4   :  { %12662 = vrcp.f32 %v8369_v39 }
0x37d6   :  { %v12363_v40 = vpop.permute.xlu0 %12362 }
0x37d7   :  { %v12365_v38 = vunpack.i.h.bf16 %v12363_v40  ;;  %v12364_v10 = vunpack.i.l.bf16 %v12363_v40  ;;  %v12358_v42 = vpop.permute.xlu1 %12357 }
0x37d8   :  { %v12360_v52 = vunpack.i.h.bf16 %v12358_v42  ;;  %v12359_v18 = vunpack.i.l.bf16 %v12358_v42 }
0x37d9   :  { %v11978_v53 = vpack.c.bf16 %v12365_v38, %v12364_v10 }
0x37da   :  { %v11974_v50 = vpack.c.bf16 %v12360_v52, %v12359_v18 }
0x37db   :  { %v12368_v13 = vpop.permute.xlu1 %12367  ;;  %11979 = vmatprep.subr.bf16.mxu0 %v11978_v53 }
0x37dc   :  { %v12370_v31 = vunpack.i.h.bf16 %v12368_v13  ;;  %v12369_v62 = vunpack.i.l.bf16 %v12368_v13  ;;  %11975 = vmatprep.subr.bf16.mxu1 %v11974_v50  ;;  %11981 = vmatpush3.bf16.msra.mxu0 %v11978_v53 }
0x37dd   :  { %v12661_v22 = vpop.eup %12660  ;;  %11977 = vmatpush3.bf16.msra.mxu1 %v11974_v50 }
0x37de   :  { %v12663_v36 = vpop.eup %12662  ;;  %v11982_v33 = vpack.c.bf16 %v12370_v31, %v12369_v62  ;;  %v8384_v61 = vmul.f32 %v12661_v22, %v12653_v46 }
0x37df   :  { %v12373_v12 = vpop.permute.xlu1 %12372  ;;  %v8383_v60 = vmul.f32 %v12663_v36, %v12655_v51 }
0x37e0   :  { %v12375_v48 = vunpack.i.h.bf16 %v12373_v12  ;;  %v12374_v2 = vunpack.i.l.bf16 %v12373_v12  ;;  %11984 = vmatprep.subr.msk.bf16.mxu1 %vm12990_vm5, %v11982_v33 }
0x37e1   :  { %11422 = vmatprep.mubr.msk.f32.mxu1 %vm83_vm0, %v8383_v60 }
0x37e2   :  { %v11988_v63 = vpack.c.bf16 %v12375_v48, %v12374_v2  ;;  %11423 = vmatmul.mubr.msk.f32.vlgmr.msra.gmra.mrb[80].mxu1 %vm83_vm0, %v8384_v61 }
0x37e3   :  { %v8564_v9 = vpop.permute.xlu1 %8563 }
0x37e4   :  { %11990 = vmatprep.subr.msk.bf16.mxu0 %vm12990_vm5, %v11988_v63 }
0x37e6   :  { %11987 = vmatpush3.bf16.xpose.msk.msra.mxu1 %vm12990_vm5, %v11982_v33 }
0x3807   :  { %v8378_v58 = vpop.xlane.xlu0 %8377 }
0x3808   :  { %12664 = vrcp.f32 %v8378_v58 }
0x380b   :  { %v8562_v3 = vpop.permute.xlu0 %8561 }
0x380c   :  { %11436 = vmatprep.mubr.msk.f32.mxu1 %vm501_vm4, %v8562_v3 }
0x380d   :  { %11437 = vmatmul.mubr.msk.f32.vlgmr.msra.gmra.mrb[82].mxu1 %vm501_vm4, %v8564_v9 }
0x380f   :  { %v8653_v49 = vpop.permute.xlu0 %8652 }
0x3812   :  { %v12665_v27 = vpop.eup %12664 }
0x3813   :  { %v8386_v7 = vmul.f32 %v12665_v27, %v12657_v30 }
0x3814   :  { %v8375_v44 = vpop.xlane.xlu1 %8374 }
0x3815   :  { %12666 = vrcp.f32 %v8375_v44 }
0x3818   :  { %v8655_v28 = vpop.permute.xlu1 %8654 }
0x381f   :  { %v12667_v46 = vpop.eup %12666 }
0x3820   :  { %v8385_v51 = vmul.f32 %v12667_v46, %v12659_v35 }
0x3822   :  { %11429 = vmatprep.mubr.msk.f32.mxu0 %vm83_vm0, %v8385_v51 }
0x3823   :  { %11430 = vmatmul.mubr.msk.f32.vlgmr.msra.gmra.mrb[100].mxu0 %vm83_vm0, %v8386_v7 }
0x3824   :  { %11993 = vmatpush3.bf16.xpose.msk.msra.mxu0 %vm12990_vm5, %v11988_v63  ;;  %11443 = vmatprep.mubr.msk.f32.mxu0 %vm501_vm4, %v8653_v49 }
0x382b   :  { %11444 = vmatmul.mubr.msk.f32.vlgmr.msra.gmra.mrb[102].mxu0 %vm501_vm4, %v8655_v28 }
0x38b5   :  { %v11424_v6 = vpop.f32.mrb[80].mxu1 }
0x38b6   :  { %v8465_v16 = vpop.f32.mrb[81].mxu1 }
0x38e0   :  { %v11438_v59 = vpop.f32.mrb[82].mxu1 }
0x38e1   :  { %v8744_v34 = vmul.f32 0.35355338, %v11438_v59  ;;  %v8643_v47 = vpop.f32.mrb[83].mxu1 }
0x38e2   :  { %v8743_v29 = vmul.f32 0.35355338, %v8643_v47 }
0x38e3   :  { %v8750_v30 = vsel %vm83_vm0, %v8744_v34, -inf }
0x38e4   :  { %8751 = vmax.xlane.f32.xlu1 %v8750_v30  ;;  %v8747_v35 = vsel %vm83_vm0, %v8743_v29, -inf }
0x38e5   :  { %8748 = vmax.xlane.f32.xlu0 %v8747_v35 }
0x38f6   :  { %v14223_v37 = vpop.f32.mrb[100].mxu0 }
0x38f7   :  { %v14225_v55 = vpop.f32.mrb[101].mxu0 }
0x38fe   :  { %v11445_v17 = vpop.f32.mrb[102].mxu0 }
0x38ff   :  { %v8734_v39 = vpop.f32.mrb[103].mxu0  ;;  %v8746_v38 = vmul.f32 0.35355338, %v11445_v17 }
0x3900   :  { %v8745_v40 = vmul.f32 0.35355338, %v8734_v39 }
0x3901   :  { %v8756_v42 = vsel %vm83_vm0, %v8746_v38, -inf }
0x3902   :  { %v8753_v10 = vsel %vm83_vm0, %v8745_v40, -inf }
0x3903   :  { %8754 = vmax.xlane.f32.xlu0 %v8753_v10  ;;  %v10279_v10 = vld [vmem:[%s14682_s28 + $0x70] sm:$0xff] }
0x3907   :  { %8757 = vmax.xlane.f32.xlu0 %v8756_v42 }
0x3971   :  { %v8752_v52 = vpop.xlane.xlu1 %8751 }
0x3972   :  { %v8760_v18 = vsub.f32 %v8744_v34, %v8752_v52  ;;  %v8749_v53 = vpop.xlane.xlu0 %8748  ;;  %v10280_v52 = vld [vmem:[%s14682_s28 + $0x78] sm:$0xff] }
0x3973   :  { %v8759_v50 = vsub.f32 %v8743_v29, %v8749_v53 }
0x3974   :  { %v8765_v13 = vmul.f32 1.442695, %v8760_v18  ;;  %v12006_v18 = vpack.c.bf16 %v10280_v52, %v10279_v10 }
0x3975   :  { %v8763_v31 = vmul.f32 1.442695, %v8759_v50 }
0x3976   :  { %12668 = vpow2.f32 %v8765_v13 }
0x3977   :  { %12670 = vpow2.f32 %v8763_v31 }
0x3980   :  { %v12669_v62 = vpop.eup %12668 }
0x3981   :  { %v12671_v22 = vpop.eup %12670  ;;  %v8774_v36 = vsel %vm83_vm0, %v12669_v62, 0.0 }
0x3982   :  { %8775 = vadd.xlane.f32.xlu0 %v8774_v36  ;;  %v8771_v33 = vsel %vm83_vm0, %v12671_v22, 0.0 }
0x3983   :  { %8772 = vadd.xlane.f32.xlu1 %v8771_v33 }
0x3990   :  { %v8755_v12 = vpop.xlane.xlu0 %8754 }
0x3991   :  { %v8761_v60 = vsub.f32 %v8745_v40, %v8755_v12  ;;  %v10277_v40 = vld [vmem:[%s14682_s28 + $0x60] sm:$0xff] }
0x3993   :  { %v8767_v61 = vmul.f32 1.442695, %v8761_v60 }
0x3994   :  { %v8758_v48 = vpop.xlane.xlu0 %8757 }
0x3995   :  { %12672 = vpow2.f32 %v8767_v61  ;;  %v8762_v2 = vsub.f32 %v8746_v38, %v8758_v48  ;;  %v10278_v38 = vld [vmem:[%s14682_s28 + $0x68] sm:$0xff] }
0x3996   :  { %v12002_v42 = vpack.c.bf16 %v10278_v38, %v10277_v40 }
0x3997   :  { %v8769_v63 = vmul.f32 1.442695, %v8762_v2 }
0x3999   :  { %12674 = vpow2.f32 %v8769_v63 }
0x399f   :  { %v12673_v58 = vpop.eup %12672 }
0x39a0   :  { %v8777_v3 = vsel %vm83_vm0, %v12673_v58, 0.0 }
0x39a1   :  { %8778 = vadd.xlane.f32.xlu1 %v8777_v3 }
0x39a3   :  { %v12675_v9 = vpop.eup %12674 }
0x39a4   :  { %v8780_v44 = vsel %vm83_vm0, %v12675_v9, 0.0 }
0x39a5   :  { %8781 = vadd.xlane.f32.xlu0 %v8780_v44 }
0x39b2   :  { %12377 = vrot.lane.b32.xlu1 %v14057_v19, %s14692_s26 }
0x39b6   :  { %8969 = vrot.lane.b32.xlu1 %v14175_v14, %s14693_s2 }
0x39ba   :  { %8971 = vrot.lane.b32.xlu1 %v14173_v43, %s14693_s2 }
0x39bb   :  { %12382 = vrot.lane.b32.xlu0 %v14069_v1, %s14692_s26  ;;  %s14702_s26 = sld [smem:[#allocation16_spill]] }
0x39be   :  { %8987 = vrot.lane.b32.xlu1 %v11424_v6, %s14694_s25 }
0x39bf   :  { %8985 = vrot.lane.b32.xlu0 %v8465_v16, %s14694_s25 }
0x3a0f   :  { %v8776_v19 = vpop.xlane.xlu0 %8775 }
0x3a10   :  { %v8773_v27 = vpop.xlane.xlu1 %8772 }
0x3a11   :  { %12676 = vrcp.f32 %v8773_v27 }
0x3a12   :  { %12678 = vrcp.f32 %v8776_v19 }
0x3a1b   :  { %v12677_v46 = vpop.eup %12676 }
0x3a1c   :  { %v8787_v51 = vmul.f32 %v12677_v46, %v12671_v22  ;;  %v12679_v59 = vpop.eup %12678 }
0x3a1d   :  { %v8788_v29 = vmul.f32 %v12679_v59, %v12669_v62 }
0x3a1e   :  { %11450 = vmatprep.mubr.msk.f32.mxu1 %vm83_vm0, %v8787_v51 }
0x3a2e   :  { %v8779_v7 = vpop.xlane.xlu1 %8778 }
0x3a2f   :  { %12680 = vrcp.f32 %v8779_v7 }
0x3a32   :  { %v12378_v14 = vpop.permute.xlu1 %12377  ;;  %v8782_v49 = vpop.xlane.xlu0 %8781 }
0x3a33   :  { %v12380_v43 = vunpack.i.h.bf16 %v12378_v14  ;;  %v12379_v28 = vunpack.i.l.bf16 %v12378_v14  ;;  %12682 = vrcp.f32 %v8782_v49 }
0x3a35   :  { %v11994_v1 = vpack.c.bf16 %v12380_v43, %v12379_v28 }
0x3a36   :  { %v12383_v6 = vpop.permute.xlu0 %12382  ;;  %v8970_v62 = vpop.permute.xlu1 %8969 }
0x3a37   :  { %v12385_v34 = vunpack.i.h.bf16 %v12383_v6  ;;  %v12384_v16 = vunpack.i.l.bf16 %v12383_v6  ;;  %11995 = vmatprep.subr.bf16.mxu1 %v11994_v1 }
0x3a38   :  { %11997 = vmatpush3.bf16.msra.mxu1 %v11994_v1 }
0x3a39   :  { %v12681_v47 = vpop.eup %12680  ;;  %v11998_v30 = vpack.c.bf16 %v12385_v34, %v12384_v16  ;;  %12003 = vmatprep.subr.bf16.mxu1 %v12002_v42 }
0x3a3a   :  { %v8789_v35 = vmul.f32 %v12681_v47, %v12673_v58  ;;  %v8972_v22 = vpop.permute.xlu1 %8971  ;;  %v8986_v33 = vpop.permute.xlu0 %8985 }
0x3a3b   :  { %11451 = vmatmul.mubr.msk.f32.vlgmr.msra.gmra.mrb[84].mxu1 %vm83_vm0, %v8788_v29  ;;  %11999 = vmatprep.subr.bf16.mxu0 %v11998_v30 }
0x3a3c   :  { %12001 = vmatpush3.bf16.msra.mxu0 %v11998_v30  ;;  %11457 = vmatprep.mubr.msk.f32.mxu0 %vm83_vm0, %v8789_v35 }
0x3a3d   :  { %v12683_v17 = vpop.eup %12682  ;;  %12005 = vmatpush3.bf16.msra.mxu1 %v12002_v42 }
0x3a3e   :  { %v8790_v39 = vmul.f32 %v12683_v17, %v12675_v9  ;;  %12007 = vmatprep.subr.bf16.mxu1 %v12006_v18  ;;  %v8988_v36 = vpop.permute.xlu1 %8987 }
0x3a40   :  { %11458 = vmatmul.mubr.msk.f32.vlgmr.msra.gmra.mrb[104].mxu0 %vm83_vm0, %v8790_v39 }
0x3a41   :  { %12009 = vmatpush3.bf16.msra.mxu1 %v12006_v18  ;;  %v10110_v18 = vld [vmem:[%s14698_s11 + $0x1] ss:$0 sm:$0xff] }
0x3b0e   :  { %v11452_v53 = vpop.f32.mrb[84].mxu1 }
0x3b0f   :  { %9003 = vrot.lane.b32.xlu1 %v11452_v53, %s14701_s4  ;;  %v8869_v50 = vpop.f32.mrb[85].mxu1 }
0x3b10   :  { %9001 = vrot.lane.b32.xlu0 %v8869_v50, %s14701_s4 }
0x3b13   :  { %8975 = vrot.lane.b32.xlu1 %v14179_v15, %s14693_s2  ;;  %v11459_v13 = vpop.f32.mrb[104].mxu0  ;;  %v9013_v15 = vsel %vm501_vm4, %v14127_v8, %v8970_v62 }
0x3b14   :  { %8973 = vrot.lane.b32.xlu0 %v14181_v57, %s14693_s2  ;;  %v8956_v31 = vpop.f32.mrb[105].mxu0  ;;  %v9014_v57 = vsel %vm501_vm4, %v14125_v0, %v8972_v22 }
0x3b17   :  { %8991 = vrot.lane.b32.xlu1 %v14223_v37, %s14694_s25  ;;  %v9017_v37 = vsel %vm83_vm0, %v9013_v15, %v8986_v33  ;;  %v4862_v33 = vadd.f32 %v13719_v23, %v10110_v18 }
0x3b18   :  { %8989 = vrot.lane.b32.xlu0 %v14225_v55, %s14694_s25  ;;  %v9018_v55 = vsel %vm83_vm0, %v9014_v57, %v8988_v36 }
0x3b1b   :  { %9007 = vrot.lane.b32.xlu1 %v11459_v13, %s14701_s4  ;;  %v4857_v13 = vadd.f32 %v10110_v18, %v13721_v45 }
0x3b1c   :  { %9005 = vrot.lane.b32.xlu0 %v8956_v31, %s14701_s4  ;;  %s14704_s4 = sld [smem:[#allocation21_spill]] }
0x3b1d   :  { %v14322_v15 = vadd.f32 %v4857_v13, %v13635_v26 }
0x3b1f   :  { %v4883_v26 = vsel %vm397_vm3, %v14322_v15, 0.0 }
0x3b81   :  { %v9004_v12 = vpop.permute.xlu1 %9003 }
0x3b82   :  { %v9002_v60 = vpop.permute.xlu0 %9001  ;;  %v9022_v48 = vsel %vm2164_vm6, %v9018_v55, %v9004_v12  ;;  %v4867_v12 = vadd.f32 %v10110_v18, %v13725_v24  ;;  %v4872_v55 = vadd.f32 %v13723_v32, %v10110_v18  ;;  %v10291_v32 = vld [vmem:[%s14597_s12 + $0x60] sm:$0xff] }
0x3b83   :  { %v9021_v61 = vsel %vm2164_vm6, %v9017_v37, %v9002_v60  ;;  %v14331_v60 = vadd.f32 %v4862_v33, %v13637_v56 }
0x3b84   :  { %11468 = vmatprep.mubr.msk.f32.mxu1 %vm397_vm3, %v9021_v61  ;;  %v14335_v23 = vadd.f32 %v4867_v12, %v13644_v41  ;;  %v14341_v61 = vadd.f32 %v4872_v55, %v13649_v21  ;;  %v10292_v21 = vld [vmem:[%s14597_s12 + $0x68] sm:$0xff] }
0x3b85   :  { %v8976_v2 = vpop.permute.xlu1 %8975  ;;  %11469 = vmatmul.mubr.msk.f32.vlgmr.msra.gmra.mrb[86].mxu1 %vm397_vm3, %v9022_v48  ;;  %v4886_v48 = vsel %vm397_vm3, %v14331_v60, 0.0 }
0x3b86   :  { %v8974_v63 = vpop.permute.xlu0 %8973  ;;  %v9016_v9 = vsel %vm501_vm4, %v14131_v20, %v8976_v2  ;;  %v4889_v56 = vsel %vm397_vm3, %v14335_v23, 0.0  ;;  %v4892_v41 = vsel %vm397_vm3, %v14341_v61, 0.0  ;;  %v12010_v2 = vpack.c.bf16 %v10292_v21, %v10291_v32 }
0x3b87   :  { %v9015_v0 = vsel %vm501_vm4, %v14133_v25, %v8974_v63  ;;  %v10282_v25 = vld [vmem:[%s14702_s26 + $0x3] ss:$0 sm:$0xff]  ;;  %v10293_v63 = vld [vmem:[%s14597_s12 + $0x70] sm:$0xff]  ;;  %s14705_s26 = sld [smem:[#allocation24_spill]] }
0x3b88   :  { %12011 = vmatprep.subr.bf16.mxu0 %v12010_v2 }
0x3b89   :  { %v8992_v8 = vpop.permute.xlu1 %8991  ;;  %12013 = vmatpush3.bf16.msra.mxu0 %v12010_v2 }
0x3b8a   :  { %v8990_v58 = vpop.permute.xlu0 %8989  ;;  %v9020_v46 = vsel %vm83_vm0, %v9016_v9, %v8992_v8  ;;  %v10294_v8 = vld [vmem:[%s14597_s12 + $0x78] sm:$0xff]  ;;  %v10303_v9 = vld [vmem:[%s14599_s14 + $0xd0] sm:$0xff] }
0x3b8b   :  { %v9019_v44 = vsel %vm83_vm0, %v9015_v0, %v8990_v58  ;;  %v12014_v58 = vpack.c.bf16 %v10294_v8, %v10293_v63  ;;  %v10301_v0 = vld [vmem:[%s14599_s14 + $0xc0] sm:$0xff] }
0x3b8d   :  { %v9008_v3 = vpop.permute.xlu1 %9007  ;;  %12015 = vmatprep.subr.bf16.mxu0 %v12014_v58 }
0x3b8e   :  { %v9006_v27 = vpop.permute.xlu0 %9005  ;;  %v9024_v19 = vsel %vm2164_vm6, %v9020_v46, %v9008_v3  ;;  %12017 = vmatpush3.bf16.msra.mxu0 %v12014_v58  ;;  %v10302_v3 = vld [vmem:[%s14599_s14 + $0xc8] sm:$0xff]  ;;  %v10310_v58 = vld [vmem:[%s14698_s11 + $0x3] ss:$0 sm:$0xff] }
0x3b8f   :  { %v9023_v51 = vsel %vm2164_vm6, %v9019_v44, %v9006_v27  ;;  %v12018_v44 = vpack.c.bf16 %v10302_v3, %v10301_v0  ;;  %v10304_v27 = vld [vmem:[%s14599_s14 + $0xd8] sm:$0xff] }
0x3b90   :  { %11471 = vmatprep.mubr.msk.f32.mxu1 %vm397_vm3, %v9023_v51  ;;  %v12022_v46 = vpack.c.bf16 %v10304_v27, %v10303_v9 }
0x3b91   :  { %11472 = vmatmul.mubr.msk.f32.gmra.mrb[88].mxu1 %vm397_vm3, %v9024_v19  ;;  %12019 = vmatprep.subr.bf16.mxu1 %v12018_v44 }
0x3b92   :  { %12021 = vmatpush3.bf16.msra.mxu1 %v12018_v44 }
0x3b93   :  { %12023 = vmatprep.subr.bf16.mxu1 %v12022_v46 }
0x3b96   :  { %12025 = vmatpush3.bf16.msra.mxu1 %v12022_v46 }
0x3c58   :  { %v11470_v7 = vpop.f32.mrb[86].mxu1 }
0x3c59   :  { %v9122_v14 = vadd.f32 %v11470_v7, %v10282_v25  ;;  %v9116_v20 = vpop.f32.mrb[87].mxu1 }
0x3c5a   :  { %v9117_v49 = vadd.f32 %v10282_v25, %v9116_v20 }
0x3c5b   :  { %v9136_v43 = vadd.f32 %v9122_v14, %v14032_v54 }
0x3c5c   :  { %v9135_v28 = vadd.f32 %v9117_v49, %v14030_v4 }
0x3c5d   :  { %v9146_v1 = vsel %vm397_vm3, %v9136_v43, 0.0 }
0x3c5e   :  { %9147 = vadd.xlane.f32.xlu1 %v9146_v1  ;;  %v9143_v59 = vsel %vm397_vm3, %v9135_v28, 0.0  ;;  %v10289_v1 = vld [vmem:[%s14593_s8 + $0x3] ss:$0 sm:$0xff] }
0x3c5f   :  { %9144 = vadd.xlane.f32.xlu0 %v9143_v59 }
0x3c64   :  { %v11473_v6 = vpop.f32.mrb[88].mxu1 }
0x3c65   :  { %v9126_v34 = vpop.f32.mrb[89].mxu1  ;;  %v9132_v16 = vadd.f32 %v11473_v6, %v10282_v25 }
0x3c66   :  { %v9127_v47 = vadd.f32 %v10282_v25, %v9126_v34 }
0x3c67   :  { %v9138_v30 = vadd.f32 %v9132_v16, %v14040_v11 }
0x3c68   :  { %v9137_v29 = vadd.f32 %v9127_v47, %v14038_v5 }
0x3c69   :  { %v9152_v54 = vsel %vm397_vm3, %v9138_v30, 0.0 }
0x3c6a   :  { %v9149_v35 = vsel %vm397_vm3, %v9137_v29, 0.0 }
0x3c6b   :  { %9150 = vadd.xlane.f32.xlu0 %v9149_v35 }
0x3c6f   :  { %9153 = vadd.xlane.f32.xlu0 %v9152_v54 }
0x3ceb   :  { %v9148_v4 = vpop.xlane.xlu1 %9147 }
0x3cec   :  { %v9156_v17 = vmul.f32 0.03125, %v9148_v4  ;;  %v9145_v39 = vpop.xlane.xlu0 %9144 }
0x3ced   :  { %v9155_v40 = vmul.f32 0.03125, %v9145_v39 }
0x3cee   :  { %v14302_v38 = vsub.f32 %v9136_v43, %v9156_v17 }
0x3cef   :  { %v14304_v10 = vsub.f32 %v9135_v28, %v9155_v40 }
0x3cf0   :  { %v9164_v42 = vmul.f32 %v14302_v38, %v14302_v38 }
0x3cf1   :  { %v9163_v5 = vmul.f32 %v14304_v10, %v14304_v10 }
0x3cf2   :  { %v9170_v11 = vsel %vm397_vm3, %v9164_v42, 0.0 }
0x3cf3   :  { %9171 = vadd.xlane.f32.xlu0 %v9170_v11  ;;  %v9167_v52 = vsel %vm397_vm3, %v9163_v5, 0.0 }
0x3cf4   :  { %9168 = vadd.xlane.f32.xlu1 %v9167_v52 }
0x3cf8   :  { %v9151_v53 = vpop.xlane.xlu0 %9150 }
0x3cf9   :  { %v9157_v50 = vmul.f32 0.03125, %v9151_v53  ;;  %v10305_v53 = vld [vmem:[%s14599_s14 + $0xe0] sm:$0xff] }
0x3cfb   :  { %v14316_v31 = vsub.f32 %v9137_v29, %v9157_v50  ;;  %v10306_v50 = vld [vmem:[%s14599_s14 + $0xe8] sm:$0xff] }
0x3cfc   :  { %v9154_v62 = vpop.xlane.xlu0 %9153  ;;  %v12026_v13 = vpack.c.bf16 %v10306_v50, %v10305_v53  ;;  %v9534_v53 = vld [vmem:[%s14703_s1 + $0x18] sm:$0xff] }
0x3cfd   :  { %v9158_v22 = vmul.f32 0.03125, %v9154_v62  ;;  %v9165_v36 = vmul.f32 %v14316_v31, %v14316_v31  ;;  %v10308_v62 = vld [vmem:[%s14599_s14 + $0xf8] sm:$0xff] }
0x3cfe   :  { %12027 = vmatprep.subr.bf16.mxu1 %v12026_v13 }
0x3cff   :  { %v14325_v57 = vsub.f32 %v9138_v30, %v9158_v22  ;;  %v9173_v37 = vsel %vm397_vm3, %v9165_v36, 0.0  ;;  %v10290_v30 = vld [vmem:[%s14594_s9 + $0x3] ss:$0 sm:$0xff]  ;;  %12029 = vmatpush3.bf16.msra.mxu1 %v12026_v13 }
0x3d00   :  { %9174 = vadd.xlane.f32.xlu1 %v9173_v37  ;;  %v10296_v36 = vld [vmem:[%s14598_s13 + $0x3] ss:$0 sm:$0xff]  ;;  %s14706_s13 = sld [smem:[#allocation22_spill]] }
0x3d01   :  { %v9166_v45 = vmul.f32 %v14325_v57, %v14325_v57 }
0x3d03   :  { %v9176_v24 = vsel %vm397_vm3, %v9166_v45, 0.0 }
0x3d04   :  { %4884 = vadd.xlane.f32.xlu1 %v4883_v26  ;;  %9177 = vadd.xlane.f32.xlu0 %v9176_v24 }
0x3d08   :  { %4887 = vadd.xlane.f32.xlu0 %v4886_v48  ;;  %4890 = vadd.xlane.f32.xlu1 %v4889_v56 }
0x3d0c   :  { %4893 = vadd.xlane.f32.xlu0 %v4892_v41 }
0x3d80   :  { %v9172_v51 = vpop.xlane.xlu0 %9171 }
0x3d81   :  { %v9180_v19 = vmul.f32 0.03125, %v9172_v51  ;;  %v9169_v25 = vpop.xlane.xlu1 %9168 }
0x3d82   :  { %v9179_v7 = vmul.f32 0.03125, %v9169_v25 }
0x3d83   :  { %v9184_v14 = vadd.f32 1e-05, %v9180_v19 }
0x3d84   :  { %v9183_v20 = vadd.f32 1e-05, %v9179_v7 }
0x3d85   :  { %12684 = vrsqrt.f32 %v9184_v14 }
0x3d86   :  { %12686 = vrsqrt.f32 %v9183_v20 }
0x3d8d   :  { %v9175_v49 = vpop.xlane.xlu1 %9174 }
0x3d8e   :  { %v9181_v43 = vmul.f32 0.03125, %v9175_v49 }
0x3d8f   :  { %v12685_v28 = vpop.eup %12684 }
0x3d90   :  { %v12687_v59 = vpop.eup %12686  ;;  %v9192_v6 = vmul.f32 %v12685_v28, %v14302_v38  ;;  %v9185_v34 = vadd.f32 1e-05, %v9181_v43 }
0x3d91   :  { %v9178_v16 = vpop.xlane.xlu0 %9177  ;;  %v9191_v47 = vmul.f32 %v12687_v59, %v14304_v10  ;;  %v4885_v7 = vpop.xlane.xlu1 %4884 }
0x3d92   :  { %12688 = vrsqrt.f32 %v9185_v34  ;;  %v9182_v29 = vmul.f32 0.03125, %v9178_v16  ;;  %v9202_v35 = vmul.f32 %v10289_v1, %v9192_v6  ;;  %v4895_v20 = vmul.f32 0.03125, %v4885_v7 }
0x3d93   :  { %v9201_v54 = vmul.f32 %v10289_v1, %v9191_v47 }
0x3d94   :  { %v9186_v4 = vadd.f32 1e-05, %v9182_v29  ;;  %v9212_v39 = vadd.f32 %v10290_v30, %v9202_v35  ;;  %v14418_v16 = vsub.f32 %v14322_v15, %v4895_v20  ;;  %v10117_v20 = vld [vmem:[%s14699_s18 + $0x1] ss:$0 sm:$0xff] }
0x3d95   :  { %v9211_v17 = vadd.f32 %v10290_v30, %v9201_v54  ;;  %v4888_v25 = vpop.xlane.xlu0 %4887  ;;  %v4891_v43 = vpop.xlane.xlu1 %4890 }
0x3d96   :  { %12690 = vrsqrt.f32 %v9186_v4  ;;  %v4896_v14 = vmul.f32 0.03125, %v4888_v25  ;;  %v4897_v47 = vmul.f32 0.03125, %v4891_v43 }
0x3d97   :  { %11482 = vmatprep.mubr.msk.f32.mxu0 %vm397_vm3, %v9211_v17 }
0x3d98   :  { %11483 = vmatmul.mubr.msk.f32.vlgmr.msra.gmra.mrb[106].mxu0 %vm397_vm3, %v9212_v39 }
0x3d99   :  { %v4894_v49 = vpop.xlane.xlu0 %4893 }
0x3d9a   :  { %v4898_v59 = vmul.f32 0.03125, %v4894_v49 }
0x3d9c   :  { %v12689_v40 = vpop.eup %12688  ;;  %v14422_v54 = vsub.f32 %v14341_v61, %v4898_v59  ;;  %v10118_v59 = vld [vmem:[%s14700_s6 + $0x1] ss:$0 sm:$0xff] }
0x3d9d   :  { %v9193_v38 = vmul.f32 %v12689_v40, %v14316_v31  ;;  %v10307_v31 = vld [vmem:[%s14599_s14 + $0xf0] sm:$0xff] }
0x3d9e   :  { %v12030_v22 = vpack.c.bf16 %v10308_v62, %v10307_v31  ;;  %v4906_v61 = vmul.f32 %v14422_v54, %v14422_v54 }
0x3d9f   :  { %v9203_v10 = vmul.f32 %v10289_v1, %v9193_v38 }
0x3da0   :  { %v12691_v42 = vpop.eup %12690  ;;  %12031 = vmatprep.subr.bf16.mxu1 %v12030_v22 }
0x3da1   :  { %v14384_v5 = vadd.f32 %v10290_v30, %v9203_v10  ;;  %v9194_v11 = vmul.f32 %v12691_v42, %v14325_v57  ;;  %12033 = vmatpush3.bf16.msra.mxu1 %v12030_v22 }
0x3da3   :  { %11485 = vmatprep.mubr.msk.f32.mxu0 %vm397_vm3, %v14384_v5  ;;  %v9204_v52 = vmul.f32 %v10289_v1, %v9194_v11  ;;  %v14415_v1 = vsub.f32 %v14331_v60, %v4896_v14  ;;  %v9532_v11 = vld [vmem:[%s14703_s1 + $0x8] sm:$0xff] }
0x3da5   :  { %v9214_v18 = vadd.f32 %v10290_v30, %v9204_v52  ;;  %v4904_v60 = vmul.f32 %v14415_v1, %v14415_v1 }
0x3da7   :  { %11486 = vmatmul.mubr.msk.f32.gmra.mrb[108].mxu0 %vm397_vm3, %v9214_v18  ;;  %v4910_v40 = vsel %vm397_vm3, %v4904_v60, 0.0 }
0x3e6b   :  { %v11484_v33 = vpop.f32.mrb[106].mxu0 }
0x3e6c   :  { %v9312_v12 = vadd.f32 %v11484_v33, %v10296_v36  ;;  %v9306_v57 = vpop.f32.mrb[107].mxu0 }
0x3e6d   :  { %v9307_v37 = vadd.f32 %v10296_v36, %v9306_v57 }
0x3e6e   :  { %v9330_v45 = vmul.f32 0.01, %v9312_v12  ;;  %vm9326_vm0 = vcmp.gt.f32.partialorder %v9312_v12, 0.0 }
0x3e6f   :  { %vm9325_vm4 = vcmp.gt.f32.partialorder %v9307_v37, 0.0  ;;  %v9329_v55 = vmul.f32 0.01, %v9307_v37 }
0x3e70   :  { %v9334_v24 = vsel %vm9326_vm0, %v9312_v12, %v9330_v45 }
0x3e71   :  { %v9333_v26 = vsel %vm9325_vm4, %v9307_v37, %v9329_v55 }
0x3e72   :  { %11504 = vmatprep.mubr.msk.f32.mxu1 %vm2491_vm9, %v9333_v26 }
0x3e73   :  { %11505 = vmatmul.mubr.msk.f32.vlgmr.msra.gmra.mrb[90].mxu1 %vm2491_vm9, %v9334_v24 }
0x3e7a   :  { %v11487_v48 = vpop.f32.mrb[108].mxu0 }
0x3e7b   :  { %v9322_v56 = vadd.f32 %v11487_v48, %v10296_v36  ;;  %v9316_v41 = vpop.f32.mrb[109].mxu0 }
0x3e7c   :  { %v9317_v32 = vadd.f32 %v10296_v36, %v9316_v41 }
0x3e7d   :  { %v9332_v21 = vmul.f32 0.01, %v9322_v56  ;;  %vm9328_vm5 = vcmp.gt.f32.partialorder %v9322_v56, 0.0 }
0x3e7e   :  { %vm9327_vm6 = vcmp.gt.f32.partialorder %v9317_v32, 0.0  ;;  %v9331_v2 = vmul.f32 0.01, %v9317_v32 }
0x3e7f   :  { %v9336_v8 = vsel %vm9328_vm5, %v9322_v56, %v9332_v21 }
0x3e80   :  { %v9335_v63 = vsel %vm9327_vm6, %v9317_v32, %v9331_v2 }
0x3e81   :  { %11507 = vmatprep.mubr.msk.f32.mxu1 %vm2491_vm9, %v9335_v63 }
0x3e82   :  { %11508 = vmatmul.mubr.msk.f32.gmra.mrb[92].mxu1 %vm2491_vm9, %v9336_v8  ;;  %vm9713_vm9 = vcmask 1041408  }
0x3e83   :  { %vm12043_vm11 = vmpackc.low %vm9713_vm9, %vm12770_vm10 }
0x3f46   :  { %v11506_v0 = vpop.f32.mrb[90].mxu1 }
0x3f47   :  { %v9438_v3 = vadd.f32 %v11506_v0, %v10310_v58  ;;  %v9432_v9 = vpop.f32.mrb[91].mxu1 }
0x3f48   :  { %v9433_v44 = vadd.f32 %v10310_v58, %v9432_v9 }
0x3f49   :  { %v9452_v27 = vadd.f32 %v9438_v3, %v9212_v39  ;;  %v4903_v39 = vmul.f32 %v14418_v16, %v14418_v16 }
0x3f4a   :  { %v9451_v46 = vadd.f32 %v9433_v44, %v9211_v17  ;;  %v14428_v17 = vsub.f32 %v14335_v23, %v4897_v47  ;;  %v4916_v23 = vsel %vm397_vm3, %v4906_v61, 0.0  ;;  %v9823_v61 = vld [vmem:[%s14705_s26 + $0x8] sm:$0xff] }
0x3f4b   :  { %v9462_v51 = vsel %vm397_vm3, %v9452_v27, 0.0  ;;  %v4907_v38 = vsel %vm397_vm3, %v4903_v39, 0.0 }
0x3f4c   :  { %9463 = vadd.xlane.f32.xlu0 %v9462_v51  ;;  %v9459_v19 = vsel %vm397_vm3, %v9451_v46, 0.0  ;;  %v4905_v10 = vmul.f32 %v14428_v17, %v14428_v17 }
0x3f4d   :  { %9460 = vadd.xlane.f32.xlu1 %v9459_v19 }
0x3f4e   :  { %v4913_v42 = vsel %vm397_vm3, %v4905_v10, 0.0  ;;  %v12771_v10 = vmov 0  }
0x3f4f   :  { %12387 = vset.pattern.permute.xlu0 %v12771_v10  ;;  %12386 = vset.pattern.permute.xlu1 %v12771_v10 }
0x3f55   :  { %v11509_v28 = vpop.f32.mrb[92].mxu1 }
0x3f56   :  { %v9448_v6 = vadd.f32 %v11509_v28, %v10310_v58  ;;  %v9442_v34 = vpop.f32.mrb[93].mxu1 }
0x3f57   :  { %v9443_v29 = vadd.f32 %v10310_v58, %v9442_v34 }
0x3f58   :  { %v9454_v30 = vadd.f32 %v9448_v6, %v9214_v18  ;;  %v9533_v18 = vld [vmem:[%s14703_s1 + $0x10] sm:$0xff] }
0x3f59   :  { %v9453_v35 = vadd.f32 %v9443_v29, %v14384_v5  ;;  %v9531_v5 = vld [vmem:[%s14703_s1] sm:$0xff]  ;;  %v12038_v50 = vpack.c.bf16 %v9534_v53, %v9533_v18  ;;  %s12772_s1 = smov [#allocation3]  }
0x3f5a   :  { %v9468_v4 = vsel %vm397_vm3, %v9454_v30, 0.0  ;;  %v12034_v52 = vpack.c.bf16 %v9532_v11, %v9531_v5  ;;  %s9911_s19 = sshll.u32 %s12772_s1, 4  ;;  %s9912_s19 = int_to_ptr.vmem [resolvable:$true] %s9911_s19 }
0x3f5b   :  { %9469 = vadd.xlane.f32.xlu0 %v9468_v4  ;;  %v9465_v15 = vsel %vm397_vm3, %v9453_v35, 0.0  ;;  %s12708_s23 = scalar_lea.vmem %s9912_s19, 32  ;;  %p12713_p1 = scmp.lt.s32.totalorder %s9912_s19, %s9912_s19 }
0x3f5c   :  { %9466 = vadd.xlane.f32.xlu1 %v9465_v15  ;;  %12035 = vmatprep.subr.bf16.mxu0 %v12034_v52  ;;  %p12709_p0 = scmp.ne.s32.totalorder %s9912_s19, %s12708_s23  ;;  %p12714_p2 = scmp.lt.s32.totalorder %s12708_s23, %s12708_s23 }
0x3f5d   :  { %12037 = vmatpush3.bf16.msra.mxu0 %v12034_v52 }
0x3f5e   :  { %12039 = vmatprep.subr.bf16.mxu0 %v12038_v50  ;;  %p12715_p3 = por %p12714_p2, %p12713_p1 }
0x3f5f   :  { %4911 = vadd.xlane.f32.xlu0 %v4910_v40 }
0x3f60   :  { %4908 = vadd.xlane.f32.xlu1 %v4907_v38  ;;  %v9822_v38 = vld [vmem:[%s14705_s26] sm:$0xff]  ;;  %p12716_p4 = pnand %p12715_p3, %p12709_p0 }
0x3f61   :  { %12041 = vmatpush3.bf16.msra.mxu0 %v12038_v50 }
0x3f63   :  { %4917 = vadd.xlane.f32.xlu0 %v4916_v23  ;;  %v10338_v23 = vld [vmem:[#allocation2] ss:$0 sm:$0xff] }
0x3f64   :  { %4914 = vadd.xlane.f32.xlu1 %v4913_v42 }
0x3fd9   :  { %v9464_v13 = vpop.xlane.xlu0 %9463 }
0x3fda   :  { %v9472_v31 = vmul.f32 0.03125, %v9464_v13  ;;  %v9461_v62 = vpop.xlane.xlu1 %9460 }
0x3fdb   :  { %v9471_v22 = vmul.f32 0.03125, %v9461_v62 }
0x3fdc   :  { %v14453_v36 = vsub.f32 %v9452_v27, %v9472_v31  ;;  %v10317_v31 = vld [vmem:[%s14699_s18 + $0x3] ss:$0 sm:$0xff] }
0x3fdd   :  { %v14455_v33 = vsub.f32 %v9451_v46, %v9471_v22 }
0x3fde   :  { %v9480_v12 = vmul.f32 %v14453_v36, %v14453_v36 }
0x3fdf   :  { %v9479_v57 = vmul.f32 %v14455_v33, %v14455_v33 }
0x3fe0   :  { %v9486_v37 = vsel %vm397_vm3, %v9480_v12, 0.0 }
0x3fe1   :  { %9487 = vadd.xlane.f32.xlu0 %v9486_v37  ;;  %v9483_v45 = vsel %vm397_vm3, %v9479_v57, 0.0 }
0x3fe2   :  { %9484 = vadd.xlane.f32.xlu1 %v9483_v45 }
0x3fe8   :  { %v9470_v55 = vpop.xlane.xlu0 %9469 }
0x3fe9   :  { %v9474_v26 = vmul.f32 0.03125, %v9470_v55  ;;  %v9467_v24 = vpop.xlane.xlu1 %9466 }
0x3fea   :  { %v9473_v48 = vmul.f32 0.03125, %v9467_v24 }
0x3feb   :  { %v14463_v56 = vsub.f32 %v9454_v30, %v9474_v26  ;;  %v10318_v26 = vld [vmem:[%s14700_s6 + $0x3] ss:$0 sm:$0xff] }
0x3fec   :  { %v14465_v41 = vsub.f32 %v9453_v35, %v9473_v48  ;;  %v4912_v32 = vpop.xlane.xlu0 %4911 }
0x3fed   :  { %v4920_v21 = vmul.f32 0.03125, %v4912_v32  ;;  %v4909_v2 = vpop.xlane.xlu1 %4908  ;;  %v9482_v63 = vmul.f32 %v14463_v56, %v14463_v56 }
0x3fee   :  { %v4919_v8 = vmul.f32 0.03125, %v4909_v2  ;;  %v9481_v58 = vmul.f32 %v14465_v41, %v14465_v41 }
0x3fef   :  { %v4924_v0 = vadd.f32 1e-05, %v4920_v21  ;;  %v9492_v3 = vsel %vm397_vm3, %v9482_v63, 0.0 }
0x3ff0   :  { %v4923_v9 = vadd.f32 1e-05, %v4919_v8  ;;  %9493 = vadd.xlane.f32.xlu0 %v9492_v3  ;;  %v4918_v44 = vpop.xlane.xlu0 %4917  ;;  %v9489_v27 = vsel %vm397_vm3, %v9481_v58, 0.0 }
0x3ff1   :  { %12692 = vrsqrt.f32 %v4924_v0  ;;  %v4922_v46 = vmul.f32 0.03125, %v4918_v44  ;;  %9490 = vadd.xlane.f32.xlu1 %v9489_v27  ;;  %v4915_v51 = vpop.xlane.xlu1 %4914  ;;  %v10319_v44 = vld [vmem:[%s14706_s13] ss:$0 sm:$0xff] }
0x3ff2   :  { %12694 = vrsqrt.f32 %v4923_v9  ;;  %v4921_v19 = vmul.f32 0.03125, %v4915_v51 }
0x3ff3   :  { %v4926_v25 = vadd.f32 1e-05, %v4922_v46 }
0x3ff4   :  { %v4925_v7 = vadd.f32 1e-05, %v4921_v19 }
0x3ff5   :  { %12696 = vrsqrt.f32 %v4926_v25 }
0x3ff6   :  { %12698 = vrsqrt.f32 %v4925_v7 }
0x3ffb   :  { %v12693_v14 = vpop.eup %12692 }
0x3ffc   :  { %v12695_v49 = vpop.eup %12694  ;;  %v4932_v43 = vmul.f32 %v12693_v14, %v14415_v1 }
0x3ffd   :  { %v4931_v28 = vmul.f32 %v12695_v49, %v14418_v16 }
0x3ffe   :  { %v4942_v6 = vmul.f32 %v10117_v20, %v4932_v43 }
0x3fff   :  { %v12697_v34 = vpop.eup %12696  ;;  %v4941_v47 = vmul.f32 %v10117_v20, %v4931_v28 }
0x4000   :  { %v12699_v29 = vpop.eup %12698  ;;  %v4934_v30 = vmul.f32 %v12697_v34, %v14422_v54  ;;  %v4952_v60 = vadd.f32 %v10118_v59, %v4942_v6  ;;  %v9679_v54 = vld [vmem:[%s14704_s4] sm:$0xff] }
0x4001   :  { %v4951_v35 = vadd.f32 %v10118_v59, %v4941_v47  ;;  %v4933_v4 = vmul.f32 %v12699_v29, %v14428_v17  ;;  %v9680_v17 = vld [vmem:[%s14704_s4 + $0x8] sm:$0x3] }
0x4002   :  { %v4944_v15 = vmul.f32 %v10117_v20, %v4934_v30  ;;  %v12042_v40 = vpack.c.bf16 %v9680_v17, %v9679_v54  ;;  %9826 = vperm.xlu1 %12386, %v9822_v38  }
0x4003   :  { %11518 = vmatprep.mubr.msk.f32.mxu0 %vm397_vm3, %v4951_v35  ;;  %v4943_v1 = vmul.f32 %v10117_v20, %v4933_v4 }
0x4004   :  { %11519 = vmatmul.mubr.msk.f32.vlgmr.msra.gmra.mrb[110].mxu0 %vm397_vm3, %v4952_v60  ;;  %v4954_v39 = vadd.f32 %v10118_v59, %v4944_v15  ;;  %12044 = vmatprep.subr.msk.bf16.mxu1 %vm12043_vm11, %v12042_v40 }
0x4005   :  { %v4953_v16 = vadd.f32 %v10118_v59, %v4943_v1  ;;  %12047 = vmatpush3.bf16.msk.msra.mxu1 %vm12043_vm11, %v12042_v40 }
0x4006   :  { %9831 = vperm.xlu0 %12387, %v9823_v61   ;;  %9886 = vperm.xlu1 %12386, %v10338_v23  }
0x4007   :  { %11521 = vmatprep.mubr.msk.f32.mxu0 %vm397_vm3, %v4953_v16  ;;  %v14527_v16 = vld [vmem:[%s14707_s17] ss:$0 sm:$0xff] }
0x4008   :  { %11522 = vmatmul.mubr.msk.f32.gmra.mrb[112].mxu0 %vm397_vm3, %v4954_v39 }
0x406e   :  { %v9488_v42 = vpop.xlane.xlu0 %9487 }
0x406f   :  { %v9496_v5 = vmul.f32 0.03125, %v9488_v42  ;;  %v9485_v11 = vpop.xlane.xlu1 %9484 }
0x4070   :  { %v9495_v52 = vmul.f32 0.03125, %v9485_v11 }
0x4071   :  { %v9500_v18 = vadd.f32 1e-05, %v9496_v5 }
0x4072   :  { %v9499_v53 = vadd.f32 1e-05, %v9495_v52 }
0x4073   :  { %12700 = vrsqrt.f32 %v9500_v18 }
0x4074   :  { %12702 = vrsqrt.f32 %v9499_v53 }
0x407d   :  { %v12701_v50 = vpop.eup %12700  ;;  %v9494_v13 = vpop.xlane.xlu0 %9493 }
0x407e   :  { %v12703_v62 = vpop.eup %12702  ;;  %v9498_v22 = vmul.f32 0.03125, %v9494_v13  ;;  %v9491_v12 = vpop.xlane.xlu1 %9490  ;;  %v9508_v57 = vmul.f32 %v12701_v50, %v14453_v36 }
0x407f   :  { %v9497_v37 = vmul.f32 0.03125, %v9491_v12  ;;  %v9507_v45 = vmul.f32 %v12703_v62, %v14455_v33 }
0x4080   :  { %v9502_v55 = vadd.f32 1e-05, %v9498_v22  ;;  %v9518_v24 = vmul.f32 %v10317_v31, %v9508_v57 }
0x4081   :  { %v9501_v48 = vadd.f32 1e-05, %v9497_v37  ;;  %v9517_v32 = vmul.f32 %v10317_v31, %v9507_v45 }
0x4082   :  { %12704 = vrsqrt.f32 %v9502_v55  ;;  %v9528_v2 = vadd.f32 %v10318_v26, %v9518_v24  ;;  %v14532_v61 = vpop.permute.xlu1 %9826 }
0x4083   :  { %12706 = vrsqrt.f32 %v9501_v48  ;;  %v9527_v21 = vadd.f32 %v10318_v26, %v9517_v32 }
0x4085   :  { %11524 = vmatprep.mubr.msk.f32.mxu0 %vm397_vm3, %v9527_v21  ;;  %v14529_v54 = vpop.permute.xlu0 %9831 }
0x4086   :  { %11525 = vmatmul.mubr.msk.f32.gmra.mrb[114].mxu0 %vm397_vm3, %v9528_v2 }
0x408c   :  { %v12705_v36 = vpop.eup %12704 }
0x408d   :  { %v12707_v63 = vpop.eup %12706  ;;  %v9510_v33 = vmul.f32 %v12705_v36, %v14463_v56 }
0x408e   :  { %v9509_v8 = vmul.f32 %v12707_v63, %v14465_v41  ;;  %v9887_v63 = vpop.permute.xlu1 %9886 }
0x408f   :  { %v9520_v58 = vmul.f32 %v10317_v31, %v9510_v33 }
0x4090   :  { %v9519_v0 = vmul.f32 %v10317_v31, %v9509_v8 }
0x4091   :  { %v9530_v9 = vadd.f32 %v10318_v26, %v9520_v58 }
0x4092   :  { %v9529_v3 = vadd.f32 %v10318_v26, %v9519_v0 }
0x4094   :  { %11527 = vmatprep.mubr.msk.f32.mxu0 %vm397_vm3, %v9529_v3 }
0x4095   :  { %11528 = vmatmul.mubr.msk.f32.gmra.mrb[116].mxu0 %vm397_vm3, %v9530_v9  ;;  %vm9842_vm3 = vcmask 23552  }
0x40d7   :  { %v11520_v27 = vpop.f32.mrb[110].mxu0 }
0x40d8   :  { %v9638_v46 = vadd.f32 %v11520_v27, %v10319_v44  ;;  %v9632_v51 = vpop.f32.mrb[111].mxu0 }
0x40d9   :  { %v9633_v19 = vadd.f32 %v10319_v44, %v9632_v51 }
0x40da   :  { %v9672_v41 = vmax.f32 %v9638_v46, 0.0 }
0x40db   :  { %v9671_v56 = vmax.f32 %v9633_v19, 0.0  ;;  %v11523_v25 = vpop.f32.mrb[112].mxu0 }
0x40dc   :  { %v9648_v7 = vadd.f32 %v11523_v25, %v10319_v44  ;;  %v9642_v14 = vpop.f32.mrb[113].mxu0 }
0x40dd   :  { %v9643_v20 = vadd.f32 %v10319_v44, %v9642_v14  ;;  %11534 = vmatprep.mubr.msk.f32.mxu1 %vm9688_vm12, %v9671_v56 }
0x40de   :  { %11535 = vmatmul.mubr.msk.f32.vlgmr.msra.gmra.mrb[94].mxu1 %vm9688_vm12, %v9672_v41  ;;  %v9674_v43 = vmax.f32 %v9648_v7, 0.0 }
0x40df   :  { %v9673_v49 = vmax.f32 %v9643_v20, 0.0 }
0x40e1   :  { %11537 = vmatprep.mubr.msk.f32.mxu1 %vm9688_vm12, %v9673_v49 }
0x40e2   :  { %11538 = vmatmul.mubr.msk.f32.gmra.mrb[96].mxu1 %vm9688_vm12, %v9674_v43 }
0x4159   :  { %v11526_v28 = vpop.f32.mrb[114].mxu0 }
0x415a   :  { %v9658_v59 = vadd.f32 %v11526_v28, %v10319_v44  ;;  %v9652_v6 = vpop.f32.mrb[115].mxu0 }
0x415b   :  { %v9653_v34 = vadd.f32 %v10319_v44, %v9652_v6 }
0x415c   :  { %v9676_v29 = vmax.f32 %v9658_v59, 0.0 }
0x415d   :  { %v9675_v47 = vmax.f32 %v9653_v34, 0.0 }
0x415f   :  { %11540 = vmatprep.mubr.msk.f32.mxu1 %vm9688_vm12, %v9675_v47 }
0x4160   :  { %11541 = vmatmul.mubr.msk.f32.gmra.mrb[98].mxu1 %vm9688_vm12, %v9676_v29 }
0x4168   :  { %v11529_v30 = vpop.f32.mrb[116].mxu0 }
0x4169   :  { %v9668_v35 = vadd.f32 %v11529_v30, %v10319_v44  ;;  %v9662_v4 = vpop.f32.mrb[117].mxu0 }
0x416a   :  { %v9663_v60 = vadd.f32 %v10319_v44, %v9662_v4 }
0x416b   :  { %v9678_v1 = vmax.f32 %v9668_v35, 0.0 }
0x416c   :  { %v9677_v15 = vmax.f32 %v9663_v60, 0.0 }
0x416e   :  { %11543 = vmatprep.mubr.msk.f32.mxu1 %vm9688_vm12, %v9677_v15 }
0x416f   :  { %11544 = vmatmul.mubr.msk.f32.gmra.mrb[100].mxu1 %vm9688_vm12, %v9678_v1 }
0x41b1   :  { %v11536_v39 = vpop.f32.mrb[94].mxu1 }
0x41b2   :  { %v9789_v17 = vadd.f32 %v11536_v39, %v14527_v16  ;;  %v9783_v40 = vpop.f32.mrb[95].mxu1 }
0x41b3   :  { %v9784_v38 = vadd.f32 %v14527_v16, %v9783_v40 }
0x41b4   :  { %v9835_v10 = vmul.f32 %v14529_v54, %v9789_v17 }
0x41b5   :  { %v9834_v23 = vmul.f32 %v14532_v61, %v9784_v38  ;;  %v11539_v42 = vpop.f32.mrb[96].mxu1 }
0x41b6   :  { %v9844_v5 = vsel %vm9842_vm3, %v9835_v10, 0.0  ;;  %v9799_v11 = vadd.f32 %v11539_v42, %v14527_v16  ;;  %v9793_v52 = vpop.f32.mrb[97].mxu1 }
0x41b7   :  { %v9843_v18 = vsel %vm9842_vm3, %v9834_v23, 0.0  ;;  %v9794_v53 = vadd.f32 %v14527_v16, %v9793_v52 }
0x41b8   :  { %v9845_v50 = vadd.f32 %v9844_v5, %v9843_v18  ;;  %v9837_v13 = vmul.f32 %v14529_v54, %v9799_v11 }
0x41b9   :  { %v9836_v31 = vmul.f32 %v14532_v61, %v9794_v53 }
0x41ba   :  { %v9846_v62 = vrot.slane %v9845_v50, 4  ;;  %v9853_v22 = vsel %vm9842_vm3, %v9837_v13, 0.0 }
0x41bb   :  { %v9852_v12 = vsel %vm9842_vm3, %v9836_v31, 0.0 }
0x41bc   :  { %v9854_v57 = vadd.f32 %v9853_v22, %v9852_v12  ;;  %v9847_v37 = vadd.f32 %v9846_v62, %v9845_v50 }
0x41be   :  { %v9855_v45 = vrot.slane %v9854_v57, 4  ;;  %v9848_v55 = vrot.slane %v9847_v37, 2 }
0x41c0   :  { %v9856_v26 = vadd.f32 %v9855_v45, %v9854_v57  ;;  %v9849_v24 = vadd.f32 %v9848_v55, %v9847_v37 }
0x41c2   :  { %v9850_v48 = vrot.slane %v9849_v24, 1  ;;  %v9857_v32 = vrot.slane %v9856_v26, 2 }
0x41c4   :  { %v9858_v21 = vadd.f32 %v9857_v32, %v9856_v26  ;;  %v9851_v2 = vadd.f32 %v9850_v48, %v9849_v24 }
0x41c6   :  { %v9859_v36 = vrot.slane %v9858_v21, 1  ;;  %v9889_v8 = vadd.f32 %v9887_v63, %v9851_v2 }
0x41c8   :  { %v9860_v33 = vadd.f32 %v9859_v36, %v9858_v21 }
0x41ca   :  { %v9890_v58 = vadd.f32 %v9887_v63, %v9860_v33 }
0x41cc   :  { %v9896_v0 = vsel %vm9895_vm13, %v9890_v58, %v9889_v8 }
0x41cd   :  { %9899 = vst.msk [vmem:[#allocation3] sm:$0x3] %vm9898_vm14, %v9896_v0 }
0x41ce   :  { %12719 = shalt.err (!%p12716_p4)
}
0x41cf   :  { %s14708_s5 = sld [smem:[#allocation25_spill]] }
0x41d5   :  { %s12720_s3 = scalar_lea.hbm %s14708_s5, 32 }
0x41d6   :  { %p12721_p5 = scmp.ne.s32.totalorder %s14708_s5, %s12720_s3  ;;  %p12724_p6 = scmp.lt.u32.totalorder %s12720_s3, %s14708_s5 }
0x41d8   :  { %p12726_p7 = pnand %p12724_p6, %p12721_p5 }
0x41da   :  { %12729 = shalt.err (!%p12726_p7)
}
0x41db   :  { %9914 = dma.vmem_to_hbm [thread:$0]  %s9912_s19, 32, %s14708_s5, [#allocation4]  }
0x41dc   :  { %s12773_s4 = smov [#allocation5]  }
0x41dd   :  { %s9921_s25 = sshll.u32 %s12773_s4, 4  ;;  %s9922_s25 = int_to_ptr.vmem [resolvable:$true] %s9921_s25 }
0x41de   :  { %s12730_s8 = scalar_lea.vmem %s9922_s25, 32  ;;  %p12735_p9 = scmp.lt.s32.totalorder %s9922_s25, %s9922_s25 }
0x41df   :  { %p12731_p8 = scmp.ne.s32.totalorder %s9922_s25, %s12730_s8  ;;  %p12736_p10 = scmp.lt.s32.totalorder %s12730_s8, %s12730_s8 }
0x41e1   :  { %p12737_p11 = por %p12736_p10, %p12735_p9 }
0x41e3   :  { %p12738_p12 = pnand %p12737_p11, %p12731_p8 }
0x4233   :  { %v11542_v3 = vpop.f32.mrb[98].mxu1 }
0x4234   :  { %v9809_v9 = vadd.f32 %v11542_v3, %v14527_v16  ;;  %v9803_v44 = vpop.f32.mrb[99].mxu1 }
0x4235   :  { %v9804_v27 = vadd.f32 %v14527_v16, %v9803_v44 }
0x4236   :  { %v9839_v46 = vmul.f32 %v14529_v54, %v9809_v9 }
0x4237   :  { %v9838_v51 = vmul.f32 %v14532_v61, %v9804_v27 }
0x4238   :  { %v9862_v19 = vsel %vm9842_vm3, %v9839_v46, 0.0 }
0x4239   :  { %v9861_v56 = vsel %vm9842_vm3, %v9838_v51, 0.0 }
0x423a   :  { %v9863_v25 = vadd.f32 %v9862_v19, %v9861_v56 }
0x423c   :  { %v9864_v41 = vrot.slane %v9863_v25, 4 }
0x423e   :  { %v9865_v14 = vadd.f32 %v9864_v41, %v9863_v25 }
0x4240   :  { %v9866_v6 = vrot.slane %v9865_v14, 2 }
0x4242   :  { %v11545_v7 = vpop.f32.mrb[100].mxu1  ;;  %v9867_v30 = vadd.f32 %v9866_v6, %v9865_v14 }
0x4243   :  { %v9819_v20 = vadd.f32 %v11545_v7, %v14527_v16  ;;  %v9813_v49 = vpop.f32.mrb[101].mxu1 }
0x4244   :  { %v9814_v43 = vadd.f32 %v14527_v16, %v9813_v49  ;;  %v9868_v15 = vrot.slane %v9867_v30, 1 }
0x4245   :  { %v9841_v28 = vmul.f32 %v14529_v54, %v9819_v20 }
0x4246   :  { %v9840_v59 = vmul.f32 %v14532_v61, %v9814_v43  ;;  %v9869_v39 = vadd.f32 %v9868_v15, %v9867_v30 }
0x4247   :  { %v9871_v34 = vsel %vm9842_vm3, %v9841_v28, 0.0 }
0x4248   :  { %v9870_v47 = vsel %vm9842_vm3, %v9840_v59, 0.0  ;;  %v9891_v16 = vadd.f32 %v9887_v63, %v9869_v39 }
0x4249   :  { %v9872_v29 = vadd.f32 %v9871_v34, %v9870_v47 }
0x424b   :  { %v9873_v35 = vrot.slane %v9872_v29, 4 }
0x424d   :  { %v9874_v4 = vadd.f32 %v9873_v35, %v9872_v29 }
0x424f   :  { %v9875_v60 = vrot.slane %v9874_v4, 2 }
0x4251   :  { %v9876_v1 = vadd.f32 %v9875_v60, %v9874_v4 }
0x4253   :  { %v9877_v17 = vrot.slane %v9876_v1, 1 }
0x4255   :  { %v9878_v40 = vadd.f32 %v9877_v17, %v9876_v1 }
0x4257   :  { %v9892_v54 = vadd.f32 %v9887_v63, %v9878_v40 }
0x4259   :  { %v9902_v61 = vsel %vm9895_vm13, %v9892_v54, %v9891_v16 }
0x425a   :  { %9904 = vst.msk [vmem:[#allocation5] sm:$0x3] %vm9898_vm14, %v9902_v61 }
0x425b   :  { %12741 = shalt.err (!%p12738_p12)
}
0x425c   :  { %s14709_s26 = sld [smem:[#allocation26_spill]] }
0x4262   :  { %s12742_s2 = scalar_lea.hbm %s14709_s26, 32 }
0x4263   :  { %p12743_p13 = scmp.ne.s32.totalorder %s14709_s26, %s12742_s2  ;;  %p12746_p0 = scmp.lt.u32.totalorder %s12742_s2, %s14709_s26 }
0x4265   :  { %p12748_p1 = pnand %p12746_p0, %p12743_p13 }
0x4267   :  { %12751 = shalt.err (!%p12748_p1)
}
0x4268   :  { %9924 = dma.vmem_to_hbm [thread:$0]  %s9922_s25, 32, %s14709_s26, [#allocation6]  }
0x4269   :  { %12752 = dma.done.wait [#allocation4], 32  }
0x426a   :  { %12753 = vsyncadd [#allocation4], 4294967264 }
0x426b   :  { %12754 = dma.done.wait [#allocation6], 32  }
0x426c   :  { %12755 = vsyncadd [#allocation6], 4294967264 }
0x426d   :  { %9931 = vsyncpa [#allocation4], 1 }
0x426e   :  { %9932 = vsyncpa [#allocation6], 1 }

</bundles_post_ra>
